<compile_context>
chip_gen: v7x
topology: tpu7x:2x2x1
jax: 0.10.0
libtpu: 0.0.40
codegen_flags: <defaults>
</compile_context>

<pallas_src>
import jax
import jax.numpy as jnp
import numpy as np
from jax.experimental import pallas as pl
from jax.experimental.pallas import tpu as pltpu

EPS = 1e-5
LANES = 128
SUBLANES = 8
GUARD = 8          # zero guard rows at the front of each activation slab


def _round_up(x, m):
    return ((x + m - 1) // m) * m


def _bytes(dt):
    return jnp.dtype(dt).itemsize


# ---------------------------------------------------------------------------
# Fused Pallas kernel (expand -> mid -> proj, hidden stays in VMEM)
# ---------------------------------------------------------------------------
def _make_fused_kernel(tap_offsets, wpad, ms, mh, mo, cp,
                       has_expand, use_res, act_dtype, mxu_dtype):
    """All tiling constants are closed over as Python ints -> static slices."""

    def conv3x3(src_ref, base, m, w_ref):
        # In-kernel im2col: per-tap K=cp matmuls accumulated into one f32 accumulator
        # (no (m, 9*cp) concatenated temporary).  TODO(synk): pair taps for K=2*cp on
        # v6e/v7x once channel widths make the MXU the binding unit.
        acc = None
        for t, d in enumerate(tap_offsets):
            a = src_ref[pl.ds(base + d, m), :]
            if a.dtype != mxu_dtype:
                a = a.astype(mxu_dtype)
            p = jnp.dot(a, w_ref[t], preferred_element_type=jnp.float32)
            acc = p if acc is None else acc + p
        return acc

    if has_expand:
        def kernel(x_ref, mask_ref, we_ref, be_ref, wm_ref, bm_ref, wp_ref, bp_ref,
                   o_ref, hid_ref):
            # Zero ONLY the small guard bands of the hidden scratch; the interior is
            # fully overwritten below (re-done per tile -> safe under megacore splits).
            hid_ref[pl.ds(0, wpad), :] = jnp.zeros((wpad, cp), act_dtype)
            hid_ref[pl.ds(ms - wpad, wpad), :] = jnp.zeros((wpad, cp), act_dtype)
            # expand: 3x3 conv (+folded BN) + ReLU6; mask zeroes padding/extra rows so
            # the mid conv sees exact zero padding.
            h = conv3x3(x_ref, GUARD + wpad, mh, we_ref)
            h = jnp.clip(h + be_ref[...], 0.0, 6.0) * mask_ref[...]
            hid_ref[pl.ds(wpad, mh), :] = h.astype(act_dtype)
            # mid: 3x3 conv (+folded BN) + ReLU6 -- hidden never leaves VMEM.
            mid = conv3x3(hid_ref, 2 * wpad, mo, wm_ref)
            mid = jnp.clip(mid + bm_ref[...], 0.0, 6.0)
            # proj: 1x1 conv (+folded BN), no ReLU6; optional residual (f32 epilogue).
            y = jnp.dot(mid.astype(mxu_dtype), wp_ref[...],
                        preferred_element_type=jnp.float32) + bp_ref[...]
            if use_res:
                y = y + x_ref[pl.ds(GUARD + 2 * wpad, mo), :].astype(jnp.float32)
            o_ref[...] = y.astype(o_ref.dtype)
        return kernel

    def kernel(x_ref, wm_ref, bm_ref, wp_ref, bp_ref, o_ref):
        # No expand stage: the input already carries exact zeros on its padding, so no
        # mask is needed (and none is DMA'd).
        mid = conv3x3(x_ref, GUARD + 2 * wpad, mo, wm_ref)
        mid = jnp.clip(mid + bm_ref[...], 0.0, 6.0)
        y = jnp.dot(mid.astype(mxu_dtype), wp_ref[...],
                    preferred_element_type=jnp.float32) + bp_ref[...]
        if use_res:
            y = y + x_ref[pl.ds(GUARD + 2 * wpad, mo), :].astype(jnp.float32)
        o_ref[...] = y.astype(o_ref.dtype)
    return kernel


# ---------------------------------------------------------------------------
# Generation-aware VMEM budgeting / band-size selection
# ---------------------------------------------------------------------------
def _vmem_budget_bytes():
    try:
        cap = int(pltpu.get_tpu_info().vmem_capacity_bytes)   # 64 MiB v7x, 128 MiB v5e/v6e
    except Exception:
        cap = 64 * 1024 * 1024
    return min(int(cap * 0.85), 100 * 1024 * 1024)


def _choose_band_rows(h, wpad, cp, act_b, out_b, w_b, has_expand, budget):
    b = max(1, h)
    while True:
        ms = (b + 4) * wpad
        s = GUARD + _round_up(ms, SUBLANES) + GUARD
        mh = (b + 2) * wpad
        mo = b * wpad
        est = 2 * s * cp * act_b                  # x slab (double-buffered)
        est += 2 * mo * cp * out_b                # output tile (double-buffered)
        n3 = 2 if has_expand else 1
        est += 2 * (n3 * 9 + 1) * cp * cp * w_b   # weights + biases (double-buffered)
        est += 2 * mo * cp * 4                    # f32 mid / accumulator temporaries
        if has_expand:
            est += ms * cp * act_b                # hidden VMEM scratch (single)
            est += 2 * mh * 4 + mh * cp * 4       # mask tile + f32 h temporary
        if est <= budget or b == 1:
            return b
        b = max(1, b // 2)


# ---------------------------------------------------------------------------
# One-time parameter preparation (BN fold, transpose, lane-pad, dtype cast)
# ---------------------------------------------------------------------------
def fold_bn(gamma, beta, mean, var):
    scale = gamma / jnp.sqrt(var + EPS)
    bias = beta - mean * scale
    return scale, bias


def _fold_conv_bn(w_oihw, bn_params, cp, w_dtype):
    """(Cout,Cin,kh,kw) conv weight + BN -> (kh*kw, cp, cp) BN-folded matmul weights.

    Padded rows/cols are zero so padded lanes contribute exactly 0 downstream."""
    scale, bias = fold_bn(*bn_params)
    cout, cin, kh, kw = w_oihw.shape
    w = jnp.transpose(w_oihw, (2, 3, 1, 0)).reshape(kh * kw, cin, cout)
    w = w * scale[None, None, :]                 # fold BN scale into weight columns
    w_pad = jnp.zeros((kh * kw, cp, cp), jnp.float32).at[:, :cin, :cout].set(w)
    b_pad = jnp.zeros((1, cp), jnp.float32).at[0, :cout].set(bias)
    return w_pad.astype(w_dtype), b_pad


def prepare_params(params, in_channels, out_channels, stride, expand_ratio,
                   dtype=jnp.bfloat16):
    hidden = in_channels * expand_ratio
    cp = _round_up(max(in_channels, hidden, out_channels), LANES)
    prepared = {
        "cfg": dict(in_channels=in_channels, out_channels=out_channels, hidden=hidden,
                    stride=stride, has_expand=(expand_ratio != 1),
                    use_res=(stride == 1 and in_channels == out_channels),
                    cp=cp, dtype=dtype),
    }
    if expand_ratio != 1:
        prepared["we"], prepared["be"] = _fold_conv_bn(
            params["expand_w"], params["expand_bn"], cp, dtype)
    prepared["wm"], prepared["bm"] = _fold_conv_bn(
        params["mid_w"], params["mid_bn"], cp, dtype)
    wp_full, prepared["bp"] = _fold_conv_bn(
        params["proj_w"], params["proj_bn"], cp, dtype)
    prepared["wp"] = wp_full[0]                  # (cp, cp) 1x1 proj weight
    return prepared


# ---------------------------------------------------------------------------
# Forward pass
# ---------------------------------------------------------------------------
def inverted_residual_forward(prepared, x_nchw, band_rows=None):
    cfg = prepared["cfg"]
    cp, stride = cfg["cp"], cfg["stride"]
    act_dtype = out_dtype = mxu_dtype = cfg["dtype"]
    has_expand, use_res = cfg["has_expand"], cfg["use_res"]
    n, c, h, w = x_nchw.shape
    assert c == cfg["in_channels"]
    wpad = w + 2

    budget = _vmem_budget_bytes()
    if band_rows is None:
        band_rows = _choose_band_rows(h, wpad, cp, _bytes(act_dtype), _bytes(out_dtype),
                                      _bytes(mxu_dtype), has_expand, budget)
    bnd = int(min(max(1, band_rows), h))
    hb = _round_up(h, bnd)
    nb = hb // bnd
    nt = n * nb                                  # grid tiles = (image, H-band)
    ms = (bnd + 4) * wpad                        # flattened content rows per input slab
    s = GUARD + _round_up(ms, SUBLANES) + GUARD  # slab rows incl. zero guard rows
    mh = (bnd + 2) * wpad                        # hidden rows computed per tile
    mo = bnd * wpad                              # output rows per tile

    # ---- pack activations: NCHW -> NHWC -> pad (H:+2 top / +2+extra bottom, W:+1/+1,
    #      C -> 128 lanes) -> per-(image, H-band) slabs with 2-row halo -> flatten rows.
    x_nhwc = jnp.transpose(x_nchw, (0, 2, 3, 1))
    x_pad = jnp.pad(x_nhwc, ((0, 0), (2, 2 + hb - h), (1, 1), (0, cp - c))).astype(act_dtype)
    x_slabs = jnp.stack([x_pad[:, j * bnd:j * bnd + bnd + 4] for j in range(nb)], axis=1)
    x_slabs = x_slabs.reshape(nt, ms, cp)
    x_slabs = jnp.pad(x_slabs, ((0, 0), (GUARD, s - GUARD - ms), (0, 0)))

    tap_offsets = tuple((ky - 1) * wpad + (kx - 1) for ky in range(3) for kx in range(3))
    kernel = _make_fused_kernel(tap_offsets, wpad, ms, mh, mo, cp,
                                has_expand, use_res, act_dtype, mxu_dtype)

    x_spec = pl.BlockSpec((None, s, cp), lambda i: (i, 0, 0))
    w3_spec = pl.BlockSpec((9, cp, cp), lambda i: (0, 0, 0))
    w1_spec = pl.BlockSpec((cp, cp), lambda i: (0, 0))
    b_spec = pl.BlockSpec((1, cp), lambda i: (0, 0))
    # NOTE: weights/biases are <1 MiB total here, so their default double-buffering is
    # negligible; pl.Buffered(1) is deliberately not used to keep lowering risk-free.

    if has_expand:
        # Interior mask (1 on real image positions), pre-sliced to exactly the hidden rows.
        mask = jnp.pad(jnp.ones((n, h, w, 1), jnp.float32),
                       ((0, 0), (2, 2 + hb - h), (1, 1), (0, 0)))
        mask_slabs = jnp.stack(
            [mask[:, j * bnd + 1:j * bnd + bnd + 3] for j in range(nb)], axis=1
        ).reshape(nt, mh, 1)
        args = (x_slabs, mask_slabs, prepared["we"], prepared["be"],
                prepared["wm"], prepared["bm"], prepared["wp"], prepared["bp"])
        in_specs = [x_spec, pl.BlockSpec((None, mh, 1), lambda i: (i, 0, 0)),
                    w3_spec, b_spec, w3_spec, b_spec, w1_spec, b_spec]
        scratch = [pltpu.VMEM((ms, cp), act_dtype)]
    else:
        args = (x_slabs, prepared["wm"], prepared["bm"], prepared["wp"], prepared["bp"])
        in_specs = [x_spec, w3_spec, b_spec, w1_spec, b_spec]
        scratch = []

    out = pl.pallas_call(
        kernel,
        out_shape=jax.ShapeDtypeStruct((nt, mo, cp), out_dtype),
        grid=(nt,),
        in_specs=in_specs,
        out_specs=pl.BlockSpec((None, mo, cp), lambda i: (i, 0, 0)),
        scratch_shapes=scratch,
        compiler_params=pltpu.CompilerParams(
            dimension_semantics=("parallel",),   # independent band tiles (2 TCs on v7x)
            vmem_limit_bytes=max(budget, 32 * 1024 * 1024),
        ),
    )(*args)

    # ---- unpack: (tiles, mo, cp) -> (N, Hb, Wp, cp) -> drop ring/extra rows & lane pad,
    #      apply the conv stride, back to NCHW.
    out = out.reshape(n, nb, bnd, wpad, cp).reshape(n, hb, wpad, cp)
    out = out[:, :h, 1:w + 1, :cfg["out_channels"]]
    if stride > 1:
        # TODO(synk): subsample the mid activation in-kernel for stride>1 to avoid the
        # wasted proj MXU work and output writeback.
        out = out[:, ::stride, ::stride, :]
    return jnp.transpose(out, (0, 3, 1, 2)).astype(x_nchw.dtype)


# ---------------------------------------------------------------------------
# Parameter init (matches PyTorch module structure) + pure-JAX reference
# ---------------------------------------------------------------------------
def init_inverted_residual(key, in_channels, out_channels, stride, expand_ratio):
    hidden = in_channels * expand_ratio
    keys = iter(jax.random.split(key, 8))
    params = {}

    def conv_w(k, cout, cin, kh, kw):
        fan_in = cin * kh * kw
        return jax.random.normal(k, (cout, cin, kh, kw), jnp.float32) * (2.0 / fan_in) ** 0.5

    def bn_p(k, cch):
        k1, k2, k3, k4 = jax.random.split(k, 4)
        return (jax.random.uniform(k1, (cch,), jnp.float32, 0.5, 1.5),   # gamma
                jax.random.normal(k2, (cch,), jnp.float32) * 0.1,        # beta
                jax.random.normal(k3, (cch,), jnp.float32) * 0.1,        # running_mean
                jax.random.uniform(k4, (cch,), jnp.float32, 0.5, 1.5))   # running_var

    if expand_ratio != 1:
        params['expand_w'] = conv_w(next(keys), hidden, in_channels, 3, 3)
        params['expand_bn'] = bn_p(next(keys), hidden)
    params['mid_w'] = conv_w(next(keys), hidden, hidden, 3, 3)   # full 3x3 conv, groups=1
    params['mid_bn'] = bn_p(next(keys), hidden)
    params['proj_w'] = conv_w(next(keys), out_channels, hidden, 1, 1)
    params['proj_bn'] = bn_p(next(keys), out_channels)
    return params


def reference_forward(params, x_nchw, in_channels, out_channels, stride, expand_ratio):
    use_res = (stride == 1) and (in_channels == out_channels)
    x = jnp.transpose(x_nchw, (0, 2, 3, 1))

    def conv(hh, ww, strd, pad):
        return jax.lax.conv_general_dilated(
            hh, jnp.transpose(ww, (2, 3, 1, 0)), (strd, strd), pad,
            dimension_numbers=('NHWC', 'HWIO', 'NHWC'),
            precision=jax.lax.Precision.HIGHEST)

    def bn(hh, p):
        g, bt, m, v = p
        return (hh - m) / jnp.sqrt(v + EPS) * g + bt

    h = x
    if expand_ratio != 1:
        h = jnp.clip(bn(conv(h, params['expand_w'], 1, ((1, 1), (1, 1))), params['expand_bn']), 0., 6.)
    h = jnp.clip(bn(conv(h, params['mid_w'], stride, ((1, 1), (1, 1))), params['mid_bn']), 0., 6.)
    h = bn(conv(h, params['proj_w'], 1, ((0, 0), (0, 0))), params['proj_bn'])
    if use_res:
        h = x + h
    return jnp.transpose(h, (0, 3, 1, 2))


if __name__ == "__main__":
    key = jax.random.PRNGKey(0)
    k_x, k_p, k_x2, k_p2 = jax.random.split(key, 4)

    # ---- Config 1: residual path (stride=1, in==out, expand_ratio=2), x = (2,4,16,16)
    ic, oc, st, er = 4, 4, 1, 2
    x = jax.random.normal(k_x, (2, ic, 16, 16), jnp.float32)
    params = init_inverted_residual(k_p, ic, oc, st, er)
    ref = reference_forward(params, x, ic, oc, st, er)

    # strict correctness check with an f32 data path
    prep_f32 = prepare_params(params, ic, oc, st, er, dtype=jnp.float32)
    out_f32 = jax.block_until_ready(inverted_residual_forward(prep_f32, x))
    assert out_f32.shape == (2, oc, 16, 16)
    np.testing.assert_allclose(np.asarray(out_f32), np.asarray(ref), rtol=1e-3, atol=1e-3)

    # performance configuration: bf16 activations / scratch / output, f32 epilogue
    prep_bf16 = prepare_params(params, ic, oc, st, er, dtype=jnp.bfloat16)
    out_bf16 = jax.block_until_ready(inverted_residual_forward(prep_bf16, x))
    np.testing.assert_allclose(np.asarray(out_bf16), np.asarray(ref), rtol=5e-2, atol=2.5e-1)

    # ---- Config 1b: N>1, H != W, forced multi-band tiling (locks the halo/band math)
    x_b = jax.random.normal(k_x2, (2, ic, 10, 16), jnp.float32)
    ref_b = reference_forward(params, x_b, ic, oc, st, er)
    out_b = jax.block_until_ready(inverted_residual_forward(prep_f32, x_b, band_rows=4))
    np.testing.assert_allclose(np.asarray(out_b), np.asarray(ref_b), rtol=1e-3, atol=1e-3)

    # ---- Config 2: expand_ratio=1 (no expand conv), stride=2, in != out (no residual)
    ic2, oc2, st2, er2 = 8, 4, 2, 1
    x2 = jax.random.normal(k_x, (2, ic2, 12, 12), jnp.float32)
    params2 = init_inverted_residual(k_p2, ic2, oc2, st2, er2)
    ref2 = reference_forward(params2, x2, ic2, oc2, st2, er2)
    prep2 = prepare_params(params2, ic2, oc2, st2, er2, dtype=jnp.float32)
    out2 = jax.block_until_ready(inverted_residual_forward(prep2, x2))
    assert out2.shape == ref2.shape
    np.testing.assert_allclose(np.asarray(out2), np.asarray(ref2), rtol=1e-3, atol=1e-3)

    print("KERNEL_OK")
</pallas_src>

<mosaic_0001>
module attributes {stable_mosaic.version = 11 : i64} {
  func.func @kernel(%arg0: i32, %arg1: memref<1x376x128xf32, #tpu.memory_space<vmem>>, %arg2: memref<1x324x1xf32, #tpu.memory_space<vmem>>, %arg3: memref<9x128x128xf32, #tpu.memory_space<vmem>>, %arg4: memref<1x128xf32, #tpu.memory_space<vmem>>, %arg5: memref<9x128x128xf32, #tpu.memory_space<vmem>>, %arg6: memref<1x128xf32, #tpu.memory_space<vmem>>, %arg7: memref<128x128xf32, #tpu.memory_space<vmem>>, %arg8: memref<1x128xf32, #tpu.memory_space<vmem>>, %arg9: memref<1x288x128xf32, #tpu.memory_space<vmem>>, %arg10: memref<360x128xf32, #tpu.memory_space<vmem>>) attributes {dimension_semantics = [#tpu.dimension_semantics<parallel>], iteration_bounds = array<i64: 2>, scalar_prefetch = 0 : i64, scratch_operands = 1 : i64, tpu.core_type = #tpu.core_type<tc>, window_params = [{transform_indices = @transform_0, window_bounds = array<i64: 1, 376, 128>}, {transform_indices = @transform_1, window_bounds = array<i64: 1, 324, 1>}, {pipeline_mode = #tpu.pipeline_mode<synchronous>, transform_indices = @transform_2, window_bounds = array<i64: 9, 128, 128>}, {pipeline_mode = #tpu.pipeline_mode<synchronous>, transform_indices = @transform_3, window_bounds = array<i64: 1, 128>}, {pipeline_mode = #tpu.pipeline_mode<synchronous>, transform_indices = @transform_4, window_bounds = array<i64: 9, 128, 128>}, {pipeline_mode = #tpu.pipeline_mode<synchronous>, transform_indices = @transform_5, window_bounds = array<i64: 1, 128>}, {pipeline_mode = #tpu.pipeline_mode<synchronous>, transform_indices = @transform_6, window_bounds = array<i64: 128, 128>}, {pipeline_mode = #tpu.pipeline_mode<synchronous>, transform_indices = @transform_7, window_bounds = array<i64: 1, 128>}, {transform_indices = @transform_8, window_bounds = array<i64: 1, 288, 128>}]} {
    %cst = arith.constant 0.000000e+00 : f32
    %0 = vector.broadcast %cst : f32 to vector<18x128xf32>
    %c0 = arith.constant 0 : index
    %c0_0 = arith.constant 0 : index
    %1 = vector.load %arg10[%c0, %c0_0] : memref<360x128xf32, #tpu.memory_space<vmem>>, vector<18x128xf32>
    tpu.vector_store %arg10[%c0, %c0_0], %0 {strides = array<i32>} : memref<360x128xf32, #tpu.memory_space<vmem>>, vector<18x128xf32>,
    %cst_1 = arith.constant 0.000000e+00 : f32
    %2 = vector.broadcast %cst_1 : f32 to vector<18x128xf32>
    %c342 = arith.constant 342 : index
    %c0_2 = arith.constant 0 : index
    %3 = vector.load %arg10[%c342, %c0_2] : memref<360x128xf32, #tpu.memory_space<vmem>>, vector<18x128xf32>
    tpu.vector_store %arg10[%c342, %c0_2], %2 {strides = array<i32>} : memref<360x128xf32, #tpu.memory_space<vmem>>, vector<18x128xf32>,
    %c0_3 = arith.constant 0 : index
    %c7 = arith.constant 7 : index
    %c0_4 = arith.constant 0 : index
    %4 = vector.load %arg1[%c0_3, %c7, %c0_4] : memref<1x376x128xf32, #tpu.memory_space<vmem>>, vector<1x324x128xf32>
    %5 = vector.shape_cast %4 : vector<1x324x128xf32> to vector<324x128xf32>
    %c0_5 = arith.constant 0 : index
    %c0_6 = arith.constant 0 : index
    %c0_7 = arith.constant 0 : index
    %6 = vector.load %arg3[%c0_5, %c0_6, %c0_7] : memref<9x128x128xf32, #tpu.memory_space<vmem>>, vector<1x128x128xf32>
    %7 = vector.shape_cast %6 : vector<1x128x128xf32> to vector<128x128xf32>
    %cst_8 = arith.constant dense<0.000000e+00> : vector<324x128xf32>
    %8 = tpu.matmul %5, %7, %cst_8 {dimension_numbers = #tpu.dot_dimension_numbers<[1], [0], [0], [1], [0, 0, 1, 1], [], []>} : vector<324x128xf32>, vector<128x128xf32>, vector<324x128xf32> -> vector<324x128xf32>
    %c0_9 = arith.constant 0 : index
    %c8 = arith.constant 8 : index
    %c0_10 = arith.constant 0 : index
    %9 = vector.load %arg1[%c0_9, %c8, %c0_10] : memref<1x376x128xf32, #tpu.memory_space<vmem>>, vector<1x324x128xf32>
    %10 = vector.shape_cast %9 : vector<1x324x128xf32> to vector<324x128xf32>
    %c1 = arith.constant 1 : index
    %c0_11 = arith.constant 0 : index
    %c0_12 = arith.constant 0 : index
    %11 = vector.load %arg3[%c1, %c0_11, %c0_12] : memref<9x128x128xf32, #tpu.memory_space<vmem>>, vector<1x128x128xf32>
    %12 = vector.shape_cast %11 : vector<1x128x128xf32> to vector<128x128xf32>
    %cst_13 = arith.constant dense<0.000000e+00> : vector<324x128xf32>
    %13 = tpu.matmul %10, %12, %cst_13 {dimension_numbers = #tpu.dot_dimension_numbers<[1], [0], [0], [1], [0, 0, 1, 1], [], []>} : vector<324x128xf32>, vector<128x128xf32>, vector<324x128xf32> -> vector<324x128xf32>
    %14 = arith.addf %8, %13 : vector<324x128xf32>
    %c0_14 = arith.constant 0 : index
    %c9 = arith.constant 9 : index
    %c0_15 = arith.constant 0 : index
    %15 = vector.load %arg1[%c0_14, %c9, %c0_15] : memref<1x376x128xf32, #tpu.memory_space<vmem>>, vector<1x324x128xf32>
    %16 = vector.shape_cast %15 : vector<1x324x128xf32> to vector<324x128xf32>
    %c2 = arith.constant 2 : index
    %c0_16 = arith.constant 0 : index
    %c0_17 = arith.constant 0 : index
    %17 = vector.load %arg3[%c2, %c0_16, %c0_17] : memref<9x128x128xf32, #tpu.memory_space<vmem>>, vector<1x128x128xf32>
    %18 = vector.shape_cast %17 : vector<1x128x128xf32> to vector<128x128xf32>
    %cst_18 = arith.constant dense<0.000000e+00> : vector<324x128xf32>
    %19 = tpu.matmul %16, %18, %cst_18 {dimension_numbers = #tpu.dot_dimension_numbers<[1], [0], [0], [1], [0, 0, 1, 1], [], []>} : vector<324x128xf32>, vector<128x128xf32>, vector<324x128xf32> -> vector<324x128xf32>
    %20 = arith.addf %14, %19 : vector<324x128xf32>
    %c0_19 = arith.constant 0 : index
    %c25 = arith.constant 25 : index
    %c0_20 = arith.constant 0 : index
    %21 = vector.load %arg1[%c0_19, %c25, %c0_20] : memref<1x376x128xf32, #tpu.memory_space<vmem>>, vector<1x324x128xf32>
    %22 = vector.shape_cast %21 : vector<1x324x128xf32> to vector<324x128xf32>
    %c3 = arith.constant 3 : index
    %c0_21 = arith.constant 0 : index
    %c0_22 = arith.constant 0 : index
    %23 = vector.load %arg3[%c3, %c0_21, %c0_22] : memref<9x128x128xf32, #tpu.memory_space<vmem>>, vector<1x128x128xf32>
    %24 = vector.shape_cast %23 : vector<1x128x128xf32> to vector<128x128xf32>
    %cst_23 = arith.constant dense<0.000000e+00> : vector<324x128xf32>
    %25 = tpu.matmul %22, %24, %cst_23 {dimension_numbers = #tpu.dot_dimension_numbers<[1], [0], [0], [1], [0, 0, 1, 1], [], []>} : vector<324x128xf32>, vector<128x128xf32>, vector<324x128xf32> -> vector<324x128xf32>
    %26 = arith.addf %20, %25 : vector<324x128xf32>
    %c0_24 = arith.constant 0 : index
    %c26 = arith.constant 26 : index
    %c0_25 = arith.constant 0 : index
    %27 = vector.load %arg1[%c0_24, %c26, %c0_25] : memref<1x376x128xf32, #tpu.memory_space<vmem>>, vector<1x324x128xf32>
    %28 = vector.shape_cast %27 : vector<1x324x128xf32> to vector<324x128xf32>
    %c4 = arith.constant 4 : index
    %c0_26 = arith.constant 0 : index
    %c0_27 = arith.constant 0 : index
    %29 = vector.load %arg3[%c4, %c0_26, %c0_27] : memref<9x128x128xf32, #tpu.memory_space<vmem>>, vector<1x128x128xf32>
    %30 = vector.shape_cast %29 : vector<1x128x128xf32> to vector<128x128xf32>
    %cst_28 = arith.constant dense<0.000000e+00> : vector<324x128xf32>
    %31 = tpu.matmul %28, %30, %cst_28 {dimension_numbers = #tpu.dot_dimension_numbers<[1], [0], [0], [1], [0, 0, 1, 1], [], []>} : vector<324x128xf32>, vector<128x128xf32>, vector<324x128xf32> -> vector<324x128xf32>
    %32 = arith.addf %26, %31 : vector<324x128xf32>
    %c0_29 = arith.constant 0 : index
    %c27 = arith.constant 27 : index
    %c0_30 = arith.constant 0 : index
    %33 = vector.load %arg1[%c0_29, %c27, %c0_30] : memref<1x376x128xf32, #tpu.memory_space<vmem>>, vector<1x324x128xf32>
    %34 = vector.shape_cast %33 : vector<1x324x128xf32> to vector<324x128xf32>
    %c5 = arith.constant 5 : index
    %c0_31 = arith.constant 0 : index
    %c0_32 = arith.constant 0 : index
    %35 = vector.load %arg3[%c5, %c0_31, %c0_32] : memref<9x128x128xf32, #tpu.memory_space<vmem>>, vector<1x128x128xf32>
    %36 = vector.shape_cast %35 : vector<1x128x128xf32> to vector<128x128xf32>
    %cst_33 = arith.constant dense<0.000000e+00> : vector<324x128xf32>
    %37 = tpu.matmul %34, %36, %cst_33 {dimension_numbers = #tpu.dot_dimension_numbers<[1], [0], [0], [1], [0, 0, 1, 1], [], []>} : vector<324x128xf32>, vector<128x128xf32>, vector<324x128xf32> -> vector<324x128xf32>
    %38 = arith.addf %32, %37 : vector<324x128xf32>
    %c0_34 = arith.constant 0 : index
    %c43 = arith.constant 43 : index
    %c0_35 = arith.constant 0 : index
    %39 = vector.load %arg1[%c0_34, %c43, %c0_35] : memref<1x376x128xf32, #tpu.memory_space<vmem>>, vector<1x324x128xf32>
    %40 = vector.shape_cast %39 : vector<1x324x128xf32> to vector<324x128xf32>
    %c6 = arith.constant 6 : index
    %c0_36 = arith.constant 0 : index
    %c0_37 = arith.constant 0 : index
    %41 = vector.load %arg3[%c6, %c0_36, %c0_37] : memref<9x128x128xf32, #tpu.memory_space<vmem>>, vector<1x128x128xf32>
    %42 = vector.shape_cast %41 : vector<1x128x128xf32> to vector<128x128xf32>
    %cst_38 = arith.constant dense<0.000000e+00> : vector<324x128xf32>
    %43 = tpu.matmul %40, %42, %cst_38 {dimension_numbers = #tpu.dot_dimension_numbers<[1], [0], [0], [1], [0, 0, 1, 1], [], []>} : vector<324x128xf32>, vector<128x128xf32>, vector<324x128xf32> -> vector<324x128xf32>
    %44 = arith.addf %38, %43 : vector<324x128xf32>
    %c0_39 = arith.constant 0 : index
    %c44 = arith.constant 44 : index
    %c0_40 = arith.constant 0 : index
    %45 = vector.load %arg1[%c0_39, %c44, %c0_40] : memref<1x376x128xf32, #tpu.memory_space<vmem>>, vector<1x324x128xf32>
    %46 = vector.shape_cast %45 : vector<1x324x128xf32> to vector<324x128xf32>
    %c7_41 = arith.constant 7 : index
    %c0_42 = arith.constant 0 : index
    %c0_43 = arith.constant 0 : index
    %47 = vector.load %arg3[%c7_41, %c0_42, %c0_43] : memref<9x128x128xf32, #tpu.memory_space<vmem>>, vector<1x128x128xf32>
    %48 = vector.shape_cast %47 : vector<1x128x128xf32> to vector<128x128xf32>
    %cst_44 = arith.constant dense<0.000000e+00> : vector<324x128xf32>
    %49 = tpu.matmul %46, %48, %cst_44 {dimension_numbers = #tpu.dot_dimension_numbers<[1], [0], [0], [1], [0, 0, 1, 1], [], []>} : vector<324x128xf32>, vector<128x128xf32>, vector<324x128xf32> -> vector<324x128xf32>
    %50 = arith.addf %44, %49 : vector<324x128xf32>
    %c0_45 = arith.constant 0 : index
    %c45 = arith.constant 45 : index
    %c0_46 = arith.constant 0 : index
    %51 = vector.load %arg1[%c0_45, %c45, %c0_46] : memref<1x376x128xf32, #tpu.memory_space<vmem>>, vector<1x324x128xf32>
    %52 = vector.shape_cast %51 : vector<1x324x128xf32> to vector<324x128xf32>
    %c8_47 = arith.constant 8 : index
    %c0_48 = arith.constant 0 : index
    %c0_49 = arith.constant 0 : index
    %53 = vector.load %arg3[%c8_47, %c0_48, %c0_49] : memref<9x128x128xf32, #tpu.memory_space<vmem>>, vector<1x128x128xf32>
    %54 = vector.shape_cast %53 : vector<1x128x128xf32> to vector<128x128xf32>
    %cst_50 = arith.constant dense<0.000000e+00> : vector<324x128xf32>
    %55 = tpu.matmul %52, %54, %cst_50 {dimension_numbers = #tpu.dot_dimension_numbers<[1], [0], [0], [1], [0, 0, 1, 1], [], []>} : vector<324x128xf32>, vector<128x128xf32>, vector<324x128xf32> -> vector<324x128xf32>
    %56 = arith.addf %50, %55 : vector<324x128xf32>
    %c0_51 = arith.constant 0 : index
    %c0_52 = arith.constant 0 : index
    %57 = vector.load %arg4[%c0_51, %c0_52] : memref<1x128xf32, #tpu.memory_space<vmem>>, vector<1x128xf32>
    %58 = vector.broadcast %57 : vector<1x128xf32> to vector<324x128xf32>
    %59 = arith.addf %56, %58 : vector<324x128xf32>
    %cst_53 = arith.constant 0.000000e+00 : f32
    %cst_54 = arith.constant 6.000000e+00 : f32
    %60 = vector.broadcast %cst_53 : f32 to vector<324x128xf32>
    %61 = arith.maximumf %60, %59 : vector<324x128xf32>
    %62 = vector.broadcast %cst_54 : f32 to vector<324x128xf32>
    %63 = arith.minimumf %62, %61 : vector<324x128xf32>
    %c0_55 = arith.constant 0 : index
    %c0_56 = arith.constant 0 : index
    %c0_57 = arith.constant 0 : index
    %64 = vector.load %arg2[%c0_55, %c0_56, %c0_57] : memref<1x324x1xf32, #tpu.memory_space<vmem>>, vector<1x324x1xf32>
    %65 = vector.shape_cast %64 : vector<1x324x1xf32> to vector<324x1xf32>
    %66 = vector.broadcast %65 : vector<324x1xf32> to vector<324x128xf32>
    %67 = arith.mulf %63, %66 : vector<324x128xf32>
    %c18 = arith.constant 18 : index
    %c0_58 = arith.constant 0 : index
    %68 = vector.load %arg10[%c18, %c0_58] : memref<360x128xf32, #tpu.memory_space<vmem>>, vector<324x128xf32>
    tpu.vector_store %arg10[%c18, %c0_58], %67 {strides = array<i32>} : memref<360x128xf32, #tpu.memory_space<vmem>>, vector<324x128xf32>,
    %c17 = arith.constant 17 : index
    %c0_59 = arith.constant 0 : index
    %69 = vector.load %arg10[%c17, %c0_59] : memref<360x128xf32, #tpu.memory_space<vmem>>, vector<288x128xf32>
    %c0_60 = arith.constant 0 : index
    %c0_61 = arith.constant 0 : index
    %c0_62 = arith.constant 0 : index
    %70 = vector.load %arg5[%c0_60, %c0_61, %c0_62] : memref<9x128x128xf32, #tpu.memory_space<vmem>>, vector<1x128x128xf32>
    %71 = vector.shape_cast %70 : vector<1x128x128xf32> to vector<128x128xf32>
    %cst_63 = arith.constant dense<0.000000e+00> : vector<288x128xf32>
    %72 = tpu.matmul %69, %71, %cst_63 {dimension_numbers = #tpu.dot_dimension_numbers<[1], [0], [0], [1], [0, 0, 1, 1], [], []>} : vector<288x128xf32>, vector<128x128xf32>, vector<288x128xf32> -> vector<288x128xf32>
    %c18_64 = arith.constant 18 : index
    %c0_65 = arith.constant 0 : index
    %73 = vector.load %arg10[%c18_64, %c0_65] : memref<360x128xf32, #tpu.memory_space<vmem>>, vector<288x128xf32>
    %c1_66 = arith.constant 1 : index
    %c0_67 = arith.constant 0 : index
    %c0_68 = arith.constant 0 : index
    %74 = vector.load %arg5[%c1_66, %c0_67, %c0_68] : memref<9x128x128xf32, #tpu.memory_space<vmem>>, vector<1x128x128xf32>
    %75 = vector.shape_cast %74 : vector<1x128x128xf32> to vector<128x128xf32>
    %cst_69 = arith.constant dense<0.000000e+00> : vector<288x128xf32>
    %76 = tpu.matmul %73, %75, %cst_69 {dimension_numbers = #tpu.dot_dimension_numbers<[1], [0], [0], [1], [0, 0, 1, 1], [], []>} : vector<288x128xf32>, vector<128x128xf32>, vector<288x128xf32> -> vector<288x128xf32>
    %77 = arith.addf %72, %76 : vector<288x128xf32>
    %c19 = arith.constant 19 : index
    %c0_70 = arith.constant 0 : index
    %78 = vector.load %arg10[%c19, %c0_70] : memref<360x128xf32, #tpu.memory_space<vmem>>, vector<288x128xf32>
    %c2_71 = arith.constant 2 : index
    %c0_72 = arith.constant 0 : index
    %c0_73 = arith.constant 0 : index
    %79 = vector.load %arg5[%c2_71, %c0_72, %c0_73] : memref<9x128x128xf32, #tpu.memory_space<vmem>>, vector<1x128x128xf32>
    %80 = vector.shape_cast %79 : vector<1x128x128xf32> to vector<128x128xf32>
    %cst_74 = arith.constant dense<0.000000e+00> : vector<288x128xf32>
    %81 = tpu.matmul %78, %80, %cst_74 {dimension_numbers = #tpu.dot_dimension_numbers<[1], [0], [0], [1], [0, 0, 1, 1], [], []>} : vector<288x128xf32>, vector<128x128xf32>, vector<288x128xf32> -> vector<288x128xf32>
    %82 = arith.addf %77, %81 : vector<288x128xf32>
    %c35 = arith.constant 35 : index
    %c0_75 = arith.constant 0 : index
    %83 = vector.load %arg10[%c35, %c0_75] : memref<360x128xf32, #tpu.memory_space<vmem>>, vector<288x128xf32>
    %c3_76 = arith.constant 3 : index
    %c0_77 = arith.constant 0 : index
    %c0_78 = arith.constant 0 : index
    %84 = vector.load %arg5[%c3_76, %c0_77, %c0_78] : memref<9x128x128xf32, #tpu.memory_space<vmem>>, vector<1x128x128xf32>
    %85 = vector.shape_cast %84 : vector<1x128x128xf32> to vector<128x128xf32>
    %cst_79 = arith.constant dense<0.000000e+00> : vector<288x128xf32>
    %86 = tpu.matmul %83, %85, %cst_79 {dimension_numbers = #tpu.dot_dimension_numbers<[1], [0], [0], [1], [0, 0, 1, 1], [], []>} : vector<288x128xf32>, vector<128x128xf32>, vector<288x128xf32> -> vector<288x128xf32>
    %87 = arith.addf %82, %86 : vector<288x128xf32>
    %c36 = arith.constant 36 : index
    %c0_80 = arith.constant 0 : index
    %88 = vector.load %arg10[%c36, %c0_80] : memref<360x128xf32, #tpu.memory_space<vmem>>, vector<288x128xf32>
    %c4_81 = arith.constant 4 : index
    %c0_82 = arith.constant 0 : index
    %c0_83 = arith.constant 0 : index
    %89 = vector.load %arg5[%c4_81, %c0_82, %c0_83] : memref<9x128x128xf32, #tpu.memory_space<vmem>>, vector<1x128x128xf32>
    %90 = vector.shape_cast %89 : vector<1x128x128xf32> to vector<128x128xf32>
    %cst_84 = arith.constant dense<0.000000e+00> : vector<288x128xf32>
    %91 = tpu.matmul %88, %90, %cst_84 {dimension_numbers = #tpu.dot_dimension_numbers<[1], [0], [0], [1], [0, 0, 1, 1], [], []>} : vector<288x128xf32>, vector<128x128xf32>, vector<288x128xf32> -> vector<288x128xf32>
    %92 = arith.addf %87, %91 : vector<288x128xf32>
    %c37 = arith.constant 37 : index
    %c0_85 = arith.constant 0 : index
    %93 = vector.load %arg10[%c37, %c0_85] : memref<360x128xf32, #tpu.memory_space<vmem>>, vector<288x128xf32>
    %c5_86 = arith.constant 5 : index
    %c0_87 = arith.constant 0 : index
    %c0_88 = arith.constant 0 : index
    %94 = vector.load %arg5[%c5_86, %c0_87, %c0_88] : memref<9x128x128xf32, #tpu.memory_space<vmem>>, vector<1x128x128xf32>
    %95 = vector.shape_cast %94 : vector<1x128x128xf32> to vector<128x128xf32>
    %cst_89 = arith.constant dense<0.000000e+00> : vector<288x128xf32>
    %96 = tpu.matmul %93, %95, %cst_89 {dimension_numbers = #tpu.dot_dimension_numbers<[1], [0], [0], [1], [0, 0, 1, 1], [], []>} : vector<288x128xf32>, vector<128x128xf32>, vector<288x128xf32> -> vector<288x128xf32>
    %97 = arith.addf %92, %96 : vector<288x128xf32>
    %c53 = arith.constant 53 : index
    %c0_90 = arith.constant 0 : index
    %98 = vector.load %arg10[%c53, %c0_90] : memref<360x128xf32, #tpu.memory_space<vmem>>, vector<288x128xf32>
    %c6_91 = arith.constant 6 : index
    %c0_92 = arith.constant 0 : index
    %c0_93 = arith.constant 0 : index
    %99 = vector.load %arg5[%c6_91, %c0_92, %c0_93] : memref<9x128x128xf32, #tpu.memory_space<vmem>>, vector<1x128x128xf32>
    %100 = vector.shape_cast %99 : vector<1x128x128xf32> to vector<128x128xf32>
    %cst_94 = arith.constant dense<0.000000e+00> : vector<288x128xf32>
    %101 = tpu.matmul %98, %100, %cst_94 {dimension_numbers = #tpu.dot_dimension_numbers<[1], [0], [0], [1], [0, 0, 1, 1], [], []>} : vector<288x128xf32>, vector<128x128xf32>, vector<288x128xf32> -> vector<288x128xf32>
    %102 = arith.addf %97, %101 : vector<288x128xf32>
    %c54 = arith.constant 54 : index
    %c0_95 = arith.constant 0 : index
    %103 = vector.load %arg10[%c54, %c0_95] : memref<360x128xf32, #tpu.memory_space<vmem>>, vector<288x128xf32>
    %c7_96 = arith.constant 7 : index
    %c0_97 = arith.constant 0 : index
    %c0_98 = arith.constant 0 : index
    %104 = vector.load %arg5[%c7_96, %c0_97, %c0_98] : memref<9x128x128xf32, #tpu.memory_space<vmem>>, vector<1x128x128xf32>
    %105 = vector.shape_cast %104 : vector<1x128x128xf32> to vector<128x128xf32>
    %cst_99 = arith.constant dense<0.000000e+00> : vector<288x128xf32>
    %106 = tpu.matmul %103, %105, %cst_99 {dimension_numbers = #tpu.dot_dimension_numbers<[1], [0], [0], [1], [0, 0, 1, 1], [], []>} : vector<288x128xf32>, vector<128x128xf32>, vector<288x128xf32> -> vector<288x128xf32>
    %107 = arith.addf %102, %106 : vector<288x128xf32>
    %c55 = arith.constant 55 : index
    %c0_100 = arith.constant 0 : index
    %108 = vector.load %arg10[%c55, %c0_100] : memref<360x128xf32, #tpu.memory_space<vmem>>, vector<288x128xf32>
    %c8_101 = arith.constant 8 : index
    %c0_102 = arith.constant 0 : index
    %c0_103 = arith.constant 0 : index
    %109 = vector.load %arg5[%c8_101, %c0_102, %c0_103] : memref<9x128x128xf32, #tpu.memory_space<vmem>>, vector<1x128x128xf32>
    %110 = vector.shape_cast %109 : vector<1x128x128xf32> to vector<128x128xf32>
    %cst_104 = arith.constant dense<0.000000e+00> : vector<288x128xf32>
    %111 = tpu.matmul %108, %110, %cst_104 {dimension_numbers = #tpu.dot_dimension_numbers<[1], [0], [0], [1], [0, 0, 1, 1], [], []>} : vector<288x128xf32>, vector<128x128xf32>, vector<288x128xf32> -> vector<288x128xf32>
    %112 = arith.addf %107, %111 : vector<288x128xf32>
    %c0_105 = arith.constant 0 : index
    %c0_106 = arith.constant 0 : index
    %113 = vector.load %arg6[%c0_105, %c0_106] : memref<1x128xf32, #tpu.memory_space<vmem>>, vector<1x128xf32>
    %114 = vector.broadcast %113 : vector<1x128xf32> to vector<288x128xf32>
    %115 = arith.addf %112, %114 : vector<288x128xf32>
    %cst_107 = arith.constant 0.000000e+00 : f32
    %cst_108 = arith.constant 6.000000e+00 : f32
    %116 = vector.broadcast %cst_107 : f32 to vector<288x128xf32>
    %117 = arith.maximumf %116, %115 : vector<288x128xf32>
    %118 = vector.broadcast %cst_108 : f32 to vector<288x128xf32>
    %119 = arith.minimumf %118, %117 : vector<288x128xf32>
    %c0_109 = arith.constant 0 : index
    %c0_110 = arith.constant 0 : index
    %120 = vector.load %arg7[%c0_109, %c0_110] : memref<128x128xf32, #tpu.memory_space<vmem>>, vector<128x128xf32>
    %cst_111 = arith.constant dense<0.000000e+00> : vector<288x128xf32>
    %121 = tpu.matmul %119, %120, %cst_111 {dimension_numbers = #tpu.dot_dimension_numbers<[1], [0], [0], [1], [0, 0, 1, 1], [], []>} : vector<288x128xf32>, vector<128x128xf32>, vector<288x128xf32> -> vector<288x128xf32>
    %c0_112 = arith.constant 0 : index
    %c0_113 = arith.constant 0 : index
    %122 = vector.load %arg8[%c0_112, %c0_113] : memref<1x128xf32, #tpu.memory_space<vmem>>, vector<1x128xf32>
    %123 = vector.broadcast %122 : vector<1x128xf32> to vector<288x128xf32>
    %124 = arith.addf %121, %123 : vector<288x128xf32>
    %c0_114 = arith.constant 0 : index
    %c44_115 = arith.constant 44 : index
    %c0_116 = arith.constant 0 : index
    %125 = vector.load %arg1[%c0_114, %c44_115, %c0_116] : memref<1x376x128xf32, #tpu.memory_space<vmem>>, vector<1x288x128xf32>
    %126 = vector.shape_cast %125 : vector<1x288x128xf32> to vector<288x128xf32>
    %127 = arith.addf %124, %126 : vector<288x128xf32>
    %c0_117 = arith.constant 0 : index
    %c0_118 = arith.constant 0 : index
    %c0_119 = arith.constant 0 : index
    %128 = vector.load %arg9[%c0_117, %c0_118, %c0_119] : memref<1x288x128xf32, #tpu.memory_space<vmem>>, vector<1x288x128xf32>
    %129 = vector.shape_cast %128 : vector<1x288x128xf32> to vector<288x128xf32>
    %130 = vector.shape_cast %127 : vector<288x128xf32> to vector<1x288x128xf32>
    tpu.vector_store %arg9[%c0_117, %c0_118, %c0_119], %130 {strides = array<i32>} : memref<1x288x128xf32, #tpu.memory_space<vmem>>, vector<1x288x128xf32>,
    return
  }
  func.func @transform_0(%arg0: i32) -> (i32, i32, i32) {
    %c0_i32 = arith.constant 0 : i32
    %c0_i32_0 = arith.constant 0 : i32
    %c0_i32_1 = arith.constant 0 : i32
    return %arg0, %c0_i32, %c0_i32_0 : i32, i32, i32
  }
  func.func @transform_1(%arg0: i32) -> (i32, i32, i32) {
    %c0_i32 = arith.constant 0 : i32
    %c0_i32_0 = arith.constant 0 : i32
    %c0_i32_1 = arith.constant 0 : i32
    return %arg0, %c0_i32, %c0_i32_0 : i32, i32, i32
  }
  func.func @transform_2(%arg0: i32) -> (i32, i32, i32) {
    %c0_i32 = arith.constant 0 : i32
    %c0_i32_0 = arith.constant 0 : i32
    %c0_i32_1 = arith.constant 0 : i32
    %c0_i32_2 = arith.constant 0 : i32
    return %c0_i32, %c0_i32_0, %c0_i32_1 : i32, i32, i32
  }
  func.func @transform_3(%arg0: i32) -> (i32, i32) {
    %c0_i32 = arith.constant 0 : i32
    %c0_i32_0 = arith.constant 0 : i32
    %c0_i32_1 = arith.constant 0 : i32
    return %c0_i32, %c0_i32_0 : i32, i32
  }
  func.func @transform_4(%arg0: i32) -> (i32, i32, i32) {
    %c0_i32 = arith.constant 0 : i32
    %c0_i32_0 = arith.constant 0 : i32
    %c0_i32_1 = arith.constant 0 : i32
    %c0_i32_2 = arith.constant 0 : i32
    return %c0_i32, %c0_i32_0, %c0_i32_1 : i32, i32, i32
  }
  func.func @transform_5(%arg0: i32) -> (i32, i32) {
    %c0_i32 = arith.constant 0 : i32
    %c0_i32_0 = arith.constant 0 : i32
    %c0_i32_1 = arith.constant 0 : i32
    return %c0_i32, %c0_i32_0 : i32, i32
  }
  func.func @transform_6(%arg0: i32) -> (i32, i32) {
    %c0_i32 = arith.constant 0 : i32
    %c0_i32_0 = arith.constant 0 : i32
    %c0_i32_1 = arith.constant 0 : i32
    return %c0_i32, %c0_i32_0 : i32, i32
  }
  func.func @transform_7(%arg0: i32) -> (i32, i32) {
    %c0_i32 = arith.constant 0 : i32
    %c0_i32_0 = arith.constant 0 : i32
    %c0_i32_1 = arith.constant 0 : i32
    return %c0_i32, %c0_i32_0 : i32, i32
  }
  func.func @transform_8(%arg0: i32) -> (i32, i32, i32) {
    %c0_i32 = arith.constant 0 : i32
    %c0_i32_0 = arith.constant 0 : i32
    %c0_i32_1 = arith.constant 0 : i32
    return %arg0, %c0_i32, %c0_i32_0 : i32, i32, i32
  }
}

</mosaic_0001>

<bundles_post_ra>
// kernel: tpu_custom_call.1
= control target key start
LH: loop header
LB: loop body
LE: loop exit
PB: predicated region body
PF: predicated region fallthrough
CT: control target
= control target key end

     0   :  { %s15244_s0 = inlined_call_operand.hbm [shape: f32[2,376,128], index: 0, kind: input, shape index: {}]   ;;  %s15245_s1 = inlined_call_operand.vmem [shape: f32[2,324,1], index: 1, kind: input, shape index: {}]   ;;  %s15246_s2 = inlined_call_operand.hbm [shape: f32[9,128,128], index: 2, kind: input, shape index: {}]   ;;  %s15247_s3 = inlined_call_operand.vmem [shape: f32[1,128], index: 3, kind: input, shape index: {}]   ;;  %s15248_s4 = inlined_call_operand.hbm [shape: f32[9,128,128], index: 4, kind: input, shape index: {}]   ;;  %s15249_s5 = inlined_call_operand.vmem [shape: f32[1,128], index: 5, kind: input, shape index: {}]   ;;  %s15250_s6 = inlined_call_operand.vmem [shape: f32[128,128], index: 6, kind: input, shape index: {}]   ;;  %s15251_s7 = inlined_call_operand.vmem [shape: f32[1,128], index: 7, kind: input, shape index: {}]   ;;  %s15252_s8 = inlined_call_operand.hbm [shape: f32[2,288,128], index: 8, kind: output, shape index: {}]  }
   0x1   :  { %15273 = sst [smem:[#allocation41_spill]] %s15246_s2 }
   0x2   :  { %15274 = sst [smem:[#allocation42_spill]] %s15248_s4 }
   0x3   :  { %13 = vsyncpa [#allocation4], 0 }
   0x4   :  { %15 = vsyncpa [#allocation4 + $0x1], 0 }
   0x5   :  { %16 = vsyncpa [#allocation7], 0 }
   0x6   :  { %17 = vsyncpa [#allocation5], 0 }
   0x7   :  { %19 = vsyncpa [#allocation5 + $0x1], 0  ;;  %s12091_s27 = smov 0   ;;  %s12093_s28 = smov 0  }
   0x8   :  { %s12095_s29 = smov 0   ;;  %s12097_s30 = smov 0  }
   0x9 LB: > { %s12112_s9 = sadd.s32 4294967295, %s12032_s30   ;;  %s7617_s10 = sadd.s32 4294967294, %s12032_s30   ;;  %s12032_s30 = sphi %s12097_s30, %s15482_s30   ;;  %s12028_s29 = sphi %s12095_s29, %s15481_s29   ;;  %s12024_s28 = sphi %s12093_s28, %s15480_s28   ;;  %s12020_s27 = sphi %s12091_s27, %s15479_s27  }
   0xa   : > { %p45_p0 = scmp.ne.s32.totalorder %s12024_s28, %s12020_s27  ;;  %p15253_p1 = scmp.eq.s32.totalorder %s12112_s9, 0 }
   0xb   : > { %p227_p3 = scmp.eq.s32.totalorder %s7617_s10, 1  ;;  %p7618_p5 = scmp.ge.s32.totalorder %s12032_s30, 1 }
   0xc   : > { %p12121_p4 = por %p15253_p1, %p45_p0  ;;  %p234_p7 = scmp.lt.s32.totalorder %s12032_s30, 3 }
   0xd   : > { %p12126_p6 = por %p227_p3, %p45_p0  ;;  %s12034_s14 = smov [#allocation6]  }
   0xe   : > { %s15275_s11 = scalar_select %p12121_p4, 1, 0 }
   0xf   : > { %s15276_s12 = scalar_select %p12126_p6, 1, 0 }
  0x10   : > { %p12131_p8 = pnand %p7618_p5, %p234_p7  ;;  %s246_s15 = sshll.u32 %s12034_s14, 4  ;;  %s12135_s15 = int_to_ptr.vmem [resolvable:$true] %s246_s15 }
  0x11   : > { %s12035_s17 = smov [#allocation8]   ;;  %s15279_s2 = sld [smem:[#allocation41_spill]] }
  0x12   : > { %p11779_p9 = pneg %p12131_p8  ;;  %s262_s18 = sshll.u32 %s12035_s17, 4  ;;  %s12146_s18 = int_to_ptr.vmem [resolvable:$true] %s262_s18 }
  0x14   : > { %p12142_p11 = pnand %p11779_p9, %p15253_p1 }
  0x16   : > { %p11878_p13 = pneg %p12142_p11 }
  0x17   : > { %s11876_s21 = scalar_lea.hbm %s15279_s2, 18432 }
  0x18   : > { %p11877_p12 = scmp.ne.s32.totalorder %s15279_s2, %s11876_s21  ;;  %p11883_p5 = scmp.lt.u32.totalorder %s11876_s21, %s15279_s2 }
  0x1a   : > { %p11879_p0 = pnand %p11878_p13, %p11877_p12 }
  0x1c   : > { %p11880_p3 = pneg %p11879_p0 }
  0x1e   : > { %p11885_p7 = pnand %p11883_p5, %p11880_p3 }
  0x20   : > { %11888 = shalt.err (!%p11885_p7)
}
  0x21   : > { %s11889_s26 = scalar_lea.vmem %s12135_s15, 18432  ;;  %p11897_p2 = scmp.lt.s32.totalorder %s12135_s15, %s12135_s15 }
  0x22   : > { %p11890_p9 = scmp.ne.s32.totalorder %s12135_s15, %s11889_s26  ;;  %p11898_p12 = scmp.lt.s32.totalorder %s11889_s26, %s11889_s26 }
  0x24   : > { %p11892_p10 = pnand %p11890_p9, %p11878_p13  ;;  %p11899_p0 = por %p11898_p12, %p11897_p2 }
  0x26   : > { %p11893_p1 = pneg %p11892_p10 }
  0x28   : > { %p11900_p6 = pnand %p11899_p0, %p11893_p1 }
  0x2a   : > { %11903 = shalt.err (!%p11900_p6)
}
  0x2b   : > { %s15254_s10 = smov 128   ;;  %s15255_s14 = smov 8  }
  0x2c   : > { %11782 = dma.hbm_to_vmem [thread:$0]  (!%p12142_p11), %s15279_s2, 18432, %s12135_s15, [#allocation7], %s15254_s10, %s15254_s10, %s15255_s14  }
  0x2d   : > { %s15280_s4 = sld [smem:[#allocation42_spill]] }
  0x33   : > { %s11904_s22 = scalar_lea.hbm %s15280_s4, 18432 }
  0x34   : > { %p11905_p1 = scmp.ne.s32.totalorder %s15280_s4, %s11904_s22  ;;  %p11911_p10 = scmp.lt.u32.totalorder %s11904_s22, %s15280_s4 }
  0x36   : > { %p11907_p2 = pnand %p11905_p1, %p11878_p13 }
  0x38   : > { %p11908_p6 = pneg %p11907_p2 }
  0x3a   : > { %p11913_p3 = pnand %p11911_p10, %p11908_p6 }
  0x3c   : > { %11916 = shalt.err (!%p11913_p3)
}
  0x3d   : > { %s11917_s15 = scalar_lea.vmem %s12146_s18, 18432  ;;  %p11925_p12 = scmp.lt.s32.totalorder %s12146_s18, %s12146_s18 }
  0x3e   : > { %p11918_p5 = scmp.ne.s32.totalorder %s12146_s18, %s11917_s15  ;;  %p11926_p0 = scmp.lt.s32.totalorder %s11917_s15, %s11917_s15 }
  0x40   : > { %p11920_p7 = pnand %p11918_p5, %p11878_p13  ;;  %p11927_p1 = por %p11926_p0, %p11925_p12 }
  0x42   : > { %p11921_p9 = pneg %p11920_p7 }
  0x44   : > { %p11928_p2 = pnand %p11927_p1, %p11921_p9 }
  0x46   : > { %11931 = shalt.err (!%p11928_p2)
}
  0x47   : > { %11785 = dma.hbm_to_vmem [thread:$0]  (!%p12142_p11), %s15280_s4, 18432, %s12146_s18, [#allocation7], %s15254_s10, %s15254_s10, %s15255_s14  }
  0x48   : > { %s12207_s16 = sadd.s32 1, %s12032_s30   ;;  %s32_s20 = sadd.s32 1, %s12028_s29 }
  0x49   : > { %s29_s21 = ssub.s32 %s12032_s30, %s12207_s16  ;;  %p39_p13 = scmp.ne.s32.totalorder %s12028_s29, %s12024_s28 }
  0x4a   : > { %p30_p6 = scmp.eq.s32.totalorder %s29_s21, 0  ;;  %p40_p10 = scmp.eq.s32.totalorder %s12032_s30, 0 }
  0x4b   : > { %p15281_p3 = scmp.eq.s32.totalorder %s12112_s9, 1  ;;  %p11796_p7 = scmp.lt.s32.totalorder %s12032_s30, 2 }
  0x4c   : > { %s12223_s23 = scalar_select %p30_p6, %s12028_s29, %s32_s20  }
  0x4d   : > { %p12217_p5 = por %p15281_p3, %p39_p13  ;;  %p41_p9 = por %p40_p10, %p39_p13 }
  0x4e   : > { %s285_s24 = sand.u32 1, %s12028_s29   ;;  %s11762_s18 = smul.u32 6016, %s12032_s30 }
  0x4f   : > { %s15282_s22 = scalar_select %p12217_p5, 1, 0 }
  0x50   : > { %s11761_s25 = smul.u32 376, %s285_s24  ;;  %p12227_p11 = pnand %p11796_p7, %p41_p9 }
  0x51   : > { %s12234_s19 = scalar_lea.hbm %s15244_s0, %s11762_s18  ;;  %s12238_s10 = scalar_lea.sflag [#allocation4], %s285_s24 }
  0x52   : > { %s289_s20 = scalar_lea.vmem [#allocation3], %s11761_s25  ;;  %s11932_s14 = scalar_lea.hbm %s12234_s19, 6016 }
  0x53   : > { %s296_s21 = sshll.u32 %s289_s20, 4  ;;  %p11933_p12 = scmp.ne.s32.totalorder %s12234_s19, %s11932_s14  ;;  %s12236_s21 = int_to_ptr.vmem [resolvable:$true] %s296_s21 }
  0x54   : > { %p11934_p0 = pneg %p12227_p11  ;;  %s11937_s17 = scalar_lea.hbm %s15244_s0, 12032 }
  0x55   : > { %p11938_p13 = scmp.lt.u32.totalorder %s12234_s19, %s15244_s0  ;;  %p11939_p6 = scmp.lt.u32.totalorder %s11937_s17, %s11932_s14 }
  0x56   : > { %p11935_p1 = pnand %p11934_p0, %p11933_p12  ;;  %p11941_p3 = scmp.lt.u32.totalorder %s11932_s14, %s12234_s19 }
  0x57   : > { %p11940_p10 = por %p11939_p6, %p11938_p13 }
  0x58   : > { %p11936_p2 = pneg %p11935_p1 }
  0x59   : > { %p11942_p7 = por %p11941_p3, %p11940_p10 }
  0x5b   : > { %p11943_p9 = pnand %p11942_p7, %p11936_p2 }
  0x5d   : > { %11946 = shalt.err (!%p11943_p9)
}
  0x5e   : > { %s11947_s24 = scalar_lea.vmem %s12236_s21, 6016  ;;  %s12038_s25 = smov [#allocation3]  }
  0x5f   : > { %p11948_p12 = scmp.ne.s32.totalorder %s12236_s21, %s11947_s24  ;;  %s11952_s20 = sshll.u32 %s12038_s25, 4  ;;  %s11953_s20 = int_to_ptr.vmem [resolvable:$false] %s11952_s20 }
  0x60   : > { %s11954_s2 = scalar_lea.vmem %s11953_s20, 12032  ;;  %p11955_p4 = scmp.lt.s32.totalorder %s12236_s21, %s11953_s20 }
  0x61   : > { %p11950_p1 = pnand %p11948_p12, %p11934_p0  ;;  %p11956_p13 = scmp.lt.s32.totalorder %s11954_s2, %s11947_s24 }
  0x63   : > { %p11951_p5 = pneg %p11950_p1  ;;  %p11957_p6 = por %p11956_p13, %p11955_p4 }
  0x65   : > { %p11958_p10 = pnand %p11957_p6, %p11951_p5 }
  0x67   : > { %11961 = shalt.err (!%p11958_p10)
}
  0x68   : > { %s15284_s4 = smov 8   ;;  %s15285_s14 = smov 128  }
  0x69   : > { %11789 = dma.hbm_to_vmem [thread:$0]  (!%p12227_p11), %s12234_s19, 6016, %s12236_s21, %s12238_s10, %s15285_s14, %s15285_s14, %s15284_s4  }
  0x6a   : > { %316 = sbr.rel (%p12131_p8) target bundleno = 2405 (0x965), region = 52 }
  0x71   : > { %s12272_s18 = sand.u32 1, %s12024_s28   ;;  %p15286_p4 = scmp.ne.s32.totalorder %s15275_s11, 0 }
  0x72   : > { %s11763_s15 = smul.u32 376, %s12272_s18  ;;  %s319_s17 = scalar_lea.sflag [#allocation4], %s12272_s18 }
  0x74   : > { %s12276_s24 = scalar_lea.vmem [#allocation3], %s11763_s15 }
  0x75   : > { %12007 = dma.done.wait (%p15286_p4), %s319_s17, 6016  }
  0x76   : > { %12009 = vsyncadd (%p15286_p4), %s319_s17, 4294961280  ;;  %p15287_p5 = scmp.eq.s32.totalorder %s12112_s9, 0 }
  0x78   : > { %12011 = dma.done.wait (%p15287_p5), [#allocation7], 36864   ;;  %p15288_p8 = pmov %p15287_p5 }
  0x79   : > { %v12039_v0 = vmov 0.0   ;;  %v15258_v1 = vmov 0.0|0.0   ;;  %vm12041_vm0 = vmmov 0   ;;  %v478_v2 = vld [vmem:[#allocation6 + $0x80] sm:$0xff]  ;;  %v479_v3 = vld [vmem:[#allocation6 + $0x88] sm:$0xff]  ;;  %v480_v4 = vld [vmem:[#allocation6 + $0x90] sm:$0xff] }
  0x7a   : > { %12013 = vsyncadd (%p15288_p8), [#allocation7], 4294930432  ;;  %373 = vst [vmem:[#allocation2] sm:$0xff] %v12039_v0  ;;  %10921 = vmatprep.subr.bf16.mxu0 %v15258_v1  ;;  %8698 = vmatprep.mubr.msk.f32.mxu0 %vm12041_vm0, %v12039_v0  ;;  %v10922_v5 = vpack.c.bf16 %v479_v3, %v478_v2  ;;  %v481_v6 = vld [vmem:[#allocation6 + $0x98] sm:$0xff]  ;;  %v482_v8 = vld [vmem:[#allocation6 + $0xa0] sm:$0xff]  ;;  %p368_p11 = scmp.lt.s32.totalorder %s12112_s9, 1 }
  0x7b   : > { %375 = vst [vmem:[#allocation2 + $0x10] sm:$0x3] %v12039_v0  ;;  %376 = vst [vmem:[#allocation2 + $0x156] sm:$0xff] %v12039_v0  ;;  %11457 = vmatprep.subr.bf16.mxu1 %v15258_v1  ;;  %9193 = vmatprep.mubr.msk.f32.mxu1 %vm12041_vm0, %v12039_v0  ;;  %v10925_v7 = vpack.c.bf16 %v481_v6, %v480_v4  ;;  %v483_v9 = vld [vmem:[#allocation6 + $0xa8] sm:$0xff]  ;;  %v484_v11 = vld [vmem:[#allocation6 + $0xb0] sm:$0xff]  ;;  %s11764_s10 = smul.u32 288, %s12272_s18 }
  0x7c   : > { %10923 = vmatpush3.bf16.msra.mxu0 %v10922_v5  ;;  %v10928_v10 = vpack.c.bf16 %v483_v9, %v482_v8  ;;  %v485_v12 = vld [vmem:[#allocation6 + $0xb8] sm:$0xff]  ;;  %v486_v14 = vld [vmem:[#allocation6 + $0xc0] sm:$0xff]  ;;  %v487_v15 = vld [vmem:[#allocation6 + $0xc8] sm:$0xff]  ;;  %s369_s11 = scalar_select %p368_p11, %s12112_s9, 1 }
  0x7d   : > { %10924 = vmatprep.subr.bf16.mxu0 %v15258_v1  ;;  %v10931_v13 = vpack.c.bf16 %v485_v12, %v484_v11  ;;  %v10934_v16 = vpack.c.bf16 %v487_v15, %v486_v14  ;;  %v488_v17 = vld [vmem:[#allocation6 + $0xd0] sm:$0xff]  ;;  %v489_v18 = vld [vmem:[#allocation6 + $0xd8] sm:$0xff]  ;;  %v490_v20 = vld [vmem:[#allocation6 + $0xe0] sm:$0xff]  ;;  %s15088_s21 = scalar_lea.vmem [#allocation9], %s11764_s10  ;;  %s11766_s25 = smul.u32 4608, %s12112_s9 }
  0x7e   : > { %v10937_v19 = vpack.c.bf16 %v489_v18, %v488_v17  ;;  %v491_v21 = vld [vmem:[#allocation6 + $0xe8] sm:$0xff]  ;;  %v492_v23 = vld [vmem:[#allocation6 + $0xf0] sm:$0xff]  ;;  %v493_v24 = vld [vmem:[#allocation6 + $0xf8] sm:$0xff]  ;;  %s11765_s13 = smul.u32 328, %s369_s11  ;;  %s7513_s20 = sshll.u32 %s15088_s21, 4  ;;  %s15198_s20 = int_to_ptr.vmem [resolvable:$true] %s7513_s20 }
  0x7f   : > { %v10940_v22 = vpack.c.bf16 %v491_v21, %v490_v20  ;;  %v10943_v25 = vpack.c.bf16 %v493_v24, %v492_v23  ;;  %v420_v26 = vld [vmem:[#allocation6] sm:$0xff]  ;;  %v421_v27 = vld [vmem:[#allocation6 + $0x8] sm:$0xff]  ;;  %v436_v28 = vld [vmem:[%s12276_s24 + $0x8] sm:$0xff]  ;;  %s15196_s9 = scalar_lea.hbm %s15252_s8, %s11766_s25  ;;  %s7500_s14 = scalar_lea.sflag [#allocation5], %s12272_s18 }
  0x80   : > { %10926 = vmatpush3.bf16.msra.mxu0 %v10925_v7  ;;  %v10946_v29 = vpack.c.bf16 %v421_v27, %v420_v26  ;;  %v422_v30 = vld [vmem:[#allocation6 + $0x10] sm:$0xff]  ;;  %v423_v31 = vld [vmem:[#allocation6 + $0x18] sm:$0xff]  ;;  %v424_v34 = vld [vmem:[#allocation6 + $0x20] sm:$0xff]  ;;  %s14093_s19 = scalar_lea.vmem %s15245_s1, %s11765_s13  ;;  %p15476_p2 = scmp.ne.s32.totalorder %s15282_s22, 0 }
  0x81   : > { %10927 = vmatprep.subr.bf16.mxu0 %v15258_v1  ;;  %v437_v32 = vld [vmem:[%s12276_s24 + $0x10] sm:$0xff]  ;;  %v10949_v33 = vpack.c.bf16 %v423_v31, %v422_v30  ;;  %v425_v35 = vld [vmem:[#allocation6 + $0x28] sm:$0xff]  ;;  %v426_v38 = vld [vmem:[#allocation6 + $0x30] sm:$0xff]  ;;  %s12043_s15 = smov [#allocation9]  }
  0x82   : > { %v438_v36 = vld [vmem:[%s12276_s24 + $0x18] sm:$0xff]  ;;  %v10952_v37 = vpack.c.bf16 %v425_v35, %v424_v34  ;;  %v427_v39 = vld [vmem:[#allocation6 + $0x38] sm:$0xff]  ;;  %v439_v40 = vld [vmem:[%s12276_s24 + $0x20] sm:$0xff]  ;;  %s11966_s17 = sshll.u32 %s12043_s15, 4  ;;  %s11967_s17 = int_to_ptr.vmem [resolvable:$false] %s11966_s17 }
  0x83   : > { %v10955_v41 = vpack.c.bf16 %v427_v39, %v426_v38  ;;  %v428_v42 = vld [vmem:[#allocation6 + $0x40] sm:$0xff]  ;;  %v429_v43 = vld [vmem:[#allocation6 + $0x48] sm:$0xff]  ;;  %v440_v44 = vld [vmem:[%s12276_s24 + $0x28] sm:$0xff]  ;;  %s11968_s11 = scalar_lea.vmem %s11967_s17, 9216  ;;  %p11969_p9 = scmp.lt.s32.totalorder %s15198_s20, %s11967_s17 }
  0x84   : > { %10929 = vmatpush3.bf16.msra.mxu0 %v10928_v10  ;;  %v10958_v45 = vpack.c.bf16 %v429_v43, %v428_v42  ;;  %v430_v46 = vld [vmem:[#allocation6 + $0x50] sm:$0xff]  ;;  %v431_v47 = vld [vmem:[#allocation6 + $0x58] sm:$0xff]  ;;  %v432_v50 = vld [vmem:[#allocation6 + $0x60] sm:$0xff] }
  0x85   : > { %10930 = vmatprep.subr.bf16.mxu0 %v15258_v1  ;;  %v441_v48 = vld [vmem:[%s12276_s24 + $0x30] sm:$0xff]  ;;  %v10961_v49 = vpack.c.bf16 %v431_v47, %v430_v46  ;;  %v433_v51 = vld [vmem:[#allocation6 + $0x68] sm:$0xff]  ;;  %v434_v54 = vld [vmem:[#allocation6 + $0x70] sm:$0xff] }
  0x86   : > { %v442_v52 = vld [vmem:[%s12276_s24 + $0x38] sm:$0xff]  ;;  %v10964_v53 = vpack.c.bf16 %v433_v51, %v432_v50  ;;  %v435_v55 = vld [vmem:[#allocation6 + $0x78] sm:$0xff]  ;;  %v443_v56 = vld [vmem:[%s12276_s24 + $0x40] sm:$0xff] }
  0x87   : > { %v10967_v57 = vpack.c.bf16 %v435_v55, %v434_v54  ;;  %v444_v58 = vld [vmem:[%s12276_s24 + $0x48] sm:$0xff]  ;;  %v445_v59 = vld [vmem:[%s12276_s24 + $0x50] sm:$0xff]  ;;  %v446_v60 = vld [vmem:[%s12276_s24 + $0x58] sm:$0xff] }
  0x88   : > { %10932 = vmatpush3.bf16.msra.mxu0 %v10931_v13  ;;  %v447_v61 = vld [vmem:[%s12276_s24 + $0x60] sm:$0xff]  ;;  %v448_v62 = vld [vmem:[%s12276_s24 + $0x68] sm:$0xff]  ;;  %v449_v63 = vld [vmem:[%s12276_s24 + $0x70] sm:$0xff] }
  0x89   : > { %10933 = vmatprep.subr.bf16.mxu0 %v15258_v1  ;;  %v450_v2 = vld [vmem:[%s12276_s24 + $0x78] sm:$0xff]  ;;  %v451_v3 = vld [vmem:[%s12276_s24 + $0x80] sm:$0xff]  ;;  %v452_v4 = vld [vmem:[%s12276_s24 + $0x88] sm:$0xff] }
  0x8a   : > { %v453_v5 = vld [vmem:[%s12276_s24 + $0x90] sm:$0xff]  ;;  %v454_v6 = vld [vmem:[%s12276_s24 + $0x98] sm:$0xff]  ;;  %v455_v7 = vld [vmem:[%s12276_s24 + $0xa0] sm:$0xff] }
  0x8b   : > { %v456_v8 = vld [vmem:[%s12276_s24 + $0xa8] sm:$0xff]  ;;  %v457_v9 = vld [vmem:[%s12276_s24 + $0xb0] sm:$0xff]  ;;  %v458_v10 = vld [vmem:[%s12276_s24 + $0xb8] sm:$0xff] }
  0x8c   : > { %10935 = vmatpush3.bf16.msra.mxu0 %v10934_v16  ;;  %v459_v11 = vld [vmem:[%s12276_s24 + $0xc0] sm:$0xff]  ;;  %v460_v12 = vld [vmem:[%s12276_s24 + $0xc8] sm:$0xff]  ;;  %v461_v13 = vld [vmem:[%s12276_s24 + $0xd0] sm:$0xff] }
  0x8d   : > { %10936 = vmatprep.subr.bf16.mxu0 %v15258_v1  ;;  %v462_v14 = vld [vmem:[%s12276_s24 + $0xd8] sm:$0xff]  ;;  %v463_v15 = vld [vmem:[%s12276_s24 + $0xe0] sm:$0xff]  ;;  %v464_v16 = vld [vmem:[%s12276_s24 + $0xe8] sm:$0xff] }
  0x8e   : > { %v465_v17 = vld [vmem:[%s12276_s24 + $0xf0] sm:$0xff]  ;;  %v466_v18 = vld [vmem:[%s12276_s24 + $0xf8] sm:$0xff]  ;;  %v468_v20 = vld [vmem:[%s12276_s24 + $0x108] sm:$0xff] }
  0x8f   : > { %v469_v21 = vld [vmem:[%s12276_s24 + $0x110] sm:$0xff]  ;;  %v471_v23 = vld [vmem:[%s12276_s24 + $0x120] sm:$0xff]  ;;  %v472_v24 = vld [vmem:[%s12276_s24 + $0x128] sm:$0xff] }
  0x90   : > { %10938 = vmatpush3.bf16.msra.mxu0 %v10937_v19  ;;  %v467_v19 = vld [vmem:[%s12276_s24 + $0x100] sm:$0xff]  ;;  %v474_v26 = vld [vmem:[%s12276_s24 + $0x138] sm:$0xff]  ;;  %v1079_v34 = vld [vmem:[#allocation6 + $0x118] sm:$0xff] }
  0x91   : > { %10939 = vmatprep.subr.bf16.mxu0 %v15258_v1  ;;  %v475_v27 = vld [vmem:[%s12276_s24 + $0x140] sm:$0xff]  ;;  %v380_v35 = vld [vmem:[%s12276_s24 + $0xf] sm:$0xff]  ;;  %v381_v39 = vld [vmem:[%s12276_s24 + $0x17] sm:$0xff] }
  0x92   : > { %v1077_v30 = vld [vmem:[#allocation6 + $0x108] sm:$0xff]  ;;  %v1083_v42 = vld [vmem:[#allocation6 + $0x138] sm:$0xff] }
  0x93   : > { %v379_v31 = vld [vmem:[%s12276_s24 + $0x7] sm:$0xff]  ;;  %v382_v43 = vld [vmem:[%s12276_s24 + $0x1f] sm:$0xff]  ;;  %v384_v51 = vld [vmem:[%s12276_s24 + $0x2f] sm:$0xff] }
  0x94   : > { %10941 = vmatpush3.bf16.msra.mxu0 %v10940_v22  ;;  %v470_v22 = vld [vmem:[%s12276_s24 + $0x118] sm:$0xff]  ;;  %v383_v47 = vld [vmem:[%s12276_s24 + $0x27] sm:$0xff] }
  0x95   : > { %10942 = vmatprep.subr.bf16.mxu0 %v15258_v1  ;;  %v1081_v38 = vld [vmem:[#allocation6 + $0x128] sm:$0xff]  ;;  %v1087_v50 = vld [vmem:[#allocation6 + $0x158] sm:$0xff] }
  0x96   : > { %v1085_v46 = vld [vmem:[#allocation6 + $0x148] sm:$0xff] }
  0x97   : > { %v1089_v54 = vld [vmem:[#allocation6 + $0x168] sm:$0xff] }
  0x98   : > { %10944 = vmatpush3.bf16.msra.mxu0 %v10943_v25  ;;  %v473_v25 = vld [vmem:[%s12276_s24 + $0x130] sm:$0xff] }
  0x99   : > { %10945 = vmatprep.subr.bf16.mxu0 %v15258_v1  ;;  %v385_v55 = vld [vmem:[%s12276_s24 + $0x37] sm:$0xff] }
  0x9b   : > { %8699 = vmatmul.mubr.f32.vlgmr.msra.gmra.mrb[0].mxu0 %v436_v28  ;;  %v476_v28 = vld [vmem:[%s12276_s24 + $0x148] sm:$0xf] }
  0x9c   : > { %10947 = vmatpush3.bf16.msra.mxu0 %v10946_v29  ;;  %8701 = vmatprep.mubr.msk.f32.mxu0 %vm12041_vm0, %v12039_v0  ;;  %v1076_v29 = vld [vmem:[#allocation6 + $0x100] sm:$0xff] }
  0x9d   : > { %10948 = vmatprep.subr.bf16.mxu0 %v15258_v1 }
  0x9f   : > { %8702 = vmatmul.mubr.f32.gmra.mrb[2].mxu0 %v437_v32  ;;  %v10970_v32 = vpack.c.bf16 %v1077_v30, %v1076_v29  ;;  %v395_v29 = vld [vmem:[%s12276_s24 + $0x87] sm:$0xff] }
  0xa0   : > { %8704 = vmatprep.mubr.msk.f32.mxu0 %vm12041_vm0, %v12039_v0  ;;  %10950 = vmatpush3.bf16.msra.mxu0 %v10949_v33  ;;  %v1078_v33 = vld [vmem:[#allocation6 + $0x110] sm:$0xff] }
  0xa1   : > { %10951 = vmatprep.subr.bf16.mxu0 %v15258_v1 }
  0xa3   : > { %8705 = vmatmul.mubr.f32.gmra.mrb[4].mxu0 %v438_v36  ;;  %v10973_v36 = vpack.c.bf16 %v1079_v34, %v1078_v33  ;;  %v1455_v33 = vld [vmem:[#allocation6 + $0x1d0] sm:$0xff]  ;;  %v1456_v34 = vld [vmem:[#allocation6 + $0x1d8] sm:$0xff] }
  0xa4   : > { %8707 = vmatprep.mubr.msk.f32.mxu0 %vm12041_vm0, %v12039_v0  ;;  %10953 = vmatpush3.bf16.msra.mxu0 %v10952_v37  ;;  %v1080_v37 = vld [vmem:[#allocation6 + $0x120] sm:$0xff] }
  0xa5   : > { %10954 = vmatprep.subr.bf16.mxu0 %v15258_v1 }
  0xa7   : > { %8708 = vmatmul.mubr.f32.gmra.mrb[6].mxu0 %v439_v40  ;;  %v10976_v40 = vpack.c.bf16 %v1081_v38, %v1080_v37 }
  0xa8   : > { %8710 = vmatprep.mubr.msk.f32.mxu0 %vm12041_vm0, %v12039_v0  ;;  %10956 = vmatpush3.bf16.msra.mxu0 %v10955_v41  ;;  %v1082_v41 = vld [vmem:[#allocation6 + $0x130] sm:$0xff] }
  0xa9   : > { %10957 = vmatprep.subr.bf16.mxu0 %v15258_v1 }
  0xab   : > { %8711 = vmatmul.mubr.f32.gmra.mrb[8].mxu0 %v440_v44  ;;  %v10979_v44 = vpack.c.bf16 %v1083_v42, %v1082_v41  ;;  %v397_v41 = vld [vmem:[%s12276_s24 + $0x97] sm:$0xff] }
  0xac   : > { %8713 = vmatprep.mubr.msk.f32.mxu0 %vm12041_vm0, %v12039_v0  ;;  %10959 = vmatpush3.bf16.msra.mxu0 %v10958_v45  ;;  %v1084_v45 = vld [vmem:[#allocation6 + $0x140] sm:$0xff] }
  0xad   : > { %10960 = vmatprep.subr.bf16.mxu0 %v15258_v1 }
  0xaf   : > { %8714 = vmatmul.mubr.f32.gmra.mrb[10].mxu0 %v441_v48  ;;  %v10982_v48 = vpack.c.bf16 %v1085_v46, %v1084_v45  ;;  %v1459_v45 = vld [vmem:[#allocation6 + $0x1f0] sm:$0xff]  ;;  %v1460_v46 = vld [vmem:[#allocation6 + $0x1f8] sm:$0xff] }
  0xb0   : > { %8716 = vmatprep.mubr.msk.f32.mxu0 %vm12041_vm0, %v12039_v0  ;;  %10962 = vmatpush3.bf16.msra.mxu0 %v10961_v49  ;;  %v1086_v49 = vld [vmem:[#allocation6 + $0x150] sm:$0xff] }
  0xb1   : > { %10963 = vmatprep.subr.bf16.mxu0 %v15258_v1 }
  0xb3   : > { %8717 = vmatmul.mubr.f32.gmra.mrb[12].mxu0 %v442_v52  ;;  %v10985_v52 = vpack.c.bf16 %v1087_v50, %v1086_v49 }
  0xb4   : > { %8719 = vmatprep.mubr.msk.f32.mxu0 %vm12041_vm0, %v12039_v0  ;;  %10965 = vmatpush3.bf16.msra.mxu0 %v10964_v53  ;;  %v1088_v53 = vld [vmem:[#allocation6 + $0x160] sm:$0xff] }
  0xb5   : > { %10966 = vmatprep.subr.bf16.mxu0 %v15258_v1 }
  0xb7   : > { %8720 = vmatmul.mubr.f32.gmra.mrb[14].mxu0 %v443_v56  ;;  %v10988_v56 = vpack.c.bf16 %v1089_v54, %v1088_v53 }
  0xb8   : > { %8722 = vmatprep.mubr.msk.f32.mxu0 %vm12041_vm0, %v12039_v0  ;;  %10968 = vmatpush3.bf16.msra.mxu0 %v10967_v57  ;;  %v1090_v57 = vld [vmem:[#allocation6 + $0x170] sm:$0xff] }
  0xb9   : > { %10969 = vmatprep.subr.bf16.mxu0 %v15258_v1 }
  0xbb   : > { %8723 = vmatmul.mubr.f32.gmra.mrb[16].mxu0 %v444_v58  ;;  %v1091_v58 = vld [vmem:[#allocation6 + $0x178] sm:$0xff] }
  0xbc   : > { %8725 = vmatprep.mubr.msk.f32.mxu0 %vm12041_vm0, %v12039_v0 }
  0xbf   : > { %8726 = vmatmul.mubr.f32.gmra.mrb[18].mxu0 %v445_v59  ;;  %v386_v59 = vld [vmem:[%s12276_s24 + $0x3f] sm:$0xff] }
  0xc0   : > { %8728 = vmatprep.mubr.msk.f32.mxu0 %vm12041_vm0, %v12039_v0 }
  0xc3   : > { %8729 = vmatmul.mubr.f32.gmra.mrb[20].mxu0 %v446_v60  ;;  %v10991_v60 = vpack.c.bf16 %v1091_v58, %v1090_v57 }
  0xc4   : > { %8731 = vmatprep.mubr.msk.f32.mxu0 %vm12041_vm0, %v12039_v0 }
  0xc7   : > { %8732 = vmatmul.mubr.f32.gmra.mrb[22].mxu0 %v447_v61  ;;  %v387_v61 = vld [vmem:[%s12276_s24 + $0x47] sm:$0xff] }
  0xc8   : > { %8734 = vmatprep.mubr.msk.f32.mxu0 %vm12041_vm0, %v12039_v0 }
  0xcb   : > { %8735 = vmatmul.mubr.f32.gmra.mrb[24].mxu0 %v448_v62  ;;  %v388_v62 = vld [vmem:[%s12276_s24 + $0x4f] sm:$0xff] }
  0xcc   : > { %8737 = vmatprep.mubr.msk.f32.mxu0 %vm12041_vm0, %v12039_v0 }
  0xcf   : > { %8738 = vmatmul.mubr.f32.gmra.mrb[26].mxu0 %v449_v63  ;;  %v1445_v63 = vld [vmem:[#allocation6 + $0x180] sm:$0xff] }
  0xd0   : > { %8740 = vmatprep.mubr.msk.f32.mxu0 %vm12041_vm0, %v12039_v0 }
  0xd3   : > { %8741 = vmatmul.mubr.f32.gmra.mrb[28].mxu0 %v450_v2  ;;  %v1446_v2 = vld [vmem:[#allocation6 + $0x188] sm:$0xff] }
  0xd4   : > { %8743 = vmatprep.mubr.msk.f32.mxu0 %vm12041_vm0, %v12039_v0 }
  0xd7   : > { %8744 = vmatmul.mubr.f32.gmra.mrb[30].mxu0 %v451_v3  ;;  %v389_v3 = vld [vmem:[%s12276_s24 + $0x57] sm:$0xff] }
  0xd8   : > { %8746 = vmatprep.mubr.msk.f32.mxu0 %vm12041_vm0, %v12039_v0 }
  0xdb   : > { %8747 = vmatmul.mubr.f32.gmra.mrb[32].mxu0 %v452_v4  ;;  %v12473_v4 = vpack.c.bf16 %v1446_v2, %v1445_v63  ;;  %v12582_v63 = vld [vmem:[%s12276_s24 + $0x81] sm:$0xff] }
  0xdc   : > { %8749 = vmatprep.mubr.msk.f32.mxu0 %vm12041_vm0, %v12039_v0  ;;  %v402_v2 = vld [vmem:[%s12276_s24 + $0xbf] sm:$0xff] }
  0xdd   : > { %11465 = vmatpush3.bf16.msra.mxu1 %v12473_v4 }
  0xde   : > { %11458 = vmatprep.subr.bf16.mxu1 %v15258_v1 }
  0xdf   : > { %8750 = vmatmul.mubr.f32.gmra.mrb[34].mxu0 %v453_v5  ;;  %v390_v5 = vld [vmem:[%s12276_s24 + $0x5f] sm:$0xff] }
  0xe0   : > { %8752 = vmatprep.mubr.msk.f32.mxu0 %vm12041_vm0, %v12039_v0 }
  0xe3   : > { %8753 = vmatmul.mubr.f32.gmra.mrb[36].mxu0 %v454_v6  ;;  %v391_v6 = vld [vmem:[%s12276_s24 + $0x67] sm:$0xff] }
  0xe4   : > { %8755 = vmatprep.mubr.msk.f32.mxu0 %vm12041_vm0, %v12039_v0 }
  0xe7   : > { %8756 = vmatmul.mubr.f32.gmra.mrb[38].mxu0 %v455_v7 }
  0xe8   : > { %8758 = vmatprep.mubr.msk.f32.mxu0 %vm12041_vm0, %v12039_v0 }
  0xeb   : > { %8759 = vmatmul.mubr.f32.gmra.mrb[40].mxu0 %v456_v8 }
  0xec   : > { %8761 = vmatprep.mubr.msk.f32.mxu0 %vm12041_vm0, %v12039_v0 }
  0xef   : > { %8762 = vmatmul.mubr.f32.gmra.mrb[42].mxu0 %v457_v9  ;;  %v1447_v9 = vld [vmem:[#allocation6 + $0x190] sm:$0xff] }
  0xf0   : > { %8764 = vmatprep.mubr.msk.f32.mxu0 %vm12041_vm0, %v12039_v0 }
  0xf3   : > { %8765 = vmatmul.mubr.f32.gmra.mrb[44].mxu0 %v458_v10  ;;  %v1448_v10 = vld [vmem:[#allocation6 + $0x198] sm:$0xff] }
  0xf4   : > { %8767 = vmatprep.mubr.msk.f32.mxu0 %vm12041_vm0, %v12039_v0 }
  0xf7   : > { %8768 = vmatmul.mubr.f32.gmra.mrb[46].mxu0 %v459_v11  ;;  %v392_v11 = vld [vmem:[%s12276_s24 + $0x6f] sm:$0xff] }
  0xf8   : > { %8770 = vmatprep.mubr.msk.f32.mxu0 %vm12041_vm0, %v12039_v0 }
  0xfb   : > { %8771 = vmatmul.mubr.f32.gmra.mrb[48].mxu0 %v460_v12  ;;  %v12488_v12 = vpack.c.bf16 %v1448_v10, %v1447_v9 }
  0xfc   : > { %8773 = vmatprep.mubr.msk.f32.mxu0 %vm12041_vm0, %v12039_v0 }
  0xfd   : > { %11466 = vmatpush3.bf16.msra.mxu1 %v12488_v12 }
  0xfe   : > { %11459 = vmatprep.subr.bf16.mxu1 %v15258_v1 }
  0xff   : > { %8774 = vmatmul.mubr.f32.gmra.mrb[50].mxu0 %v461_v13 }
 0x100   : > { %8776 = vmatprep.mubr.msk.f32.mxu0 %vm12041_vm0, %v12039_v0 }
 0x103   : > { %8777 = vmatmul.mubr.f32.gmra.mrb[52].mxu0 %v462_v14 }
 0x104   : > { %8779 = vmatprep.mubr.msk.f32.mxu0 %vm12041_vm0, %v12039_v0 }
 0x107   : > { %8780 = vmatmul.mubr.f32.gmra.mrb[54].mxu0 %v463_v15  ;;  %v1449_v15 = vld [vmem:[#allocation6 + $0x1a0] sm:$0xff] }
 0x108   : > { %8782 = vmatprep.mubr.msk.f32.mxu0 %vm12041_vm0, %v12039_v0 }
 0x10b   : > { %8783 = vmatmul.mubr.f32.gmra.mrb[56].mxu0 %v464_v16  ;;  %v1450_v16 = vld [vmem:[#allocation6 + $0x1a8] sm:$0xff] }
 0x10c   : > { %8785 = vmatprep.mubr.msk.f32.mxu0 %vm12041_vm0, %v12039_v0 }
 0x10f   : > { %8786 = vmatmul.mubr.f32.gmra.mrb[58].mxu0 %v465_v17  ;;  %v393_v17 = vld [vmem:[%s12276_s24 + $0x77] sm:$0xff] }
 0x110   : > { %8788 = vmatprep.mubr.msk.f32.mxu0 %vm12041_vm0, %v12039_v0 }
 0x113   : > { %8789 = vmatmul.mubr.f32.gmra.mrb[60].mxu0 %v466_v18  ;;  %v12497_v18 = vpack.c.bf16 %v1450_v16, %v1449_v15 }
 0x114   : > { %8791 = vmatprep.mubr.msk.f32.mxu0 %vm12041_vm0, %v12039_v0 }
 0x115   : > { %11467 = vmatpush3.bf16.msra.mxu1 %v12497_v18 }
 0x116   : > { %11460 = vmatprep.subr.bf16.mxu1 %v15258_v1 }
 0x117   : > { %8792 = vmatmul.mubr.f32.gmra.mrb[62].mxu0 %v467_v19 }
 0x118   : > { %8794 = vmatprep.mubr.msk.f32.mxu0 %vm12041_vm0, %v12039_v0 }
 0x11b   : > { %8795 = vmatmul.mubr.f32.gmra.mrb[64].mxu0 %v468_v20 }
 0x11c   : > { %8797 = vmatprep.mubr.msk.f32.mxu0 %vm12041_vm0, %v12039_v0 }
 0x11f   : > { %8798 = vmatmul.mubr.f32.gmra.mrb[66].mxu0 %v469_v21  ;;  %v1451_v21 = vld [vmem:[#allocation6 + $0x1b0] sm:$0xff] }
 0x120   : > { %8800 = vmatprep.mubr.msk.f32.mxu0 %vm12041_vm0, %v12039_v0 }
 0x123   : > { %8801 = vmatmul.mubr.f32.gmra.mrb[68].mxu0 %v470_v22  ;;  %v1452_v22 = vld [vmem:[#allocation6 + $0x1b8] sm:$0xff] }
 0x124   : > { %8803 = vmatprep.mubr.msk.f32.mxu0 %vm12041_vm0, %v12039_v0 }
 0x127   : > { %8804 = vmatmul.mubr.f32.gmra.mrb[70].mxu0 %v471_v23  ;;  %v394_v23 = vld [vmem:[%s12276_s24 + $0x7f] sm:$0xff] }
 0x128   : > { %8806 = vmatprep.mubr.msk.f32.mxu0 %vm12041_vm0, %v12039_v0 }
 0x12b   : > { %8807 = vmatmul.mubr.f32.gmra.mrb[72].mxu0 %v472_v24  ;;  %v12506_v24 = vpack.c.bf16 %v1452_v22, %v1451_v21 }
 0x12c   : > { %8809 = vmatprep.mubr.msk.f32.mxu0 %vm12041_vm0, %v12039_v0 }
 0x12d   : > { %11468 = vmatpush3.bf16.msra.mxu1 %v12506_v24 }
 0x12e   : > { %11461 = vmatprep.subr.bf16.mxu1 %v15258_v1 }
 0x12f   : > { %8810 = vmatmul.mubr.f32.gmra.mrb[74].mxu0 %v473_v25 }
 0x130   : > { %8812 = vmatprep.mubr.msk.f32.mxu0 %vm12041_vm0, %v12039_v0 }
 0x133   : > { %8813 = vmatmul.mubr.f32.gmra.mrb[76].mxu0 %v474_v26 }
 0x134   : > { %8815 = vmatprep.mubr.msk.f32.mxu0 %vm12041_vm0, %v12039_v0 }
 0x137   : > { %8816 = vmatmul.mubr.f32.gmra.mrb[78].mxu0 %v475_v27  ;;  %v1453_v27 = vld [vmem:[#allocation6 + $0x1c0] sm:$0xff] }
 0x138   : > { %8818 = vmatprep.mubr.msk.f32.mxu0 %vm12041_vm0, %v12039_v0 }
 0x13b   : > { %8819 = vmatmul.mubr.f32.gmra.mrb[80].mxu0 %v476_v28  ;;  %v1454_v28 = vld [vmem:[#allocation6 + $0x1c8] sm:$0xff] }
 0x13c   : > { %8853 = vmatprep.mubr.msk.f32.mxu0 %vm12041_vm0, %v12039_v0  ;;  %v12515_v30 = vpack.c.bf16 %v1454_v28, %v1453_v27 }
 0x13e   : > { %11469 = vmatpush3.bf16.msra.mxu1 %v12515_v30 }
 0x13f   : > { %8854 = vmatmul.mubr.f32.vlgmr.msra.gmra.mrb[82].mxu0 %v379_v31  ;;  %11462 = vmatprep.subr.bf16.mxu1 %v15258_v1 }
 0x140   : > { %10971 = vmatpush3.bf16.msra.mxu0 %v10970_v32  ;;  %8856 = vmatprep.mubr.msk.f32.mxu0 %vm12041_vm0, %v12039_v0 }
 0x141   : > { %10972 = vmatprep.subr.bf16.mxu0 %v15258_v1 }
 0x143   : > { %8857 = vmatmul.mubr.f32.gmra.mrb[84].mxu0 %v380_v35  ;;  %v396_v35 = vld [vmem:[%s12276_s24 + $0x8f] sm:$0xff] }
 0x144   : > { %8859 = vmatprep.mubr.msk.f32.mxu0 %vm12041_vm0, %v12039_v0  ;;  %10974 = vmatpush3.bf16.msra.mxu0 %v10973_v36  ;;  %v12524_v36 = vpack.c.bf16 %v1456_v34, %v1455_v33 }
 0x145   : > { %10975 = vmatprep.subr.bf16.mxu0 %v15258_v1 }
 0x146   : > { %11470 = vmatpush3.bf16.msra.mxu1 %v12524_v36 }
 0x147   : > { %8860 = vmatmul.mubr.f32.gmra.mrb[86].mxu0 %v381_v39  ;;  %11463 = vmatprep.subr.bf16.mxu1 %v15258_v1  ;;  %v1457_v39 = vld [vmem:[#allocation6 + $0x1e0] sm:$0xff] }
 0x148   : > { %8862 = vmatprep.mubr.msk.f32.mxu0 %vm12041_vm0, %v12039_v0  ;;  %10977 = vmatpush3.bf16.msra.mxu0 %v10976_v40  ;;  %v1458_v40 = vld [vmem:[#allocation6 + $0x1e8] sm:$0xff] }
 0x149   : > { %10978 = vmatprep.subr.bf16.mxu0 %v15258_v1  ;;  %v12533_v42 = vpack.c.bf16 %v1458_v40, %v1457_v39 }
 0x14b   : > { %8863 = vmatmul.mubr.f32.gmra.mrb[88].mxu0 %v382_v43  ;;  %11471 = vmatpush3.bf16.msra.mxu1 %v12533_v42 }
 0x14c   : > { %8865 = vmatprep.mubr.msk.f32.mxu0 %vm12041_vm0, %v12039_v0  ;;  %10980 = vmatpush3.bf16.msra.mxu0 %v10979_v44 }
 0x14d   : > { %10981 = vmatprep.subr.bf16.mxu0 %v15258_v1  ;;  %11464 = vmatprep.subr.bf16.mxu1 %v15258_v1 }
 0x14f   : > { %8866 = vmatmul.mubr.f32.gmra.mrb[90].mxu0 %v383_v47  ;;  %v398_v47 = vld [vmem:[%s12276_s24 + $0x9f] sm:$0xff] }
 0x150   : > { %8868 = vmatprep.mubr.msk.f32.mxu0 %vm12041_vm0, %v12039_v0  ;;  %10983 = vmatpush3.bf16.msra.mxu0 %v10982_v48  ;;  %v12542_v48 = vpack.c.bf16 %v1460_v46, %v1459_v45 }
 0x151   : > { %10984 = vmatprep.subr.bf16.mxu0 %v15258_v1 }
 0x152   : > { %11472 = vmatpush3.bf16.msra.mxu1 %v12542_v48 }
 0x153   : > { %8869 = vmatmul.mubr.f32.gmra.mrb[92].mxu0 %v384_v51  ;;  %v12548_v51 = vld [vmem:[%s12276_s24 + $0x69] sm:$0xff]  ;;  %11041 = vmatprep.subr.bf16.mxu1 %v15258_v1 }
 0x154   : > { %8871 = vmatprep.mubr.msk.f32.mxu0 %vm12041_vm0, %v12039_v0  ;;  %10986 = vmatpush3.bf16.msra.mxu0 %v10985_v52  ;;  %v399_v52 = vld [vmem:[%s12276_s24 + $0xa7] sm:$0xff] }
 0x155   : > { %10987 = vmatprep.subr.bf16.mxu0 %v15258_v1  ;;  %9194 = vmatmul.mubr.f32.vlgmr.msra.gmra.mrb[0].mxu1 %v12548_v51 }
 0x156   : > { %9196 = vmatprep.mubr.msk.f32.mxu1 %vm12041_vm0, %v12039_v0 }
 0x157   : > { %8872 = vmatmul.mubr.f32.gmra.mrb[94].mxu0 %v385_v55  ;;  %v12560_v55 = vld [vmem:[%s12276_s24 + $0x71] sm:$0xff] }
 0x158   : > { %8874 = vmatprep.mubr.msk.f32.mxu0 %vm12041_vm0, %v12039_v0  ;;  %10989 = vmatpush3.bf16.msra.mxu0 %v10988_v56  ;;  %v400_v56 = vld [vmem:[%s12276_s24 + $0xaf] sm:$0xff] }
 0x159   : > { %10990 = vmatprep.subr.bf16.mxu0 %v15258_v1  ;;  %9197 = vmatmul.mubr.f32.gmra.mrb[2].mxu1 %v12560_v55 }
 0x15a   : > { %9199 = vmatprep.mubr.msk.f32.mxu1 %vm12041_vm0, %v12039_v0 }
 0x15b   : > { %8875 = vmatmul.mubr.f32.gmra.mrb[96].mxu0 %v386_v59  ;;  %v12571_v59 = vld [vmem:[%s12276_s24 + $0x79] sm:$0xff] }
 0x15c   : > { %8877 = vmatprep.mubr.msk.f32.mxu0 %vm12041_vm0, %v12039_v0  ;;  %10992 = vmatpush3.bf16.msra.mxu0 %v10991_v60  ;;  %v401_v60 = vld [vmem:[%s12276_s24 + $0xb7] sm:$0xff] }
 0x15d   : > { %10993 = vmatprep.subr.bf16.mxu0 %v15258_v1  ;;  %9200 = vmatmul.mubr.f32.gmra.mrb[4].mxu1 %v12571_v59  ;;  %v12782_v1 = vld [vmem:[%s12276_s24 + $0x111] sm:$0xff] }
 0x15e   : > { %9202 = vmatprep.mubr.msk.f32.mxu1 %vm12041_vm0, %v12039_v0 }
 0x15f   : > { %8878 = vmatmul.mubr.f32.gmra.mrb[98].mxu0 %v387_v61 }
 0x160   : > { %8880 = vmatprep.mubr.msk.f32.mxu0 %vm12041_vm0, %v12039_v0 }
 0x161   : > { %9203 = vmatmul.mubr.f32.gmra.mrb[6].mxu1 %v12582_v63 }
 0x162   : > { %9205 = vmatprep.mubr.msk.f32.mxu1 %vm12041_vm0, %v12039_v0 }
 0x163   : > { %8881 = vmatmul.mubr.f32.gmra.mrb[100].mxu0 %v388_v62 }
 0x164   : > { %8883 = vmatprep.mubr.msk.f32.mxu0 %vm12041_vm0, %v12039_v0 }
 0x167   : > { %8884 = vmatmul.mubr.f32.gmra.mrb[102].mxu0 %v389_v3 }
 0x168   : > { %8886 = vmatprep.mubr.msk.f32.mxu0 %vm12041_vm0, %v12039_v0 }
 0x16b   : > { %8887 = vmatmul.mubr.f32.gmra.mrb[104].mxu0 %v390_v5 }
 0x16c   : > { %8889 = vmatprep.mubr.msk.f32.mxu0 %vm12041_vm0, %v12039_v0 }
 0x16e   : > { %v12483_v7 = vpop.f32.mrb[0].mxu0 }
 0x16f   : > { %v8700_v8 = vpop.f32.mrb[1].mxu0  ;;  %8890 = vmatmul.mubr.f32.gmra.mrb[106].mxu0 %v391_v6  ;;  %v12593_v6 = vld [vmem:[%s12276_s24 + $0x89] sm:$0xff] }
 0x170   : > { %8892 = vmatprep.mubr.msk.f32.mxu0 %vm12041_vm0, %v12039_v0  ;;  %v403_v8 = vld [vmem:[%s12276_s24 + $0xc7] sm:$0xff]  ;;  %9206 = vmatmul.mubr.f32.gmra.mrb[8].mxu1 %v12593_v6 }
 0x171   : > { %9208 = vmatprep.mubr.msk.f32.mxu1 %vm12041_vm0, %v12039_v0 }
 0x172   : > { %v12490_v13 = vpop.f32.mrb[2].mxu0 }
 0x173   : > { %v8703_v14 = vpop.f32.mrb[3].mxu0  ;;  %8893 = vmatmul.mubr.f32.gmra.mrb[108].mxu0 %v392_v11  ;;  %v12604_v11 = vld [vmem:[%s12276_s24 + $0x91] sm:$0xff] }
 0x174   : > { %8895 = vmatprep.mubr.msk.f32.mxu0 %vm12041_vm0, %v12039_v0  ;;  %v404_v14 = vld [vmem:[%s12276_s24 + $0xcf] sm:$0xff]  ;;  %9209 = vmatmul.mubr.f32.gmra.mrb[10].mxu1 %v12604_v11 }
 0x175   : > { %9211 = vmatprep.mubr.msk.f32.mxu1 %vm12041_vm0, %v12039_v0 }
 0x176   : > { %v12499_v19 = vpop.f32.mrb[4].mxu0 }
 0x177   : > { %v8706_v20 = vpop.f32.mrb[5].mxu0  ;;  %8896 = vmatmul.mubr.f32.gmra.mrb[110].mxu0 %v393_v17  ;;  %v12615_v17 = vld [vmem:[%s12276_s24 + $0x99] sm:$0xff] }
 0x178   : > { %8898 = vmatprep.mubr.msk.f32.mxu0 %vm12041_vm0, %v12039_v0  ;;  %v405_v20 = vld [vmem:[%s12276_s24 + $0xd7] sm:$0xff]  ;;  %9212 = vmatmul.mubr.f32.gmra.mrb[12].mxu1 %v12615_v17 }
 0x179   : > { %9214 = vmatprep.mubr.msk.f32.mxu1 %vm12041_vm0, %v12039_v0 }
 0x17a   : > { %v12508_v25 = vpop.f32.mrb[6].mxu0 }
 0x17b   : > { %v8709_v26 = vpop.f32.mrb[7].mxu0  ;;  %8899 = vmatmul.mubr.f32.gmra.mrb[112].mxu0 %v394_v23  ;;  %v12626_v23 = vld [vmem:[%s12276_s24 + $0xa1] sm:$0xff] }
 0x17c   : > { %8901 = vmatprep.mubr.msk.f32.mxu0 %vm12041_vm0, %v12039_v0  ;;  %v406_v26 = vld [vmem:[%s12276_s24 + $0xdf] sm:$0xff]  ;;  %9215 = vmatmul.mubr.f32.gmra.mrb[14].mxu1 %v12626_v23 }
 0x17d   : > { %9217 = vmatprep.mubr.msk.f32.mxu1 %vm12041_vm0, %v12039_v0 }
 0x17e   : > { %v12517_v31 = vpop.f32.mrb[8].mxu0 }
 0x17f   : > { %v8712_v32 = vpop.f32.mrb[9].mxu0  ;;  %8902 = vmatmul.mubr.f32.gmra.mrb[114].mxu0 %v395_v29  ;;  %v12637_v29 = vld [vmem:[%s12276_s24 + $0xa9] sm:$0xff] }
 0x180   : > { %8904 = vmatprep.mubr.msk.f32.mxu0 %vm12041_vm0, %v12039_v0  ;;  %v407_v32 = vld [vmem:[%s12276_s24 + $0xe7] sm:$0xff]  ;;  %9218 = vmatmul.mubr.f32.gmra.mrb[16].mxu1 %v12637_v29 }
 0x181   : > { %9220 = vmatprep.mubr.msk.f32.mxu1 %vm12041_vm0, %v12039_v0 }
 0x182   : > { %v12526_v37 = vpop.f32.mrb[10].mxu0 }
 0x183   : > { %v8715_v38 = vpop.f32.mrb[11].mxu0  ;;  %8905 = vmatmul.mubr.f32.gmra.mrb[116].mxu0 %v396_v35  ;;  %v12648_v35 = vld [vmem:[%s12276_s24 + $0xb1] sm:$0xff] }
 0x184   : > { %8907 = vmatprep.mubr.msk.f32.mxu0 %vm12041_vm0, %v12039_v0  ;;  %v408_v38 = vld [vmem:[%s12276_s24 + $0xef] sm:$0xff]  ;;  %9221 = vmatmul.mubr.f32.gmra.mrb[18].mxu1 %v12648_v35 }
 0x185   : > { %9223 = vmatprep.mubr.msk.f32.mxu1 %vm12041_vm0, %v12039_v0 }
 0x186   : > { %v12535_v43 = vpop.f32.mrb[12].mxu0 }
 0x187   : > { %v8718_v44 = vpop.f32.mrb[13].mxu0  ;;  %8908 = vmatmul.mubr.f32.gmra.mrb[118].mxu0 %v397_v41  ;;  %v12659_v41 = vld [vmem:[%s12276_s24 + $0xb9] sm:$0xff] }
 0x188   : > { %8910 = vmatprep.mubr.msk.f32.mxu0 %vm12041_vm0, %v12039_v0  ;;  %v409_v44 = vld [vmem:[%s12276_s24 + $0xf7] sm:$0xff]  ;;  %9224 = vmatmul.mubr.f32.gmra.mrb[20].mxu1 %v12659_v41 }
 0x189   : > { %9226 = vmatprep.mubr.msk.f32.mxu1 %vm12041_vm0, %v12039_v0 }
 0x18a   : > { %v12544_v49 = vpop.f32.mrb[14].mxu0 }
 0x18b   : > { %v8721_v50 = vpop.f32.mrb[15].mxu0  ;;  %8911 = vmatmul.mubr.f32.gmra.mrb[120].mxu0 %v398_v47  ;;  %v12670_v47 = vld [vmem:[%s12276_s24 + $0xc1] sm:$0xff] }
 0x18c   : > { %8913 = vmatprep.mubr.msk.f32.mxu0 %vm12041_vm0, %v12039_v0  ;;  %v410_v50 = vld [vmem:[%s12276_s24 + $0xff] sm:$0xff]  ;;  %9227 = vmatmul.mubr.f32.gmra.mrb[22].mxu1 %v12670_v47 }
 0x18d   : > { %9229 = vmatprep.mubr.msk.f32.mxu1 %vm12041_vm0, %v12039_v0 }
 0x18e   : > { %v12555_v53 = vpop.f32.mrb[16].mxu0 }
 0x18f   : > { %v8724_v54 = vpop.f32.mrb[17].mxu0  ;;  %8914 = vmatmul.mubr.f32.gmra.mrb[122].mxu0 %v399_v52 }
 0x190   : > { %8916 = vmatprep.mubr.msk.f32.mxu0 %vm12041_vm0, %v12039_v0 }
 0x192   : > { %v12566_v57 = vpop.f32.mrb[18].mxu0 }
 0x193   : > { %v8727_v58 = vpop.f32.mrb[19].mxu0  ;;  %8917 = vmatmul.mubr.f32.gmra.mrb[124].mxu0 %v400_v56  ;;  %v12681_v56 = vld [vmem:[%s12276_s24 + $0xc9] sm:$0xff] }
 0x194   : > { %8919 = vmatprep.mubr.msk.f32.mxu0 %vm12041_vm0, %v12039_v0  ;;  %v411_v58 = vld [vmem:[%s12276_s24 + $0x107] sm:$0xff]  ;;  %9230 = vmatmul.mubr.f32.gmra.mrb[24].mxu1 %v12681_v56 }
 0x195   : > { %9232 = vmatprep.mubr.msk.f32.mxu1 %vm12041_vm0, %v12039_v0 }
 0x196   : > { %v12577_v61 = vpop.f32.mrb[20].mxu0 }
 0x197   : > { %v8730_v62 = vpop.f32.mrb[21].mxu0  ;;  %8920 = vmatmul.mubr.f32.gmra.mrb[126].mxu0 %v401_v60 }
 0x198   : > { %8922 = vmatprep.mubr.msk.f32.mxu0 %vm12041_vm0, %v12039_v0 }
 0x19a   : > { %v12588_v3 = vpop.f32.mrb[22].mxu0 }
 0x19b   : > { %v8733_v5 = vpop.f32.mrb[23].mxu0  ;;  %8923 = vmatmul.mubr.f32.gmra.mrb[128].mxu0 %v402_v2  ;;  %v12692_v2 = vld [vmem:[%s12276_s24 + $0xd1] sm:$0xff] }
 0x19c   : > { %8925 = vmatprep.mubr.msk.f32.mxu0 %vm12041_vm0, %v12039_v0  ;;  %v412_v5 = vld [vmem:[%s12276_s24 + $0x10f] sm:$0xff]  ;;  %9233 = vmatmul.mubr.f32.gmra.mrb[26].mxu1 %v12692_v2 }
 0x19d   : > { %9235 = vmatprep.mubr.msk.f32.mxu1 %vm12041_vm0, %v12039_v0 }
 0x19e   : > { %v12599_v9 = vpop.f32.mrb[24].mxu0 }
 0x19f   : > { %v8736_v10 = vpop.f32.mrb[25].mxu0  ;;  %8926 = vmatmul.mubr.f32.gmra.mrb[130].mxu0 %v403_v8 }
 0x1a0   : > { %8928 = vmatprep.mubr.msk.f32.mxu0 %vm12041_vm0, %v12039_v0 }
 0x1a2   : > { %v12610_v15 = vpop.f32.mrb[26].mxu0 }
 0x1a3   : > { %v8739_v16 = vpop.f32.mrb[27].mxu0  ;;  %8929 = vmatmul.mubr.f32.gmra.mrb[132].mxu0 %v404_v14  ;;  %v12703_v14 = vld [vmem:[%s12276_s24 + $0xd9] sm:$0xff] }
 0x1a4   : > { %8931 = vmatprep.mubr.msk.f32.mxu0 %vm12041_vm0, %v12039_v0  ;;  %v413_v16 = vld [vmem:[%s12276_s24 + $0x117] sm:$0xff]  ;;  %9236 = vmatmul.mubr.f32.gmra.mrb[28].mxu1 %v12703_v14 }
 0x1a5   : > { %9238 = vmatprep.mubr.msk.f32.mxu1 %vm12041_vm0, %v12039_v0 }
 0x1a6   : > { %v12621_v21 = vpop.f32.mrb[28].mxu0 }
 0x1a7   : > { %v8742_v22 = vpop.f32.mrb[29].mxu0  ;;  %8932 = vmatmul.mubr.f32.gmra.mrb[134].mxu0 %v405_v20 }
 0x1a8   : > { %8934 = vmatprep.mubr.msk.f32.mxu0 %vm12041_vm0, %v12039_v0 }
 0x1aa   : > { %v12632_v27 = vpop.f32.mrb[30].mxu0 }
 0x1ab   : > { %v8745_v28 = vpop.f32.mrb[31].mxu0  ;;  %8935 = vmatmul.mubr.f32.gmra.mrb[136].mxu0 %v406_v26  ;;  %v12714_v26 = vld [vmem:[%s12276_s24 + $0xe1] sm:$0xff] }
 0x1ac   : > { %8937 = vmatprep.mubr.msk.f32.mxu0 %vm12041_vm0, %v12039_v0  ;;  %v414_v28 = vld [vmem:[%s12276_s24 + $0x11f] sm:$0xff]  ;;  %9239 = vmatmul.mubr.f32.gmra.mrb[30].mxu1 %v12714_v26 }
 0x1ad   : > { %9241 = vmatprep.mubr.msk.f32.mxu1 %vm12041_vm0, %v12039_v0 }
 0x1ae   : > { %v12643_v33 = vpop.f32.mrb[32].mxu0 }
 0x1af   : > { %v8748_v34 = vpop.f32.mrb[33].mxu0  ;;  %8938 = vmatmul.mubr.f32.gmra.mrb[138].mxu0 %v407_v32 }
 0x1b0   : > { %8940 = vmatprep.mubr.msk.f32.mxu0 %vm12041_vm0, %v12039_v0 }
 0x1b2   : > { %v12654_v39 = vpop.f32.mrb[34].mxu0 }
 0x1b3   : > { %v8751_v40 = vpop.f32.mrb[35].mxu0  ;;  %8941 = vmatmul.mubr.f32.gmra.mrb[140].mxu0 %v408_v38  ;;  %v12725_v38 = vld [vmem:[%s12276_s24 + $0xe9] sm:$0xff] }
 0x1b4   : > { %8943 = vmatprep.mubr.msk.f32.mxu0 %vm12041_vm0, %v12039_v0  ;;  %v415_v40 = vld [vmem:[%s12276_s24 + $0x127] sm:$0xff]  ;;  %9242 = vmatmul.mubr.f32.gmra.mrb[32].mxu1 %v12725_v38 }
 0x1b5   : > { %9244 = vmatprep.mubr.msk.f32.mxu1 %vm12041_vm0, %v12039_v0 }
 0x1b6   : > { %v12665_v45 = vpop.f32.mrb[36].mxu0 }
 0x1b7   : > { %v8754_v46 = vpop.f32.mrb[37].mxu0  ;;  %8944 = vmatmul.mubr.f32.gmra.mrb[142].mxu0 %v409_v44 }
 0x1b8   : > { %8946 = vmatprep.mubr.msk.f32.mxu0 %vm12041_vm0, %v12039_v0 }
 0x1ba   : > { %v12676_v52 = vpop.f32.mrb[38].mxu0 }
 0x1bb   : > { %v8757_v54 = vpop.f32.mrb[39].mxu0  ;;  %8947 = vmatmul.mubr.f32.gmra.mrb[144].mxu0 %v410_v50  ;;  %v12736_v50 = vld [vmem:[%s12276_s24 + $0xf1] sm:$0xff] }
 0x1bc   : > { %8949 = vmatprep.mubr.msk.f32.mxu0 %vm12041_vm0, %v12039_v0  ;;  %v416_v54 = vld [vmem:[%s12276_s24 + $0x12f] sm:$0xff]  ;;  %9245 = vmatmul.mubr.f32.gmra.mrb[34].mxu1 %v12736_v50 }
 0x1bd   : > { %9247 = vmatprep.mubr.msk.f32.mxu1 %vm12041_vm0, %v12039_v0 }
 0x1be   : > { %v12687_v60 = vpop.f32.mrb[40].mxu0 }
 0x1bf   : > { %v8760_v62 = vpop.f32.mrb[41].mxu0  ;;  %8950 = vmatmul.mubr.f32.gmra.mrb[146].mxu0 %v411_v58 }
 0x1c0   : > { %8952 = vmatprep.mubr.msk.f32.mxu0 %vm12041_vm0, %v12039_v0 }
 0x1c2   : > { %v12698_v8 = vpop.f32.mrb[42].mxu0 }
 0x1c3   : > { %v8763_v10 = vpop.f32.mrb[43].mxu0  ;;  %8953 = vmatmul.mubr.f32.gmra.mrb[148].mxu0 %v412_v5  ;;  %v12747_v5 = vld [vmem:[%s12276_s24 + $0xf9] sm:$0xff] }
 0x1c4   : > { %8955 = vmatprep.mubr.msk.f32.mxu0 %vm12041_vm0, %v12039_v0  ;;  %v12749_v10 = vld [vmem:[#allocation2] sm:$0xff]  ;;  %9248 = vmatmul.mubr.f32.gmra.mrb[36].mxu1 %v12747_v5 }
 0x1c5   : > { %9250 = vmatprep.mubr.msk.f32.mxu1 %vm12041_vm0, %v12749_v10 }
 0x1c6   : > { %v12709_v20 = vpop.f32.mrb[44].mxu0 }
 0x1c7   : > { %v8766_v22 = vpop.f32.mrb[45].mxu0  ;;  %8956 = vmatmul.mubr.f32.gmra.mrb[150].mxu0 %v413_v16  ;;  %v417_v16 = vld [vmem:[%s12276_s24 + $0x137] sm:$0xff] }
 0x1c8   : > { %8958 = vmatprep.mubr.msk.f32.mxu0 %vm12041_vm0, %v12039_v0 }
 0x1ca   : > { %v12720_v32 = vpop.f32.mrb[46].mxu0 }
 0x1cb   : > { %v8769_v34 = vpop.f32.mrb[47].mxu0  ;;  %8959 = vmatmul.mubr.f32.gmra.mrb[152].mxu0 %v414_v28  ;;  %v12760_v28 = vld [vmem:[%s12276_s24 + $0x101] sm:$0xff] }
 0x1cc   : > { %8961 = vmatprep.mubr.msk.f32.mxu0 %vm12041_vm0, %v12039_v0  ;;  %v418_v34 = vld [vmem:[%s12276_s24 + $0x13f] sm:$0xff]  ;;  %9251 = vmatmul.mubr.f32.gmra.mrb[38].mxu1 %v12760_v28 }
 0x1cd   : > { %9253 = vmatprep.mubr.msk.f32.mxu1 %vm12041_vm0, %v12749_v10 }
 0x1ce   : > { %v12731_v44 = vpop.f32.mrb[48].mxu0 }
 0x1cf   : > { %v8772_v46 = vpop.f32.mrb[49].mxu0  ;;  %8962 = vmatmul.mubr.f32.gmra.mrb[154].mxu0 %v415_v40 }
 0x1d0   : > { %8964 = vmatprep.mubr.msk.f32.mxu0 %vm12041_vm0, %v12039_v0 }
 0x1d2   : > { %v12742_v58 = vpop.f32.mrb[50].mxu0 }
 0x1d3   : > { %v8775_v62 = vpop.f32.mrb[51].mxu0  ;;  %8965 = vmatmul.mubr.f32.gmra.mrb[156].mxu0 %v416_v54  ;;  %v12771_v54 = vld [vmem:[%s12276_s24 + $0x109] sm:$0xff] }
 0x1d4   : > { %8967 = vmatprep.mubr.msk.f32.mxu0 %vm12041_vm0, %v12749_v10  ;;  %v419_v62 = vld [vmem:[%s12276_s24 + $0x147] sm:$0xf]  ;;  %9254 = vmatmul.mubr.f32.gmra.mrb[40].mxu1 %v12771_v54 }
 0x1d5   : > { %9256 = vmatprep.mubr.msk.f32.mxu1 %vm12041_vm0, %v12749_v10 }
 0x1d6   : > { %v12755_v22 = vpop.f32.mrb[52].mxu0 }
 0x1d7   : > { %15289 = vst [vmem:[#allocation13_spill] sm:$0xff] %v12755_v22  ;;  %v8778_v0 = vpop.f32.mrb[53].mxu0  ;;  %8968 = vmatmul.mubr.f32.gmra.mrb[158].mxu0 %v417_v16 }
 0x1d8   : > { %8970 = vmatprep.mubr.msk.f32.mxu0 %vm12041_vm0, %v12749_v10  ;;  %9257 = vmatmul.mubr.f32.gmra.mrb[42].mxu1 %v12782_v1 }
 0x1d9   : > { %9259 = vmatprep.mubr.msk.f32.mxu1 %vm12041_vm0, %v12749_v10 }
 0x1da   : > { %v12766_v40 = vpop.f32.mrb[54].mxu0 }
 0x1db   : > { %15290 = vst [vmem:[#allocation14_spill] sm:$0xff] %v12766_v40  ;;  %v8781_v46 = vpop.f32.mrb[55].mxu0  ;;  %8971 = vmatmul.mubr.f32.gmra.mrb[160].mxu0 %v418_v34  ;;  %v1034_v34 = vld [vmem:[%s12276_s24 + $0x9] sm:$0xff]  ;;  %v12793_v40 = vld [vmem:[%s12276_s24 + $0x119] sm:$0xff] }
 0x1dc   : > { %8973 = vmatprep.mubr.msk.f32.mxu0 %vm12041_vm0, %v12749_v10  ;;  %9260 = vmatmul.mubr.f32.gmra.mrb[44].mxu1 %v12793_v40 }
 0x1dd   : > { %9262 = vmatprep.mubr.msk.f32.mxu1 %vm12041_vm0, %v12749_v10 }
 0x1de   : > { %v12777_v16 = vpop.f32.mrb[56].mxu0 }
 0x1df   : > { %15291 = vst [vmem:[#allocation15_spill] sm:$0xff] %v12777_v16  ;;  %v8784_v0 = vpop.f32.mrb[57].mxu0  ;;  %8974 = vmatmul.mubr.f32.gmra.mrb[162].mxu0 %v419_v62  ;;  %v1035_v62 = vld [vmem:[%s12276_s24 + $0x11] sm:$0xff] }
 0x1e0   : > { %9008 = vmatprep.mubr.msk.f32.mxu0 %vm12041_vm0, %v12749_v10  ;;  %v15293_v0 = vmov 0.0|0.0  }
 0x1e2   : > { %v12788_v46 = vpop.f32.mrb[58].mxu0 }
 0x1e3   : > { %15292 = vst [vmem:[#allocation16_spill] sm:$0xff] %v12788_v46  ;;  %v8787_v16 = vpop.f32.mrb[59].mxu0  ;;  %9009 = vmatmul.mubr.f32.vlgmr.msra.gmra.mrb[164].mxu0 %v1034_v34  ;;  %v12806_v34 = vld [vmem:[%s12276_s24 + $0x121] sm:$0xff] }
 0x1e4   : > { %10995 = vmatpush3.bf16.msra.mxu0 %v12473_v4  ;;  %9011 = vmatprep.mubr.msk.f32.mxu0 %vm12041_vm0, %v12749_v10  ;;  %v12811_v4 = vld [vmem:[%s12276_s24 + $0x19] sm:$0xff] }
 0x1e5   : > { %10996 = vmatprep.subr.bf16.mxu0 %v15293_v0  ;;  %15295 = vst [vmem:[#allocation18_spill] sm:$0xff] %v12811_v4  ;;  %9263 = vmatmul.mubr.f32.gmra.mrb[46].mxu1 %v12806_v34 }
 0x1e6   : > { %v12801_v46 = vpop.f32.mrb[60].mxu0  ;;  %9265 = vmatprep.mubr.msk.f32.mxu1 %vm12041_vm0, %v12749_v10 }
 0x1e7   : > { %15294 = vst [vmem:[#allocation17_spill] sm:$0xff] %v12801_v46  ;;  %v8790_v16 = vpop.f32.mrb[61].mxu0  ;;  %9012 = vmatmul.mubr.f32.gmra.mrb[166].mxu0 %v1035_v62 }
 0x1e8   : > { %9014 = vmatprep.mubr.msk.f32.mxu0 %vm12041_vm0, %v12749_v10  ;;  %10998 = vmatpush3.bf16.msra.mxu0 %v12488_v12  ;;  %v12822_v16 = vld [vmem:[%s12276_s24 + $0x129] sm:$0xff]  ;;  %v12827_v12 = vld [vmem:[%s12276_s24 + $0x21] sm:$0xff] }
 0x1e9   : > { %10999 = vmatprep.subr.bf16.mxu0 %v15293_v0  ;;  %15297 = vst [vmem:[#allocation20_spill] sm:$0xff] %v12827_v12  ;;  %9266 = vmatmul.mubr.f32.gmra.mrb[48].mxu1 %v12822_v16 }
 0x1ea   : > { %v12816_v46 = vpop.f32.mrb[62].mxu0  ;;  %9268 = vmatprep.mubr.msk.f32.mxu1 %vm12041_vm0, %v12749_v10 }
 0x1eb   : > { %15296 = vst [vmem:[#allocation19_spill] sm:$0xff] %v12816_v46  ;;  %v8793_v62 = vpop.f32.mrb[63].mxu0  ;;  %9015 = vmatmul.mubr.f32.gmra.mrb[168].mxu0 %v12811_v4  ;;  %v12838_v4 = vld [vmem:[%s12276_s24 + $0x131] sm:$0xff] }
 0x1ec   : > { %9017 = vmatprep.mubr.msk.f32.mxu0 %vm12041_vm0, %v12749_v10  ;;  %11001 = vmatpush3.bf16.msra.mxu0 %v12497_v18  ;;  %15299 = vst [vmem:[#allocation22_spill] sm:$0xff] %v12838_v4  ;;  %v12843_v18 = vld [vmem:[%s12276_s24 + $0x29] sm:$0xff] }
 0x1ed   : > { %11002 = vmatprep.subr.bf16.mxu0 %v15293_v0  ;;  %15300 = vst [vmem:[#allocation23_spill] sm:$0xff] %v12843_v18  ;;  %9269 = vmatmul.mubr.f32.gmra.mrb[50].mxu1 %v12838_v4 }
 0x1ee   : > { %v12832_v46 = vpop.f32.mrb[64].mxu0  ;;  %9271 = vmatprep.mubr.msk.f32.mxu1 %vm12041_vm0, %v12749_v10 }
 0x1ef   : > { %15298 = vst [vmem:[#allocation21_spill] sm:$0xff] %v12832_v46  ;;  %v8796_v62 = vpop.f32.mrb[65].mxu0  ;;  %9018 = vmatmul.mubr.f32.gmra.mrb[170].mxu0 %v12827_v12  ;;  %v12854_v12 = vld [vmem:[%s12276_s24 + $0x139] sm:$0xff] }
 0x1f0   : > { %9020 = vmatprep.mubr.msk.f32.mxu0 %vm12041_vm0, %v12749_v10  ;;  %11004 = vmatpush3.bf16.msra.mxu0 %v12506_v24  ;;  %15302 = vst [vmem:[#allocation25_spill] sm:$0xff] %v12854_v12  ;;  %v12859_v24 = vld [vmem:[%s12276_s24 + $0x31] sm:$0xff] }
 0x1f1   : > { %11005 = vmatprep.subr.bf16.mxu0 %v15293_v0  ;;  %15303 = vst [vmem:[#allocation26_spill] sm:$0xff] %v12859_v24  ;;  %9272 = vmatmul.mubr.f32.gmra.mrb[52].mxu1 %v12854_v12  ;;  %v12889_v12 = vld [vmem:[%s12276_s24 + $0x41] sm:$0xff] }
 0x1f2   : > { %v12848_v46 = vpop.f32.mrb[66].mxu0  ;;  %9274 = vmatprep.mubr.msk.f32.mxu1 %vm12041_vm0, %v12749_v10  ;;  %15308 = vst [vmem:[#allocation31_spill] sm:$0xff] %v12889_v12 }
 0x1f3   : > { %15301 = vst [vmem:[#allocation24_spill] sm:$0xff] %v12848_v46  ;;  %v8799_v62 = vpop.f32.mrb[67].mxu0  ;;  %9021 = vmatmul.mubr.f32.gmra.mrb[172].mxu0 %v12843_v18  ;;  %v12870_v18 = vld [vmem:[%s12276_s24 + $0x141] sm:$0xff] }
 0x1f4   : > { %9023 = vmatprep.mubr.msk.f32.mxu0 %vm12041_vm0, %v12749_v10  ;;  %11007 = vmatpush3.bf16.msra.mxu0 %v12515_v30  ;;  %15305 = vst [vmem:[#allocation28_spill] sm:$0xff] %v12870_v18  ;;  %v12875_v30 = vld [vmem:[%s12276_s24 + $0x39] sm:$0xff] }
 0x1f5   : > { %11008 = vmatprep.subr.bf16.mxu0 %v15293_v0  ;;  %15306 = vst [vmem:[#allocation29_spill] sm:$0xff] %v12875_v30  ;;  %9275 = vmatmul.mubr.f32.gmra.mrb[54].mxu1 %v12870_v18 }
 0x1f6   : > { %v12864_v46 = vpop.f32.mrb[68].mxu0  ;;  %9277 = vmatprep.mubr.msk.f32.mxu1 %vm12041_vm0, %v12749_v10 }
 0x1f7   : > { %15304 = vst [vmem:[#allocation27_spill] sm:$0xff] %v12864_v46  ;;  %v8802_v62 = vpop.f32.mrb[69].mxu0  ;;  %9024 = vmatmul.mubr.f32.gmra.mrb[174].mxu0 %v12859_v24  ;;  %v1441_v24 = vld [vmem:[%s12276_s24 + $0x149] sm:$0xff] }
 0x1f8   : > { %9026 = vmatprep.mubr.msk.f32.mxu0 %vm12041_vm0, %v12749_v10  ;;  %11010 = vmatpush3.bf16.msra.mxu0 %v12524_v36 }
 0x1f9   : > { %11011 = vmatprep.subr.bf16.mxu0 %v15293_v0  ;;  %9278 = vmatmul.mubr.f32.gmra.mrb[56].mxu1 %v1441_v24 }
 0x1fa   : > { %v12880_v46 = vpop.f32.mrb[70].mxu0  ;;  %9280 = vmatprep.mubr.msk.f32.mxu1 %vm12041_vm0, %v12749_v10 }
 0x1fb   : > { %15307 = vst [vmem:[#allocation30_spill] sm:$0xff] %v12880_v46  ;;  %v8805_v62 = vpop.f32.mrb[71].mxu0  ;;  %9027 = vmatmul.mubr.f32.gmra.mrb[176].mxu0 %v12875_v30  ;;  %v1442_v46 = vld [vmem:[%s12276_s24 + $0x151] sm:$0xff]  ;;  %v12902_v30 = vld [vmem:[%s12276_s24 + $0x49] sm:$0xff] }
 0x1fc   : > { %9029 = vmatprep.mubr.msk.f32.mxu0 %vm12041_vm0, %v12749_v10  ;;  %11013 = vmatpush3.bf16.msra.mxu0 %v12533_v42  ;;  %15310 = vst [vmem:[#allocation33_spill] sm:$0xff] %v12902_v30 }
 0x1fd   : > { %11014 = vmatprep.subr.bf16.mxu0 %v15293_v0  ;;  %9281 = vmatmul.mubr.f32.gmra.mrb[58].mxu1 %v1442_v46 }
 0x1fe   : > { %v12893_v36 = vpop.f32.mrb[72].mxu0  ;;  %9283 = vmatprep.mubr.msk.f32.mxu1 %vm12041_vm0, %v12749_v10 }
 0x1ff   : > { %15309 = vst [vmem:[#allocation32_spill] sm:$0xff] %v12893_v36  ;;  %v8808_v62 = vpop.f32.mrb[73].mxu0  ;;  %9030 = vmatmul.mubr.f32.gmra.mrb[178].mxu0 %v12889_v12  ;;  %v12915_v36 = vld [vmem:[%s12276_s24 + $0x51] sm:$0xff] }
 0x200   : > { %9032 = vmatprep.mubr.msk.f32.mxu0 %vm12041_vm0, %v12749_v10  ;;  %11016 = vmatpush3.bf16.msra.mxu0 %v12542_v48  ;;  %v1443_v62 = vld [vmem:[%s12276_s24 + $0x159] sm:$0xf]  ;;  %15312 = vst [vmem:[#allocation35_spill] sm:$0xff] %v12915_v36 }
 0x201   : > { %11017 = vmatprep.subr.bf16.mxu0 %v15293_v0  ;;  %9284 = vmatmul.mubr.f32.gmra.mrb[60].mxu1 %v1443_v62  ;;  %v12933_v62 = vld [vmem:[%s12276_s24 + $0x61] sm:$0xff] }
 0x202   : > { %v12906_v42 = vpop.f32.mrb[74].mxu0  ;;  %9473 = vmatprep.mubr.msk.f32.mxu1 %vm12041_vm0, %v12749_v10  ;;  %15316 = vst [vmem:[#allocation39_spill] sm:$0xff] %v12933_v62  ;;  %v2184_v12 = vld [vmem:[#allocation6 + $0x288] sm:$0xff] }
 0x203   : > { %15311 = vst [vmem:[#allocation34_spill] sm:$0xff] %v12906_v42  ;;  %v8811_v24 = vpop.f32.mrb[75].mxu0  ;;  %9033 = vmatmul.mubr.f32.gmra.mrb[180].mxu0 %v12902_v30 }
 0x204   : > { %9035 = vmatprep.mubr.msk.f32.mxu0 %vm12041_vm0, %v12749_v10  ;;  %v12925_v24 = vld [vmem:[%s12276_s24 + $0x59] sm:$0xff] }
 0x205   : > { %15314 = vst [vmem:[#allocation37_spill] sm:$0xff] %v12925_v24 }
 0x206   : > { %v12917_v48 = vpop.f32.mrb[76].mxu0 }
 0x207   : > { %15313 = vst [vmem:[#allocation36_spill] sm:$0xff] %v12917_v48  ;;  %v8814_v46 = vpop.f32.mrb[77].mxu0  ;;  %9036 = vmatmul.mubr.f32.gmra.mrb[182].mxu0 %v12915_v36  ;;  %v2183_v36 = vld [vmem:[#allocation6 + $0x280] sm:$0xff] }
 0x208   : > { %9038 = vmatprep.mubr.msk.f32.mxu0 %vm12041_vm0, %v12749_v10  ;;  %v11042_v18 = vpack.c.bf16 %v2184_v12, %v2183_v36 }
 0x20a   : > { %v12927_v42 = vpop.f32.mrb[78].mxu0  ;;  %11043 = vmatpush3.bf16.msra.mxu1 %v11042_v18 }
 0x20b   : > { %15315 = vst [vmem:[#allocation38_spill] sm:$0xff] %v12927_v42  ;;  %v8817_v30 = vpop.f32.mrb[79].mxu0  ;;  %9039 = vmatmul.mubr.f32.gmra.mrb[184].mxu0 %v12925_v24  ;;  %11044 = vmatprep.subr.bf16.mxu1 %v15293_v0 }
 0x20c   : > { %9041 = vmatprep.mubr.msk.f32.mxu0 %vm12041_vm0, %v12749_v10 }
 0x20e   : > { %v12935_v48 = vpop.f32.mrb[80].mxu0 }
 0x20f   : > { %15317 = vst [vmem:[#allocation40_spill] sm:$0xff] %v12935_v48  ;;  %v8820_v46 = vpop.f32.mrb[81].mxu0  ;;  %9042 = vmatmul.mubr.f32.gmra.mrb[186].mxu0 %v12933_v62  ;;  %v2185_v48 = vld [vmem:[#allocation6 + $0x290] sm:$0xff] }
 0x210   : > { %9044 = vmatprep.mubr.msk.f32.mxu0 %vm12041_vm0, %v12749_v10  ;;  %v2186_v46 = vld [vmem:[#allocation6 + $0x298] sm:$0xff] }
 0x211   : > { %v11045_v62 = vpack.c.bf16 %v2186_v46, %v2185_v48 }
 0x212   : > { %v830_v42 = vpop.f32.mrb[82].mxu0 }
 0x213   : > { %v12941_v30 = vadd.f32 %v830_v42, %v12483_v7  ;;  %v8855_v24 = vpop.f32.mrb[83].mxu0  ;;  %9045 = vmatmul.mubr.f32.gmra.mrb[188].mxu0 %v12548_v51  ;;  %11046 = vmatpush3.bf16.msra.mxu1 %v11045_v62  ;;  %v2187_v7 = vld [vmem:[#allocation6 + $0x2a0] sm:$0xff]  ;;  %v2188_v51 = vld [vmem:[#allocation6 + $0x2a8] sm:$0xff] }
 0x214   : > { %9047 = vmatprep.mubr.msk.f32.mxu0 %vm12041_vm0, %v12749_v10  ;;  %11047 = vmatprep.subr.bf16.mxu1 %v15293_v0  ;;  %v11048_v18 = vpack.c.bf16 %v2188_v51, %v2187_v7 }
 0x216   : > { %v835_v22 = vpop.f32.mrb[84].mxu0 }
 0x217   : > { %v12948_v4 = vadd.f32 %v835_v22, %v12490_v13  ;;  %v8858_v12 = vpop.f32.mrb[85].mxu0  ;;  %9048 = vmatmul.mubr.f32.gmra.mrb[190].mxu0 %v12560_v55  ;;  %11049 = vmatpush3.bf16.msra.mxu1 %v11048_v18  ;;  %v2189_v13 = vld [vmem:[#allocation6 + $0x2b0] sm:$0xff]  ;;  %v2190_v55 = vld [vmem:[#allocation6 + $0x2b8] sm:$0xff] }
 0x218   : > { %9050 = vmatprep.mubr.msk.f32.mxu0 %vm12041_vm0, %v12749_v10  ;;  %11050 = vmatprep.subr.bf16.mxu1 %v15293_v0  ;;  %v11051_v22 = vpack.c.bf16 %v2190_v55, %v2189_v13 }
 0x21a   : > { %v840_v36 = vpop.f32.mrb[86].mxu0 }
 0x21b   : > { %v12955_v42 = vadd.f32 %v840_v36, %v12499_v19  ;;  %v8861_v48 = vpop.f32.mrb[87].mxu0  ;;  %9051 = vmatmul.mubr.f32.gmra.mrb[192].mxu0 %v12571_v59  ;;  %11052 = vmatpush3.bf16.msra.mxu1 %v11051_v22  ;;  %v2191_v19 = vld [vmem:[#allocation6 + $0x2c0] sm:$0xff]  ;;  %v2192_v59 = vld [vmem:[#allocation6 + $0x2c8] sm:$0xff]  ;;  %v2194_v36 = vld [vmem:[#allocation6 + $0x2d8] sm:$0xff] }
 0x21c   : > { %9053 = vmatprep.mubr.msk.f32.mxu0 %vm12041_vm0, %v12749_v10  ;;  %11053 = vmatprep.subr.bf16.mxu1 %v15293_v0  ;;  %v11054_v12 = vpack.c.bf16 %v2192_v59, %v2191_v19  ;;  %v2196_v22 = vld [vmem:[#allocation6 + $0x2e8] sm:$0xff] }
 0x21e   : > { %v845_v24 = vpop.f32.mrb[88].mxu0 }
 0x21f   : > { %v12962_v62 = vadd.f32 %v845_v24, %v12508_v25  ;;  %v8864_v46 = vpop.f32.mrb[89].mxu0  ;;  %9054 = vmatmul.mubr.f32.gmra.mrb[194].mxu0 %v12582_v63  ;;  %11055 = vmatpush3.bf16.msra.mxu1 %v11054_v12  ;;  %v2193_v25 = vld [vmem:[#allocation6 + $0x2d0] sm:$0xff] }
 0x220   : > { %9056 = vmatprep.mubr.msk.f32.mxu0 %vm12041_vm0, %v12749_v10  ;;  %11056 = vmatprep.subr.bf16.mxu1 %v15293_v0  ;;  %v11057_v63 = vpack.c.bf16 %v2194_v36, %v2193_v25 }
 0x222   : > { %v850_v7 = vpop.f32.mrb[90].mxu0 }
 0x223   : > { %v12969_v51 = vadd.f32 %v850_v7, %v12517_v31  ;;  %v8867_v18 = vpop.f32.mrb[91].mxu0  ;;  %9057 = vmatmul.mubr.f32.gmra.mrb[196].mxu0 %v12593_v6  ;;  %11058 = vmatpush3.bf16.msra.mxu1 %v11057_v63  ;;  %v2195_v31 = vld [vmem:[#allocation6 + $0x2e0] sm:$0xff] }
 0x224   : > { %9059 = vmatprep.mubr.msk.f32.mxu0 %vm12041_vm0, %v12749_v10  ;;  %11059 = vmatprep.subr.bf16.mxu1 %v15293_v0  ;;  %v11060_v6 = vpack.c.bf16 %v2196_v22, %v2195_v31 }
 0x226   : > { %v855_v48 = vpop.f32.mrb[92].mxu0 }
 0x227   : > { %v12976_v13 = vadd.f32 %v855_v48, %v12526_v37  ;;  %v8870_v55 = vpop.f32.mrb[93].mxu0  ;;  %9060 = vmatmul.mubr.f32.gmra.mrb[198].mxu0 %v12604_v11  ;;  %11061 = vmatpush3.bf16.msra.mxu1 %v11060_v6  ;;  %v2197_v37 = vld [vmem:[#allocation6 + $0x2f0] sm:$0xff]  ;;  %v2198_v11 = vld [vmem:[#allocation6 + $0x2f8] sm:$0xff] }
 0x228   : > { %9062 = vmatprep.mubr.msk.f32.mxu0 %vm12041_vm0, %v12749_v10  ;;  %11062 = vmatprep.subr.bf16.mxu1 %v15293_v0  ;;  %v11063_v59 = vpack.c.bf16 %v2198_v11, %v2197_v37 }
 0x22a   : > { %v860_v24 = vpop.f32.mrb[94].mxu0 }
 0x22b   : > { %v12983_v46 = vadd.f32 %v860_v24, %v12535_v43  ;;  %v8873_v19 = vpop.f32.mrb[95].mxu0  ;;  %9063 = vmatmul.mubr.f32.gmra.mrb[200].mxu0 %v12615_v17  ;;  %11064 = vmatpush3.bf16.msra.mxu1 %v11063_v59  ;;  %v2141_v43 = vld [vmem:[%s12276_s24 + $0x1b] sm:$0xff] }
 0x22c   : > { %9065 = vmatprep.mubr.msk.f32.mxu0 %vm12041_vm0, %v12749_v10  ;;  %11089 = vmatprep.subr.bf16.mxu1 %v15293_v0 }
 0x22e   : > { %v865_v12 = vpop.f32.mrb[96].mxu0  ;;  %9474 = vmatmul.mubr.f32.vlgmr.msra.gmra.mrb[62].mxu1 %v2141_v43 }
 0x22f   : > { %v12990_v7 = vadd.f32 %v865_v12, %v12544_v49  ;;  %v8876_v18 = vpop.f32.mrb[97].mxu0  ;;  %9066 = vmatmul.mubr.f32.gmra.mrb[202].mxu0 %v12626_v23  ;;  %9476 = vmatprep.mubr.msk.f32.mxu1 %vm12041_vm0, %v12749_v10  ;;  %v2142_v49 = vld [vmem:[%s12276_s24 + $0x23] sm:$0xff] }
 0x230   : > { %9068 = vmatprep.mubr.msk.f32.mxu0 %vm12041_vm0, %v12749_v10 }
 0x232   : > { %v870_v17 = vpop.f32.mrb[98].mxu0  ;;  %9477 = vmatmul.mubr.f32.gmra.mrb[64].mxu1 %v2142_v49 }
 0x233   : > { %v12998_v25 = vadd.f32 %v870_v17, %v12555_v53  ;;  %v8879_v36 = vpop.f32.mrb[99].mxu0  ;;  %9069 = vmatmul.mubr.f32.gmra.mrb[204].mxu0 %v12637_v29  ;;  %9479 = vmatprep.mubr.msk.f32.mxu1 %vm12041_vm0, %v12749_v10  ;;  %v2143_v53 = vld [vmem:[%s12276_s24 + $0x2b] sm:$0xff] }
 0x234   : > { %9071 = vmatprep.mubr.msk.f32.mxu0 %vm12041_vm0, %v12749_v10 }
 0x236   : > { %v875_v23 = vpop.f32.mrb[100].mxu0  ;;  %9480 = vmatmul.mubr.f32.gmra.mrb[66].mxu1 %v2143_v53 }
 0x237   : > { %v13007_v63 = vadd.f32 %v875_v23, %v12566_v57  ;;  %v8882_v48 = vpop.f32.mrb[101].mxu0  ;;  %9072 = vmatmul.mubr.f32.gmra.mrb[206].mxu0 %v12648_v35  ;;  %9482 = vmatprep.mubr.msk.f32.mxu1 %vm12041_vm0, %v12749_v10  ;;  %v2144_v57 = vld [vmem:[%s12276_s24 + $0x33] sm:$0xff] }
 0x238   : > { %9074 = vmatprep.mubr.msk.f32.mxu0 %vm12041_vm0, %v12749_v10 }
 0x23a   : > { %v880_v29 = vpop.f32.mrb[102].mxu0  ;;  %9483 = vmatmul.mubr.f32.gmra.mrb[68].mxu1 %v2144_v57 }
 0x23b   : > { %v13016_v55 = vadd.f32 %v880_v29, %v12577_v61  ;;  %v8885_v31 = vpop.f32.mrb[103].mxu0  ;;  %9075 = vmatmul.mubr.f32.gmra.mrb[208].mxu0 %v12659_v41  ;;  %9485 = vmatprep.mubr.msk.f32.mxu1 %vm12041_vm0, %v12749_v10  ;;  %v2145_v61 = vld [vmem:[%s12276_s24 + $0x3b] sm:$0xff] }
 0x23c   : > { %9077 = vmatprep.mubr.msk.f32.mxu0 %vm12041_vm0, %v12749_v10 }
 0x23e   : > { %v885_v35 = vpop.f32.mrb[104].mxu0  ;;  %9486 = vmatmul.mubr.f32.gmra.mrb[70].mxu1 %v2145_v61 }
 0x23f   : > { %v13025_v22 = vadd.f32 %v885_v35, %v12588_v3  ;;  %v8888_v6 = vpop.f32.mrb[105].mxu0  ;;  %9078 = vmatmul.mubr.f32.gmra.mrb[210].mxu0 %v12670_v47  ;;  %9488 = vmatprep.mubr.msk.f32.mxu1 %vm12041_vm0, %v12749_v10  ;;  %v2146_v3 = vld [vmem:[%s12276_s24 + $0x43] sm:$0xff] }
 0x240   : > { %9080 = vmatprep.mubr.msk.f32.mxu0 %vm12041_vm0, %v12749_v10 }
 0x242   : > { %v890_v41 = vpop.f32.mrb[106].mxu0  ;;  %9489 = vmatmul.mubr.f32.gmra.mrb[72].mxu1 %v2146_v3 }
 0x243   : > { %v13034_v24 = vadd.f32 %v890_v41, %v12599_v9  ;;  %v8891_v19 = vpop.f32.mrb[107].mxu0  ;;  %9081 = vmatmul.mubr.f32.gmra.mrb[212].mxu0 %v12681_v56  ;;  %9491 = vmatprep.mubr.msk.f32.mxu1 %vm12041_vm0, %v12749_v10  ;;  %v2147_v9 = vld [vmem:[%s12276_s24 + $0x4b] sm:$0xff] }
 0x244   : > { %9083 = vmatprep.mubr.msk.f32.mxu0 %vm12041_vm0, %v12749_v10 }
 0x246   : > { %v895_v47 = vpop.f32.mrb[108].mxu0  ;;  %9492 = vmatmul.mubr.f32.gmra.mrb[74].mxu1 %v2147_v9 }
 0x247   : > { %v13043_v37 = vadd.f32 %v895_v47, %v12610_v15  ;;  %v8894_v11 = vpop.f32.mrb[109].mxu0  ;;  %9084 = vmatmul.mubr.f32.gmra.mrb[214].mxu0 %v12692_v2  ;;  %9494 = vmatprep.mubr.msk.f32.mxu1 %vm12041_vm0, %v12749_v10  ;;  %v2148_v15 = vld [vmem:[%s12276_s24 + $0x53] sm:$0xff] }
 0x248   : > { %9086 = vmatprep.mubr.msk.f32.mxu0 %vm12041_vm0, %v12749_v10 }
 0x24a   : > { %v900_v56 = vpop.f32.mrb[110].mxu0  ;;  %9495 = vmatmul.mubr.f32.gmra.mrb[76].mxu1 %v2148_v15 }
 0x24b   : > { %v13052_v59 = vadd.f32 %v900_v56, %v12621_v21  ;;  %v8897_v12 = vpop.f32.mrb[111].mxu0  ;;  %9087 = vmatmul.mubr.f32.gmra.mrb[216].mxu0 %v12703_v14  ;;  %9497 = vmatprep.mubr.msk.f32.mxu1 %vm12041_vm0, %v12749_v10  ;;  %v2149_v21 = vld [vmem:[%s12276_s24 + $0x5b] sm:$0xff] }
 0x24c   : > { %9089 = vmatprep.mubr.msk.f32.mxu0 %vm12041_vm0, %v12749_v10  ;;  %v2156_v12 = vld [vmem:[%s12276_s24 + $0x93] sm:$0xff] }
 0x24e   : > { %v905_v2 = vpop.f32.mrb[112].mxu0  ;;  %9498 = vmatmul.mubr.f32.gmra.mrb[78].mxu1 %v2149_v21  ;;  %v2157_v21 = vld [vmem:[%s12276_s24 + $0x9b] sm:$0xff] }
 0x24f   : > { %v13061_v18 = vadd.f32 %v905_v2, %v12632_v27  ;;  %v8900_v43 = vpop.f32.mrb[113].mxu0  ;;  %9090 = vmatmul.mubr.f32.gmra.mrb[218].mxu0 %v12714_v26  ;;  %9500 = vmatprep.mubr.msk.f32.mxu1 %vm12041_vm0, %v12749_v10  ;;  %v2150_v27 = vld [vmem:[%s12276_s24 + $0x63] sm:$0xff] }
 0x250   : > { %9092 = vmatprep.mubr.msk.f32.mxu0 %vm12041_vm0, %v12749_v10 }
 0x252   : > { %v910_v14 = vpop.f32.mrb[114].mxu0  ;;  %9501 = vmatmul.mubr.f32.gmra.mrb[80].mxu1 %v2150_v27 }
 0x253   : > { %v13070_v17 = vadd.f32 %v910_v14, %v12643_v33  ;;  %v8903_v36 = vpop.f32.mrb[115].mxu0  ;;  %9093 = vmatmul.mubr.f32.gmra.mrb[220].mxu0 %v12725_v38  ;;  %9503 = vmatprep.mubr.msk.f32.mxu1 %vm12041_vm0, %v12749_v10  ;;  %v2151_v33 = vld [vmem:[%s12276_s24 + $0x6b] sm:$0xff] }
 0x254   : > { %9095 = vmatprep.mubr.msk.f32.mxu0 %vm12041_vm0, %v12749_v10 }
 0x256   : > { %v915_v26 = vpop.f32.mrb[116].mxu0  ;;  %9504 = vmatmul.mubr.f32.gmra.mrb[82].mxu1 %v2151_v33 }
 0x257   : > { %v13079_v49 = vadd.f32 %v915_v26, %v12654_v39  ;;  %v8906_v23 = vpop.f32.mrb[117].mxu0  ;;  %9096 = vmatmul.mubr.f32.gmra.mrb[222].mxu0 %v12736_v50  ;;  %9506 = vmatprep.mubr.msk.f32.mxu1 %vm12041_vm0, %v12749_v10  ;;  %v2152_v39 = vld [vmem:[%s12276_s24 + $0x73] sm:$0xff]  ;;  %v2158_v26 = vld [vmem:[%s12276_s24 + $0xa3] sm:$0xff] }
 0x258   : > { %9098 = vmatprep.mubr.msk.f32.mxu0 %vm12041_vm0, %v12749_v10 }
 0x25a   : > { %v920_v38 = vpop.f32.mrb[118].mxu0  ;;  %9507 = vmatmul.mubr.f32.gmra.mrb[84].mxu1 %v2152_v39  ;;  %v2159_v39 = vld [vmem:[%s12276_s24 + $0xab] sm:$0xff] }
 0x25b   : > { %v13088_v48 = vadd.f32 %v920_v38, %v12665_v45  ;;  %v8909_v53 = vpop.f32.mrb[119].mxu0  ;;  %9099 = vmatmul.mubr.f32.gmra.mrb[224].mxu0 %v12747_v5  ;;  %9509 = vmatprep.mubr.msk.f32.mxu1 %vm12041_vm0, %v12749_v10  ;;  %v2153_v45 = vld [vmem:[%s12276_s24 + $0x7b] sm:$0xff]  ;;  %v13105_v5 = vpop.f32.mrb[0].mxu1 }
 0x25c   : > { %9101 = vmatprep.mubr.msk.f32.mxu0 %vm12041_vm0, %v12749_v10  ;;  %v9195_v57 = vpop.f32.mrb[1].mxu1  ;;  %v15318_v53 = vld [vmem:[#allocation22_spill] sm:$0xff] }
 0x25d   : > { %v13116_v61 = vpop.f32.mrb[2].mxu1 }
 0x25e   : > { %v925_v50 = vpop.f32.mrb[120].mxu0  ;;  %9510 = vmatmul.mubr.f32.gmra.mrb[86].mxu1 %v2153_v45  ;;  %v9198_v41 = vpop.f32.mrb[3].mxu1  ;;  %v15319_v45 = vld [vmem:[#allocation13_spill] sm:$0xff] }
 0x25f   : > { %v13097_v29 = vadd.f32 %v925_v50, %v12676_v52  ;;  %v8912_v31 = vpop.f32.mrb[121].mxu0  ;;  %9102 = vmatmul.mubr.f32.gmra.mrb[226].mxu0 %v12760_v28  ;;  %9512 = vmatprep.mubr.msk.f32.mxu1 %vm12041_vm0, %v12749_v10  ;;  %v2154_v28 = vld [vmem:[%s12276_s24 + $0x83] sm:$0xff]  ;;  %v13127_v47 = vpop.f32.mrb[4].mxu1 }
 0x260   : > { %9104 = vmatprep.mubr.msk.f32.mxu0 %vm12041_vm0, %v12749_v10  ;;  %v9201_v11 = vpop.f32.mrb[5].mxu1 }
 0x262   : > { %v930_v35 = vpop.f32.mrb[122].mxu0  ;;  %9513 = vmatmul.mubr.f32.gmra.mrb[88].mxu1 %v2154_v28  ;;  %v2160_v28 = vld [vmem:[%s12276_s24 + $0xb3] sm:$0xff] }
 0x263   : > { %v13108_v6 = vadd.f32 %v930_v35, %v12687_v60  ;;  %v8915_v52 = vpop.f32.mrb[123].mxu0  ;;  %9105 = vmatmul.mubr.f32.gmra.mrb[228].mxu0 %v12771_v54  ;;  %9515 = vmatprep.mubr.msk.f32.mxu1 %vm12041_vm0, %v12749_v10  ;;  %v2155_v54 = vld [vmem:[%s12276_s24 + $0x8b] sm:$0xff] }
 0x264   : > { %9107 = vmatprep.mubr.msk.f32.mxu0 %vm12041_vm0, %v12749_v10  ;;  %v15320_v35 = vld [vmem:[#allocation25_spill] sm:$0xff] }
 0x266   : > { %v935_v19 = vpop.f32.mrb[124].mxu0  ;;  %9516 = vmatmul.mubr.f32.gmra.mrb[90].mxu1 %v2155_v54 }
 0x267   : > { %v13119_v3 = vadd.f32 %v935_v19, %v12698_v8  ;;  %v8918_v60 = vpop.f32.mrb[125].mxu0  ;;  %9108 = vmatmul.mubr.f32.gmra.mrb[230].mxu0 %v12782_v1  ;;  %9518 = vmatprep.mubr.msk.f32.mxu1 %vm12041_vm0, %v12749_v10  ;;  %v13137_v1 = vpop.f32.mrb[6].mxu1 }
 0x268   : > { %9110 = vmatprep.mubr.msk.f32.mxu0 %vm12041_vm0, %v12749_v10  ;;  %v9204_v15 = vpop.f32.mrb[7].mxu1  ;;  %v15321_v60 = vld [vmem:[#allocation14_spill] sm:$0xff] }
 0x269   : > { %v2161_v15 = vld [vmem:[%s12276_s24 + $0xbb] sm:$0xff] }
 0x26a   : > { %v940_v9 = vpop.f32.mrb[126].mxu0  ;;  %9519 = vmatmul.mubr.f32.gmra.mrb[92].mxu1 %v2156_v12 }
 0x26b   : > { %v13130_v56 = vadd.f32 %v940_v9, %v12709_v20  ;;  %v8921_v8 = vpop.f32.mrb[127].mxu0  ;;  %9111 = vmatmul.mubr.f32.gmra.mrb[232].mxu0 %v12793_v40  ;;  %9521 = vmatprep.mubr.msk.f32.mxu1 %vm12041_vm0, %v12749_v10  ;;  %v13148_v40 = vpop.f32.mrb[8].mxu1  ;;  %v15322_v9 = vld [vmem:[#allocation28_spill] sm:$0xff] }
 0x26c   : > { %9113 = vmatprep.mubr.msk.f32.mxu0 %vm12041_vm0, %v12749_v10  ;;  %v9207_v14 = vpop.f32.mrb[9].mxu1  ;;  %v1074_v8 = vld [vmem:[%s12276_s24 + $0x149] sm:$0xf] }
 0x26e   : > { %v945_v2 = vpop.f32.mrb[128].mxu0  ;;  %9522 = vmatmul.mubr.f32.gmra.mrb[94].mxu1 %v2157_v21 }
 0x26f   : > { %v13141_v43 = vadd.f32 %v945_v2, %v12720_v32  ;;  %v8924_v20 = vpop.f32.mrb[129].mxu0  ;;  %9114 = vmatmul.mubr.f32.gmra.mrb[234].mxu0 %v12806_v34  ;;  %9524 = vmatprep.mubr.msk.f32.mxu1 %vm12041_vm0, %v12749_v10  ;;  %v13159_v34 = vpop.f32.mrb[10].mxu1  ;;  %v1814_v2 = vld [vmem:[#allocation6 + $0x200] sm:$0xff] }
 0x270   : > { %9116 = vmatprep.mubr.msk.f32.mxu0 %vm12041_vm0, %v12749_v10  ;;  %v9210_v23 = vpop.f32.mrb[11].mxu1  ;;  %v1815_v20 = vld [vmem:[#allocation6 + $0x208] sm:$0xff] }
 0x271   : > { %v11018_v23 = vpack.c.bf16 %v1815_v20, %v1814_v2  ;;  %v15328_v2 = vld [vmem:[#allocation17_spill] sm:$0xff] }
 0x272   : > { %v950_v36 = vpop.f32.mrb[130].mxu0  ;;  %9525 = vmatmul.mubr.f32.gmra.mrb[96].mxu1 %v2158_v26 }
 0x273   : > { %v13152_v27 = vadd.f32 %v950_v36, %v12731_v44  ;;  %v8927_v32 = vpop.f32.mrb[131].mxu0  ;;  %9117 = vmatmul.mubr.f32.gmra.mrb[236].mxu0 %v12822_v16  ;;  %9527 = vmatprep.mubr.msk.f32.mxu1 %vm12041_vm0, %v12749_v10  ;;  %v13170_v16 = vpop.f32.mrb[12].mxu1  ;;  %v15323_v36 = vld [vmem:[#allocation15_spill] sm:$0xff] }
 0x274   : > { %9119 = vmatprep.mubr.msk.f32.mxu0 %vm12041_vm0, %v12749_v10  ;;  %v9213_v50 = vpop.f32.mrb[13].mxu1 }
 0x275   : > { %v13181_v52 = vpop.f32.mrb[14].mxu1 }
 0x276   : > { %v955_v33 = vpop.f32.mrb[132].mxu0  ;;  %9528 = vmatmul.mubr.f32.gmra.mrb[98].mxu1 %v2159_v39  ;;  %v9216_v41 = vpop.f32.mrb[15].mxu1  ;;  %v1817_v39 = vld [vmem:[#allocation6 + $0x218] sm:$0xff] }
 0x277   : > { %v13163_v38 = vadd.f32 %v955_v33, %v12742_v58  ;;  %v8930_v44 = vpop.f32.mrb[133].mxu0  ;;  %9120 = vmatmul.mubr.f32.gmra.mrb[238].mxu0 %v15318_v53  ;;  %9530 = vmatprep.mubr.msk.f32.mxu1 %vm12041_vm0, %v12749_v10  ;;  %v13193_v12 = vpop.f32.mrb[16].mxu1  ;;  %v1816_v53 = vld [vmem:[#allocation6 + $0x210] sm:$0xff] }
 0x278   : > { %9122 = vmatprep.mubr.msk.f32.mxu0 %vm12041_vm0, %v12749_v10  ;;  %v9219_v21 = vpop.f32.mrb[17].mxu1  ;;  %v2162_v44 = vld [vmem:[%s12276_s24 + $0xc3] sm:$0xff]  ;;  %v11021_v41 = vpack.c.bf16 %v1817_v39, %v1816_v53 }
 0x279   : > { %v13203_v33 = vpop.f32.mrb[18].mxu1  ;;  %v1821_v53 = vld [vmem:[#allocation6 + $0x238] sm:$0xff] }
 0x27a   : > { %v960_v31 = vpop.f32.mrb[134].mxu0  ;;  %9531 = vmatmul.mubr.f32.gmra.mrb[100].mxu1 %v2160_v28  ;;  %v9222_v50 = vpop.f32.mrb[19].mxu1  ;;  %v15327_v28 = vld [vmem:[#allocation18_spill] sm:$0xff] }
 0x27b   : > { %v13174_v58 = vadd.f32 %v960_v31, %v15319_v45  ;;  %v8933_v57 = vpop.f32.mrb[135].mxu0  ;;  %9123 = vmatmul.mubr.f32.gmra.mrb[240].mxu0 %v15320_v35  ;;  %9533 = vmatprep.mubr.msk.f32.mxu1 %vm12041_vm0, %v12749_v10  ;;  %v15325_v45 = vld [vmem:[#allocation16_spill] sm:$0xff] }
 0x27c   : > { %9125 = vmatprep.mubr.msk.f32.mxu0 %vm12041_vm0, %v12749_v10 }
 0x27e   : > { %v965_v19 = vpop.f32.mrb[136].mxu0  ;;  %9534 = vmatmul.mubr.f32.gmra.mrb[102].mxu1 %v2161_v15 }
 0x27f   : > { %v13185_v54 = vadd.f32 %v965_v19, %v15321_v60  ;;  %v8936_v11 = vpop.f32.mrb[137].mxu0  ;;  %9126 = vmatmul.mubr.f32.gmra.mrb[242].mxu0 %v15322_v9  ;;  %9536 = vmatprep.mubr.msk.f32.mxu1 %vm12041_vm0, %v12749_v10  ;;  %v13214_v19 = vpop.f32.mrb[20].mxu1  ;;  %v2163_v60 = vld [vmem:[%s12276_s24 + $0xcb] sm:$0xff]  ;;  %v1819_v9 = vld [vmem:[#allocation6 + $0x228] sm:$0xff] }
 0x280   : > { %9128 = vmatprep.mubr.msk.f32.mxu0 %vm12041_vm0, %v12749_v10  ;;  %v1818_v11 = vld [vmem:[#allocation6 + $0x220] sm:$0xff] }
 0x282   : > { %v970_v14 = vpop.f32.mrb[138].mxu0  ;;  %9537 = vmatmul.mubr.f32.gmra.mrb[104].mxu1 %v2162_v44  ;;  %v1820_v44 = vld [vmem:[#allocation6 + $0x230] sm:$0xff] }
 0x283   : > { %v13197_v32 = vadd.f32 %v970_v14, %v15323_v36  ;;  %v8939_v26 = vpop.f32.mrb[139].mxu0  ;;  %9129 = vmatmul.mubr.f32.gmra.mrb[244].mxu0 %v1074_v8  ;;  %9539 = vmatprep.mubr.msk.f32.mxu1 %vm12041_vm0, %v12749_v10  ;;  %v9225_v8 = vpop.f32.mrb[21].mxu1  ;;  %v15330_v14 = vld [vmem:[#allocation20_spill] sm:$0xff]  ;;  %v11024_v36 = vpack.c.bf16 %v1819_v9, %v1818_v11  ;;  %v2165_v11 = vld [vmem:[%s12276_s24 + $0xdb] sm:$0xff] }
 0x284   : > { %9163 = vmatprep.mubr.msk.f32.mxu0 %vm12041_vm0, %v12749_v10  ;;  %v13226_v26 = vpop.f32.mrb[22].mxu1  ;;  %v1822_v9 = vld [vmem:[#allocation6 + $0x240] sm:$0xff]  ;;  %v1823_v8 = vld [vmem:[#allocation6 + $0x248] sm:$0xff] }
 0x285   : > { %15324 = vst [vmem:[#allocation22_spill] sm:$0xff] %v13197_v32  ;;  %v9228_v39 = vpop.f32.mrb[23].mxu1 }
 0x286   : > { %v975_v31 = vpop.f32.mrb[140].mxu0  ;;  %9540 = vmatmul.mubr.f32.gmra.mrb[106].mxu1 %v2163_v60  ;;  %v13238_v60 = vpop.f32.mrb[24].mxu1  ;;  %v15336_v39 = vld [vmem:[#allocation26_spill] sm:$0xff] }
 0x287   : > { %v13207_v57 = vadd.f32 %v975_v31, %v15325_v45  ;;  %v8942_v35 = vpop.f32.mrb[141].mxu0  ;;  %9164 = vmatmul.mubr.f32.vlgmr.msra.gmra.mrb[246].mxu0 %v15327_v28  ;;  %9542 = vmatprep.mubr.msk.f32.mxu1 %vm12041_vm0, %v12749_v10  ;;  %v15331_v31 = vld [vmem:[#allocation19_spill] sm:$0xff] }
 0x288   : > { %11019 = vmatpush3.bf16.msra.mxu0 %v11018_v23  ;;  %9166 = vmatprep.mubr.msk.f32.mxu0 %vm12041_vm0, %v12749_v10  ;;  %v2164_v23 = vld [vmem:[%s12276_s24 + $0xd3] sm:$0xff]  ;;  %v15333_v28 = vld [vmem:[#allocation23_spill] sm:$0xff] }
 0x289   : > { %15326 = vst [vmem:[#allocation13_spill] sm:$0xff] %v13207_v57  ;;  %11020 = vmatprep.subr.bf16.mxu0 %v15293_v0 }
 0x28a   : > { %v980_v15 = vpop.f32.mrb[142].mxu0  ;;  %9543 = vmatmul.mubr.f32.gmra.mrb[108].mxu1 %v2164_v23 }
 0x28b   : > { %v13219_v20 = vadd.f32 %v980_v15, %v15328_v2  ;;  %v8945_v21 = vpop.f32.mrb[143].mxu0  ;;  %9167 = vmatmul.mubr.f32.gmra.mrb[248].mxu0 %v15330_v14  ;;  %9545 = vmatprep.mubr.msk.f32.mxu1 %vm12041_vm0, %v12749_v10  ;;  %v9231_v15 = vpop.f32.mrb[25].mxu1 }
 0x28c   : > { %11022 = vmatpush3.bf16.msra.mxu0 %v11021_v41  ;;  %9169 = vmatprep.mubr.msk.f32.mxu0 %vm12041_vm0, %v12749_v10  ;;  %v11027_v41 = vpack.c.bf16 %v1821_v53, %v1820_v44  ;;  %v15334_v21 = vld [vmem:[#allocation21_spill] sm:$0xff]  ;;  %v13250_v44 = vpop.f32.mrb[26].mxu1  ;;  %v2166_v53 = vld [vmem:[%s12276_s24 + $0xe3] sm:$0xff] }
 0x28d   : > { %15329 = vst [vmem:[#allocation25_spill] sm:$0xff] %v13219_v20  ;;  %11023 = vmatprep.subr.bf16.mxu0 %v15293_v0  ;;  %v2555_v20 = vld [vmem:[#allocation6 + $0x318] sm:$0xff] }
 0x28e   : > { %v985_v50 = vpop.f32.mrb[144].mxu0  ;;  %9546 = vmatmul.mubr.f32.gmra.mrb[110].mxu1 %v2165_v11  ;;  %v15337_v11 = vld [vmem:[#allocation24_spill] sm:$0xff] }
 0x28f   : > { %v13231_v45 = vadd.f32 %v985_v50, %v15331_v31  ;;  %v8948_v35 = vpop.f32.mrb[145].mxu0  ;;  %9170 = vmatmul.mubr.f32.gmra.mrb[250].mxu0 %v15333_v28  ;;  %9548 = vmatprep.mubr.msk.f32.mxu1 %vm12041_vm0, %v12749_v10  ;;  %v1824_v50 = vld [vmem:[#allocation6 + $0x250] sm:$0xff]  ;;  %v1825_v31 = vld [vmem:[#allocation6 + $0x258] sm:$0xff] }
 0x290   : > { %9172 = vmatprep.mubr.msk.f32.mxu0 %vm12041_vm0, %v12749_v10  ;;  %11025 = vmatpush3.bf16.msra.mxu0 %v11024_v36  ;;  %v11030_v36 = vpack.c.bf16 %v1823_v8, %v1822_v9  ;;  %v9234_v35 = vpop.f32.mrb[27].mxu1  ;;  %v2167_v8 = vld [vmem:[%s12276_s24 + $0xeb] sm:$0xff] }
 0x291   : > { %15332 = vst [vmem:[#allocation14_spill] sm:$0xff] %v13231_v45  ;;  %11026 = vmatprep.subr.bf16.mxu0 %v15293_v0  ;;  %v13262_v9 = vpop.f32.mrb[28].mxu1 }
 0x292   : > { %v990_v2 = vpop.f32.mrb[146].mxu0  ;;  %9549 = vmatmul.mubr.f32.gmra.mrb[112].mxu1 %v2166_v53  ;;  %v9237_v53 = vpop.f32.mrb[29].mxu1 }
 0x293   : > { %v13243_v14 = vadd.f32 %v990_v2, %v15334_v21  ;;  %v8951_v23 = vpop.f32.mrb[147].mxu0  ;;  %9173 = vmatmul.mubr.f32.gmra.mrb[252].mxu0 %v15336_v39  ;;  %v15339_v21 = vld [vmem:[#allocation29_spill] sm:$0xff]  ;;  %9551 = vmatprep.mubr.msk.f32.mxu1 %vm12041_vm0, %v12749_v10  ;;  %v1827_v39 = vld [vmem:[#allocation6 + $0x268] sm:$0xff]  ;;  %v1829_v53 = vld [vmem:[#allocation6 + $0x278] sm:$0xff] }
 0x294   : > { %9175 = vmatprep.mubr.msk.f32.mxu0 %vm12041_vm0, %v12749_v10  ;;  %11028 = vmatpush3.bf16.msra.mxu0 %v11027_v41  ;;  %v11033_v41 = vpack.c.bf16 %v1825_v31, %v1824_v50  ;;  %v1826_v23 = vld [vmem:[#allocation6 + $0x260] sm:$0xff]  ;;  %v13274_v50 = vpop.f32.mrb[30].mxu1 }
 0x295   : > { %15335 = vst [vmem:[#allocation28_spill] sm:$0xff] %v13243_v14  ;;  %11029 = vmatprep.subr.bf16.mxu0 %v15293_v0  ;;  %v2168_v31 = vld [vmem:[%s12276_s24 + $0xf3] sm:$0xff] }
 0x296   : > { %v995_v28 = vpop.f32.mrb[148].mxu0  ;;  %9552 = vmatmul.mubr.f32.gmra.mrb[114].mxu1 %v2167_v8  ;;  %v1828_v8 = vld [vmem:[#allocation6 + $0x270] sm:$0xff] }
 0x297   : > { %v13255_v15 = vadd.f32 %v995_v28, %v15337_v11  ;;  %v8954_v2 = vpop.f32.mrb[149].mxu0  ;;  %9176 = vmatmul.mubr.f32.gmra.mrb[254].mxu0 %v15339_v21  ;;  %v15340_v28 = vld [vmem:[#allocation27_spill] sm:$0xff]  ;;  %9554 = vmatprep.mubr.msk.f32.mxu1 %vm12041_vm0, %v12749_v10 }
 0x298   : > { %9178 = vmatprep.mubr.msk.f32.mxu0 %vm12041_vm0, %v12749_v10  ;;  %11031 = vmatpush3.bf16.msra.mxu0 %v11030_v36  ;;  %v15342_v21 = vld [vmem:[#allocation31_spill] sm:$0xff]  ;;  %v11036_v36 = vpack.c.bf16 %v1827_v39, %v1826_v23 }
 0x299   : > { %15338 = vst [vmem:[#allocation15_spill] sm:$0xff] %v13255_v15  ;;  %11032 = vmatprep.subr.bf16.mxu0 %v15293_v0  ;;  %v15345_v15 = vld [vmem:[#allocation33_spill] sm:$0xff] }
 0x29a   : > { %v1000_v35 = vpop.f32.mrb[150].mxu0  ;;  %9555 = vmatmul.mubr.f32.gmra.mrb[116].mxu1 %v2168_v31  ;;  %v2169_v39 = vld [vmem:[%s12276_s24 + $0xfb] sm:$0xff] }
 0x29b   : > { %v13267_v11 = vadd.f32 %v1000_v35, %v15340_v28  ;;  %v8957_v2 = vpop.f32.mrb[151].mxu0  ;;  %9179 = vmatmul.mubr.f32.gmra.mrb[0].mxu0 %v15342_v21  ;;  %v9240_v35 = vpop.f32.mrb[31].mxu1  ;;  %9557 = vmatprep.mubr.msk.f32.mxu1 %vm12041_vm0, %v12749_v10 }
 0x29c   : > { %9181 = vmatprep.mubr.msk.f32.mxu0 %vm12041_vm0, %v12749_v10  ;;  %11034 = vmatpush3.bf16.msra.mxu0 %v11033_v41  ;;  %v15343_v2 = vld [vmem:[#allocation30_spill] sm:$0xff]  ;;  %v11039_v41 = vpack.c.bf16 %v1829_v53, %v1828_v8  ;;  %v13286_v23 = vpop.f32.mrb[32].mxu1 }
 0x29d   : > { %15341 = vst [vmem:[#allocation16_spill] sm:$0xff] %v13267_v11  ;;  %11035 = vmatprep.subr.bf16.mxu0 %v15293_v0  ;;  %v9243_v31 = vpop.f32.mrb[33].mxu1 }
 0x29e   : > { %v1005_v28 = vpop.f32.mrb[152].mxu0  ;;  %9558 = vmatmul.mubr.f32.gmra.mrb[118].mxu1 %v2169_v39  ;;  %v15349_v39 = vld [vmem:[#allocation34_spill] sm:$0xff] }
 0x29f   : > { %v13279_v21 = vadd.f32 %v1005_v28, %v15343_v2  ;;  %v8960_v11 = vpop.f32.mrb[153].mxu0  ;;  %9182 = vmatmul.mubr.f32.gmra.mrb[2].mxu0 %v15345_v15  ;;  %v15348_v2 = vld [vmem:[#allocation35_spill] sm:$0xff] }
 0x2a0   : > { %9184 = vmatprep.mubr.msk.f32.mxu0 %vm12041_vm0, %v12749_v10  ;;  %11037 = vmatpush3.bf16.msra.mxu0 %v11036_v36  ;;  %v15346_v11 = vld [vmem:[#allocation32_spill] sm:$0xff]  ;;  %v13300_v10 = vpop.f32.mrb[34].mxu1 }
 0x2a1   : > { %15344 = vst [vmem:[#allocation18_spill] sm:$0xff] %v13279_v21  ;;  %11038 = vmatprep.subr.bf16.mxu0 %v15293_v0  ;;  %v13294_v21 = vld [vmem:[#allocation2] sm:$0xff]  ;;  %v9246_v8 = vpop.f32.mrb[35].mxu1 }
 0x2a2   : > { %v1010_v35 = vpop.f32.mrb[154].mxu0  ;;  %9560 = vmatprep.mubr.msk.f32.mxu1 %vm12041_vm0, %v13294_v21  ;;  %v2170_v36 = vld [vmem:[%s12276_s24 + $0x103] sm:$0xff] }
 0x2a3   : > { %v13291_v28 = vadd.f32 %v1010_v35, %v15346_v11  ;;  %v8963_v15 = vpop.f32.mrb[155].mxu0  ;;  %9185 = vmatmul.mubr.f32.gmra.mrb[4].mxu0 %v15348_v2  ;;  %9561 = vmatmul.mubr.f32.gmra.mrb[120].mxu1 %v2170_v36  ;;  %v15351_v11 = vld [vmem:[#allocation37_spill] sm:$0xff]  ;;  %v2553_v8 = vld [vmem:[#allocation6 + $0x308] sm:$0xff] }
 0x2a4   : > { %9187 = vmatprep.mubr.msk.f32.mxu0 %vm12041_vm0, %v13294_v21  ;;  %11040 = vmatpush3.bf16.msra.mxu0 %v11039_v41  ;;  %v13312_v41 = vpop.f32.mrb[36].mxu1  ;;  %v2171_v15 = vld [vmem:[%s12276_s24 + $0x10b] sm:$0xff] }
 0x2a5   : > { %15347 = vst [vmem:[#allocation17_spill] sm:$0xff] %v13291_v28  ;;  %11065 = vmatprep.subr.bf16.mxu0 %v15293_v0  ;;  %9563 = vmatprep.mubr.msk.f32.mxu1 %vm12041_vm0, %v13294_v21  ;;  %15352 = vst [vmem:[#allocation19_spill] sm:$0xff] %v13312_v41  ;;  %v2552_v2 = vld [vmem:[#allocation6 + $0x300] sm:$0xff]  ;;  %v9249_v36 = vpop.f32.mrb[37].mxu1 }
 0x2a6   : > { %v1015_v53 = vpop.f32.mrb[156].mxu0  ;;  %v11066_v14 = vpack.c.bf16 %v2553_v8, %v2552_v2  ;;  %v13324_v45 = vpop.f32.mrb[38].mxu1  ;;  %v2172_v36 = vld [vmem:[%s12276_s24 + $0x113] sm:$0xff]  ;;  %v1773_v2 = vld [vmem:[%s12276_s24 + $0x22] sm:$0xff] }
 0x2a7   : > { %v13305_v31 = vadd.f32 %v1015_v53, %v15349_v39  ;;  %v8966_v35 = vpop.f32.mrb[157].mxu0  ;;  %9188 = vmatmul.mubr.f32.gmra.mrb[6].mxu0 %v15351_v11  ;;  %9564 = vmatmul.mubr.f32.gmra.mrb[122].mxu1 %v2171_v15  ;;  %v15353_v53 = vld [vmem:[#allocation36_spill] sm:$0xff]  ;;  %v15355_v11 = vld [vmem:[#allocation39_spill] sm:$0xff]  ;;  %15356 = vst [vmem:[#allocation21_spill] sm:$0xff] %v13324_v45 }
 0x2a8   : > { %9190 = vmatprep.mubr.msk.f32.mxu0 %vm12041_vm0, %v13294_v21  ;;  %9566 = vmatprep.mubr.msk.f32.mxu1 %vm12041_vm0, %v13294_v21  ;;  %v2554_v15 = vld [vmem:[#allocation6 + $0x310] sm:$0xff] }
 0x2a9   : > { %15350 = vst [vmem:[#allocation20_spill] sm:$0xff] %v13305_v31  ;;  %v1772_v31 = vld [vmem:[%s12276_s24 + $0x1a] sm:$0xff]  ;;  %v11069_v8 = vpack.c.bf16 %v2555_v20, %v2554_v15 }
 0x2aa   : > { %v1020_v28 = vpop.f32.mrb[158].mxu0  ;;  %v2921_v20 = vld [vmem:[#allocation6 + $0x380] sm:$0xff]  ;;  %v2922_v15 = vld [vmem:[#allocation6 + $0x388] sm:$0xff] }
 0x2ab   : > { %v13316_v39 = vadd.f32 %v1020_v28, %v15353_v53  ;;  %v8969_v35 = vpop.f32.mrb[159].mxu0  ;;  %9191 = vmatmul.mubr.f32.gmra.mrb[8].mxu0 %v15355_v11  ;;  %v9252_v28 = vpop.f32.mrb[39].mxu1  ;;  %9567 = vmatmul.mubr.f32.gmra.mrb[124].mxu1 %v2172_v36  ;;  %v2556_v36 = vld [vmem:[#allocation6 + $0x320] sm:$0xff] }
 0x2ac   : > { %9318 = vmatprep.mubr.msk.f32.mxu0 %vm12041_vm0, %v13294_v21  ;;  %v15357_v35 = vld [vmem:[#allocation38_spill] sm:$0xff]  ;;  %9569 = vmatprep.mubr.msk.f32.mxu1 %vm12041_vm0, %v13294_v21  ;;  %v13335_v45 = vpop.f32.mrb[40].mxu1 }
 0x2ad   : > { %15354 = vst [vmem:[#allocation23_spill] sm:$0xff] %v13316_v39  ;;  %15359 = vst [vmem:[#allocation24_spill] sm:$0xff] %v13335_v45  ;;  %v2173_v28 = vld [vmem:[%s12276_s24 + $0x11b] sm:$0xff]  ;;  %v1774_v45 = vld [vmem:[%s12276_s24 + $0x2a] sm:$0xff] }
 0x2ae   : > { %v1025_v53 = vpop.f32.mrb[160].mxu0 }
 0x2af   : > { %v13328_v11 = vadd.f32 %v1025_v53, %v15357_v35  ;;  %v8972_v39 = vpop.f32.mrb[161].mxu0  ;;  %9319 = vmatmul.mubr.f32.vlgmr.msra.gmra.mrb[10].mxu0 %v1772_v31  ;;  %v2557_v53 = vld [vmem:[#allocation6 + $0x328] sm:$0xff]  ;;  %9570 = vmatmul.mubr.f32.gmra.mrb[126].mxu1 %v2173_v28  ;;  %v15360_v35 = vld [vmem:[#allocation40_spill] sm:$0xff] }
 0x2b0   : > { %11067 = vmatpush3.bf16.msra.mxu0 %v11066_v14  ;;  %9321 = vmatprep.mubr.msk.f32.mxu0 %vm12041_vm0, %v13294_v21  ;;  %v9255_v39 = vpop.f32.mrb[41].mxu1  ;;  %v11072_v57 = vpack.c.bf16 %v2557_v53, %v2556_v36  ;;  %v2174_v28 = vld [vmem:[%s12276_s24 + $0x123] sm:$0xff]  ;;  %v1775_v53 = vld [vmem:[%s12276_s24 + $0x32] sm:$0xff] }
 0x2b1   : > { %15358 = vst [vmem:[#allocation26_spill] sm:$0xff] %v13328_v11  ;;  %11068 = vmatprep.subr.bf16.mxu0 %v15293_v0  ;;  %9572 = vmatprep.mubr.msk.f32.mxu1 %vm12041_vm0, %v13294_v21  ;;  %v13347_v41 = vpop.f32.mrb[42].mxu1  ;;  %v11090_v39 = vpack.c.bf16 %v2922_v15, %v2921_v20  ;;  %v2924_v36 = vld [vmem:[#allocation6 + $0x398] sm:$0xff] }
 0x2b2   : > { %v1030_v31 = vpop.f32.mrb[162].mxu0  ;;  %15362 = vst [vmem:[#allocation27_spill] sm:$0xff] %v13347_v41  ;;  %v2175_v41 = vld [vmem:[%s12276_s24 + $0x12b] sm:$0xff] }
 0x2b3   : > { %v13340_v11 = vadd.f32 %v1030_v31, %v15360_v35  ;;  %v8975_v14 = vpop.f32.mrb[163].mxu0  ;;  %9322 = vmatmul.mubr.f32.gmra.mrb[12].mxu0 %v1773_v2  ;;  %v2558_v31 = vld [vmem:[#allocation6 + $0x330] sm:$0xff]  ;;  %v2559_v2 = vld [vmem:[#allocation6 + $0x338] sm:$0xff]  ;;  %v9258_v35 = vpop.f32.mrb[43].mxu1  ;;  %9573 = vmatmul.mubr.f32.gmra.mrb[128].mxu1 %v2174_v28  ;;  %v2561_v28 = vld [vmem:[#allocation6 + $0x348] sm:$0xff] }
 0x2b4   : > { %9324 = vmatprep.mubr.msk.f32.mxu0 %vm12041_vm0, %v13294_v21  ;;  %11070 = vmatpush3.bf16.msra.mxu0 %v11069_v8  ;;  %v2923_v8 = vld [vmem:[#allocation6 + $0x390] sm:$0xff]  ;;  %v11075_v20 = vpack.c.bf16 %v2559_v2, %v2558_v31  ;;  %v13357_v15 = vpop.f32.mrb[44].mxu1  ;;  %v2925_v31 = vld [vmem:[#allocation6 + $0x3a0] sm:$0xff]  ;;  %v2926_v2 = vld [vmem:[#allocation6 + $0x3a8] sm:$0xff] }
 0x2b5   : > { %15361 = vst [vmem:[#allocation29_spill] sm:$0xff] %v13340_v11  ;;  %11071 = vmatprep.subr.bf16.mxu0 %v15293_v0  ;;  %11091 = vmatpush3.bf16.msra.mxu1 %v11090_v39  ;;  %v11093_v35 = vpack.c.bf16 %v2924_v36, %v2923_v8 }
 0x2b6   : > { %v1158_v14 = vpop.f32.mrb[164].mxu0  ;;  %9575 = vmatprep.mubr.msk.f32.mxu1 %vm12041_vm0, %v13294_v21  ;;  %11092 = vmatprep.subr.bf16.mxu1 %v15293_v0 }
 0x2b7   : > { %v13352_v11 = vadd.f32 %v1158_v14, %v12941_v30  ;;  %v9010_v32 = vpop.f32.mrb[165].mxu0  ;;  %9325 = vmatmul.mubr.f32.gmra.mrb[14].mxu0 %v1774_v45  ;;  %v2560_v30 = vld [vmem:[#allocation6 + $0x340] sm:$0xff]  ;;  %9576 = vmatmul.mubr.f32.gmra.mrb[130].mxu1 %v2175_v41  ;;  %v11096_v41 = vpack.c.bf16 %v2926_v2, %v2925_v31  ;;  %v1777_v31 = vld [vmem:[%s12276_s24 + $0x42] sm:$0xff] }
 0x2b8   : > { %9327 = vmatprep.mubr.msk.f32.mxu0 %vm12041_vm0, %v13294_v21  ;;  %11073 = vmatpush3.bf16.msra.mxu0 %v11072_v57  ;;  %v9261_v32 = vpop.f32.mrb[45].mxu1  ;;  %v1776_v14 = vld [vmem:[%s12276_s24 + $0x3a] sm:$0xff]  ;;  %v11078_v8 = vpack.c.bf16 %v2561_v28, %v2560_v30 }
 0x2b9   : > { %11074 = vmatprep.subr.bf16.mxu0 %v15293_v0  ;;  %11094 = vmatpush3.bf16.msra.mxu1 %v11093_v35  ;;  %v13370_v36 = vpop.f32.mrb[46].mxu1  ;;  %v2176_v32 = vld [vmem:[%s12276_s24 + $0x133] sm:$0xff]  ;;  %v2927_v28 = vld [vmem:[#allocation6 + $0x3b0] sm:$0xff] }
 0x2ba   : > { %v1163_v45 = vpop.f32.mrb[166].mxu0  ;;  %9578 = vmatprep.mubr.msk.f32.mxu1 %vm12041_vm0, %v13294_v21  ;;  %11095 = vmatprep.subr.bf16.mxu1 %v15293_v0 }
 0x2bb   : > { %v13365_v57 = vadd.f32 %v1163_v45, %v12948_v4  ;;  %v9013_v39 = vpop.f32.mrb[167].mxu0  ;;  %9328 = vmatmul.mubr.f32.gmra.mrb[16].mxu0 %v1775_v53  ;;  %v2562_v4 = vld [vmem:[#allocation6 + $0x350] sm:$0xff]  ;;  %v2563_v45 = vld [vmem:[#allocation6 + $0x358] sm:$0xff]  ;;  %v9264_v53 = vpop.f32.mrb[47].mxu1  ;;  %9579 = vmatmul.mubr.f32.gmra.mrb[132].mxu1 %v2176_v32 }
 0x2bc   : > { %9330 = vmatprep.mubr.msk.f32.mxu0 %vm12041_vm0, %v13294_v21  ;;  %11076 = vmatpush3.bf16.msra.mxu0 %v11075_v20  ;;  %v2928_v39 = vld [vmem:[#allocation6 + $0x3b8] sm:$0xff]  ;;  %v11081_v2 = vpack.c.bf16 %v2563_v45, %v2562_v4  ;;  %v2177_v53 = vld [vmem:[%s12276_s24 + $0x13b] sm:$0xff] }
 0x2bd   : > { %15363 = vst [vmem:[#allocation31_spill] sm:$0xff] %v13365_v57  ;;  %11077 = vmatprep.subr.bf16.mxu0 %v15293_v0  ;;  %11097 = vmatpush3.bf16.msra.mxu1 %v11096_v41  ;;  %v13383_v57 = vpop.f32.mrb[48].mxu1  ;;  %v11099_v32 = vpack.c.bf16 %v2928_v39, %v2927_v28  ;;  %v2929_v45 = vld [vmem:[#allocation6 + $0x3c0] sm:$0xff] }
 0x2be   : > { %v1168_v35 = vpop.f32.mrb[168].mxu0  ;;  %9581 = vmatprep.mubr.msk.f32.mxu1 %vm12041_vm0, %v13294_v21  ;;  %11098 = vmatprep.subr.bf16.mxu1 %v15293_v0  ;;  %v1778_v28 = vld [vmem:[%s12276_s24 + $0x4a] sm:$0xff] }
 0x2bf   : > { %v13378_v20 = vadd.f32 %v1168_v35, %v12955_v42  ;;  %v9016_v30 = vpop.f32.mrb[169].mxu0  ;;  %9331 = vmatmul.mubr.f32.gmra.mrb[18].mxu0 %v1776_v14  ;;  %v2564_v42 = vld [vmem:[#allocation6 + $0x360] sm:$0xff]  ;;  %v2565_v35 = vld [vmem:[#allocation6 + $0x368] sm:$0xff]  ;;  %v9267_v14 = vpop.f32.mrb[49].mxu1  ;;  %9582 = vmatmul.mubr.f32.gmra.mrb[134].mxu1 %v2177_v53 }
 0x2c0   : > { %9333 = vmatprep.mubr.msk.f32.mxu0 %vm12041_vm0, %v13294_v21  ;;  %11079 = vmatpush3.bf16.msra.mxu0 %v11078_v8  ;;  %v2930_v30 = vld [vmem:[#allocation6 + $0x3c8] sm:$0xff]  ;;  %v11084_v39 = vpack.c.bf16 %v2565_v35, %v2564_v42  ;;  %v2931_v35 = vld [vmem:[#allocation6 + $0x3d0] sm:$0xff] }
 0x2c1   : > { %15364 = vst [vmem:[#allocation30_spill] sm:$0xff] %v13378_v20  ;;  %11080 = vmatprep.subr.bf16.mxu0 %v15293_v0  ;;  %11100 = vmatpush3.bf16.msra.mxu1 %v11099_v32  ;;  %v13396_v20 = vpop.f32.mrb[50].mxu1  ;;  %v2178_v14 = vld [vmem:[%s12276_s24 + $0x143] sm:$0xff]  ;;  %v11102_v53 = vpack.c.bf16 %v2930_v30, %v2929_v45  ;;  %v1779_v45 = vld [vmem:[%s12276_s24 + $0x52] sm:$0xff] }
 0x2c2   : > { %v1173_v41 = vpop.f32.mrb[170].mxu0  ;;  %9584 = vmatprep.mubr.msk.f32.mxu1 %vm12041_vm0, %v13294_v21  ;;  %11101 = vmatprep.subr.bf16.mxu1 %v15293_v0 }
 0x2c3   : > { %v13391_v8 = vadd.f32 %v1173_v41, %v12962_v62  ;;  %v9019_v4 = vpop.f32.mrb[171].mxu0  ;;  %9334 = vmatmul.mubr.f32.gmra.mrb[20].mxu0 %v1777_v31  ;;  %v2566_v62 = vld [vmem:[#allocation6 + $0x370] sm:$0xff]  ;;  %v2567_v41 = vld [vmem:[#allocation6 + $0x378] sm:$0xff]  ;;  %v9270_v31 = vpop.f32.mrb[51].mxu1  ;;  %9585 = vmatmul.mubr.f32.gmra.mrb[136].mxu1 %v2178_v14 }
 0x2c4   : > { %9336 = vmatprep.mubr.msk.f32.mxu0 %vm12041_vm0, %v13294_v21  ;;  %11082 = vmatpush3.bf16.msra.mxu0 %v11081_v2  ;;  %v2932_v4 = vld [vmem:[#allocation6 + $0x3d8] sm:$0xff]  ;;  %v11087_v30 = vpack.c.bf16 %v2567_v41, %v2566_v62  ;;  %v2933_v62 = vld [vmem:[#allocation6 + $0x3e0] sm:$0xff]  ;;  %v2934_v41 = vld [vmem:[#allocation6 + $0x3e8] sm:$0xff] }
 0x2c5   : > { %15365 = vst [vmem:[#allocation33_spill] sm:$0xff] %v13391_v8  ;;  %11083 = vmatprep.subr.bf16.mxu0 %v15293_v0  ;;  %11103 = vmatpush3.bf16.msra.mxu1 %v11102_v53  ;;  %v13409_v8 = vpop.f32.mrb[52].mxu1  ;;  %v2179_v14 = vld [vmem:[%s12276_s24 + $0x14b] sm:$0xff]  ;;  %v11105_v31 = vpack.c.bf16 %v2932_v4, %v2931_v35  ;;  %v2180_v35 = vld [vmem:[%s12276_s24 + $0x153] sm:$0xff]  ;;  %v11108_v4 = vpack.c.bf16 %v2934_v41, %v2933_v62  ;;  %v2181_v62 = vld [vmem:[%s12276_s24 + $0x15b] sm:$0xf] }
 0x2c6   : > { %v1178_v32 = vpop.f32.mrb[172].mxu0  ;;  %9587 = vmatprep.mubr.msk.f32.mxu1 %vm12041_vm0, %v13294_v21  ;;  %11104 = vmatprep.subr.bf16.mxu1 %v15293_v0 }
 0x2c7   : > { %v13404_v2 = vadd.f32 %v1178_v32, %v12969_v51  ;;  %v9022_v42 = vpop.f32.mrb[173].mxu0  ;;  %9337 = vmatmul.mubr.f32.gmra.mrb[22].mxu0 %v1778_v28  ;;  %v9273_v51 = vpop.f32.mrb[53].mxu1  ;;  %9588 = vmatmul.mubr.f32.gmra.mrb[138].mxu1 %v2179_v14  ;;  %v1780_v32 = vld [vmem:[%s12276_s24 + $0x5a] sm:$0xff] }
 0x2c8   : > { %9339 = vmatprep.mubr.msk.f32.mxu0 %vm12041_vm0, %v13294_v21  ;;  %11085 = vmatpush3.bf16.msra.mxu0 %v11084_v39  ;;  %v13422_v42 = vpop.f32.mrb[54].mxu1  ;;  %v2936_v51 = vld [vmem:[#allocation6 + $0x3f8] sm:$0xff] }
 0x2c9   : > { %11086 = vmatprep.subr.bf16.mxu0 %v15293_v0  ;;  %11106 = vmatpush3.bf16.msra.mxu1 %v11105_v31  ;;  %v2935_v31 = vld [vmem:[#allocation6 + $0x3f0] sm:$0xff] }
 0x2ca   : > { %v1183_v28 = vpop.f32.mrb[174].mxu0  ;;  %9590 = vmatprep.mubr.msk.f32.mxu1 %vm12041_vm0, %v13294_v21  ;;  %11107 = vmatprep.subr.bf16.mxu1 %v15293_v0  ;;  %v11111_v41 = vpack.c.bf16 %v2936_v51, %v2935_v31 }
 0x2cb   : > { %v13417_v53 = vadd.f32 %v1183_v28, %v12976_v13  ;;  %v9025_v39 = vpop.f32.mrb[175].mxu0  ;;  %9340 = vmatmul.mubr.f32.gmra.mrb[24].mxu0 %v1779_v45  ;;  %v9276_v13 = vpop.f32.mrb[55].mxu1  ;;  %9591 = vmatmul.mubr.f32.gmra.mrb[140].mxu1 %v2180_v35  ;;  %v1781_v28 = vld [vmem:[%s12276_s24 + $0x62] sm:$0xff] }
 0x2cc   : > { %9342 = vmatprep.mubr.msk.f32.mxu0 %vm12041_vm0, %v13294_v21  ;;  %11088 = vmatpush3.bf16.msra.mxu0 %v11087_v30  ;;  %v13435_v39 = vpop.f32.mrb[56].mxu1  ;;  %v1782_v13 = vld [vmem:[%s12276_s24 + $0x6a] sm:$0xff] }
 0x2cd   : > { %11113 = vmatprep.subr.bf16.mxu0 %v15293_v0  ;;  %11109 = vmatpush3.bf16.msra.mxu1 %v11108_v4 }
 0x2ce   : > { %v1188_v45 = vpop.f32.mrb[176].mxu0  ;;  %9593 = vmatprep.mubr.msk.f32.mxu1 %vm12041_vm0, %v13294_v21  ;;  %11110 = vmatprep.subr.bf16.mxu1 %v15293_v0 }
 0x2cf   : > { %v13430_v14 = vadd.f32 %v1188_v45, %v12983_v46  ;;  %v9028_v30 = vpop.f32.mrb[177].mxu0  ;;  %9343 = vmatmul.mubr.f32.gmra.mrb[26].mxu0 %v1780_v32  ;;  %v9279_v46 = vpop.f32.mrb[57].mxu1  ;;  %9594 = vmatmul.mubr.f32.gmra.mrb[142].mxu1 %v2181_v62  ;;  %v1783_v62 = vld [vmem:[%s12276_s24 + $0x72] sm:$0xff] }
 0x2d0   : > { %9345 = vmatprep.mubr.msk.f32.mxu0 %vm12041_vm0, %v13294_v21  ;;  %v13447_v45 = vpop.f32.mrb[58].mxu1  ;;  %9783 = vmatprep.mubr.msk.f32.mxu1 %vm12041_vm0, %v13294_v21  ;;  %v2879_v30 = vld [vmem:[%s12276_s24 + $0x2c] sm:$0xff]  ;;  %v2880_v46 = vld [vmem:[%s12276_s24 + $0x34] sm:$0xff] }
 0x2d1   : > { %11112 = vmatpush3.bf16.msra.mxu1 %v11111_v41  ;;  %v9282_v31 = vpop.f32.mrb[59].mxu1 }
 0x2d2   : > { %v1193_v32 = vpop.f32.mrb[178].mxu0  ;;  %v1784_v31 = vld [vmem:[%s12276_s24 + $0x7a] sm:$0xff] }
 0x2d3   : > { %v13442_v35 = vadd.f32 %v1193_v32, %v12990_v7  ;;  %v9031_v4 = vpop.f32.mrb[179].mxu0  ;;  %9346 = vmatmul.mubr.f32.gmra.mrb[28].mxu0 %v1781_v28 }
 0x2d4   : > { %9348 = vmatprep.mubr.msk.f32.mxu0 %vm12041_vm0, %v13294_v21  ;;  %9784 = vmatmul.mubr.f32.vlgmr.msra.gmra.mrb[144].mxu1 %v2879_v30  ;;  %v13460_v41 = vpop.f32.mrb[60].mxu1 }
 0x2d5   : > { %9786 = vmatprep.mubr.msk.f32.mxu1 %vm12041_vm0, %v13294_v21  ;;  %v9285_v32 = vpop.f32.mrb[61].mxu1 }
 0x2d6   : > { %v1198_v51 = vpop.f32.mrb[180].mxu0 }
 0x2d7   : > { %v13453_v7 = vadd.f32 %v1198_v51, %v12998_v25  ;;  %v9034_v28 = vpop.f32.mrb[181].mxu0  ;;  %9349 = vmatmul.mubr.f32.gmra.mrb[30].mxu0 %v1782_v13  ;;  %v2881_v13 = vld [vmem:[%s12276_s24 + $0x3c] sm:$0xff] }
 0x2d8   : > { %9351 = vmatprep.mubr.msk.f32.mxu0 %vm12041_vm0, %v13294_v21  ;;  %9787 = vmatmul.mubr.f32.gmra.mrb[146].mxu1 %v2880_v46 }
 0x2d9   : > { %9789 = vmatprep.mubr.msk.f32.mxu1 %vm12041_vm0, %v13294_v21 }
 0x2da   : > { %v1203_v4 = vpop.f32.mrb[182].mxu0 }
 0x2db   : > { %v13464_v25 = vadd.f32 %v1203_v4, %v13007_v63  ;;  %v9037_v30 = vpop.f32.mrb[183].mxu0  ;;  %9352 = vmatmul.mubr.f32.gmra.mrb[32].mxu0 %v1783_v62  ;;  %v2882_v63 = vld [vmem:[%s12276_s24 + $0x44] sm:$0xff] }
 0x2dc   : > { %9354 = vmatprep.mubr.msk.f32.mxu0 %vm12041_vm0, %v13294_v21  ;;  %9790 = vmatmul.mubr.f32.gmra.mrb[148].mxu1 %v2881_v13  ;;  %v1785_v62 = vld [vmem:[%s12276_s24 + $0x82] sm:$0xff]  ;;  %v2883_v13 = vld [vmem:[%s12276_s24 + $0x4c] sm:$0xff] }
 0x2dd   : > { %9792 = vmatprep.mubr.msk.f32.mxu1 %vm12041_vm0, %v13294_v21 }
 0x2de   : > { %v1208_v51 = vpop.f32.mrb[184].mxu0 }
 0x2df   : > { %v1372_v28 = vadd.f32 %v1208_v51, %v13016_v55  ;;  %v9040_v46 = vpop.f32.mrb[185].mxu0  ;;  %9355 = vmatmul.mubr.f32.gmra.mrb[34].mxu0 %v1784_v31  ;;  %v1786_v31 = vld [vmem:[%s12276_s24 + $0x8a] sm:$0xff] }
 0x2e0   : > { %9357 = vmatprep.mubr.msk.f32.mxu0 %vm12041_vm0, %v13294_v21  ;;  %9793 = vmatmul.mubr.f32.gmra.mrb[150].mxu1 %v2882_v63  ;;  %v2884_v46 = vld [vmem:[%s12276_s24 + $0x54] sm:$0xff] }
 0x2e1   : > { %v13480_v32 = vadd.f32 %v13105_v5, %v1372_v28  ;;  %9795 = vmatprep.mubr.msk.f32.mxu1 %vm12041_vm0, %v13294_v21  ;;  %v1787_v63 = vld [vmem:[%s12276_s24 + $0x92] sm:$0xff] }
 0x2e2   : > { %v1213_v4 = vpop.f32.mrb[186].mxu0 }
 0x2e3   : > { %v1373_v30 = vadd.f32 %v1213_v4, %v13025_v22  ;;  %v9043_v55 = vpop.f32.mrb[187].mxu0  ;;  %9358 = vmatmul.mubr.f32.gmra.mrb[36].mxu0 %v1785_v62 }
 0x2e4   : > { %9360 = vmatprep.mubr.msk.f32.mxu0 %vm12041_vm0, %v13294_v21  ;;  %9796 = vmatmul.mubr.f32.gmra.mrb[152].mxu1 %v2883_v13  ;;  %v1788_v55 = vld [vmem:[%s12276_s24 + $0x9a] sm:$0xff] }
 0x2e5   : > { %v13490_v51 = vadd.f32 %v13116_v61, %v1373_v30  ;;  %9798 = vmatprep.mubr.msk.f32.mxu1 %vm12041_vm0, %v13294_v21  ;;  %v2885_v30 = vld [vmem:[%s12276_s24 + $0x5c] sm:$0xff] }
 0x2e6   : > { %v1218_v5 = vpop.f32.mrb[188].mxu0 }
 0x2e7   : > { %v1374_v28 = vadd.f32 %v1218_v5, %v13034_v24  ;;  %v9046_v22 = vpop.f32.mrb[189].mxu0  ;;  %9361 = vmatmul.mubr.f32.gmra.mrb[38].mxu0 %v1786_v31 }
 0x2e8   : > { %9363 = vmatprep.mubr.msk.f32.mxu0 %vm12041_vm0, %v13294_v21  ;;  %9799 = vmatmul.mubr.f32.gmra.mrb[154].mxu1 %v2884_v46 }
 0x2e9   : > { %v13500_v62 = vadd.f32 %v13127_v47, %v1374_v28  ;;  %9801 = vmatprep.mubr.msk.f32.mxu1 %vm12041_vm0, %v13294_v21  ;;  %v1789_v28 = vld [vmem:[%s12276_s24 + $0xa2] sm:$0xff] }
 0x2ea   : > { %v1223_v61 = vpop.f32.mrb[190].mxu0 }
 0x2eb   : > { %v9049_v4 = vpop.f32.mrb[191].mxu0  ;;  %9364 = vmatmul.mubr.f32.gmra.mrb[40].mxu0 %v1787_v63  ;;  %v1375_v24 = vadd.f32 %v1223_v61, %v13043_v37  ;;  %v2886_v37 = vld [vmem:[%s12276_s24 + $0x64] sm:$0xff] }
 0x2ec   : > { %9366 = vmatprep.mubr.msk.f32.mxu0 %vm12041_vm0, %v13294_v21  ;;  %9802 = vmatmul.mubr.f32.gmra.mrb[156].mxu1 %v2885_v30  ;;  %v1790_v61 = vld [vmem:[%s12276_s24 + $0xaa] sm:$0xff] }
 0x2ed   : > { %v13510_v13 = vadd.f32 %v13137_v1, %v1375_v24  ;;  %9804 = vmatprep.mubr.msk.f32.mxu1 %vm12041_vm0, %v13294_v21 }
 0x2ee   : > { %v1228_v47 = vpop.f32.mrb[192].mxu0 }
 0x2ef   : > { %v9052_v31 = vpop.f32.mrb[193].mxu0  ;;  %9367 = vmatmul.mubr.f32.gmra.mrb[42].mxu0 %v1788_v55  ;;  %v1376_v5 = vadd.f32 %v1228_v47, %v13052_v59  ;;  %v2887_v59 = vld [vmem:[%s12276_s24 + $0x6c] sm:$0xff] }
 0x2f0   : > { %9369 = vmatprep.mubr.msk.f32.mxu0 %vm12041_vm0, %v13294_v21  ;;  %9805 = vmatmul.mubr.f32.gmra.mrb[158].mxu1 %v2886_v37  ;;  %v1791_v55 = vld [vmem:[%s12276_s24 + $0xb2] sm:$0xff]  ;;  %v1792_v37 = vld [vmem:[%s12276_s24 + $0xba] sm:$0xff] }
 0x2f1   : > { %v13520_v22 = vadd.f32 %v13148_v40, %v1376_v5  ;;  %9807 = vmatprep.mubr.msk.f32.mxu1 %vm12041_vm0, %v13294_v21 }
 0x2f2   : > { %v1233_v1 = vpop.f32.mrb[194].mxu0 }
 0x2f3   : > { %v9055_v46 = vpop.f32.mrb[195].mxu0  ;;  %9370 = vmatmul.mubr.f32.gmra.mrb[44].mxu0 %v1789_v28  ;;  %v1377_v63 = vadd.f32 %v1233_v1, %v13061_v18  ;;  %v2888_v18 = vld [vmem:[%s12276_s24 + $0x74] sm:$0xff] }
 0x2f4   : > { %9372 = vmatprep.mubr.msk.f32.mxu0 %vm12041_vm0, %v13294_v21  ;;  %9808 = vmatmul.mubr.f32.gmra.mrb[160].mxu1 %v2887_v59 }
 0x2f5   : > { %v13530_v4 = vadd.f32 %v13159_v34, %v1377_v63  ;;  %9810 = vmatprep.mubr.msk.f32.mxu1 %vm12041_vm0, %v13294_v21  ;;  %v1793_v63 = vld [vmem:[%s12276_s24 + $0xc2] sm:$0xff] }
 0x2f6   : > { %v1238_v40 = vpop.f32.mrb[196].mxu0 }
 0x2f7   : > { %v9058_v24 = vpop.f32.mrb[197].mxu0  ;;  %9373 = vmatmul.mubr.f32.gmra.mrb[46].mxu0 %v1790_v61  ;;  %v1378_v30 = vadd.f32 %v1238_v40, %v13070_v17  ;;  %v2889_v17 = vld [vmem:[%s12276_s24 + $0x7c] sm:$0xff] }
 0x2f8   : > { %9375 = vmatprep.mubr.msk.f32.mxu0 %vm12041_vm0, %v13294_v21  ;;  %9811 = vmatmul.mubr.f32.gmra.mrb[162].mxu1 %v2888_v18  ;;  %v2891_v24 = vld [vmem:[%s12276_s24 + $0x8c] sm:$0xff] }
 0x2f9   : > { %v13540_v47 = vadd.f32 %v13170_v16, %v1378_v30  ;;  %9813 = vmatprep.mubr.msk.f32.mxu1 %vm12041_vm0, %v13294_v21 }
 0x2fa   : > { %v1243_v34 = vpop.f32.mrb[198].mxu0 }
 0x2fb   : > { %v9061_v31 = vpop.f32.mrb[199].mxu0  ;;  %9376 = vmatmul.mubr.f32.gmra.mrb[48].mxu0 %v1791_v55  ;;  %v1379_v5 = vadd.f32 %v1243_v34, %v13079_v49  ;;  %v2890_v49 = vld [vmem:[%s12276_s24 + $0x84] sm:$0xff] }
 0x2fc   : > { %9378 = vmatprep.mubr.msk.f32.mxu0 %vm12041_vm0, %v13294_v21  ;;  %9814 = vmatmul.mubr.f32.gmra.mrb[164].mxu1 %v2889_v17  ;;  %v1795_v31 = vld [vmem:[%s12276_s24 + $0xd2] sm:$0xff] }
 0x2fd   : > { %v13550_v28 = vadd.f32 %v13181_v52, %v1379_v5  ;;  %9816 = vmatprep.mubr.msk.f32.mxu1 %vm12041_vm0, %v13294_v21 }
 0x2fe   : > { %v1248_v16 = vpop.f32.mrb[200].mxu0 }
 0x2ff   : > { %v9064_v1 = vpop.f32.mrb[201].mxu0  ;;  %9379 = vmatmul.mubr.f32.gmra.mrb[50].mxu0 %v1792_v37  ;;  %v1380_v46 = vadd.f32 %v1248_v16, %v13088_v48  ;;  %v1794_v48 = vld [vmem:[%s12276_s24 + $0xca] sm:$0xff] }
 0x300   : > { %9381 = vmatprep.mubr.msk.f32.mxu0 %vm12041_vm0, %v13294_v21  ;;  %9817 = vmatmul.mubr.f32.gmra.mrb[166].mxu1 %v2890_v49 }
 0x301   : > { %v13560_v59 = vadd.f32 %v13193_v12, %v1380_v46  ;;  %9819 = vmatprep.mubr.msk.f32.mxu1 %vm12041_vm0, %v13294_v21  ;;  %v13572_v12 = vpop.f32.mrb[62].mxu1  ;;  %v1796_v46 = vld [vmem:[%s12276_s24 + $0xda] sm:$0xff] }
 0x302   : > { %v1253_v52 = vpop.f32.mrb[202].mxu0  ;;  %v9475_v55 = vpop.f32.mrb[63].mxu1 }
 0x303   : > { %v9067_v61 = vpop.f32.mrb[203].mxu0  ;;  %9382 = vmatmul.mubr.f32.gmra.mrb[52].mxu0 %v1793_v63  ;;  %v1381_v40 = vadd.f32 %v1253_v52, %v13097_v29 }
 0x304   : > { %9384 = vmatprep.mubr.msk.f32.mxu0 %vm12041_vm0, %v13294_v21  ;;  %9820 = vmatmul.mubr.f32.gmra.mrb[168].mxu1 %v2891_v24 }
 0x305   : > { %v13570_v30 = vadd.f32 %v13203_v33, %v1381_v40  ;;  %9822 = vmatprep.mubr.msk.f32.mxu1 %vm12041_vm0, %v13294_v21  ;;  %v2892_v33 = vld [vmem:[%s12276_s24 + $0x94] sm:$0xff]  ;;  %v13584_v17 = vpop.f32.mrb[64].mxu1 }
 0x306   : > { %v1258_v18 = vpop.f32.mrb[204].mxu0  ;;  %v9478_v16 = vpop.f32.mrb[65].mxu1 }
 0x307   : > { %v9070_v34 = vpop.f32.mrb[205].mxu0  ;;  %9385 = vmatmul.mubr.f32.gmra.mrb[54].mxu0 %v1794_v48  ;;  %v1382_v29 = vadd.f32 %v1258_v18, %v13108_v6  ;;  %v1797_v48 = vld [vmem:[%s12276_s24 + $0xe2] sm:$0xff] }
 0x308   : > { %9387 = vmatprep.mubr.msk.f32.mxu0 %vm12041_vm0, %v13294_v21  ;;  %9823 = vmatmul.mubr.f32.gmra.mrb[170].mxu1 %v2892_v33 }
 0x309   : > { %v13582_v5 = vadd.f32 %v13214_v19, %v1382_v29  ;;  %9825 = vmatprep.mubr.msk.f32.mxu1 %vm12041_vm0, %v13294_v21  ;;  %v2893_v19 = vld [vmem:[%s12276_s24 + $0x9c] sm:$0xff]  ;;  %v13596_v63 = vpop.f32.mrb[66].mxu1 }
 0x30a   : > { %v1263_v37 = vpop.f32.mrb[206].mxu0  ;;  %v9481_v61 = vpop.f32.mrb[67].mxu1 }
 0x30b   : > { %v9073_v1 = vpop.f32.mrb[207].mxu0  ;;  %9388 = vmatmul.mubr.f32.gmra.mrb[56].mxu0 %v1795_v31  ;;  %v1383_v6 = vadd.f32 %v1263_v37, %v13119_v3  ;;  %v1798_v31 = vld [vmem:[%s12276_s24 + $0xea] sm:$0xff] }
 0x30c   : > { %9390 = vmatprep.mubr.msk.f32.mxu0 %vm12041_vm0, %v13294_v21  ;;  %9826 = vmatmul.mubr.f32.gmra.mrb[172].mxu1 %v2893_v19 }
 0x30d   : > { %v13594_v49 = vadd.f32 %v13226_v26, %v1383_v6  ;;  %9828 = vmatprep.mubr.msk.f32.mxu1 %vm12041_vm0, %v13294_v21  ;;  %v2894_v26 = vld [vmem:[%s12276_s24 + $0xa4] sm:$0xff]  ;;  %v13608_v18 = vpop.f32.mrb[68].mxu1 }
 0x30e   : > { %v1268_v52 = vpop.f32.mrb[208].mxu0  ;;  %v9484_v34 = vpop.f32.mrb[69].mxu1 }
 0x30f   : > { %v9076_v40 = vpop.f32.mrb[209].mxu0  ;;  %9391 = vmatmul.mubr.f32.gmra.mrb[58].mxu0 %v1796_v46  ;;  %v1384_v3 = vadd.f32 %v1268_v52, %v13130_v56  ;;  %v1799_v46 = vld [vmem:[%s12276_s24 + $0xf2] sm:$0xff] }
 0x310   : > { %9393 = vmatprep.mubr.msk.f32.mxu0 %vm12041_vm0, %v13294_v21  ;;  %9829 = vmatmul.mubr.f32.gmra.mrb[174].mxu1 %v2894_v26 }
 0x311   : > { %v13606_v24 = vadd.f32 %v13238_v60, %v1384_v3  ;;  %9831 = vmatprep.mubr.msk.f32.mxu1 %vm12041_vm0, %v13294_v21  ;;  %v2895_v60 = vld [vmem:[%s12276_s24 + $0xac] sm:$0xff]  ;;  %v13620_v37 = vpop.f32.mrb[70].mxu1 }
 0x312   : > { %v1273_v55 = vpop.f32.mrb[210].mxu0  ;;  %v9487_v1 = vpop.f32.mrb[71].mxu1 }
 0x313   : > { %v9079_v29 = vpop.f32.mrb[211].mxu0  ;;  %9394 = vmatmul.mubr.f32.gmra.mrb[60].mxu0 %v1797_v48  ;;  %v1385_v56 = vadd.f32 %v1273_v55, %v13141_v43  ;;  %v1800_v48 = vld [vmem:[%s12276_s24 + $0xfa] sm:$0xff] }
 0x314   : > { %9396 = vmatprep.mubr.msk.f32.mxu0 %vm12041_vm0, %v13294_v21  ;;  %9832 = vmatmul.mubr.f32.gmra.mrb[176].mxu1 %v2895_v60 }
 0x315   : > { %v13618_v33 = vadd.f32 %v13250_v44, %v1385_v56  ;;  %9834 = vmatprep.mubr.msk.f32.mxu1 %vm12041_vm0, %v13294_v21  ;;  %v2896_v44 = vld [vmem:[%s12276_s24 + $0xb4] sm:$0xff]  ;;  %v13632_v52 = vpop.f32.mrb[72].mxu1 }
 0x316   : > { %v1278_v16 = vpop.f32.mrb[212].mxu0  ;;  %v9490_v40 = vpop.f32.mrb[73].mxu1 }
 0x317   : > { %v9082_v6 = vpop.f32.mrb[213].mxu0  ;;  %9397 = vmatmul.mubr.f32.gmra.mrb[62].mxu0 %v1798_v31  ;;  %v1386_v43 = vadd.f32 %v1278_v16, %v13152_v27  ;;  %v1801_v31 = vld [vmem:[%s12276_s24 + $0x102] sm:$0xff] }
 0x318   : > { %9399 = vmatprep.mubr.msk.f32.mxu0 %vm12041_vm0, %v13294_v21  ;;  %9835 = vmatmul.mubr.f32.gmra.mrb[178].mxu1 %v2896_v44 }
 0x319   : > { %v13630_v19 = vadd.f32 %v13262_v9, %v1386_v43  ;;  %9837 = vmatprep.mubr.msk.f32.mxu1 %vm12041_vm0, %v13294_v21  ;;  %v2897_v9 = vld [vmem:[%s12276_s24 + $0xbc] sm:$0xff]  ;;  %v13644_v55 = vpop.f32.mrb[74].mxu1 }
 0x31a   : > { %v1283_v61 = vpop.f32.mrb[214].mxu0  ;;  %v9493_v29 = vpop.f32.mrb[75].mxu1 }
 0x31b   : > { %v9085_v3 = vpop.f32.mrb[215].mxu0  ;;  %9400 = vmatmul.mubr.f32.gmra.mrb[64].mxu0 %v1799_v46  ;;  %v1387_v27 = vadd.f32 %v1283_v61, %v13163_v38  ;;  %v1802_v46 = vld [vmem:[%s12276_s24 + $0x10a] sm:$0xff] }
 0x31c   : > { %9402 = vmatprep.mubr.msk.f32.mxu0 %vm12041_vm0, %v13294_v21  ;;  %9838 = vmatmul.mubr.f32.gmra.mrb[180].mxu1 %v2897_v9  ;;  %v1803_v9 = vld [vmem:[%s12276_s24 + $0x112] sm:$0xff] }
 0x31d   : > { %v13642_v26 = vadd.f32 %v13274_v50, %v1387_v27  ;;  %9840 = vmatprep.mubr.msk.f32.mxu1 %vm12041_vm0, %v13294_v21  ;;  %v2898_v50 = vld [vmem:[%s12276_s24 + $0xc4] sm:$0xff]  ;;  %v13656_v16 = vpop.f32.mrb[76].mxu1 }
 0x31e   : > { %v1288_v34 = vpop.f32.mrb[216].mxu0  ;;  %v9496_v6 = vpop.f32.mrb[77].mxu1 }
 0x31f   : > { %15366 = vst [vmem:[#allocation32_spill] sm:$0xff] %v13642_v26  ;;  %v9088_v56 = vpop.f32.mrb[217].mxu0  ;;  %9403 = vmatmul.mubr.f32.gmra.mrb[66].mxu0 %v1800_v48  ;;  %v1388_v38 = vadd.f32 %v1288_v34, %v13174_v58  ;;  %v15370_v34 = vld [vmem:[#allocation19_spill] sm:$0xff]  ;;  %v11849_v26 = vld [vmem:[%s12276_s24 + $0x53] sm:$0xff] }
 0x320   : > { %9405 = vmatprep.mubr.msk.f32.mxu0 %vm12041_vm0, %v13294_v21  ;;  %9841 = vmatmul.mubr.f32.gmra.mrb[182].mxu1 %v2898_v50 }
 0x321   : > { %v13654_v60 = vadd.f32 %v13286_v23, %v1388_v38  ;;  %9843 = vmatprep.mubr.msk.f32.mxu1 %vm12041_vm0, %v13294_v21  ;;  %v2899_v23 = vld [vmem:[%s12276_s24 + $0xcc] sm:$0xff]  ;;  %v13668_v61 = vpop.f32.mrb[78].mxu1 }
 0x322   : > { %v1293_v1 = vpop.f32.mrb[218].mxu0  ;;  %v9499_v3 = vpop.f32.mrb[79].mxu1 }
 0x323   : > { %15367 = vst [vmem:[#allocation35_spill] sm:$0xff] %v13654_v60  ;;  %v9091_v43 = vpop.f32.mrb[219].mxu0  ;;  %9406 = vmatmul.mubr.f32.gmra.mrb[68].mxu0 %v1801_v31  ;;  %v1389_v58 = vadd.f32 %v1293_v1, %v13185_v54  ;;  %v15369_v54 = vld [vmem:[#allocation22_spill] sm:$0xff]  ;;  %v15372_v1 = vld [vmem:[#allocation13_spill] sm:$0xff] }
 0x324   : > { %9408 = vmatprep.mubr.msk.f32.mxu0 %vm12041_vm0, %v13294_v21  ;;  %9844 = vmatmul.mubr.f32.gmra.mrb[184].mxu1 %v2899_v23  ;;  %v1804_v43 = vld [vmem:[%s12276_s24 + $0x11a] sm:$0xff] }
 0x325   : > { %v13666_v44 = vadd.f32 %v13300_v10, %v1389_v58  ;;  %9846 = vmatprep.mubr.msk.f32.mxu1 %vm12041_vm0, %v13294_v21  ;;  %v2900_v10 = vld [vmem:[%s12276_s24 + $0xd4] sm:$0xff]  ;;  %v13680_v56 = vpop.f32.mrb[80].mxu1  ;;  %v2901_v58 = vld [vmem:[%s12276_s24 + $0xdc] sm:$0xff] }
 0x326   : > { %v1298_v40 = vpop.f32.mrb[220].mxu0  ;;  %v9502_v31 = vpop.f32.mrb[81].mxu1 }
 0x327   : > { %15368 = vst [vmem:[#allocation34_spill] sm:$0xff] %v13666_v44  ;;  %v9094_v27 = vpop.f32.mrb[221].mxu0  ;;  %9409 = vmatmul.mubr.f32.gmra.mrb[70].mxu0 %v1802_v46  ;;  %v1390_v48 = vadd.f32 %v1298_v40, %v15369_v54  ;;  %v15373_v46 = vld [vmem:[#allocation21_spill] sm:$0xff] }
 0x328   : > { %9411 = vmatprep.mubr.msk.f32.mxu0 %vm12041_vm0, %v13294_v21  ;;  %9847 = vmatmul.mubr.f32.gmra.mrb[186].mxu1 %v2900_v10  ;;  %v1805_v10 = vld [vmem:[%s12276_s24 + $0x122] sm:$0xff]  ;;  %v11848_v44 = vld [vmem:[%s12276_s24 + $0x4b] sm:$0xff] }
 0x329   : > { %v13678_v29 = vadd.f32 %v15370_v34, %v1390_v48  ;;  %9849 = vmatprep.mubr.msk.f32.mxu1 %vm12041_vm0, %v13294_v21  ;;  %v13692_v40 = vpop.f32.mrb[82].mxu1  ;;  %v15375_v48 = vld [vmem:[#allocation25_spill] sm:$0xff]  ;;  %v2902_v34 = vld [vmem:[%s12276_s24 + $0xe4] sm:$0xff] }
 0x32a   : > { %v1303_v38 = vpop.f32.mrb[222].mxu0  ;;  %v9505_v27 = vpop.f32.mrb[83].mxu1 }
 0x32b   : > { %15371 = vst [vmem:[#allocation37_spill] sm:$0xff] %v13678_v29  ;;  %v9097_v50 = vpop.f32.mrb[223].mxu0  ;;  %9412 = vmatmul.mubr.f32.gmra.mrb[72].mxu0 %v1803_v9  ;;  %v1391_v6 = vadd.f32 %v1303_v38, %v15372_v1  ;;  %v15376_v38 = vld [vmem:[#allocation24_spill] sm:$0xff] }
 0x32c   : > { %9414 = vmatprep.mubr.msk.f32.mxu0 %vm12041_vm0, %v13294_v21  ;;  %9850 = vmatmul.mubr.f32.gmra.mrb[188].mxu1 %v2901_v58  ;;  %v15378_v58 = vld [vmem:[#allocation14_spill] sm:$0xff]  ;;  %v2903_v27 = vld [vmem:[%s12276_s24 + $0xec] sm:$0xff] }
 0x32d   : > { %v13690_v23 = vadd.f32 %v15373_v46, %v1391_v6  ;;  %9852 = vmatprep.mubr.msk.f32.mxu1 %vm12041_vm0, %v13294_v21  ;;  %v13704_v50 = vpop.f32.mrb[84].mxu1 }
 0x32e   : > { %v1308_v3 = vpop.f32.mrb[224].mxu0  ;;  %v9508_v6 = vpop.f32.mrb[85].mxu1 }
 0x32f   : > { %15374 = vst [vmem:[#allocation36_spill] sm:$0xff] %v13690_v23  ;;  %v9100_v54 = vpop.f32.mrb[225].mxu0  ;;  %9415 = vmatmul.mubr.f32.gmra.mrb[74].mxu0 %v1804_v43  ;;  %v1392_v9 = vadd.f32 %v1308_v3, %v15375_v48  ;;  %v1806_v3 = vld [vmem:[%s12276_s24 + $0x12a] sm:$0xff]  ;;  %v15395_v23 = vld [vmem:[#allocation26_spill] sm:$0xff] }
 0x330   : > { %9417 = vmatprep.mubr.msk.f32.mxu0 %vm12041_vm0, %v13294_v21  ;;  %9853 = vmatmul.mubr.f32.gmra.mrb[190].mxu1 %v2902_v34  ;;  %v15379_v54 = vld [vmem:[#allocation27_spill] sm:$0xff] }
 0x331   : > { %v13702_v31 = vadd.f32 %v15376_v38, %v1392_v9  ;;  %9855 = vmatprep.mubr.msk.f32.mxu1 %vm12041_vm0, %v13294_v21  ;;  %v13716_v9 = vpop.f32.mrb[86].mxu1 }
 0x332   : > { %v1313_v1 = vpop.f32.mrb[226].mxu0 }
 0x333   : > { %15377 = vst [vmem:[#allocation39_spill] sm:$0xff] %v13702_v31  ;;  %v9103_v43 = vpop.f32.mrb[227].mxu0  ;;  %9418 = vmatmul.mubr.f32.gmra.mrb[76].mxu0 %v1805_v10  ;;  %v1393_v46 = vadd.f32 %v1313_v1, %v15378_v58  ;;  %v9511_v10 = vpop.f32.mrb[87].mxu1  ;;  %v15381_v1 = vld [vmem:[#allocation28_spill] sm:$0xff] }
 0x334   : > { %9420 = vmatprep.mubr.msk.f32.mxu0 %vm12041_vm0, %v13294_v21  ;;  %9856 = vmatmul.mubr.f32.gmra.mrb[192].mxu1 %v2903_v27  ;;  %v1807_v43 = vld [vmem:[%s12276_s24 + $0x132] sm:$0xff] }
 0x335   : > { %v13714_v48 = vadd.f32 %v15379_v54, %v1393_v46  ;;  %9858 = vmatprep.mubr.msk.f32.mxu1 %vm12041_vm0, %v13294_v21  ;;  %v2904_v58 = vld [vmem:[%s12276_s24 + $0xf4] sm:$0xff]  ;;  %v13728_v54 = vpop.f32.mrb[88].mxu1 }
 0x336   : > { %v1318_v34 = vpop.f32.mrb[228].mxu0 }
 0x337   : > { %15380 = vst [vmem:[#allocation38_spill] sm:$0xff] %v13714_v48  ;;  %v9106_v38 = vpop.f32.mrb[229].mxu0  ;;  %9421 = vmatmul.mubr.f32.gmra.mrb[78].mxu0 %v1806_v3  ;;  %v1394_v6 = vadd.f32 %v1318_v34, %v15381_v1  ;;  %v9514_v3 = vpop.f32.mrb[89].mxu1  ;;  %v15383_v34 = vld [vmem:[#allocation15_spill] sm:$0xff] }
 0x338   : > { %9423 = vmatprep.mubr.msk.f32.mxu0 %vm12041_vm0, %v13294_v21  ;;  %9859 = vmatmul.mubr.f32.gmra.mrb[194].mxu1 %v2904_v58  ;;  %v1808_v1 = vld [vmem:[%s12276_s24 + $0x13a] sm:$0xff] }
 0x339   : > { %v13726_v46 = vadd.f32 %v13357_v15, %v1394_v6  ;;  %9861 = vmatprep.mubr.msk.f32.mxu1 %vm12041_vm0, %v13294_v21  ;;  %v2905_v15 = vld [vmem:[%s12276_s24 + $0xfc] sm:$0xff] }
 0x33a   : > { %v1323_v27 = vpop.f32.mrb[230].mxu0  ;;  %v2909_v48 = vld [vmem:[%s12276_s24 + $0x11c] sm:$0xff] }
 0x33b   : > { %15382 = vst [vmem:[#allocation40_spill] sm:$0xff] %v13726_v46  ;;  %v9109_v10 = vpop.f32.mrb[231].mxu0  ;;  %9424 = vmatmul.mubr.f32.gmra.mrb[80].mxu0 %v1807_v43  ;;  %v1395_v38 = vadd.f32 %v1323_v27, %v15383_v34  ;;  %v13740_v46 = vpop.f32.mrb[90].mxu1  ;;  %v15385_v27 = vld [vmem:[#allocation16_spill] sm:$0xff]  ;;  %v13743_v34 = vld [vmem:[#allocation2] sm:$0xff] }
 0x33c   : > { %9426 = vmatprep.mubr.msk.f32.mxu0 %vm12041_vm0, %v13294_v21  ;;  %9862 = vmatmul.mubr.f32.gmra.mrb[196].mxu1 %v2905_v15  ;;  %v9517_v43 = vpop.f32.mrb[91].mxu1  ;;  %v1809_v21 = vld [vmem:[%s12276_s24 + $0x142] sm:$0xff] }
 0x33d   : > { %v13738_v6 = vadd.f32 %v13370_v36, %v1395_v38  ;;  %9864 = vmatprep.mubr.msk.f32.mxu1 %vm12041_vm0, %v13743_v34  ;;  %v2906_v36 = vld [vmem:[%s12276_s24 + $0x104] sm:$0xff]  ;;  %v13754_v15 = vpop.f32.mrb[92].mxu1 }
 0x33e   : > { %v1328_v58 = vpop.f32.mrb[232].mxu0 }
 0x33f   : > { %15384 = vst [vmem:[#allocation22_spill] sm:$0xff] %v13738_v6  ;;  %v9112_v3 = vpop.f32.mrb[233].mxu0  ;;  %9427 = vmatmul.mubr.f32.gmra.mrb[82].mxu0 %v1808_v1  ;;  %v1396_v10 = vadd.f32 %v1328_v58, %v15385_v27  ;;  %v9520_v58 = vpop.f32.mrb[93].mxu1  ;;  %v1810_v6 = vld [vmem:[%s12276_s24 + $0x14a] sm:$0xff] }
 0x340   : > { %9429 = vmatprep.mubr.msk.f32.mxu0 %vm12041_vm0, %v13743_v34  ;;  %9865 = vmatmul.mubr.f32.gmra.mrb[198].mxu1 %v2906_v36  ;;  %v15387_v3 = vld [vmem:[#allocation18_spill] sm:$0xff] }
 0x341   : > { %v13752_v38 = vadd.f32 %v13383_v57, %v1396_v10  ;;  %9867 = vmatprep.mubr.msk.f32.mxu1 %vm12041_vm0, %v13743_v34  ;;  %v2907_v57 = vld [vmem:[%s12276_s24 + $0x10c] sm:$0xff] }
 0x342   : > { %v1333_v1 = vpop.f32.mrb[234].mxu0 }
 0x343   : > { %15386 = vst [vmem:[#allocation19_spill] sm:$0xff] %v13752_v38  ;;  %v9115_v43 = vpop.f32.mrb[235].mxu0  ;;  %9430 = vmatmul.mubr.f32.gmra.mrb[84].mxu0 %v1809_v21  ;;  %v1397_v27 = vadd.f32 %v1333_v1, %v15387_v3  ;;  %v13766_v38 = vpop.f32.mrb[94].mxu1  ;;  %v15389_v1 = vld [vmem:[#allocation17_spill] sm:$0xff] }
 0x344   : > { %9432 = vmatprep.mubr.msk.f32.mxu0 %vm12041_vm0, %v13743_v34  ;;  %9868 = vmatmul.mubr.f32.gmra.mrb[200].mxu1 %v2907_v57  ;;  %v9523_v21 = vpop.f32.mrb[95].mxu1  ;;  %v1811_v3 = vld [vmem:[%s12276_s24 + $0x152] sm:$0xff] }
 0x345   : > { %v13764_v10 = vadd.f32 %v13396_v20, %v1397_v27  ;;  %9870 = vmatprep.mubr.msk.f32.mxu1 %vm12041_vm0, %v13743_v34  ;;  %v2908_v20 = vld [vmem:[%s12276_s24 + $0x114] sm:$0xff] }
 0x346   : > { %v1338_v36 = vpop.f32.mrb[236].mxu0 }
 0x347   : > { %15388 = vst [vmem:[#allocation13_spill] sm:$0xff] %v13764_v10  ;;  %v9118_v58 = vpop.f32.mrb[237].mxu0  ;;  %9433 = vmatmul.mubr.f32.gmra.mrb[86].mxu0 %v1810_v6  ;;  %v1398_v43 = vadd.f32 %v1338_v36, %v15389_v1  ;;  %v13778_v10 = vpop.f32.mrb[96].mxu1  ;;  %v15391_v36 = vld [vmem:[#allocation20_spill] sm:$0xff]  ;;  %v1812_v1 = vld [vmem:[%s12276_s24 + $0x15a] sm:$0xf] }
 0x348   : > { %9435 = vmatprep.mubr.msk.f32.mxu0 %vm12041_vm0, %v13743_v34  ;;  %9871 = vmatmul.mubr.f32.gmra.mrb[202].mxu1 %v2908_v20  ;;  %v9526_v6 = vpop.f32.mrb[97].mxu1 }
 0x349   : > { %v13776_v27 = vadd.f32 %v13409_v8, %v1398_v43  ;;  %9873 = vmatprep.mubr.msk.f32.mxu1 %vm12041_vm0, %v13743_v34  ;;  %v3290_v43 = vld [vmem:[#allocation6 + $0x400] sm:$0xff]  ;;  %v13790_v20 = vpop.f32.mrb[98].mxu1 }
 0x34a   : > { %v1343_v57 = vpop.f32.mrb[238].mxu0 }
 0x34b   : > { %15390 = vst [vmem:[#allocation21_spill] sm:$0xff] %v13776_v27  ;;  %v9121_v21 = vpop.f32.mrb[239].mxu0  ;;  %9436 = vmatmul.mubr.f32.gmra.mrb[88].mxu0 %v1811_v3  ;;  %v1399_v58 = vadd.f32 %v1343_v57, %v15391_v36  ;;  %v3291_v27 = vld [vmem:[#allocation6 + $0x408] sm:$0xff]  ;;  %v9529_v3 = vpop.f32.mrb[99].mxu1 }
 0x34c   : > { %9438 = vmatprep.mubr.msk.f32.mxu0 %vm12041_vm0, %v13743_v34  ;;  %9874 = vmatmul.mubr.f32.gmra.mrb[204].mxu1 %v2909_v48  ;;  %v15393_v21 = vld [vmem:[#allocation23_spill] sm:$0xff]  ;;  %v3293_v3 = vld [vmem:[#allocation6 + $0x418] sm:$0xff] }
 0x34d   : > { %v13788_v8 = vadd.f32 %v13422_v42, %v1399_v58  ;;  %9876 = vmatprep.mubr.msk.f32.mxu1 %vm12041_vm0, %v13743_v34  ;;  %v11114_v42 = vpack.c.bf16 %v3291_v27, %v3290_v43  ;;  %v2910_v58 = vld [vmem:[%s12276_s24 + $0x124] sm:$0xff]  ;;  %v13801_v31 = vpop.f32.mrb[100].mxu1  ;;  %v2911_v43 = vld [vmem:[%s12276_s24 + $0x12c] sm:$0xff] }
 0x34e   : > { %v1348_v6 = vpop.f32.mrb[240].mxu0  ;;  %v3292_v48 = vld [vmem:[#allocation6 + $0x410] sm:$0xff] }
 0x34f   : > { %15392 = vst [vmem:[#allocation25_spill] sm:$0xff] %v13788_v8  ;;  %v9124_v57 = vpop.f32.mrb[241].mxu0  ;;  %9439 = vmatmul.mubr.f32.gmra.mrb[90].mxu0 %v1812_v1  ;;  %v1400_v36 = vadd.f32 %v1348_v6, %v15393_v21  ;;  %v9532_v6 = vpop.f32.mrb[101].mxu1  ;;  %v11847_v21 = vld [vmem:[%s12276_s24 + $0x2b] sm:$0xff]  ;;  %v11117_v27 = vpack.c.bf16 %v3293_v3, %v3292_v48  ;;  %v2912_v48 = vld [vmem:[%s12276_s24 + $0x134] sm:$0xff] }
 0x350   : > { %9628 = vmatprep.mubr.msk.f32.mxu0 %vm12041_vm0, %v13743_v34  ;;  %9877 = vmatmul.mubr.f32.gmra.mrb[206].mxu1 %v2910_v58  ;;  %v3294_v58 = vld [vmem:[#allocation6 + $0x420] sm:$0xff]  ;;  %v3295_v6 = vld [vmem:[#allocation6 + $0x428] sm:$0xff] }
 0x351   : > { %v13799_v8 = vadd.f32 %v13435_v39, %v1400_v36  ;;  %9879 = vmatprep.mubr.msk.f32.mxu1 %vm12041_vm0, %v13743_v34  ;;  %v2511_v39 = vld [vmem:[%s12276_s24 + $0x33] sm:$0xff] }
 0x352   : > { %v1353_v1 = vpop.f32.mrb[242].mxu0 }
 0x353   : > { %15394 = vst [vmem:[#allocation24_spill] sm:$0xff] %v13799_v8  ;;  %v9127_v57 = vpop.f32.mrb[243].mxu0  ;;  %9629 = vmatmul.mubr.f32.vlgmr.msra.gmra.mrb[92].mxu0 %v11847_v21  ;;  %v1401_v29 = vadd.f32 %v1353_v1, %v15395_v23  ;;  %v13815_v23 = vpop.f32.mrb[102].mxu1  ;;  %v15397_v21 = vld [vmem:[#allocation29_spill] sm:$0xff] }
 0x354   : > { %11115 = vmatpush3.bf16.msra.mxu0 %v11114_v42  ;;  %9631 = vmatprep.mubr.msk.f32.mxu0 %vm12041_vm0, %v13743_v34  ;;  %v9535_v42 = vpop.f32.mrb[103].mxu1 }
 0x355   : > { %v13812_v36 = vadd.f32 %v13447_v45, %v1401_v29  ;;  %11116 = vmatprep.subr.bf16.mxu0 %v15293_v0  ;;  %9880 = vmatmul.mubr.f32.gmra.mrb[208].mxu1 %v2911_v43  ;;  %v2512_v45 = vld [vmem:[%s12276_s24 + $0x3b] sm:$0xff]  ;;  %v11120_v29 = vpack.c.bf16 %v3295_v6, %v3294_v58  ;;  %v3297_v43 = vld [vmem:[#allocation6 + $0x438] sm:$0xff] }
 0x356   : > { %v1358_v1 = vpop.f32.mrb[244].mxu0  ;;  %9882 = vmatprep.mubr.msk.f32.mxu1 %vm12041_vm0, %v13743_v34  ;;  %v2913_v58 = vld [vmem:[%s12276_s24 + $0x13c] sm:$0xff] }
 0x357   : > { %15396 = vst [vmem:[#allocation14_spill] sm:$0xff] %v13812_v36  ;;  %v9130_v57 = vpop.f32.mrb[245].mxu0  ;;  %9632 = vmatmul.mubr.f32.gmra.mrb[94].mxu0 %v2511_v39  ;;  %v1402_v8 = vadd.f32 %v1358_v1, %v15397_v21  ;;  %v3296_v39 = vld [vmem:[#allocation6 + $0x430] sm:$0xff]  ;;  %v13828_v1 = vpop.f32.mrb[104].mxu1  ;;  %v3298_v6 = vld [vmem:[#allocation6 + $0x440] sm:$0xff] }
 0x358   : > { %9634 = vmatprep.mubr.msk.f32.mxu0 %vm12041_vm0, %v13743_v34  ;;  %11118 = vmatpush3.bf16.msra.mxu0 %v11117_v27  ;;  %v9538_v57 = vpop.f32.mrb[105].mxu1 }
 0x359   : > { %v13825_v3 = vadd.f32 %v13460_v41, %v1402_v8  ;;  %11119 = vmatprep.subr.bf16.mxu0 %v15293_v0  ;;  %9883 = vmatmul.mubr.f32.gmra.mrb[210].mxu1 %v2912_v48  ;;  %v2513_v41 = vld [vmem:[%s12276_s24 + $0x43] sm:$0xff]  ;;  %v11123_v8 = vpack.c.bf16 %v3297_v43, %v3296_v39  ;;  %v13840_v57 = vpop.f32.mrb[106].mxu1 }
 0x35a   : > { %v1527_v42 = vpop.f32.mrb[246].mxu0  ;;  %9885 = vmatprep.mubr.msk.f32.mxu1 %vm12041_vm0, %v13743_v34  ;;  %v3299_v48 = vld [vmem:[#allocation6 + $0x448] sm:$0xff]  ;;  %v3300_v43 = vld [vmem:[#allocation6 + $0x450] sm:$0xff] }
 0x35b   : > { %15398 = vst [vmem:[#allocation27_spill] sm:$0xff] %v13825_v3  ;;  %v13831_v21 = vadd.f32 %v1527_v42, %v13352_v11  ;;  %v9165_v27 = vpop.f32.mrb[247].mxu0  ;;  %9635 = vmatmul.mubr.f32.gmra.mrb[96].mxu0 %v2512_v45  ;;  %v9541_v45 = vpop.f32.mrb[107].mxu1  ;;  %v15399_v42 = vld [vmem:[#allocation31_spill] sm:$0xff] }
 0x35c   : > { %9637 = vmatprep.mubr.msk.f32.mxu0 %vm12041_vm0, %v13743_v34  ;;  %11121 = vmatpush3.bf16.msra.mxu0 %v11120_v29  ;;  %v11126_v29 = vpack.c.bf16 %v3299_v48, %v3298_v6  ;;  %v2914_v39 = vld [vmem:[%s12276_s24 + $0x144] sm:$0xff]  ;;  %v2915_v6 = vld [vmem:[%s12276_s24 + $0x14c] sm:$0xff] }
 0x35d   : > { %11122 = vmatprep.subr.bf16.mxu0 %v15293_v0  ;;  %9886 = vmatmul.mubr.f32.gmra.mrb[212].mxu1 %v2913_v58  ;;  %v3301_v58 = vld [vmem:[#allocation6 + $0x458] sm:$0xff]  ;;  %v13851_v45 = vpop.f32.mrb[108].mxu1  ;;  %v3302_v48 = vld [vmem:[#allocation6 + $0x460] sm:$0xff] }
 0x35e   : > { %v1532_v11 = vpop.f32.mrb[248].mxu0  ;;  %9888 = vmatprep.mubr.msk.f32.mxu1 %vm12041_vm0, %v13743_v34 }
 0x35f   : > { %v13843_v27 = vadd.f32 %v1532_v11, %v15399_v42  ;;  %v9168_v3 = vpop.f32.mrb[249].mxu0  ;;  %9638 = vmatmul.mubr.f32.gmra.mrb[98].mxu0 %v2513_v41  ;;  %v15400_v41 = vld [vmem:[#allocation30_spill] sm:$0xff] }
 0x360   : > { %9640 = vmatprep.mubr.msk.f32.mxu0 %vm12041_vm0, %v13743_v34  ;;  %11124 = vmatpush3.bf16.msra.mxu0 %v11123_v8  ;;  %v9544_v3 = vpop.f32.mrb[109].mxu1  ;;  %v11129_v8 = vpack.c.bf16 %v3301_v58, %v3300_v43  ;;  %v2916_v58 = vld [vmem:[%s12276_s24 + $0x154] sm:$0xff] }
 0x361   : > { %11125 = vmatprep.subr.bf16.mxu0 %v15293_v0  ;;  %9889 = vmatmul.mubr.f32.gmra.mrb[214].mxu1 %v2914_v39  ;;  %v3303_v39 = vld [vmem:[#allocation6 + $0x468] sm:$0xff]  ;;  %v15402_v3 = vld [vmem:[#allocation33_spill] sm:$0xff] }
 0x362   : > { %v1537_v11 = vpop.f32.mrb[250].mxu0  ;;  %9891 = vmatprep.mubr.msk.f32.mxu1 %vm12041_vm0, %v13743_v34  ;;  %v11132_v43 = vpack.c.bf16 %v3303_v39, %v3302_v48  ;;  %v2917_v39 = vld [vmem:[%s12276_s24 + $0x15c] sm:$0xff] }
 0x363   : > { %v13854_v42 = vadd.f32 %v1537_v11, %v15400_v41  ;;  %v9171_v36 = vpop.f32.mrb[251].mxu0  ;;  %9641 = vmatmul.mubr.f32.gmra.mrb[100].mxu0 %v11848_v44  ;;  %v13863_v11 = vpop.f32.mrb[110].mxu1 }
 0x364   : > { %9643 = vmatprep.mubr.msk.f32.mxu0 %vm12041_vm0, %v13743_v34  ;;  %11127 = vmatpush3.bf16.msra.mxu0 %v11126_v29  ;;  %15401 = vst [vmem:[#allocation28_spill] sm:$0xff] %v13863_v11  ;;  %v9547_v44 = vpop.f32.mrb[111].mxu1  ;;  %v2516_v29 = vld [vmem:[%s12276_s24 + $0x5b] sm:$0xff] }
 0x365   : > { %11128 = vmatprep.subr.bf16.mxu0 %v15293_v0  ;;  %9892 = vmatmul.mubr.f32.gmra.mrb[216].mxu1 %v2915_v6  ;;  %v3304_v6 = vld [vmem:[#allocation6 + $0x470] sm:$0xff]  ;;  %v13876_v44 = vpop.f32.mrb[112].mxu1 }
 0x366   : > { %v1542_v36 = vpop.f32.mrb[252].mxu0  ;;  %9894 = vmatprep.mubr.msk.f32.mxu1 %vm12041_vm0, %v13743_v34 }
 0x367   : > { %v13866_v41 = vadd.f32 %v1542_v36, %v15402_v3  ;;  %v9174_v60 = vpop.f32.mrb[253].mxu0  ;;  %9644 = vmatmul.mubr.f32.gmra.mrb[102].mxu0 %v11849_v26  ;;  %v3305_v36 = vld [vmem:[#allocation6 + $0x478] sm:$0xff]  ;;  %v9550_v26 = vpop.f32.mrb[113].mxu1 }
 0x368   : > { %9646 = vmatprep.mubr.msk.f32.mxu0 %vm12041_vm0, %v13743_v34  ;;  %11130 = vmatpush3.bf16.msra.mxu0 %v11129_v8  ;;  %v2517_v8 = vld [vmem:[%s12276_s24 + $0x63] sm:$0xff]  ;;  %v11135_v48 = vpack.c.bf16 %v3305_v36, %v3304_v6 }
 0x369   : > { %11131 = vmatprep.subr.bf16.mxu0 %v15293_v0  ;;  %9895 = vmatmul.mubr.f32.gmra.mrb[218].mxu1 %v2916_v58  ;;  %v13888_v58 = vpop.f32.mrb[114].mxu1 }
 0x36a   : > { %v1547_v60 = vpop.f32.mrb[254].mxu0  ;;  %9897 = vmatprep.mubr.msk.f32.mxu1 %vm12041_vm0, %v13743_v34 }
 0x36b   : > { %v13879_v3 = vadd.f32 %v1547_v60, %v13404_v2  ;;  %v9177_v11 = vpop.f32.mrb[255].mxu0  ;;  %9647 = vmatmul.mubr.f32.gmra.mrb[104].mxu0 %v2516_v29 }
 0x36c   : > { %9649 = vmatprep.mubr.msk.f32.mxu0 %vm12041_vm0, %v13743_v34  ;;  %11133 = vmatpush3.bf16.msra.mxu0 %v11132_v43  ;;  %v9553_v11 = vpop.f32.mrb[115].mxu1  ;;  %v2518_v43 = vld [vmem:[%s12276_s24 + $0x6b] sm:$0xff] }
 0x36d   : > { %11134 = vmatprep.subr.bf16.mxu0 %v15293_v0  ;;  %9898 = vmatmul.mubr.f32.gmra.mrb[220].mxu1 %v2917_v39  ;;  %v2918_v0 = vld [vmem:[%s12276_s24 + $0x164] sm:$0xff]  ;;  %v13899_v6 = vpop.f32.mrb[116].mxu1 }
 0x36e   : > { %v1552_v2 = vpop.f32.mrb[0].mxu0  ;;  %9900 = vmatprep.mubr.msk.f32.mxu1 %vm12041_vm0, %v13743_v34  ;;  %v9556_v26 = vpop.f32.mrb[117].mxu1 }
 0x36f   : > { %v13891_v29 = vadd.f32 %v1552_v2, %v13417_v53  ;;  %v9180_v60 = vpop.f32.mrb[1].mxu0  ;;  %9650 = vmatmul.mubr.f32.gmra.mrb[106].mxu0 %v2517_v8  ;;  %v2919_v8 = vld [vmem:[%s12276_s24 + $0x16c] sm:$0xf] }
 0x370   : > { %9652 = vmatprep.mubr.msk.f32.mxu0 %vm12041_vm0, %v13743_v34  ;;  %11136 = vmatpush3.bf16.msra.mxu0 %v11135_v48 }
 0x371   : > { %9901 = vmatmul.mubr.f32.gmra.mrb[222].mxu1 %v2918_v0  ;;  %v13909_v48 = vpop.f32.mrb[118].mxu1  ;;  %v11850_v0 = vld [vmem:[%s12276_s24 + $0x73] sm:$0xff] }
 0x372   : > { %v1557_v36 = vpop.f32.mrb[2].mxu0  ;;  %9903 = vmatprep.mubr.msk.f32.mxu1 %vm12041_vm0, %v13743_v34  ;;  %15403 = vst [vmem:[#allocation15_spill] sm:$0xff] %v13909_v48  ;;  %v9559_v11 = vpop.f32.mrb[119].mxu1 }
 0x373   : > { %v13902_v53 = vadd.f32 %v1557_v36, %v13430_v14  ;;  %v9183_v39 = vpop.f32.mrb[3].mxu0  ;;  %9653 = vmatmul.mubr.f32.gmra.mrb[108].mxu0 %v2518_v43 }
 0x374   : > { %9655 = vmatprep.mubr.msk.f32.mxu0 %vm12041_vm0, %v13743_v34 }
 0x375   : > { %9904 = vmatmul.mubr.f32.gmra.mrb[224].mxu1 %v2919_v8  ;;  %v11851_v8 = vld [vmem:[%s12276_s24 + $0x7b] sm:$0xff] }
 0x376   : > { %v1562_v2 = vpop.f32.mrb[4].mxu0  ;;  %v13917_v43 = vpop.f32.mrb[120].mxu1 }
 0x377   : > { %v13912_v60 = vadd.f32 %v1562_v2, %v13442_v35  ;;  %v9186_v14 = vpop.f32.mrb[5].mxu0  ;;  %9656 = vmatmul.mubr.f32.gmra.mrb[110].mxu0 %v11850_v0  ;;  %15404 = vst [vmem:[#allocation16_spill] sm:$0xff] %v13917_v43  ;;  %v9562_v26 = vpop.f32.mrb[121].mxu1  ;;  %v2521_v35 = vld [vmem:[%s12276_s24 + $0x83] sm:$0xff] }
 0x378   : > { %9658 = vmatprep.mubr.msk.f32.mxu0 %vm12041_vm0, %v13743_v34 }
 0x37a   : > { %v1567_v36 = vpop.f32.mrb[6].mxu0  ;;  %v13926_v2 = vpop.f32.mrb[122].mxu1 }
 0x37b   : > { %v13920_v39 = vadd.f32 %v1567_v36, %v13453_v7  ;;  %v9189_v48 = vpop.f32.mrb[7].mxu0  ;;  %9659 = vmatmul.mubr.f32.gmra.mrb[112].mxu0 %v11851_v8  ;;  %15405 = vst [vmem:[#allocation18_spill] sm:$0xff] %v13926_v2  ;;  %v9565_v14 = vpop.f32.mrb[123].mxu1  ;;  %v11852_v8 = vld [vmem:[%s12276_s24 + $0x8b] sm:$0xff] }
 0x37c   : > { %9661 = vmatprep.mubr.msk.f32.mxu0 %vm12041_vm0, %v13743_v34 }
 0x37e   : > { %v1572_v11 = vpop.f32.mrb[8].mxu0  ;;  %v13933_v7 = vpop.f32.mrb[124].mxu1 }
 0x37f   : > { %v13929_v0 = vadd.f32 %v1572_v11, %v13464_v25  ;;  %v9192_v43 = vpop.f32.mrb[9].mxu0  ;;  %9662 = vmatmul.mubr.f32.gmra.mrb[114].mxu0 %v2521_v35  ;;  %15406 = vst [vmem:[#allocation17_spill] sm:$0xff] %v13933_v7  ;;  %v9568_v36 = vpop.f32.mrb[125].mxu1  ;;  %v11853_v7 = vld [vmem:[%s12276_s24 + $0x93] sm:$0xff] }
 0x380   : > { %9664 = vmatprep.mubr.msk.f32.mxu0 %vm12041_vm0, %v13743_v34 }
 0x382   : > { %v1896_v48 = vpop.f32.mrb[10].mxu0  ;;  %v13942_v43 = vpop.f32.mrb[126].mxu1 }
 0x383   : > { %v9320_v26 = vpop.f32.mrb[11].mxu0  ;;  %9665 = vmatmul.mubr.f32.gmra.mrb[116].mxu0 %v11852_v8  ;;  %v2100_v2 = vadd.f32 %v1896_v48, %v13831_v21  ;;  %v9571_v11 = vpop.f32.mrb[127].mxu1  ;;  %v11854_v8 = vld [vmem:[%s12276_s24 + $0x9b] sm:$0xff] }
 0x384   : > { %9667 = vmatprep.mubr.msk.f32.mxu0 %vm12041_vm0, %v13743_v34 }
 0x385   : > { %v13940_v25 = vadd.f32 %v13572_v12, %v2100_v2 }
 0x386   : > { %v1901_v35 = vpop.f32.mrb[12].mxu0  ;;  %v13951_v48 = vpop.f32.mrb[128].mxu1 }
 0x387   : > { %v9323_v14 = vpop.f32.mrb[13].mxu0  ;;  %9668 = vmatmul.mubr.f32.gmra.mrb[118].mxu0 %v11853_v7  ;;  %v2101_v36 = vadd.f32 %v1901_v35, %v13843_v27  ;;  %v9574_v2 = vpop.f32.mrb[129].mxu1 }
 0x388   : > { %9670 = vmatprep.mubr.msk.f32.mxu0 %vm12041_vm0, %v13743_v34 }
 0x389   : > { %v13949_v21 = vadd.f32 %v13584_v17, %v2101_v36  ;;  %v11855_v36 = vld [vmem:[%s12276_s24 + $0xa3] sm:$0xff] }
 0x38a   : > { %v1906_v12 = vpop.f32.mrb[14].mxu0  ;;  %v13960_v7 = vpop.f32.mrb[130].mxu1 }
 0x38b   : > { %v9326_v26 = vpop.f32.mrb[15].mxu0  ;;  %9671 = vmatmul.mubr.f32.gmra.mrb[120].mxu0 %v11854_v8  ;;  %v2102_v11 = vadd.f32 %v1906_v12, %v13854_v42  ;;  %v9577_v35 = vpop.f32.mrb[131].mxu1 }
 0x38c   : > { %9673 = vmatprep.mubr.msk.f32.mxu0 %vm12041_vm0, %v13743_v34 }
 0x38d   : > { %v13958_v27 = vadd.f32 %v13596_v63, %v2102_v11  ;;  %v11856_v11 = vld [vmem:[%s12276_s24 + $0xab] sm:$0xff] }
 0x38e   : > { %v1911_v17 = vpop.f32.mrb[16].mxu0  ;;  %v13969_v12 = vpop.f32.mrb[132].mxu1 }
 0x38f   : > { %v9329_v14 = vpop.f32.mrb[17].mxu0  ;;  %9674 = vmatmul.mubr.f32.gmra.mrb[122].mxu0 %v11855_v36  ;;  %v2103_v2 = vadd.f32 %v1911_v17, %v13866_v41  ;;  %v9580_v26 = vpop.f32.mrb[133].mxu1 }
 0x390   : > { %9676 = vmatprep.mubr.msk.f32.mxu0 %vm12041_vm0, %v13743_v34 }
 0x391   : > { %v13967_v42 = vadd.f32 %v13608_v18, %v2103_v2  ;;  %v11857_v2 = vld [vmem:[%s12276_s24 + $0xb3] sm:$0xff] }
 0x392   : > { %v1916_v63 = vpop.f32.mrb[18].mxu0  ;;  %v13978_v17 = vpop.f32.mrb[134].mxu1 }
 0x393   : > { %v9332_v8 = vpop.f32.mrb[19].mxu0  ;;  %9677 = vmatmul.mubr.f32.gmra.mrb[124].mxu0 %v11856_v11  ;;  %v2104_v35 = vadd.f32 %v1916_v63, %v13879_v3  ;;  %v9583_v14 = vpop.f32.mrb[135].mxu1 }
 0x394   : > { %9679 = vmatprep.mubr.msk.f32.mxu0 %vm12041_vm0, %v13743_v34 }
 0x395   : > { %v13976_v41 = vadd.f32 %v13620_v37, %v2104_v35  ;;  %v11858_v35 = vld [vmem:[%s12276_s24 + $0xbb] sm:$0xff] }
 0x396   : > { %v1921_v18 = vpop.f32.mrb[20].mxu0  ;;  %v13987_v63 = vpop.f32.mrb[136].mxu1 }
 0x397   : > { %v9335_v36 = vpop.f32.mrb[21].mxu0  ;;  %9680 = vmatmul.mubr.f32.gmra.mrb[126].mxu0 %v11857_v2  ;;  %v2105_v26 = vadd.f32 %v1921_v18, %v13891_v29  ;;  %v9586_v8 = vpop.f32.mrb[137].mxu1 }
 0x398   : > { %9682 = vmatprep.mubr.msk.f32.mxu0 %vm12041_vm0, %v13743_v34 }
 0x399   : > { %v13985_v3 = vadd.f32 %v13632_v52, %v2105_v26  ;;  %v11859_v26 = vld [vmem:[%s12276_s24 + $0xc3] sm:$0xff] }
 0x39a   : > { %v1926_v37 = vpop.f32.mrb[22].mxu0  ;;  %v13996_v18 = vpop.f32.mrb[138].mxu1 }
 0x39b   : > { %v9338_v11 = vpop.f32.mrb[23].mxu0  ;;  %9683 = vmatmul.mubr.f32.gmra.mrb[128].mxu0 %v11858_v35  ;;  %v2106_v14 = vadd.f32 %v1926_v37, %v13902_v53  ;;  %v9589_v36 = vpop.f32.mrb[139].mxu1 }
 0x39c   : > { %9685 = vmatprep.mubr.msk.f32.mxu0 %vm12041_vm0, %v13743_v34 }
 0x39d   : > { %v13994_v29 = vadd.f32 %v13644_v55, %v2106_v14  ;;  %v11860_v14 = vld [vmem:[%s12276_s24 + $0xcb] sm:$0xff] }
 0x39e   : > { %v1931_v52 = vpop.f32.mrb[24].mxu0  ;;  %v14005_v37 = vpop.f32.mrb[140].mxu1 }
 0x39f   : > { %v9341_v2 = vpop.f32.mrb[25].mxu0  ;;  %9686 = vmatmul.mubr.f32.gmra.mrb[130].mxu0 %v11859_v26  ;;  %v2107_v8 = vadd.f32 %v1931_v52, %v13912_v60  ;;  %v9592_v11 = vpop.f32.mrb[141].mxu1 }
 0x3a0   : > { %9688 = vmatprep.mubr.msk.f32.mxu0 %vm12041_vm0, %v13743_v34 }
 0x3a1   : > { %v14003_v53 = vadd.f32 %v13656_v16, %v2107_v8  ;;  %v11861_v8 = vld [vmem:[%s12276_s24 + $0xd3] sm:$0xff] }
 0x3a2   : > { %v1936_v55 = vpop.f32.mrb[26].mxu0  ;;  %v14014_v52 = vpop.f32.mrb[142].mxu1 }
 0x3a3   : > { %v9344_v35 = vpop.f32.mrb[27].mxu0  ;;  %9689 = vmatmul.mubr.f32.gmra.mrb[132].mxu0 %v11860_v14  ;;  %v2108_v36 = vadd.f32 %v1936_v55, %v13920_v39  ;;  %v9595_v2 = vpop.f32.mrb[143].mxu1 }
 0x3a4   : > { %9691 = vmatprep.mubr.msk.f32.mxu0 %vm12041_vm0, %v13743_v34 }
 0x3a5   : > { %v14012_v60 = vadd.f32 %v13668_v61, %v2108_v36  ;;  %v11862_v36 = vld [vmem:[%s12276_s24 + $0xdb] sm:$0xff] }
 0x3a6   : > { %v1941_v16 = vpop.f32.mrb[28].mxu0 }
 0x3a7   : > { %v9347_v26 = vpop.f32.mrb[29].mxu0  ;;  %9692 = vmatmul.mubr.f32.gmra.mrb[134].mxu0 %v11861_v8  ;;  %v2109_v11 = vadd.f32 %v1941_v16, %v13929_v0  ;;  %v14023_v55 = vpop.f32.mrb[144].mxu1  ;;  %v2533_v0 = vld [vmem:[%s12276_s24 + $0xe3] sm:$0xff] }
 0x3a8   : > { %9694 = vmatprep.mubr.msk.f32.mxu0 %vm12041_vm0, %v13743_v34  ;;  %v9785_v35 = vpop.f32.mrb[145].mxu1 }
 0x3a9   : > { %v14021_v39 = vadd.f32 %v13680_v56, %v2109_v11 }
 0x3aa   : > { %v1946_v61 = vpop.f32.mrb[30].mxu0 }
 0x3ab   : > { %v9350_v14 = vpop.f32.mrb[31].mxu0  ;;  %9695 = vmatmul.mubr.f32.gmra.mrb[136].mxu0 %v11862_v36  ;;  %v2110_v2 = vadd.f32 %v1946_v61, %v13480_v32  ;;  %v14033_v26 = vpop.f32.mrb[146].mxu1 }
 0x3ac   : > { %9697 = vmatprep.mubr.msk.f32.mxu0 %vm12041_vm0, %v13743_v34  ;;  %v9788_v8 = vpop.f32.mrb[147].mxu1 }
 0x3ad   : > { %v14031_v16 = vadd.f32 %v13692_v40, %v2110_v2  ;;  %v11863_v2 = vld [vmem:[%s12276_s24 + $0xeb] sm:$0xff] }
 0x3ae   : > { %v1951_v56 = vpop.f32.mrb[32].mxu0 }
 0x3af   : > { %v9353_v11 = vpop.f32.mrb[33].mxu0  ;;  %9698 = vmatmul.mubr.f32.gmra.mrb[138].mxu0 %v2533_v0  ;;  %v2111_v35 = vadd.f32 %v1951_v56, %v13490_v51  ;;  %v14041_v61 = vpop.f32.mrb[148].mxu1 }
 0x3b0   : > { %9700 = vmatprep.mubr.msk.f32.mxu0 %vm12041_vm0, %v13743_v34  ;;  %v9791_v40 = vpop.f32.mrb[149].mxu1 }
 0x3b1   : > { %v14039_v32 = vadd.f32 %v13704_v50, %v2111_v35  ;;  %v11864_v40 = vld [vmem:[%s12276_s24 + $0xf3] sm:$0xff] }
 0x3b2   : > { %v1956_v14 = vpop.f32.mrb[34].mxu0 }
 0x3b3   : > { %v9356_v36 = vpop.f32.mrb[35].mxu0  ;;  %9701 = vmatmul.mubr.f32.gmra.mrb[140].mxu0 %v11863_v2  ;;  %v2112_v8 = vadd.f32 %v1956_v14, %v13500_v62  ;;  %v14050_v0 = vpop.f32.mrb[150].mxu1 }
 0x3b4   : > { %9703 = vmatprep.mubr.msk.f32.mxu0 %vm12041_vm0, %v13743_v34  ;;  %v9794_v56 = vpop.f32.mrb[151].mxu1 }
 0x3b5   : > { %v14048_v51 = vadd.f32 %v13716_v9, %v2112_v8  ;;  %v11865_v56 = vld [vmem:[%s12276_s24 + $0xfb] sm:$0xff] }
 0x3b6   : > { %v1961_v50 = vpop.f32.mrb[36].mxu0 }
 0x3b7   : > { %v2113_v11 = vadd.f32 %v1961_v50, %v13510_v13  ;;  %v9359_v35 = vpop.f32.mrb[37].mxu0  ;;  %9704 = vmatmul.mubr.f32.gmra.mrb[142].mxu0 %v11864_v40  ;;  %v14059_v14 = vpop.f32.mrb[152].mxu1  ;;  %v2537_v13 = vld [vmem:[%s12276_s24 + $0x103] sm:$0xff] }
 0x3b8   : > { %9706 = vmatprep.mubr.msk.f32.mxu0 %vm12041_vm0, %v13743_v34  ;;  %v9797_v36 = vpop.f32.mrb[153].mxu1 }
 0x3b9   : > { %v14057_v62 = vadd.f32 %v13728_v54, %v2113_v11 }
 0x3ba   : > { %v1966_v9 = vpop.f32.mrb[38].mxu0 }
 0x3bb   : > { %v2114_v2 = vadd.f32 %v1966_v9, %v13520_v22  ;;  %v9362_v8 = vpop.f32.mrb[39].mxu0  ;;  %9707 = vmatmul.mubr.f32.gmra.mrb[144].mxu0 %v11865_v56  ;;  %v14069_v54 = vpop.f32.mrb[154].mxu1  ;;  %v2538_v22 = vld [vmem:[%s12276_s24 + $0x10b] sm:$0xff] }
 0x3bc   : > { %9709 = vmatprep.mubr.msk.f32.mxu0 %vm12041_vm0, %v13743_v34  ;;  %v9800_v35 = vpop.f32.mrb[155].mxu1 }
 0x3bd   : > { %v14067_v50 = vadd.f32 %v13740_v46, %v2114_v2 }
 0x3be   : > { %v1971_v11 = vpop.f32.mrb[40].mxu0 }
 0x3bf   : > { %v2115_v40 = vadd.f32 %v1971_v11, %v13530_v4  ;;  %v9365_v36 = vpop.f32.mrb[41].mxu0  ;;  %9710 = vmatmul.mubr.f32.gmra.mrb[146].mxu0 %v2537_v13  ;;  %v14079_v8 = vpop.f32.mrb[156].mxu1 }
 0x3c0   : > { %9712 = vmatprep.mubr.msk.f32.mxu0 %vm12041_vm0, %v13743_v34  ;;  %v9803_v2 = vpop.f32.mrb[157].mxu1 }
 0x3c1   : > { %v14077_v9 = vadd.f32 %v13754_v15, %v2115_v40  ;;  %v3747_v40 = vld [vmem:[%s14093_s19] sm:$0xff] }
 0x3c2   : > { %v1976_v46 = vpop.f32.mrb[42].mxu0 }
 0x3c3   : > { %v2116_v56 = vadd.f32 %v1976_v46, %v13540_v47  ;;  %v9368_v35 = vpop.f32.mrb[43].mxu0  ;;  %9713 = vmatmul.mubr.f32.gmra.mrb[148].mxu0 %v2538_v22  ;;  %v14088_v13 = vpop.f32.mrb[158].mxu1  ;;  %v12042_v47 = vmov 0   ;;  %v11866_v22 = vld [vmem:[%s12276_s24 + $0x113] sm:$0xff] }
 0x3c4   : > { %9715 = vmatprep.mubr.msk.f32.mxu0 %vm12041_vm0, %v13743_v34  ;;  %11842 = vset.pattern.permute.xlu0 %v12042_v47  ;;  %v9806_v11 = vpop.f32.mrb[159].mxu1 }
 0x3c5   : > { %v14086_v4 = vadd.f32 %v13766_v38, %v2116_v56  ;;  %11843 = vset.pattern.permute.xlu1 %v12042_v47  ;;  %3790 = vperm.xlu0 %11842, %v3747_v40   ;;  %v3748_v47 = vld [vmem:[%s14093_s19 + $0x8] sm:$0xff] }
 0x3c6   : > { %v1981_v15 = vpop.f32.mrb[44].mxu0  ;;  %v11867_v11 = vld [vmem:[%s12276_s24 + $0x11b] sm:$0xff] }
 0x3c7   : > { %v2117_v36 = vadd.f32 %v1981_v15, %v13550_v28  ;;  %v9371_v38 = vpop.f32.mrb[45].mxu0  ;;  %9716 = vmatmul.mubr.f32.gmra.mrb[150].mxu0 %v11866_v22  ;;  %v14103_v2 = vpop.f32.mrb[160].mxu1  ;;  %v3749_v22 = vld [vmem:[%s14093_s19 + $0x10] sm:$0xff] }
 0x3c8   : > { %9718 = vmatprep.mubr.msk.f32.mxu0 %vm12041_vm0, %v13743_v34  ;;  %v9809_v35 = vpop.f32.mrb[161].mxu1  ;;  %3800 = vperm.xlu1 %11843, %v3749_v22   ;;  %v11869_v22 = vld [vmem:[%s12276_s24 + $0x12b] sm:$0xff] }
 0x3c9   : > { %v14101_v46 = vadd.f32 %v13778_v10, %v2117_v36  ;;  %3795 = vperm.xlu0 %11842, %v3748_v47   ;;  %v3751_v35 = vld [vmem:[%s14093_s19 + $0x20] sm:$0xff] }
 0x3ca   : > { %v1986_v56 = vpop.f32.mrb[46].mxu0 }
 0x3cb   : > { %v2118_v28 = vadd.f32 %v1986_v56, %v13560_v59  ;;  %v9374_v15 = vpop.f32.mrb[47].mxu0  ;;  %9719 = vmatmul.mubr.f32.gmra.mrb[152].mxu0 %v11867_v11  ;;  %v14113_v10 = vpop.f32.mrb[162].mxu1 }
 0x3cc   : > { %9721 = vmatprep.mubr.msk.f32.mxu0 %vm12041_vm0, %v13743_v34  ;;  %v9812_v38 = vpop.f32.mrb[163].mxu1  ;;  %v11868_v15 = vld [vmem:[%s12276_s24 + $0x123] sm:$0xff] }
 0x3cd   : > { %v14111_v40 = vadd.f32 %v13790_v20, %v2118_v28  ;;  %3810 = vperm.xlu0 %11842, %v3751_v35   ;;  %v3750_v38 = vld [vmem:[%s14093_s19 + $0x18] sm:$0xff] }
 0x3ce   : > { %v1991_v36 = vpop.f32.mrb[48].mxu0  ;;  %3805 = vperm.xlu1 %11843, %v3750_v38   ;;  %v11870_v38 = vld [vmem:[%s12276_s24 + $0x133] sm:$0xff] }
 0x3cf   : > { %15407 = vst [vmem:[#allocation20_spill] sm:$0xff] %v14111_v40  ;;  %v2119_v59 = vadd.f32 %v1991_v36, %v13570_v30  ;;  %v9377_v56 = vpop.f32.mrb[49].mxu0  ;;  %9722 = vmatmul.mubr.f32.gmra.mrb[154].mxu0 %v11868_v15  ;;  %v14124_v47 = vpop.f32.mrb[164].mxu1  ;;  %v3753_v40 = vld [vmem:[%s14093_s19 + $0x30] sm:$0xff]  ;;  %v3752_v15 = vld [vmem:[%s14093_s19 + $0x28] sm:$0xff] }
 0x3d0   : > { %9724 = vmatprep.mubr.msk.f32.mxu0 %vm12041_vm0, %v13743_v34  ;;  %v9815_v11 = vpop.f32.mrb[165].mxu1 }
 0x3d1   : > { %v14122_v20 = vadd.f32 %v13801_v31, %v2119_v59  ;;  %3820 = vperm.xlu0 %11842, %v3753_v40   ;;  %v3755_v11 = vld [vmem:[%s14093_s19 + $0x40] sm:$0xff] }
 0x3d2   : > { %v1996_v28 = vpop.f32.mrb[50].mxu0  ;;  %3815 = vperm.xlu1 %11843, %v3752_v15   ;;  %v11871_v15 = vld [vmem:[%s12276_s24 + $0x13b] sm:$0xff] }
 0x3d3   : > { %v2120_v30 = vadd.f32 %v1996_v28, %v13582_v5  ;;  %v9380_v36 = vpop.f32.mrb[51].mxu0  ;;  %9725 = vmatmul.mubr.f32.gmra.mrb[156].mxu0 %v11869_v22  ;;  %v14135_v35 = vpop.f32.mrb[166].mxu1  ;;  %v3754_v22 = vld [vmem:[%s14093_s19 + $0x38] sm:$0xff] }
 0x3d4   : > { %9727 = vmatprep.mubr.msk.f32.mxu0 %vm12041_vm0, %v13743_v34  ;;  %v9818_v56 = vpop.f32.mrb[167].mxu1 }
 0x3d5   : > { %v14133_v31 = vadd.f32 %v13815_v23, %v2120_v30  ;;  %3830 = vperm.xlu0 %11842, %v3755_v11   ;;  %v3757_v56 = vld [vmem:[%s14093_s19 + $0x50] sm:$0xff] }
 0x3d6   : > { %v2001_v59 = vpop.f32.mrb[52].mxu0  ;;  %3825 = vperm.xlu1 %11843, %v3754_v22   ;;  %v11872_v22 = vld [vmem:[%s12276_s24 + $0x143] sm:$0xff] }
 0x3d7   : > { %15408 = vst [vmem:[#allocation23_spill] sm:$0xff] %v14133_v31  ;;  %v2121_v5 = vadd.f32 %v2001_v59, %v13594_v49  ;;  %v9383_v28 = vpop.f32.mrb[53].mxu0  ;;  %9728 = vmatmul.mubr.f32.gmra.mrb[158].mxu0 %v11870_v38  ;;  %v14146_v40 = vpop.f32.mrb[168].mxu1  ;;  %v3756_v38 = vld [vmem:[%s14093_s19 + $0x48] sm:$0xff] }
 0x3d8   : > { %9730 = vmatprep.mubr.msk.f32.mxu0 %vm12041_vm0, %v13743_v34  ;;  %v9821_v36 = vpop.f32.mrb[169].mxu1 }
 0x3d9   : > { %v14144_v23 = vadd.f32 %v13828_v1, %v2121_v5  ;;  %3840 = vperm.xlu0 %11842, %v3757_v56   ;;  %v3759_v36 = vld [vmem:[%s14093_s19 + $0x60] sm:$0xff] }
 0x3da   : > { %v2006_v30 = vpop.f32.mrb[54].mxu0  ;;  %3835 = vperm.xlu1 %11843, %v3756_v38   ;;  %v11873_v38 = vld [vmem:[%s12276_s24 + $0x14b] sm:$0xff] }
 0x3db   : > { %15409 = vst [vmem:[#allocation26_spill] sm:$0xff] %v14144_v23  ;;  %v2122_v49 = vadd.f32 %v2006_v30, %v13606_v24  ;;  %v9386_v59 = vpop.f32.mrb[55].mxu0  ;;  %9731 = vmatmul.mubr.f32.gmra.mrb[160].mxu0 %v11871_v15  ;;  %v14157_v11 = vpop.f32.mrb[170].mxu1  ;;  %v3758_v15 = vld [vmem:[%s14093_s19 + $0x58] sm:$0xff] }
 0x3dc   : > { %9733 = vmatprep.mubr.msk.f32.mxu0 %vm12041_vm0, %v13743_v34  ;;  %v9824_v28 = vpop.f32.mrb[171].mxu1  ;;  %v3770_v23 = vld [vmem:[%s14093_s19 + $0xb8] sm:$0xff] }
 0x3dd   : > { %v14155_v1 = vadd.f32 %v13840_v57, %v2122_v49  ;;  %3850 = vperm.xlu0 %11842, %v3759_v36   ;;  %v3761_v28 = vld [vmem:[%s14093_s19 + $0x70] sm:$0xff] }
 0x3de   : > { %v2011_v5 = vpop.f32.mrb[56].mxu0  ;;  %3845 = vperm.xlu1 %11843, %v3758_v15   ;;  %v2548_v15 = vld [vmem:[%s12276_s24 + $0x15b] sm:$0xff] }
 0x3df   : > { %15410 = vst [vmem:[#allocation29_spill] sm:$0xff] %v14155_v1  ;;  %v2123_v24 = vadd.f32 %v2011_v5, %v13618_v33  ;;  %v9389_v30 = vpop.f32.mrb[57].mxu0  ;;  %9734 = vmatmul.mubr.f32.gmra.mrb[162].mxu0 %v11872_v22  ;;  %v14168_v56 = vpop.f32.mrb[172].mxu1  ;;  %v3768_v1 = vld [vmem:[%s14093_s19 + $0xa8] sm:$0xff] }
 0x3e0   : > { %9736 = vmatprep.mubr.msk.f32.mxu0 %vm12041_vm0, %v13743_v34  ;;  %v9827_v59 = vpop.f32.mrb[173].mxu1 }
 0x3e1   : > { %v14166_v57 = vadd.f32 %v13851_v45, %v2123_v24  ;;  %3860 = vperm.xlu0 %11842, %v3761_v28   ;;  %v15412_v45 = vld [vmem:[#allocation28_spill] sm:$0xff]  ;;  %v3760_v59 = vld [vmem:[%s14093_s19 + $0x68] sm:$0xff] }
 0x3e2   : > { %v2016_v49 = vpop.f32.mrb[58].mxu0  ;;  %3855 = vperm.xlu1 %11843, %v3760_v59   ;;  %v2549_v59 = vld [vmem:[%s12276_s24 + $0x163] sm:$0xff] }
 0x3e3   : > { %15411 = vst [vmem:[#allocation31_spill] sm:$0xff] %v14166_v57  ;;  %v2124_v33 = vadd.f32 %v2016_v49, %v13630_v19  ;;  %v9392_v5 = vpop.f32.mrb[59].mxu0  ;;  %9737 = vmatmul.mubr.f32.gmra.mrb[164].mxu0 %v11873_v38  ;;  %v14179_v24 = vpop.f32.mrb[174].mxu1  ;;  %v3763_v19 = vld [vmem:[%s14093_s19 + $0x80] sm:$0xff]  ;;  %v15414_v49 = vld [vmem:[#allocation32_spill] sm:$0xff] }
 0x3e4   : > { %9739 = vmatprep.mubr.msk.f32.mxu0 %vm12041_vm0, %v13743_v34  ;;  %v9830_v22 = vpop.f32.mrb[175].mxu1  ;;  %v11874_v57 = vld [vmem:[%s12276_s24 + $0x153] sm:$0xff] }
 0x3e5   : > { %v14177_v36 = vadd.f32 %v15412_v45, %v2124_v33  ;;  %3870 = vperm.xlu0 %11842, %v3763_v19  }
 0x3e6   : > { %v2021_v30 = vpop.f32.mrb[60].mxu0 }
 0x3e7   : > { %15413 = vst [vmem:[#allocation30_spill] sm:$0xff] %v14177_v36  ;;  %v2125_v5 = vadd.f32 %v2021_v30, %v15414_v49  ;;  %v9395_v38 = vpop.f32.mrb[61].mxu0  ;;  %9740 = vmatmul.mubr.f32.gmra.mrb[166].mxu0 %v11874_v57  ;;  %v14191_v33 = vpop.f32.mrb[176].mxu1  ;;  %v3762_v30 = vld [vmem:[%s14093_s19 + $0x78] sm:$0xff]  ;;  %v3765_v49 = vld [vmem:[%s14093_s19 + $0x90] sm:$0xff] }
 0x3e8   : > { %9742 = vmatprep.mubr.msk.f32.mxu0 %vm12041_vm0, %v13743_v34  ;;  %v9833_v22 = vpop.f32.mrb[177].mxu1  ;;  %v15416_v38 = vld [vmem:[#allocation35_spill] sm:$0xff]  ;;  %3865 = vperm.xlu1 %11843, %v3762_v30  }
 0x3e9   : > { %v14189_v28 = vadd.f32 %v13876_v44, %v2125_v5  ;;  %3880 = vperm.xlu0 %11842, %v3765_v49   ;;  %v2550_v30 = vld [vmem:[%s12276_s24 + $0x16b] sm:$0xf] }
 0x3ea   : > { %v2026_v45 = vpop.f32.mrb[62].mxu0 }
 0x3eb   : > { %15415 = vst [vmem:[#allocation33_spill] sm:$0xff] %v14189_v28  ;;  %v2126_v57 = vadd.f32 %v2026_v45, %v15416_v38  ;;  %v9398_v36 = vpop.f32.mrb[63].mxu0  ;;  %9743 = vmatmul.mubr.f32.gmra.mrb[168].mxu0 %v2548_v15  ;;  %v14202_v19 = vpop.f32.mrb[178].mxu1  ;;  %v3764_v28 = vld [vmem:[%s14093_s19 + $0x88] sm:$0xff]  ;;  %v3767_v45 = vld [vmem:[%s14093_s19 + $0xa0] sm:$0xff] }
 0x3ec   : > { %9745 = vmatprep.mubr.msk.f32.mxu0 %vm12041_vm0, %v13743_v34  ;;  %v9836_v22 = vpop.f32.mrb[179].mxu1  ;;  %v15418_v36 = vld [vmem:[#allocation34_spill] sm:$0xff]  ;;  %3875 = vperm.xlu1 %11843, %v3764_v28   ;;  %v3248_v28 = vld [vmem:[%s12276_s24 + $0x2d] sm:$0xff] }
 0x3ed   : > { %v14200_v44 = vadd.f32 %v13888_v58, %v2126_v57  ;;  %3890 = vperm.xlu0 %11842, %v3767_v45  }
 0x3ee   : > { %v2031_v5 = vpop.f32.mrb[64].mxu0 }
 0x3ef   : > { %15417 = vst [vmem:[#allocation28_spill] sm:$0xff] %v14200_v44  ;;  %v2127_v15 = vadd.f32 %v2031_v5, %v15418_v36  ;;  %v9401_v38 = vpop.f32.mrb[65].mxu0  ;;  %9746 = vmatmul.mubr.f32.gmra.mrb[170].mxu0 %v2549_v59  ;;  %v14213_v49 = vpop.f32.mrb[180].mxu1  ;;  %v3766_v44 = vld [vmem:[%s14093_s19 + $0x98] sm:$0xff]  ;;  %v3769_v5 = vld [vmem:[%s14093_s19 + $0xb0] sm:$0xff] }
 0x3f0   : > { %9748 = vmatprep.mubr.msk.f32.mxu0 %vm12041_vm0, %v13743_v34  ;;  %v9839_v22 = vpop.f32.mrb[181].mxu1  ;;  %v15420_v36 = vld [vmem:[#allocation37_spill] sm:$0xff]  ;;  %3885 = vperm.xlu1 %11843, %v3766_v44  }
 0x3f1   : > { %v14211_v58 = vadd.f32 %v13899_v6, %v2127_v15  ;;  %3900 = vperm.xlu0 %11842, %v3769_v5   ;;  %v15421_v6 = vld [vmem:[#allocation15_spill] sm:$0xff]  ;;  %v3249_v44 = vld [vmem:[%s12276_s24 + $0x35] sm:$0xff] }
 0x3f2   : > { %v2036_v57 = vpop.f32.mrb[66].mxu0  ;;  %v15425_v5 = vld [vmem:[#allocation16_spill] sm:$0xff] }
 0x3f3   : > { %15419 = vst [vmem:[#allocation32_spill] sm:$0xff] %v14211_v58  ;;  %v2128_v59 = vadd.f32 %v2036_v57, %v15420_v36  ;;  %v9404_v38 = vpop.f32.mrb[67].mxu0  ;;  %9749 = vmatmul.mubr.f32.gmra.mrb[172].mxu0 %v2550_v30  ;;  %v14224_v15 = vpop.f32.mrb[182].mxu1  ;;  %v3771_v57 = vld [vmem:[%s14093_s19 + $0xc0] sm:$0xff]  ;;  %v15424_v36 = vld [vmem:[#allocation36_spill] sm:$0xff] }
 0x3f4   : > { %9938 = vmatprep.mubr.msk.f32.mxu0 %vm12041_vm0, %v13743_v34  ;;  %15423 = vst [vmem:[#allocation34_spill] sm:$0xff] %v14224_v15  ;;  %v9842_v58 = vpop.f32.mrb[183].mxu1  ;;  %3895 = vperm.xlu1 %11843, %v3768_v1  }
 0x3f5   : > { %v14222_v45 = vadd.f32 %v15421_v6, %v2128_v59  ;;  %3910 = vperm.xlu0 %11842, %v3771_v57   ;;  %v3250_v57 = vld [vmem:[%s12276_s24 + $0x3d] sm:$0xff] }
 0x3f6   : > { %v2041_v22 = vpop.f32.mrb[68].mxu0 }
 0x3f7   : > { %15422 = vst [vmem:[#allocation35_spill] sm:$0xff] %v14222_v45  ;;  %v2129_v30 = vadd.f32 %v2041_v22, %v15424_v36  ;;  %v9407_v38 = vpop.f32.mrb[69].mxu0  ;;  %9939 = vmatmul.mubr.f32.vlgmr.msra.gmra.mrb[174].mxu0 %v3248_v28  ;;  %v14235_v6 = vpop.f32.mrb[184].mxu1  ;;  %v3773_v22 = vld [vmem:[%s14093_s19 + $0xd0] sm:$0xff]  ;;  %v15428_v36 = vld [vmem:[#allocation39_spill] sm:$0xff] }
 0x3f8   : > { %9941 = vmatprep.mubr.msk.f32.mxu0 %vm12041_vm0, %v13743_v34  ;;  %15427 = vst [vmem:[#allocation15_spill] sm:$0xff] %v14235_v6  ;;  %v9845_v58 = vpop.f32.mrb[185].mxu1  ;;  %3905 = vperm.xlu1 %11843, %v3770_v23   ;;  %v14240_v34 = vld [vmem:[#allocation2] sm:$0xff]  ;;  %v3772_v6 = vld [vmem:[%s14093_s19 + $0xc8] sm:$0xff] }
 0x3f9   : > { %v14233_v59 = vadd.f32 %v15425_v5, %v2129_v30  ;;  %3920 = vperm.xlu0 %11842, %v3773_v22   ;;  %v15429_v30 = vld [vmem:[#allocation18_spill] sm:$0xff] }
 0x3fa   : > { %v2046_v45 = vpop.f32.mrb[70].mxu0  ;;  %v3251_v22 = vld [vmem:[%s12276_s24 + $0x45] sm:$0xff] }
 0x3fb   : > { %15426 = vst [vmem:[#allocation37_spill] sm:$0xff] %v14233_v59  ;;  %v2130_v28 = vadd.f32 %v2046_v45, %v15428_v36  ;;  %v9410_v1 = vpop.f32.mrb[71].mxu0  ;;  %9942 = vmatmul.mubr.f32.gmra.mrb[176].mxu0 %v3249_v44  ;;  %v14248_v5 = vpop.f32.mrb[186].mxu1  ;;  %v3775_v45 = vld [vmem:[%s14093_s19 + $0xe0] sm:$0xff] }
 0x3fc   : > { %9944 = vmatprep.mubr.msk.f32.mxu0 %vm12041_vm0, %v14240_v34  ;;  %15431 = vst [vmem:[#allocation16_spill] sm:$0xff] %v14248_v5  ;;  %v9848_v59 = vpop.f32.mrb[187].mxu1  ;;  %v15432_v44 = vld [vmem:[#allocation38_spill] sm:$0xff]  ;;  %3915 = vperm.xlu1 %11843, %v3772_v6   ;;  %v3777_v6 = vld [vmem:[%s14093_s19 + $0xf0] sm:$0xff] }
 0x3fd   : > { %v14246_v38 = vadd.f32 %v15429_v30, %v2130_v28  ;;  %3930 = vperm.xlu0 %11842, %v3775_v45   ;;  %v15433_v28 = vld [vmem:[#allocation17_spill] sm:$0xff] }
 0x3fe   : > { %v2051_v58 = vpop.f32.mrb[72].mxu0  ;;  %v4164_v59 = vld [vmem:[#allocation8 + $0x80] sm:$0xff] }
 0x3ff   : > { %15430 = vst [vmem:[#allocation36_spill] sm:$0xff] %v14246_v38  ;;  %v2131_v23 = vadd.f32 %v2051_v58, %v15432_v44  ;;  %v9413_v36 = vpop.f32.mrb[73].mxu0  ;;  %9945 = vmatmul.mubr.f32.gmra.mrb[178].mxu0 %v3250_v57  ;;  %v14259_v30 = vpop.f32.mrb[188].mxu1  ;;  %v4165_v38 = vld [vmem:[#allocation8 + $0x88] sm:$0xff]  ;;  %v3774_v58 = vld [vmem:[%s14093_s19 + $0xd8] sm:$0xff]  ;;  %v15435_v57 = vld [vmem:[#allocation40_spill] sm:$0xff] }
 0x400   : > { %9947 = vmatprep.mubr.msk.f32.mxu0 %vm12041_vm0, %v14240_v34  ;;  %v11137_v31 = vpack.c.bf16 %v4165_v38, %v4164_v59  ;;  %v9851_v15 = vpop.f32.mrb[189].mxu1  ;;  %3925 = vperm.xlu1 %11843, %v3774_v58   ;;  %v3252_v45 = vld [vmem:[%s12276_s24 + $0x4d] sm:$0xff]  ;;  %v15437_v59 = vld [vmem:[#allocation22_spill] sm:$0xff] }
 0x401   : > { %v14257_v1 = vadd.f32 %v15433_v28, %v2131_v23  ;;  %3940 = vperm.xlu0 %11842, %v3777_v6   ;;  %v3776_v28 = vld [vmem:[%s14093_s19 + $0xe8] sm:$0xff] }
 0x402   : > { %v2056_v5 = vpop.f32.mrb[74].mxu0  ;;  %11138 = vmatprep.subr.bf16.mxu1 %v11137_v31 }
 0x403   : > { %15434 = vst [vmem:[#allocation39_spill] sm:$0xff] %v14257_v1  ;;  %v2132_v44 = vadd.f32 %v2056_v5, %v15435_v57  ;;  %v9416_v36 = vpop.f32.mrb[75].mxu0  ;;  %9948 = vmatmul.mubr.f32.gmra.mrb[180].mxu0 %v3251_v22  ;;  %11140 = vmatpush3.bf16.msra.mxu1 %v11137_v31  ;;  %v14270_v15 = vpop.f32.mrb[190].mxu1  ;;  %v3779_v22 = vld [vmem:[%s14093_s19 + $0x100] sm:$0xff] }
 0x404   : > { %9950 = vmatprep.mubr.msk.f32.mxu0 %vm12041_vm0, %v14240_v34  ;;  %v9854_v5 = vpop.f32.mrb[191].mxu1  ;;  %3935 = vperm.xlu1 %11843, %v3776_v28  }
 0x405   : > { %v14268_v23 = vadd.f32 %v13942_v43, %v2132_v44  ;;  %v3253_v43 = vld [vmem:[%s12276_s24 + $0x55] sm:$0xff]  ;;  %3950 = vperm.xlu0 %11842, %v3779_v22  }
 0x406   : > { %v2061_v38 = vpop.f32.mrb[76].mxu0  ;;  %v3778_v5 = vld [vmem:[%s14093_s19 + $0xf8] sm:$0xff] }
 0x407   : > { %15436 = vst [vmem:[#allocation18_spill] sm:$0xff] %v14268_v23  ;;  %v2133_v58 = vadd.f32 %v2061_v38, %v15437_v59  ;;  %v9419_v57 = vpop.f32.mrb[77].mxu0  ;;  %9951 = vmatmul.mubr.f32.gmra.mrb[182].mxu0 %v3252_v45  ;;  %v14281_v6 = vpop.f32.mrb[192].mxu1  ;;  %v3781_v38 = vld [vmem:[%s14093_s19 + $0x110] sm:$0xff]  ;;  %v15439_v59 = vld [vmem:[#allocation19_spill] sm:$0xff] }
 0x408   : > { %9953 = vmatprep.mubr.msk.f32.mxu0 %vm12041_vm0, %v14240_v34  ;;  %v9857_v36 = vpop.f32.mrb[193].mxu1  ;;  %3945 = vperm.xlu1 %11843, %v3778_v5   ;;  %v3785_v23 = vld [vmem:[%s14093_s19 + $0x130] sm:$0xff] }
 0x409   : > { %v14279_v31 = vadd.f32 %v13951_v48, %v2133_v58  ;;  %v3254_v48 = vld [vmem:[%s12276_s24 + $0x5d] sm:$0xff]  ;;  %3960 = vperm.xlu0 %11842, %v3781_v38  }
 0x40a   : > { %v2066_v44 = vpop.f32.mrb[78].mxu0 }
 0x40b   : > { %15438 = vst [vmem:[#allocation38_spill] sm:$0xff] %v14279_v31  ;;  %v2134_v45 = vadd.f32 %v2066_v44, %v15439_v59  ;;  %v9422_v57 = vpop.f32.mrb[79].mxu0  ;;  %9954 = vmatmul.mubr.f32.gmra.mrb[184].mxu0 %v3253_v43  ;;  %v14292_v22 = vpop.f32.mrb[194].mxu1  ;;  %v3780_v31 = vld [vmem:[%s14093_s19 + $0x108] sm:$0xff]  ;;  %v3783_v44 = vld [vmem:[%s14093_s19 + $0x120] sm:$0xff]  ;;  %v15441_v59 = vld [vmem:[#allocation13_spill] sm:$0xff] }
 0x40c   : > { %9956 = vmatprep.mubr.msk.f32.mxu0 %vm12041_vm0, %v14240_v34  ;;  %v9860_v36 = vpop.f32.mrb[195].mxu1  ;;  %3955 = vperm.xlu1 %11843, %v3780_v31  }
 0x40d   : > { %v14290_v28 = vadd.f32 %v13960_v7, %v2134_v45  ;;  %v3255_v7 = vld [vmem:[%s12276_s24 + $0x65] sm:$0xff]  ;;  %3970 = vperm.xlu0 %11842, %v3783_v44  }
 0x40e   : > { %v2071_v58 = vpop.f32.mrb[80].mxu0 }
 0x40f   : > { %15440 = vst [vmem:[#allocation17_spill] sm:$0xff] %v14290_v28  ;;  %v2135_v43 = vadd.f32 %v2071_v58, %v15441_v59  ;;  %v9425_v57 = vpop.f32.mrb[81].mxu0  ;;  %9957 = vmatmul.mubr.f32.gmra.mrb[186].mxu0 %v3254_v48  ;;  %v14303_v38 = vpop.f32.mrb[196].mxu1  ;;  %v3782_v28 = vld [vmem:[%s14093_s19 + $0x118] sm:$0xff] }
 0x410   : > { %9959 = vmatprep.mubr.msk.f32.mxu0 %vm12041_vm0, %v14240_v34  ;;  %v9863_v36 = vpop.f32.mrb[197].mxu1  ;;  %v15443_v58 = vld [vmem:[#allocation21_spill] sm:$0xff]  ;;  %3965 = vperm.xlu1 %11843, %v3782_v28   ;;  %v4166_v28 = vld [vmem:[#allocation8 + $0x90] sm:$0xff] }
 0x411   : > { %v14301_v5 = vadd.f32 %v13969_v12, %v2135_v43  ;;  %v3256_v12 = vld [vmem:[%s12276_s24 + $0x6d] sm:$0xff]  ;;  %3980 = vperm.xlu0 %11842, %v3785_v23  }
 0x412   : > { %v2076_v45 = vpop.f32.mrb[82].mxu0  ;;  %v3784_v36 = vld [vmem:[%s14093_s19 + $0x128] sm:$0xff] }
 0x413   : > { %15442 = vst [vmem:[#allocation40_spill] sm:$0xff] %v14301_v5  ;;  %v2136_v59 = vadd.f32 %v2076_v45, %v15443_v58  ;;  %v9428_v48 = vpop.f32.mrb[83].mxu0  ;;  %9960 = vmatmul.mubr.f32.gmra.mrb[188].mxu0 %v3255_v7  ;;  %v14314_v44 = vpop.f32.mrb[198].mxu1  ;;  %v15445_v5 = vld [vmem:[#allocation25_spill] sm:$0xff]  ;;  %v4167_v58 = vld [vmem:[#allocation8 + $0x98] sm:$0xff] }
 0x414   : > { %9962 = vmatprep.mubr.msk.f32.mxu0 %vm12041_vm0, %v14240_v34  ;;  %v9866_v57 = vpop.f32.mrb[199].mxu1  ;;  %3975 = vperm.xlu1 %11843, %v3784_v36   ;;  %v3787_v48 = vld [vmem:[%s14093_s19 + $0x140] sm:$0xf]  ;;  %v11141_v23 = vpack.c.bf16 %v4167_v58, %v4166_v28 }
 0x415   : > { %v14312_v31 = vadd.f32 %v13978_v17, %v2136_v59  ;;  %v3257_v17 = vld [vmem:[%s12276_s24 + $0x75] sm:$0xff]  ;;  %3990 = vperm.xlu0 %11842, %v3787_v48   ;;  %v3258_v28 = vld [vmem:[%s12276_s24 + $0x7d] sm:$0xff] }
 0x416   : > { %v2081_v43 = vpop.f32.mrb[84].mxu0  ;;  %11142 = vmatprep.subr.bf16.mxu1 %v11141_v23 }
 0x417   : > { %15444 = vst [vmem:[#allocation22_spill] sm:$0xff] %v14312_v31  ;;  %v2137_v45 = vadd.f32 %v2081_v43, %v15445_v5  ;;  %v9431_v7 = vpop.f32.mrb[85].mxu0  ;;  %9963 = vmatmul.mubr.f32.gmra.mrb[190].mxu0 %v3256_v12  ;;  %v14325_v57 = vpop.f32.mrb[200].mxu1  ;;  %v3786_v12 = vld [vmem:[%s14093_s19 + $0x138] sm:$0xff]  ;;  %11144 = vmatpush3.bf16.msra.mxu1 %v11141_v23 }
 0x418   : > { %9965 = vmatprep.mubr.msk.f32.mxu0 %vm12041_vm0, %v14240_v34  ;;  %v9869_v43 = vpop.f32.mrb[201].mxu1  ;;  %v15447_v7 = vld [vmem:[#allocation24_spill] sm:$0xff]  ;;  %3985 = vperm.xlu1 %11843, %v3786_v12   ;;  %v15449_v12 = vld [vmem:[#allocation27_spill] sm:$0xff] }
 0x419   : > { %v14323_v59 = vadd.f32 %v13987_v63, %v2137_v45  ;;  %v15448_v43 = vld [vmem:[#allocation14_spill] sm:$0xff] }
 0x41a   : > { %v2086_v5 = vpop.f32.mrb[86].mxu0 }
 0x41b   : > { %15446 = vst [vmem:[#allocation19_spill] sm:$0xff] %v14323_v59  ;;  %v2138_v36 = vadd.f32 %v2086_v5, %v15447_v7  ;;  %v9434_v31 = vpop.f32.mrb[87].mxu0  ;;  %9966 = vmatmul.mubr.f32.gmra.mrb[192].mxu0 %v3257_v17  ;;  %v14335_v45 = vpop.f32.mrb[202].mxu1 }
 0x41c   : > { %9968 = vmatprep.mubr.msk.f32.mxu0 %vm12041_vm0, %v14240_v34  ;;  %v9872_v48 = vpop.f32.mrb[203].mxu1  ;;  %v3259_v31 = vld [vmem:[%s12276_s24 + $0x85] sm:$0xff] }
 0x41d   : > { %v14333_v63 = vadd.f32 %v13996_v18, %v2138_v36 }
 0x41e   : > { %v2091_v58 = vpop.f32.mrb[88].mxu0 }
 0x41f   : > { %v2139_v59 = vadd.f32 %v2091_v58, %v15448_v43  ;;  %v9437_v1 = vpop.f32.mrb[89].mxu0  ;;  %9969 = vmatmul.mubr.f32.gmra.mrb[194].mxu0 %v3258_v28  ;;  %v14344_v23 = vpop.f32.mrb[204].mxu1 }
 0x420   : > { %9971 = vmatprep.mubr.msk.f32.mxu0 %vm12041_vm0, %v14240_v34  ;;  %v9875_v5 = vpop.f32.mrb[205].mxu1  ;;  %v3260_v1 = vld [vmem:[%s12276_s24 + $0x8d] sm:$0xff] }
 0x421   : > { %v14342_v17 = vadd.f32 %v14005_v37, %v2139_v59 }
 0x422   : > { %v2096_v18 = vpop.f32.mrb[90].mxu0 }
 0x423   : > { %v2140_v7 = vadd.f32 %v2096_v18, %v15449_v12  ;;  %v9440_v36 = vpop.f32.mrb[91].mxu0  ;;  %9972 = vmatmul.mubr.f32.gmra.mrb[196].mxu0 %v3259_v31  ;;  %v14353_v58 = vpop.f32.mrb[206].mxu1  ;;  %v3261_v31 = vld [vmem:[%s12276_s24 + $0x95] sm:$0xff] }
 0x424   : > { %9974 = vmatprep.mubr.msk.f32.mxu0 %vm12041_vm0, %v14240_v34  ;;  %v9878_v59 = vpop.f32.mrb[207].mxu1 }
 0x425   : > { %v14351_v28 = vadd.f32 %v14014_v52, %v2140_v7  ;;  %v4168_v59 = vld [vmem:[#allocation8 + $0xa0] sm:$0xff] }
 0x426   : > { %v2634_v37 = vpop.f32.mrb[92].mxu0 }
 0x427   : > { %v2838_v48 = vadd.f32 %v2634_v37, %v13940_v25  ;;  %v9630_v43 = vpop.f32.mrb[93].mxu0  ;;  %9975 = vmatmul.mubr.f32.gmra.mrb[198].mxu0 %v3260_v1  ;;  %v4169_v25 = vld [vmem:[#allocation8 + $0xa8] sm:$0xff] }
 0x428   : > { %9977 = vmatprep.mubr.msk.f32.mxu0 %vm12041_vm0, %v14240_v34  ;;  %v14362_v5 = vpop.f32.mrb[208].mxu1  ;;  %v3262_v1 = vld [vmem:[%s12276_s24 + $0x9d] sm:$0xff]  ;;  %v11145_v37 = vpack.c.bf16 %v4169_v25, %v4168_v59 }
 0x429   : > { %v14360_v18 = vadd.f32 %v14023_v55, %v2838_v48  ;;  %v9881_v12 = vpop.f32.mrb[209].mxu1 }
 0x42a   : > { %v2639_v52 = vpop.f32.mrb[94].mxu0  ;;  %11146 = vmatprep.subr.bf16.mxu1 %v11145_v37 }
 0x42b   : > { %v2839_v7 = vadd.f32 %v2639_v52, %v13949_v21  ;;  %v9633_v36 = vpop.f32.mrb[95].mxu0  ;;  %9978 = vmatmul.mubr.f32.gmra.mrb[200].mxu0 %v3261_v31  ;;  %11148 = vmatpush3.bf16.msra.mxu1 %v11145_v37  ;;  %v3263_v52 = vld [vmem:[%s12276_s24 + $0xa5] sm:$0xff] }
 0x42c   : > { %9980 = vmatprep.mubr.msk.f32.mxu0 %vm12041_vm0, %v14240_v34  ;;  %v14371_v55 = vpop.f32.mrb[210].mxu1 }
 0x42d   : > { %v14369_v43 = vadd.f32 %v14033_v26, %v2839_v7  ;;  %v9884_v12 = vpop.f32.mrb[211].mxu1 }
 0x42e   : > { %v2644_v48 = vpop.f32.mrb[96].mxu0 }
 0x42f   : > { %v2840_v21 = vadd.f32 %v2644_v48, %v13958_v27  ;;  %v9636_v31 = vpop.f32.mrb[97].mxu0  ;;  %9981 = vmatmul.mubr.f32.gmra.mrb[202].mxu0 %v3262_v1  ;;  %v3264_v27 = vld [vmem:[%s12276_s24 + $0xad] sm:$0xff] }
 0x430   : > { %9983 = vmatprep.mubr.msk.f32.mxu0 %vm12041_vm0, %v14240_v34  ;;  %v14380_v26 = vpop.f32.mrb[212].mxu1 }
 0x431   : > { %v14378_v36 = vadd.f32 %v14041_v61, %v2840_v21  ;;  %v9887_v59 = vpop.f32.mrb[213].mxu1 }
 0x432   : > { %v2649_v7 = vpop.f32.mrb[98].mxu0 }
 0x433   : > { %v2841_v25 = vadd.f32 %v2649_v7, %v13967_v42  ;;  %v9639_v12 = vpop.f32.mrb[99].mxu0  ;;  %9984 = vmatmul.mubr.f32.gmra.mrb[204].mxu0 %v3263_v52  ;;  %v3265_v42 = vld [vmem:[%s12276_s24 + $0xb5] sm:$0xff] }
 0x434   : > { %9986 = vmatprep.mubr.msk.f32.mxu0 %vm12041_vm0, %v14240_v34  ;;  %v14389_v37 = vpop.f32.mrb[214].mxu1 }
 0x435   : > { %v14387_v1 = vadd.f32 %v14050_v0, %v2841_v25  ;;  %v9890_v48 = vpop.f32.mrb[215].mxu1 }
 0x436   : > { %v2654_v61 = vpop.f32.mrb[100].mxu0 }
 0x437   : > { %v2842_v21 = vadd.f32 %v2654_v61, %v13976_v41  ;;  %v9642_v31 = vpop.f32.mrb[101].mxu0  ;;  %9987 = vmatmul.mubr.f32.gmra.mrb[206].mxu0 %v3264_v27  ;;  %v3266_v41 = vld [vmem:[%s12276_s24 + $0xbd] sm:$0xff] }
 0x438   : > { %9989 = vmatprep.mubr.msk.f32.mxu0 %vm12041_vm0, %v14240_v34  ;;  %v14398_v7 = vpop.f32.mrb[216].mxu1 }
 0x439   : > { %v14396_v52 = vadd.f32 %v14059_v14, %v2842_v21  ;;  %v9893_v59 = vpop.f32.mrb[217].mxu1 }
 0x43a   : > { %v2659_v0 = vpop.f32.mrb[102].mxu0  ;;  %v4170_v59 = vld [vmem:[#allocation8 + $0xb0] sm:$0xff] }
 0x43b   : > { %v2843_v25 = vadd.f32 %v2659_v0, %v13985_v3  ;;  %v9645_v12 = vpop.f32.mrb[103].mxu0  ;;  %9990 = vmatmul.mubr.f32.gmra.mrb[208].mxu0 %v3265_v42  ;;  %v4171_v3 = vld [vmem:[#allocation8 + $0xb8] sm:$0xff] }
 0x43c   : > { %9992 = vmatprep.mubr.msk.f32.mxu0 %vm12041_vm0, %v14240_v34  ;;  %v14407_v61 = vpop.f32.mrb[218].mxu1  ;;  %v3267_v42 = vld [vmem:[%s12276_s24 + $0xc5] sm:$0xff]  ;;  %v11149_v0 = vpack.c.bf16 %v4171_v3, %v4170_v59  ;;  %v4172_v59 = vld [vmem:[#allocation8 + $0xc0] sm:$0xff] }
 0x43d   : > { %v14405_v27 = vadd.f32 %v14069_v54, %v2843_v25  ;;  %v9896_v48 = vpop.f32.mrb[219].mxu1  ;;  %v4173_v3 = vld [vmem:[#allocation8 + $0xc8] sm:$0xff] }
 0x43e   : > { %v2664_v14 = vpop.f32.mrb[104].mxu0  ;;  %11150 = vmatprep.subr.bf16.mxu1 %v11149_v0 }
 0x43f   : > { %v2844_v21 = vadd.f32 %v2664_v14, %v13994_v29  ;;  %v9648_v31 = vpop.f32.mrb[105].mxu0  ;;  %9993 = vmatmul.mubr.f32.gmra.mrb[210].mxu0 %v3266_v41  ;;  %11152 = vmatpush3.bf16.msra.mxu1 %v11149_v0  ;;  %v3268_v41 = vld [vmem:[%s12276_s24 + $0xcd] sm:$0xff] }
 0x440   : > { %9995 = vmatprep.mubr.msk.f32.mxu0 %vm12041_vm0, %v14240_v34  ;;  %v14416_v54 = vpop.f32.mrb[220].mxu1 }
 0x441   : > { %v14414_v12 = vadd.f32 %v14079_v8, %v2844_v21  ;;  %v9899_v48 = vpop.f32.mrb[221].mxu1 }
 0x442   : > { %v2669_v25 = vpop.f32.mrb[106].mxu0 }
 0x443   : > { %15450 = vst [vmem:[#allocation13_spill] sm:$0xff] %v14414_v12  ;;  %v2845_v29 = vadd.f32 %v2669_v25, %v14003_v53  ;;  %v9651_v14 = vpop.f32.mrb[107].mxu0  ;;  %9996 = vmatmul.mubr.f32.gmra.mrb[212].mxu0 %v3267_v42  ;;  %v11153_v25 = vpack.c.bf16 %v4173_v3, %v4172_v59  ;;  %v3269_v42 = vld [vmem:[%s12276_s24 + $0xd5] sm:$0xff]  ;;  %v3270_v59 = vld [vmem:[%s12276_s24 + $0xdd] sm:$0xff] }
 0x444   : > { %9998 = vmatprep.mubr.msk.f32.mxu0 %vm12041_vm0, %v14240_v34  ;;  %v14425_v8 = vpop.f32.mrb[222].mxu1  ;;  %v4174_v14 = vld [vmem:[#allocation8 + $0xd0] sm:$0xff] }
 0x445   : > { %v14423_v31 = vadd.f32 %v14088_v13, %v2845_v29  ;;  %v9902_v53 = vpop.f32.mrb[223].mxu1  ;;  %11154 = vmatprep.subr.bf16.mxu1 %v11153_v25 }
 0x446   : > { %v2674_v21 = vpop.f32.mrb[108].mxu0  ;;  %11156 = vmatpush3.bf16.msra.mxu1 %v11153_v25  ;;  %v4177_v53 = vld [vmem:[#allocation8 + $0xe8] sm:$0xff] }
 0x447   : > { %15451 = vst [vmem:[#allocation21_spill] sm:$0xff] %v14423_v31  ;;  %v2846_v48 = vadd.f32 %v2674_v21, %v14012_v60  ;;  %v9654_v12 = vpop.f32.mrb[109].mxu0  ;;  %9999 = vmatmul.mubr.f32.gmra.mrb[214].mxu0 %v3268_v41  ;;  %v4175_v31 = vld [vmem:[#allocation8 + $0xd8] sm:$0xff] }
 0x448   : > { %10001 = vmatprep.mubr.msk.f32.mxu0 %vm12041_vm0, %v14240_v34  ;;  %v14434_v13 = vpop.f32.mrb[224].mxu1  ;;  %v11157_v41 = vpack.c.bf16 %v4175_v31, %v4174_v14  ;;  %v3271_v31 = vld [vmem:[%s12276_s24 + $0xe5] sm:$0xff] }
 0x449   : > { %v14432_v0 = vadd.f32 %v14103_v2, %v2846_v48  ;;  %v9905_v21 = vpop.f32.mrb[225].mxu1  ;;  %v4176_v48 = vld [vmem:[#allocation8 + $0xe0] sm:$0xff]  ;;  %v4178_v14 = vld [vmem:[#allocation8 + $0xf0] sm:$0xff] }
 0x44a   : > { %v2679_v29 = vpop.f32.mrb[110].mxu0  ;;  %11158 = vmatprep.subr.bf16.mxu1 %v11157_v41  ;;  %v3272_v21 = vld [vmem:[%s12276_s24 + $0xed] sm:$0xff] }
 0x44b   : > { %v2847_v60 = vadd.f32 %v2679_v29, %v14021_v39  ;;  %v9657_v12 = vpop.f32.mrb[111].mxu0  ;;  %10002 = vmatmul.mubr.f32.gmra.mrb[216].mxu0 %v3269_v42  ;;  %11160 = vmatpush3.bf16.msra.mxu1 %v11157_v41  ;;  %v11161_v42 = vpack.c.bf16 %v4177_v53, %v4176_v48 }
 0x44c   : > { %10004 = vmatprep.mubr.msk.f32.mxu0 %vm12041_vm0, %v14240_v34 }
 0x44d   : > { %v14441_v2 = vadd.f32 %v14113_v10, %v2847_v60  ;;  %11162 = vmatprep.subr.bf16.mxu1 %v11161_v42  ;;  %v4179_v60 = vld [vmem:[#allocation8 + $0xf8] sm:$0xff] }
 0x44e   : > { %v2684_v3 = vpop.f32.mrb[112].mxu0  ;;  %v11165_v41 = vpack.c.bf16 %v4179_v60, %v4178_v14 }
 0x44f   : > { %v2848_v25 = vadd.f32 %v2684_v3, %v14031_v16  ;;  %v9660_v39 = vpop.f32.mrb[113].mxu0  ;;  %10005 = vmatmul.mubr.f32.gmra.mrb[218].mxu0 %v3270_v59  ;;  %11164 = vmatpush3.bf16.msra.mxu1 %v11161_v42 }
 0x450   : > { %10007 = vmatprep.mubr.msk.f32.mxu0 %vm12041_vm0, %v14240_v34  ;;  %11166 = vmatprep.subr.bf16.mxu1 %v11165_v41 }
 0x451   : > { %v14448_v29 = vadd.f32 %v14124_v47, %v2848_v25 }
 0x452   : > { %v2689_v10 = vpop.f32.mrb[114].mxu0 }
 0x453   : > { %v2849_v12 = vadd.f32 %v2689_v10, %v14039_v32  ;;  %v9663_v16 = vpop.f32.mrb[115].mxu0  ;;  %10008 = vmatmul.mubr.f32.gmra.mrb[220].mxu0 %v3271_v31  ;;  %11168 = vmatpush3.bf16.msra.mxu1 %v11165_v41  ;;  %v3273_v32 = vld [vmem:[%s12276_s24 + $0xf5] sm:$0xff] }
 0x454   : > { %10010 = vmatprep.mubr.msk.f32.mxu0 %vm12041_vm0, %v14240_v34 }
 0x455   : > { %v14455_v59 = vadd.f32 %v14135_v35, %v2849_v12 }
 0x456   : > { %v2694_v47 = vpop.f32.mrb[116].mxu0 }
 0x457   : > { %v2850_v3 = vadd.f32 %v2694_v47, %v14048_v51  ;;  %v9666_v48 = vpop.f32.mrb[117].mxu0  ;;  %10011 = vmatmul.mubr.f32.gmra.mrb[222].mxu0 %v3272_v21  ;;  %v3274_v51 = vld [vmem:[%s12276_s24 + $0xfd] sm:$0xff] }
 0x458   : > { %10013 = vmatprep.mubr.msk.f32.mxu0 %vm12041_vm0, %v14240_v34 }
 0x459   : > { %v14462_v53 = vadd.f32 %v14146_v40, %v2850_v3 }
 0x45a   : > { %v2699_v25 = vpop.f32.mrb[118].mxu0 }
 0x45b   : > { %v2851_v39 = vadd.f32 %v2699_v25, %v14057_v62  ;;  %v9669_v35 = vpop.f32.mrb[119].mxu0  ;;  %10014 = vmatmul.mubr.f32.gmra.mrb[224].mxu0 %v3273_v32  ;;  %v3275_v62 = vld [vmem:[%s12276_s24 + $0x105] sm:$0xff] }
 0x45c   : > { %10016 = vmatprep.mubr.msk.f32.mxu0 %vm12041_vm0, %v14240_v34 }
 0x45d   : > { %v14469_v42 = vadd.f32 %v14157_v11, %v2851_v39  ;;  %v15452_v39 = vld [vmem:[#allocation20_spill] sm:$0xff] }
 0x45e   : > { %v2704_v31 = vpop.f32.mrb[120].mxu0 }
 0x45f   : > { %v2852_v10 = vadd.f32 %v2704_v31, %v14067_v50  ;;  %v9672_v14 = vpop.f32.mrb[121].mxu0  ;;  %10017 = vmatmul.mubr.f32.gmra.mrb[226].mxu0 %v3274_v51  ;;  %v3276_v50 = vld [vmem:[%s12276_s24 + $0x10d] sm:$0xff] }
 0x460   : > { %10019 = vmatprep.mubr.msk.f32.mxu0 %vm12041_vm0, %v14240_v34 }
 0x461   : > { %v14476_v40 = vadd.f32 %v14168_v56, %v2852_v10 }
 0x462   : > { %v2709_v60 = vpop.f32.mrb[122].mxu0 }
 0x463   : > { %v2853_v12 = vadd.f32 %v2709_v60, %v14077_v9  ;;  %v9675_v16 = vpop.f32.mrb[123].mxu0  ;;  %10020 = vmatmul.mubr.f32.gmra.mrb[228].mxu0 %v3275_v62  ;;  %v3277_v9 = vld [vmem:[%s12276_s24 + $0x115] sm:$0xff] }
 0x464   : > { %10022 = vmatprep.mubr.msk.f32.mxu0 %vm12041_vm0, %v14240_v34  ;;  %v15453_v62 = vld [vmem:[#allocation34_spill] sm:$0xff]  ;;  %v15454_v16 = vld [vmem:[#allocation23_spill] sm:$0xff] }
 0x465   : > { %v14483_v11 = vadd.f32 %v14179_v24, %v2853_v12 }
 0x466   : > { %v2714_v41 = vpop.f32.mrb[124].mxu0 }
 0x467   : > { %v2854_v21 = vadd.f32 %v2714_v41, %v14086_v4  ;;  %v9678_v47 = vpop.f32.mrb[125].mxu0  ;;  %10023 = vmatmul.mubr.f32.gmra.mrb[230].mxu0 %v3276_v50  ;;  %v3278_v4 = vld [vmem:[%s12276_s24 + $0x11d] sm:$0xff] }
 0x468   : > { %10025 = vmatprep.mubr.msk.f32.mxu0 %vm12041_vm0, %v14240_v34 }
 0x469   : > { %v14490_v56 = vadd.f32 %v14191_v33, %v2854_v21 }
 0x46a   : > { %v2719_v3 = vpop.f32.mrb[126].mxu0 }
 0x46b   : > { %v2855_v48 = vadd.f32 %v2719_v3, %v14101_v46  ;;  %v9681_v32 = vpop.f32.mrb[127].mxu0  ;;  %10026 = vmatmul.mubr.f32.gmra.mrb[232].mxu0 %v3277_v9  ;;  %v3279_v46 = vld [vmem:[%s12276_s24 + $0x125] sm:$0xff] }
 0x46c   : > { %10028 = vmatprep.mubr.msk.f32.mxu0 %vm12041_vm0, %v14240_v34  ;;  %v15456_v9 = vld [vmem:[#allocation26_spill] sm:$0xff] }
 0x46d   : > { %v14497_v24 = vadd.f32 %v14202_v19, %v2855_v48  ;;  %v3280_v19 = vld [vmem:[%s12276_s24 + $0x12d] sm:$0xff]  ;;  %v3282_v32 = vld [vmem:[%s12276_s24 + $0x13d] sm:$0xff] }
 0x46e   : > { %v2724_v25 = vpop.f32.mrb[128].mxu0 }
 0x46f   : > { %v2856_v35 = vadd.f32 %v2724_v25, %v15452_v39  ;;  %v9684_v51 = vpop.f32.mrb[129].mxu0  ;;  %10029 = vmatmul.mubr.f32.gmra.mrb[234].mxu0 %v3278_v4  ;;  %v15457_v4 = vld [vmem:[#allocation16_spill] sm:$0xff] }
 0x470   : > { %10031 = vmatprep.mubr.msk.f32.mxu0 %vm12041_vm0, %v14240_v34 }
 0x471   : > { %v14504_v33 = vadd.f32 %v14213_v49, %v2856_v35  ;;  %v15455_v49 = vld [vmem:[#allocation15_spill] sm:$0xff]  ;;  %v15458_v35 = vld [vmem:[#allocation29_spill] sm:$0xff] }
 0x472   : > { %v2729_v31 = vpop.f32.mrb[130].mxu0 }
 0x473   : > { %v2857_v10 = vadd.f32 %v2729_v31, %v14122_v20  ;;  %v9687_v14 = vpop.f32.mrb[131].mxu0  ;;  %10032 = vmatmul.mubr.f32.gmra.mrb[236].mxu0 %v3279_v46  ;;  %v3281_v20 = vld [vmem:[%s12276_s24 + $0x135] sm:$0xff]  ;;  %v3283_v31 = vld [vmem:[%s12276_s24 + $0x145] sm:$0xff] }
 0x474   : > { %10034 = vmatprep.mubr.msk.f32.mxu0 %vm12041_vm0, %v14240_v34 }
 0x475   : > { %v14511_v60 = vadd.f32 %v15453_v62, %v2857_v10 }
 0x476   : > { %v2734_v12 = vpop.f32.mrb[132].mxu0 }
 0x477   : > { %v2858_v50 = vadd.f32 %v2734_v12, %v15454_v16  ;;  %v9690_v41 = vpop.f32.mrb[133].mxu0  ;;  %10035 = vmatmul.mubr.f32.gmra.mrb[238].mxu0 %v3280_v19  ;;  %v15459_v19 = vld [vmem:[#allocation31_spill] sm:$0xff] }
 0x478   : > { %10037 = vmatprep.mubr.msk.f32.mxu0 %vm12041_vm0, %v14240_v34  ;;  %v3284_v16 = vld [vmem:[%s12276_s24 + $0x14d] sm:$0xff] }
 0x479   : > { %v14518_v21 = vadd.f32 %v15455_v49, %v2858_v50 }
 0x47a   : > { %v2739_v47 = vpop.f32.mrb[134].mxu0 }
 0x47b   : > { %v2859_v3 = vadd.f32 %v2739_v47, %v15456_v9  ;;  %v9693_v48 = vpop.f32.mrb[135].mxu0  ;;  %10038 = vmatmul.mubr.f32.gmra.mrb[240].mxu0 %v3281_v20  ;;  %v15460_v20 = vld [vmem:[#allocation30_spill] sm:$0xff] }
 0x47c   : > { %10040 = vmatprep.mubr.msk.f32.mxu0 %vm12041_vm0, %v14240_v34  ;;  %v15461_v48 = vld [vmem:[#allocation33_spill] sm:$0xff] }
 0x47d   : > { %v14525_v25 = vadd.f32 %v15457_v4, %v2859_v3 }
 0x47e   : > { %v2744_v39 = vpop.f32.mrb[136].mxu0 }
 0x47f   : > { %v2860_v51 = vadd.f32 %v2744_v39, %v15458_v35  ;;  %v9696_v46 = vpop.f32.mrb[137].mxu0  ;;  %10041 = vmatmul.mubr.f32.gmra.mrb[242].mxu0 %v3282_v32 }
 0x480   : > { %10043 = vmatprep.mubr.msk.f32.mxu0 %vm12041_vm0, %v14240_v34 }
 0x481   : > { %v14532_v10 = vadd.f32 %v14259_v30, %v2860_v51  ;;  %v3285_v30 = vld [vmem:[%s12276_s24 + $0x155] sm:$0xff] }
 0x482   : > { %v2749_v14 = vpop.f32.mrb[138].mxu0  ;;  %v15462_v51 = vld [vmem:[#allocation28_spill] sm:$0xff] }
 0x483   : > { %v2861_v62 = vadd.f32 %v2749_v14, %v15459_v19  ;;  %v9699_v12 = vpop.f32.mrb[139].mxu0  ;;  %10044 = vmatmul.mubr.f32.gmra.mrb[244].mxu0 %v3283_v31 }
 0x484   : > { %10046 = vmatprep.mubr.msk.f32.mxu0 %vm12041_vm0, %v14240_v34 }
 0x485   : > { %v14539_v50 = vadd.f32 %v14270_v15, %v2861_v62  ;;  %v3286_v15 = vld [vmem:[%s12276_s24 + $0x15d] sm:$0xff]  ;;  %v15463_v62 = vld [vmem:[#allocation32_spill] sm:$0xff] }
 0x486   : > { %v2754_v41 = vpop.f32.mrb[140].mxu0 }
 0x487   : > { %v2862_v49 = vadd.f32 %v2754_v41, %v15460_v20  ;;  %v9702_v47 = vpop.f32.mrb[141].mxu0  ;;  %10047 = vmatmul.mubr.f32.gmra.mrb[246].mxu0 %v3284_v16 }
 0x488   : > { %10049 = vmatprep.mubr.msk.f32.mxu0 %vm12041_vm0, %v14240_v34 }
 0x489   : > { %v14546_v9 = vadd.f32 %v14281_v6, %v2862_v49  ;;  %v3287_v6 = vld [vmem:[%s12276_s24 + $0x165] sm:$0xff] }
 0x48a   : > { %v2759_v3 = vpop.f32.mrb[142].mxu0  ;;  %v15464_v49 = vld [vmem:[#allocation35_spill] sm:$0xff] }
 0x48b   : > { %v2863_v32 = vadd.f32 %v2759_v3, %v15461_v48  ;;  %v9705_v4 = vpop.f32.mrb[143].mxu0  ;;  %10050 = vmatmul.mubr.f32.gmra.mrb[248].mxu0 %v3285_v30  ;;  %v15465_v48 = vld [vmem:[#allocation37_spill] sm:$0xff] }
 0x48c   : > { %10052 = vmatprep.mubr.msk.f32.mxu0 %vm12041_vm0, %v14240_v34 }
 0x48d   : > { %v14553_v39 = vadd.f32 %v14292_v22, %v2863_v32  ;;  %v3288_v22 = vld [vmem:[%s12276_s24 + $0x16d] sm:$0xf] }
 0x48e   : > { %v2764_v35 = vpop.f32.mrb[144].mxu0 }
 0x48f   : > { %v2864_v46 = vadd.f32 %v2764_v35, %v15462_v51  ;;  %v9708_v31 = vpop.f32.mrb[145].mxu0  ;;  %10053 = vmatmul.mubr.f32.gmra.mrb[250].mxu0 %v3286_v15  ;;  %v15466_v35 = vld [vmem:[#allocation36_spill] sm:$0xff] }
 0x490   : > { %10055 = vmatprep.mubr.msk.f32.mxu0 %vm12041_vm0, %v14240_v34 }
 0x491   : > { %v14560_v14 = vadd.f32 %v14303_v38, %v2864_v46 }
 0x492   : > { %v2769_v19 = vpop.f32.mrb[146].mxu0 }
 0x493   : > { %v2865_v12 = vadd.f32 %v2769_v19, %v15463_v62  ;;  %v9711_v16 = vpop.f32.mrb[147].mxu0  ;;  %10056 = vmatmul.mubr.f32.gmra.mrb[252].mxu0 %v3287_v6  ;;  %v15467_v6 = vld [vmem:[#allocation39_spill] sm:$0xff] }
 0x494   : > { %10058 = vmatprep.mubr.msk.f32.mxu0 %vm12041_vm0, %v14240_v34  ;;  %v15468_v16 = vld [vmem:[#allocation18_spill] sm:$0xff] }
 0x495   : > { %v14567_v41 = vadd.f32 %v14314_v44, %v2865_v12 }
 0x496   : > { %v2774_v20 = vpop.f32.mrb[148].mxu0 }
 0x497   : > { %v2866_v47 = vadd.f32 %v2774_v20, %v15464_v49  ;;  %v9714_v30 = vpop.f32.mrb[149].mxu0  ;;  %10059 = vmatmul.mubr.f32.gmra.mrb[254].mxu0 %v3288_v22 }
 0x499   : > { %v14571_v38 = vadd.f32 %v14325_v57, %v2866_v47  ;;  %v15469_v47 = vld [vmem:[#allocation38_spill] sm:$0xff] }
 0x49a   : > { %v2779_v3 = vpop.f32.mrb[150].mxu0 }
 0x49b   : > { %v2867_v32 = vadd.f32 %v2779_v3, %v15465_v48  ;;  %v9717_v4 = vpop.f32.mrb[151].mxu0  ;;  %v4111_v48 = vld [vmem:[#allocation8] sm:$0xff] }
 0x49d   : > { %v14575_v15 = vadd.f32 %v14335_v45, %v2867_v32  ;;  %v4112_v32 = vld [vmem:[#allocation8 + $0x8] sm:$0xff] }
 0x49e   : > { %v2784_v34 = vpop.f32.mrb[152].mxu0 }
 0x49f   : > { %v2868_v51 = vadd.f32 %v2784_v34, %v15466_v35  ;;  %v9720_v44 = vpop.f32.mrb[153].mxu0  ;;  %v14593_v34 = vpack.c.bf16 %v4112_v32, %v4111_v48 }
 0x4a1   : > { %v14579_v46 = vadd.f32 %v14344_v23, %v2868_v51  ;;  %11170 = vmatprep.subr.bf16.mxu1 %v14593_v34 }
 0x4a2   : > { %v2789_v31 = vpop.f32.mrb[154].mxu0 }
 0x4a3   : > { %v2869_v19 = vadd.f32 %v2789_v31, %v15467_v6  ;;  %v9723_v62 = vpop.f32.mrb[155].mxu0  ;;  %v15471_v31 = vld [vmem:[#allocation40_spill] sm:$0xff] }
 0x4a5   : > { %v14583_v57 = vadd.f32 %v14353_v58, %v2869_v19  ;;  %v15470_v58 = vld [vmem:[#allocation17_spill] sm:$0xff] }
 0x4a6   : > { %v2794_v12 = vpop.f32.mrb[156].mxu0 }
 0x4a7   : > { %v2870_v22 = vadd.f32 %v2794_v12, %v15468_v16  ;;  %v9726_v20 = vpop.f32.mrb[157].mxu0  ;;  %v15472_v12 = vld [vmem:[#allocation22_spill] sm:$0xff] }
 0x4a9   : > { %v14587_v45 = vadd.f32 %v14362_v5, %v2870_v22 }
 0x4aa   : > { %v2799_v49 = vpop.f32.mrb[158].mxu0 }
 0x4ab   : > { %v2871_v30 = vadd.f32 %v2799_v49, %v15469_v47  ;;  %v9729_v3 = vpop.f32.mrb[159].mxu0  ;;  %v15473_v47 = vld [vmem:[#allocation19_spill] sm:$0xff] }
 0x4ad   : > { %v14591_v23 = vadd.f32 %v14371_v55, %v2871_v30 }
 0x4ae   : > { %v2804_v4 = vpop.f32.mrb[160].mxu0 }
 0x4af   : > { %v2872_v35 = vadd.f32 %v2804_v4, %v15470_v58  ;;  %v9732_v51 = vpop.f32.mrb[161].mxu0 }
 0x4b1   : > { %v14598_v5 = vadd.f32 %v14380_v26, %v2872_v35 }
 0x4b2   : > { %v2809_v44 = vpop.f32.mrb[162].mxu0 }
 0x4b3   : > { %v2873_v6 = vadd.f32 %v2809_v44, %v15471_v31  ;;  %v9735_v19 = vpop.f32.mrb[163].mxu0 }
 0x4b5   : > { %v14602_v55 = vadd.f32 %v14389_v37, %v2873_v6 }
 0x4b6   : > { %v2814_v62 = vpop.f32.mrb[164].mxu0 }
 0x4b7   : > { %v2874_v16 = vadd.f32 %v2814_v62, %v15472_v12  ;;  %v9738_v22 = vpop.f32.mrb[165].mxu0 }
 0x4b8   : > { %v3791_v22 = vpop.permute.xlu0 %3790 }
 0x4b9   : > { %v14606_v20 = vadd.f32 %v14398_v7, %v2874_v16 }
 0x4ba   : > { %v2819_v49 = vpop.f32.mrb[166].mxu0 }
 0x4bb   : > { %v2875_v30 = vadd.f32 %v2819_v49, %v15473_v47  ;;  %v9741_v3 = vpop.f32.mrb[167].mxu0 }
 0x4bd   : > { %v14610_v26 = vadd.f32 %v14407_v61, %v2875_v30 }
 0x4be   : > { %v2824_v48 = vpop.f32.mrb[168].mxu0 }
 0x4bf   : > { %v2876_v32 = vadd.f32 %v2824_v48, %v14333_v63  ;;  %v9744_v4 = vpop.f32.mrb[169].mxu0  ;;  %v14627_v63 = vld [vmem:[%s15247_s3] ss:$0 sm:$0xff] }
 0x4c0   : > { %v4113_v4 = vld [vmem:[#allocation8 + $0x10] sm:$0xff] }
 0x4c1   : > { %v14614_v37 = vadd.f32 %v14416_v54, %v2876_v32 }
 0x4c2   : > { %v2829_v58 = vpop.f32.mrb[170].mxu0 }
 0x4c3   : > { %v2877_v35 = vadd.f32 %v2829_v58, %v14342_v17  ;;  %v9747_v51 = vpop.f32.mrb[171].mxu0 }
 0x4c4   : > { %v3796_v51 = vpop.permute.xlu0 %3795 }
 0x4c5   : > { %v14618_v7 = vadd.f32 %v14425_v8, %v2877_v35 }
 0x4c6   : > { %v2834_v44 = vpop.f32.mrb[172].mxu0 }
 0x4c7   : > { %v2878_v31 = vadd.f32 %v2834_v44, %v14351_v28  ;;  %v9750_v6 = vpop.f32.mrb[173].mxu0 }
 0x4c9   : > { %v14622_v61 = vadd.f32 %v14434_v13, %v2878_v31 }
 0x4ca   : > { %v3372_v19 = vpop.f32.mrb[174].mxu0 }
 0x4cb   : > { %v3576_v54 = vadd.f32 %v3372_v19, %v14360_v18  ;;  %v9940_v17 = vpop.f32.mrb[175].mxu0  ;;  %v4114_v18 = vld [vmem:[#allocation8 + $0x18] sm:$0xff] }
 0x4cc   : > { %v3801_v17 = vpop.permute.xlu1 %3800 }
 0x4cd   : > { %v3624_v62 = vadd.f32 %v14627_v63, %v3576_v54  ;;  %v11173_v54 = vpack.c.bf16 %v4114_v18, %v4113_v4 }
 0x4ce   : > { %v3377_v8 = vpop.f32.mrb[176].mxu0 }
 0x4cf   : > { %v3665_v12 = vmax.f32 %v3624_v62, 0.0  ;;  %v3577_v16 = vadd.f32 %v3377_v8, %v14369_v43  ;;  %v9943_v28 = vpop.f32.mrb[177].mxu0  ;;  %v4115_v62 = vld [vmem:[#allocation8 + $0x20] sm:$0xff]  ;;  %v4116_v8 = vld [vmem:[#allocation8 + $0x28] sm:$0xff] }
 0x4d1   : > { %v3706_v49 = vmin.f32 %v3665_v12, 6.0  ;;  %v3625_v13 = vadd.f32 %v14627_v63, %v3577_v16 }
 0x4d2   : > { %v3382_v47 = vpop.f32.mrb[178].mxu0 }
 0x4d3   : > { %v3993_v30 = vmul.f32 %v3791_v22, %v3706_v49  ;;  %v3666_v3 = vmax.f32 %v3625_v13, 0.0  ;;  %v3578_v48 = vadd.f32 %v3382_v47, %v14378_v36  ;;  %v9946_v32 = vpop.f32.mrb[179].mxu0  ;;  %v4117_v47 = vld [vmem:[#allocation8 + $0x30] sm:$0xff] }
 0x4d4   : > { %v3806_v32 = vpop.permute.xlu1 %3805 }
 0x4d5   : > { %4034 = vst [vmem:[#allocation2 + $0x12] sm:$0xff] %v3993_v30  ;;  %v3707_v58 = vmin.f32 %v3666_v3, 6.0  ;;  %v3626_v35 = vadd.f32 %v14627_v63, %v3578_v48  ;;  %10093 = vmatprep.mubr.f32.mxu1 %v3993_v30  ;;  %v4118_v30 = vld [vmem:[#allocation8 + $0x38] sm:$0xff] }
 0x4d6   : > { %v3387_v43 = vpop.f32.mrb[180].mxu0 }
 0x4d7   : > { %v3994_v44 = vmul.f32 %v3796_v51, %v3707_v58  ;;  %v3667_v31 = vmax.f32 %v3626_v35, 0.0  ;;  %v3579_v6 = vadd.f32 %v3387_v43, %v14387_v1  ;;  %v9949_v19 = vpop.f32.mrb[181].mxu0  ;;  %v11177_v1 = vpack.c.bf16 %v4116_v8, %v4115_v62  ;;  %v4119_v51 = vld [vmem:[#allocation8 + $0x40] sm:$0xff]  ;;  %v4120_v43 = vld [vmem:[#allocation8 + $0x48] sm:$0xff] }
 0x4d9   : > { %4035 = vst [vmem:[#allocation2 + $0x1a] sm:$0xff] %v3994_v44  ;;  %v3708_v36 = vmin.f32 %v3667_v31, 6.0  ;;  %v3627_v12 = vadd.f32 %v14627_v63, %v3579_v6  ;;  %10094 = vmatmul.mubr.f32.vlgmr.msra.gmra.mrb[226].mxu1 %v3994_v44  ;;  %v3811_v6 = vpop.permute.xlu0 %3810 }
 0x4da   : > { %v3392_v16 = vpop.f32.mrb[182].mxu0  ;;  %11172 = vmatpush3.bf16.msra.mxu1 %v14593_v34 }
 0x4db   : > { %v3995_v28 = vmul.f32 %v3801_v17, %v3708_v36  ;;  %v3668_v22 = vmax.f32 %v3627_v12, 0.0  ;;  %v3580_v49 = vadd.f32 %v3392_v16, %v14396_v52  ;;  %v9952_v13 = vpop.f32.mrb[183].mxu0  ;;  %11174 = vmatprep.subr.bf16.mxu1 %v11173_v54  ;;  %v11181_v52 = vpack.c.bf16 %v4118_v30, %v4117_v47  ;;  %v4121_v12 = vld [vmem:[#allocation8 + $0x50] sm:$0xff]  ;;  %v4122_v16 = vld [vmem:[#allocation8 + $0x58] sm:$0xff] }
 0x4dd   : > { %4036 = vst [vmem:[#allocation2 + $0x22] sm:$0xff] %v3995_v28  ;;  %v3709_v3 = vmin.f32 %v3668_v22, 6.0  ;;  %v3628_v48 = vadd.f32 %v14627_v63, %v3580_v49  ;;  %10096 = vmatprep.mubr.f32.mxu1 %v3995_v28  ;;  %v3816_v49 = vpop.permute.xlu1 %3815 }
 0x4de   : > { %v3397_v4 = vpop.f32.mrb[184].mxu0  ;;  %11176 = vmatpush3.bf16.msra.mxu1 %v11173_v54  ;;  %v15474_v54 = vld [vmem:[#allocation13_spill] sm:$0xff] }
 0x4df   : > { %v3996_v18 = vmul.f32 %v3806_v32, %v3709_v3  ;;  %v3669_v58 = vmax.f32 %v3628_v48, 0.0  ;;  %v3581_v34 = vadd.f32 %v3397_v4, %v14405_v27  ;;  %v9955_v35 = vpop.f32.mrb[185].mxu0  ;;  %11178 = vmatprep.subr.bf16.mxu1 %v11177_v1  ;;  %v11185_v27 = vpack.c.bf16 %v4120_v43, %v4119_v51  ;;  %v4123_v4 = vld [vmem:[#allocation8 + $0x60] sm:$0xff] }
 0x4e0   : > { %v11189_v32 = vpack.c.bf16 %v4122_v16, %v4121_v12  ;;  %v3821_v35 = vpop.permute.xlu0 %3820 }
 0x4e1   : > { %4037 = vst [vmem:[#allocation2 + $0x2a] sm:$0xff] %v3996_v18  ;;  %v3710_v44 = vmin.f32 %v3669_v58, 6.0  ;;  %v3629_v31 = vadd.f32 %v14627_v63, %v3581_v34  ;;  %10097 = vmatmul.mubr.f32.gmra.mrb[228].mxu1 %v3996_v18  ;;  %v4124_v18 = vld [vmem:[#allocation8 + $0x68] sm:$0xff] }
 0x4e2   : > { %v3402_v19 = vpop.f32.mrb[186].mxu0  ;;  %11180 = vmatpush3.bf16.msra.mxu1 %v11177_v1  ;;  %v15475_v1 = vld [vmem:[#allocation21_spill] sm:$0xff] }
 0x4e3   : > { %v3997_v17 = vmul.f32 %v3811_v6, %v3710_v44  ;;  %v3670_v62 = vmax.f32 %v3629_v31, 0.0  ;;  %v3582_v8 = vadd.f32 %v3402_v19, %v15474_v54  ;;  %v9958_v36 = vpop.f32.mrb[187].mxu0  ;;  %11182 = vmatprep.subr.bf16.mxu1 %v11181_v52  ;;  %v11193_v6 = vpack.c.bf16 %v4124_v18, %v4123_v4  ;;  %v4125_v19 = vld [vmem:[#allocation8 + $0x70] sm:$0xff]  ;;  %v4707_v4 = vld [vmem:[#allocation8 + $0x100] sm:$0xff]  ;;  %v4708_v18 = vld [vmem:[#allocation8 + $0x108] sm:$0xff] }
 0x4e5   : > { %4038 = vst [vmem:[#allocation2 + $0x32] sm:$0xff] %v3997_v17  ;;  %v3711_v28 = vmin.f32 %v3670_v62, 6.0  ;;  %v3630_v22 = vadd.f32 %v14627_v63, %v3582_v8  ;;  %10099 = vmatprep.mubr.f32.mxu1 %v3997_v17  ;;  %v4126_v17 = vld [vmem:[#allocation8 + $0x78] sm:$0xff]  ;;  %v3826_v8 = vpop.permute.xlu1 %3825 }
 0x4e6   : > { %v3407_v13 = vpop.f32.mrb[188].mxu0  ;;  %11184 = vmatpush3.bf16.msra.mxu1 %v11181_v52 }
 0x4e7   : > { %v3998_v47 = vmul.f32 %v3816_v49, %v3711_v28  ;;  %v3671_v30 = vmax.f32 %v3630_v22, 0.0  ;;  %v3583_v3 = vadd.f32 %v3407_v13, %v15475_v1  ;;  %v9961_v48 = vpop.f32.mrb[189].mxu0  ;;  %11186 = vmatprep.subr.bf16.mxu1 %v11185_v27  ;;  %v3831_v13 = vpop.permute.xlu0 %3830 }
 0x4e9   : > { %4039 = vst [vmem:[#allocation2 + $0x3a] sm:$0xff] %v3998_v47  ;;  %v3712_v58 = vmin.f32 %v3671_v30, 6.0  ;;  %v3631_v34 = vadd.f32 %v14627_v63, %v3583_v3  ;;  %10100 = vmatmul.mubr.f32.gmra.mrb[230].mxu1 %v3998_v47 }
 0x4ea   : > { %v3412_v51 = vpop.f32.mrb[190].mxu0  ;;  %11188 = vmatpush3.bf16.msra.mxu1 %v11185_v27 }
 0x4eb   : > { %v3999_v43 = vmul.f32 %v3821_v35, %v3712_v58  ;;  %v3672_v44 = vmax.f32 %v3631_v34, 0.0  ;;  %v3584_v52 = vadd.f32 %v3412_v51, %v14432_v0  ;;  %v9964_v31 = vpop.f32.mrb[191].mxu0  ;;  %11190 = vmatprep.subr.bf16.mxu1 %v11189_v32  ;;  %v11197_v0 = vpack.c.bf16 %v4126_v17, %v4125_v19  ;;  %v3836_v58 = vpop.permute.xlu1 %3835 }
 0x4ec   : > { %v14652_v35 = vpack.c.bf16 %v4708_v18, %v4707_v4 }
 0x4ed   : > { %4040 = vst [vmem:[#allocation2 + $0x42] sm:$0xff] %v3999_v43  ;;  %v3713_v62 = vmin.f32 %v3672_v44, 6.0  ;;  %v3632_v54 = vadd.f32 %v14627_v63, %v3584_v52  ;;  %10102 = vmatprep.mubr.f32.mxu1 %v3999_v43 }
 0x4ee   : > { %v3417_v36 = vpop.f32.mrb[192].mxu0  ;;  %11192 = vmatpush3.bf16.msra.mxu1 %v11189_v32 }
 0x4ef   : > { %v4000_v12 = vmul.f32 %v3826_v8, %v3713_v62  ;;  %v3673_v16 = vmax.f32 %v3632_v54, 0.0  ;;  %v3585_v27 = vadd.f32 %v3417_v36, %v14441_v2  ;;  %v9967_v28 = vpop.f32.mrb[193].mxu0  ;;  %11194 = vmatprep.subr.bf16.mxu1 %v11193_v6 }
 0x4f1   : > { %4041 = vst [vmem:[#allocation2 + $0x4a] sm:$0xff] %v4000_v12  ;;  %v3714_v22 = vmin.f32 %v3673_v16, 6.0  ;;  %v3633_v49 = vadd.f32 %v14627_v63, %v3585_v27  ;;  %10103 = vmatmul.mubr.f32.gmra.mrb[232].mxu1 %v4000_v12 }
 0x4f2   : > { %v3422_v47 = vpop.f32.mrb[194].mxu0  ;;  %11196 = vmatpush3.bf16.msra.mxu1 %v11193_v6  ;;  %v3841_v6 = vpop.permute.xlu0 %3840 }
 0x4f3   : > { %v4001_v30 = vmul.f32 %v3831_v13, %v3714_v22  ;;  %v3674_v1 = vmax.f32 %v3633_v49, 0.0  ;;  %v3586_v3 = vadd.f32 %v3422_v47, %v14448_v29  ;;  %v9970_v48 = vpop.f32.mrb[195].mxu0  ;;  %11198 = vmatprep.subr.bf16.mxu1 %v11197_v0 }
 0x4f5   : > { %4042 = vst [vmem:[#allocation2 + $0x52] sm:$0xff] %v4001_v30  ;;  %v3715_v32 = vmin.f32 %v3674_v1, 6.0  ;;  %v3634_v2 = vadd.f32 %v14627_v63, %v3586_v3  ;;  %10105 = vmatprep.mubr.f32.mxu1 %v4001_v30 }
 0x4f6   : > { %v3427_v34 = vpop.f32.mrb[196].mxu0  ;;  %11200 = vmatpush3.bf16.msra.mxu1 %v11197_v0  ;;  %v3851_v47 = vpop.permute.xlu0 %3850 }
 0x4f7   : > { %v4002_v51 = vmul.f32 %v3836_v58, %v3715_v32  ;;  %v3675_v43 = vmax.f32 %v3634_v2, 0.0  ;;  %v3587_v44 = vadd.f32 %v3427_v34, %v14455_v59  ;;  %v9973_v52 = vpop.f32.mrb[197].mxu0  ;;  %11202 = vmatprep.subr.bf16.mxu1 %v14652_v35  ;;  %v3846_v59 = vpop.permute.xlu1 %3845 }
 0x4f9   : > { %4043 = vst [vmem:[#allocation2 + $0x5a] sm:$0xff] %v4002_v51  ;;  %v3716_v29 = vmin.f32 %v3675_v43, 6.0  ;;  %v3635_v31 = vadd.f32 %v14627_v63, %v3587_v44  ;;  %10106 = vmatmul.mubr.f32.gmra.mrb[234].mxu1 %v4002_v51 }
 0x4fa   : > { %v3432_v19 = vpop.f32.mrb[198].mxu0  ;;  %v3861_v52 = vpop.permute.xlu0 %3860 }
 0x4fb   : > { %v4003_v17 = vmul.f32 %v3841_v6, %v3716_v29  ;;  %v3676_v62 = vmax.f32 %v3635_v31, 0.0  ;;  %v3588_v54 = vadd.f32 %v3432_v19, %v14462_v53  ;;  %v9976_v8 = vpop.f32.mrb[199].mxu0  ;;  %v3856_v4 = vpop.permute.xlu1 %3855 }
 0x4fd   : > { %4044 = vst [vmem:[#allocation2 + $0x62] sm:$0xff] %v4003_v17  ;;  %v3717_v36 = vmin.f32 %v3676_v62, 6.0  ;;  %v3636_v12 = vadd.f32 %v14627_v63, %v3588_v54  ;;  %10108 = vmatprep.mubr.f32.mxu1 %v4003_v17 }
 0x4fe   : > { %v3437_v16 = vpop.f32.mrb[200].mxu0 }
 0x4ff   : > { %v4004_v27 = vmul.f32 %v3846_v59, %v3717_v36  ;;  %v3677_v28 = vmax.f32 %v3636_v12, 0.0  ;;  %v3589_v0 = vadd.f32 %v3437_v16, %v14469_v42  ;;  %v9979_v22 = vpop.f32.mrb[201].mxu0  ;;  %v3866_v54 = vpop.permute.xlu1 %3865 }
 0x501   : > { %4045 = vst [vmem:[#allocation2 + $0x6a] sm:$0xff] %v4004_v27  ;;  %v3718_v49 = vmin.f32 %v3677_v28, 6.0  ;;  %v3637_v13 = vadd.f32 %v14627_v63, %v3589_v0  ;;  %10109 = vmatmul.mubr.f32.gmra.mrb[236].mxu1 %v4004_v27  ;;  %v3871_v28 = vpop.permute.xlu0 %3870 }
 0x502   : > { %v3442_v53 = vpop.f32.mrb[202].mxu0 }
 0x503   : > { %v4005_v30 = vmul.f32 %v3851_v47, %v3718_v49  ;;  %v3678_v1 = vmax.f32 %v3637_v13, 0.0  ;;  %v3590_v3 = vadd.f32 %v3442_v53, %v14476_v40  ;;  %v9982_v48 = vpop.f32.mrb[203].mxu0 }
 0x505   : > { %4046 = vst [vmem:[#allocation2 + $0x72] sm:$0xff] %v4005_v30  ;;  %v3719_v32 = vmin.f32 %v3678_v1, 6.0  ;;  %v3638_v2 = vadd.f32 %v14627_v63, %v3590_v3  ;;  %10111 = vmatprep.mubr.f32.mxu1 %v4005_v30  ;;  %v3876_v30 = vpop.permute.xlu1 %3875 }
 0x506   : > { %v3447_v42 = vpop.f32.mrb[204].mxu0 }
 0x507   : > { %v4006_v18 = vmul.f32 %v3856_v4, %v3719_v32  ;;  %v3679_v58 = vmax.f32 %v3638_v2, 0.0  ;;  %v3591_v34 = vadd.f32 %v3447_v42, %v14483_v11  ;;  %v9985_v51 = vpop.f32.mrb[205].mxu0  ;;  %v3881_v42 = vpop.permute.xlu0 %3880 }
 0x509   : > { %4047 = vst [vmem:[#allocation2 + $0x7a] sm:$0xff] %v4006_v18  ;;  %v3720_v43 = vmin.f32 %v3679_v58, 6.0  ;;  %v3639_v44 = vadd.f32 %v14627_v63, %v3591_v34  ;;  %10112 = vmatmul.mubr.f32.gmra.mrb[238].mxu1 %v4006_v18 }
 0x50a   : > { %v3452_v40 = vpop.f32.mrb[206].mxu0 }
 0x50b   : > { %v4007_v29 = vmul.f32 %v3861_v52, %v3720_v43  ;;  %v3680_v31 = vmax.f32 %v3639_v44, 0.0  ;;  %v3592_v6 = vadd.f32 %v3452_v40, %v14490_v56  ;;  %v9988_v19 = vpop.f32.mrb[207].mxu0  ;;  %v3886_v52 = vpop.permute.xlu1 %3885 }
 0x50d   : > { %4048 = vst [vmem:[#allocation2 + $0x82] sm:$0xff] %v4007_v29  ;;  %v3721_v17 = vmin.f32 %v3680_v31, 6.0  ;;  %v3640_v62 = vadd.f32 %v14627_v63, %v3592_v6  ;;  %10114 = vmatprep.mubr.f32.mxu1 %v4007_v29 }
 0x50e   : > { %v3457_v11 = vpop.f32.mrb[208].mxu0 }
 0x50f   : > { %v4008_v8 = vmul.f32 %v3866_v54, %v3721_v17  ;;  %v3681_v36 = vmax.f32 %v3640_v62, 0.0  ;;  %v3593_v12 = vadd.f32 %v3457_v11, %v14497_v24  ;;  %v9991_v59 = vpop.f32.mrb[209].mxu0  ;;  %v3891_v62 = vpop.permute.xlu0 %3890 }
 0x511   : > { %4049 = vst [vmem:[#allocation2 + $0x8a] sm:$0xff] %v4008_v8  ;;  %v3722_v16 = vmin.f32 %v3681_v36, 6.0  ;;  %v3641_v27 = vadd.f32 %v14627_v63, %v3593_v12  ;;  %10115 = vmatmul.mubr.f32.gmra.mrb[240].mxu1 %v4008_v8 }
 0x512   : > { %v3462_v56 = vpop.f32.mrb[210].mxu0 }
 0x513   : > { %v4009_v0 = vmul.f32 %v3871_v28, %v3722_v16  ;;  %v3682_v22 = vmax.f32 %v3641_v27, 0.0  ;;  %v3594_v49 = vadd.f32 %v3462_v56, %v14504_v33  ;;  %v9994_v13 = vpop.f32.mrb[211].mxu0  ;;  %v3896_v16 = vpop.permute.xlu1 %3895 }
 0x514   : > { %v3901_v13 = vpop.permute.xlu0 %3900 }
 0x515   : > { %4050 = vst [vmem:[#allocation2 + $0x92] sm:$0xff] %v4009_v0  ;;  %v3723_v47 = vmin.f32 %v3682_v22, 6.0  ;;  %v3642_v53 = vadd.f32 %v14627_v63, %v3594_v49  ;;  %10117 = vmatprep.mubr.f32.mxu1 %v4009_v0 }
 0x516   : > { %v3467_v24 = vpop.f32.mrb[212].mxu0 }
 0x517   : > { %v4010_v1 = vmul.f32 %v3876_v30, %v3723_v47  ;;  %v3683_v3 = vmax.f32 %v3642_v53, 0.0  ;;  %v3595_v48 = vadd.f32 %v3467_v24, %v14511_v60  ;;  %v9997_v32 = vpop.f32.mrb[213].mxu0 }
 0x519   : > { %4051 = vst [vmem:[#allocation2 + $0x9a] sm:$0xff] %v4010_v1  ;;  %v3724_v2 = vmin.f32 %v3683_v3, 6.0  ;;  %v3643_v4 = vadd.f32 %v14627_v63, %v3595_v48  ;;  %10118 = vmatmul.mubr.f32.gmra.mrb[242].mxu1 %v4010_v1  ;;  %v3906_v48 = vpop.permute.xlu1 %3905 }
 0x51a   : > { %v3472_v33 = vpop.f32.mrb[214].mxu0 }
 0x51b   : > { %v4011_v18 = vmul.f32 %v3881_v42, %v3724_v2  ;;  %v3684_v58 = vmax.f32 %v3643_v4, 0.0  ;;  %v3596_v34 = vadd.f32 %v3472_v33, %v14518_v21  ;;  %v10000_v51 = vpop.f32.mrb[215].mxu0 }
 0x51d   : > { %4052 = vst [vmem:[#allocation2 + $0xa2] sm:$0xff] %v4011_v18  ;;  %v3725_v43 = vmin.f32 %v3684_v58, 6.0  ;;  %v3644_v44 = vadd.f32 %v14627_v63, %v3596_v34  ;;  %10120 = vmatprep.mubr.f32.mxu1 %v4011_v18  ;;  %v3911_v58 = vpop.permute.xlu0 %3910 }
 0x51e   : > { %v3477_v60 = vpop.f32.mrb[216].mxu0 }
 0x51f   : > { %v4012_v40 = vmul.f32 %v3886_v52, %v3725_v43  ;;  %v3685_v29 = vmax.f32 %v3644_v44, 0.0  ;;  %v3597_v31 = vadd.f32 %v3477_v60, %v14525_v25  ;;  %v10003_v6 = vpop.f32.mrb[217].mxu0 }
 0x521   : > { %4053 = vst [vmem:[#allocation2 + $0xaa] sm:$0xff] %v4012_v40  ;;  %v3726_v19 = vmin.f32 %v3685_v29, 6.0  ;;  %v3645_v17 = vadd.f32 %v14627_v63, %v3597_v31  ;;  %10121 = vmatmul.mubr.f32.gmra.mrb[244].mxu1 %v4012_v40  ;;  %v3916_v40 = vpop.permute.xlu1 %3915 }
 0x522   : > { %v3482_v21 = vpop.f32.mrb[218].mxu0 }
 0x523   : > { %v4013_v54 = vmul.f32 %v3891_v62, %v3726_v19  ;;  %v3686_v11 = vmax.f32 %v3645_v17, 0.0  ;;  %v3598_v8 = vadd.f32 %v3482_v21, %v14532_v10  ;;  %v10006_v36 = vpop.f32.mrb[219].mxu0  ;;  %v3921_v21 = vpop.permute.xlu0 %3920 }
 0x525   : > { %4054 = vst [vmem:[#allocation2 + $0xb2] sm:$0xff] %v4013_v54  ;;  %v3727_v12 = vmin.f32 %v3686_v11, 6.0  ;;  %v3646_v59 = vadd.f32 %v14627_v63, %v3598_v8  ;;  %10123 = vmatprep.mubr.f32.mxu1 %v4013_v54 }
 0x526   : > { %v3487_v25 = vpop.f32.mrb[220].mxu0 }
 0x527   : > { %v4014_v27 = vmul.f32 %v3896_v16, %v3727_v12  ;;  %v3687_v28 = vmax.f32 %v3646_v59, 0.0  ;;  %v3599_v56 = vadd.f32 %v3487_v25, %v14539_v50  ;;  %v10009_v0 = vpop.f32.mrb[221].mxu0  ;;  %v3926_v16 = vpop.permute.xlu1 %3925 }
 0x529   : > { %4055 = vst [vmem:[#allocation2 + $0xba] sm:$0xff] %v4014_v27  ;;  %v3728_v22 = vmin.f32 %v3687_v28, 6.0  ;;  %v3647_v49 = vadd.f32 %v14627_v63, %v3599_v56  ;;  %10124 = vmatmul.mubr.f32.gmra.mrb[246].mxu1 %v4014_v27 }
 0x52a   : > { %v3492_v10 = vpop.f32.mrb[222].mxu0 }
 0x52b   : > { %v4015_v47 = vmul.f32 %v3901_v13, %v3728_v22  ;;  %v3688_v53 = vmax.f32 %v3647_v49, 0.0  ;;  %v3600_v30 = vadd.f32 %v3492_v10, %v14546_v9  ;;  %v10012_v24 = vpop.f32.mrb[223].mxu0  ;;  %v3931_v49 = vpop.permute.xlu0 %3930 }
 0x52d   : > { %4056 = vst [vmem:[#allocation2 + $0xc2] sm:$0xff] %v4015_v47  ;;  %v3729_v1 = vmin.f32 %v3688_v53, 6.0  ;;  %v3648_v3 = vadd.f32 %v14627_v63, %v3600_v30  ;;  %10126 = vmatprep.mubr.f32.mxu1 %v4015_v47 }
 0x52e   : > { %v3497_v50 = vpop.f32.mrb[224].mxu0 }
 0x52f   : > { %v4016_v32 = vmul.f32 %v3906_v48, %v3729_v1  ;;  %v3689_v2 = vmax.f32 %v3648_v3, 0.0  ;;  %v3601_v4 = vadd.f32 %v3497_v50, %v14553_v39  ;;  %v10015_v42 = vpop.f32.mrb[225].mxu0  ;;  %v3936_v1 = vpop.permute.xlu1 %3935 }
 0x530   : > { %v3941_v42 = vpop.permute.xlu0 %3940 }
 0x531   : > { %4057 = vst [vmem:[#allocation2 + $0xca] sm:$0xff] %v4016_v32  ;;  %v3730_v33 = vmin.f32 %v3689_v2, 6.0  ;;  %v3649_v18 = vadd.f32 %v14627_v63, %v3601_v4  ;;  %10127 = vmatmul.mubr.f32.gmra.mrb[248].mxu1 %v4016_v32 }
 0x532   : > { %v3502_v9 = vpop.f32.mrb[226].mxu0 }
 0x533   : > { %v4017_v34 = vmul.f32 %v3911_v58, %v3730_v33  ;;  %v3690_v51 = vmax.f32 %v3649_v18, 0.0  ;;  %v3602_v43 = vadd.f32 %v3502_v9, %v14560_v14  ;;  %v10018_v44 = vpop.f32.mrb[227].mxu0 }
 0x535   : > { %4058 = vst [vmem:[#allocation2 + $0xd2] sm:$0xff] %v4017_v34  ;;  %v3731_v52 = vmin.f32 %v3690_v51, 6.0  ;;  %v3650_v60 = vadd.f32 %v14627_v63, %v3602_v43  ;;  %10129 = vmatprep.mubr.f32.mxu1 %v4017_v34  ;;  %v3946_v43 = vpop.permute.xlu1 %3945 }
 0x536   : > { %v3507_v39 = vpop.f32.mrb[228].mxu0 }
 0x537   : > { %v4018_v29 = vmul.f32 %v3916_v40, %v3731_v52  ;;  %v3691_v31 = vmax.f32 %v3650_v60, 0.0  ;;  %v3603_v6 = vadd.f32 %v3507_v39, %v14567_v41  ;;  %v10021_v19 = vpop.f32.mrb[229].mxu0 }
 0x539   : > { %4059 = vst [vmem:[#allocation2 + $0xda] sm:$0xff] %v4018_v29  ;;  %v3732_v17 = vmin.f32 %v3691_v31, 6.0  ;;  %v3651_v62 = vadd.f32 %v14627_v63, %v3603_v6  ;;  %10130 = vmatmul.mubr.f32.gmra.mrb[250].mxu1 %v4018_v29  ;;  %v3951_v31 = vpop.permute.xlu0 %3950 }
 0x53a   : > { %v3512_v14 = vpop.f32.mrb[230].mxu0 }
 0x53b   : > { %v4019_v54 = vmul.f32 %v3921_v21, %v3732_v17  ;;  %v3692_v11 = vmax.f32 %v3651_v62, 0.0  ;;  %v3604_v8 = vadd.f32 %v3512_v14, %v14571_v38  ;;  %v10024_v36 = vpop.f32.mrb[231].mxu0 }
 0x53d   : > { %4060 = vst [vmem:[#allocation2 + $0xe2] sm:$0xff] %v4019_v54  ;;  %v3733_v12 = vmin.f32 %v3692_v11, 6.0  ;;  %v3652_v59 = vadd.f32 %v14627_v63, %v3604_v8  ;;  %10132 = vmatprep.mubr.f32.mxu1 %v4019_v54  ;;  %v3956_v54 = vpop.permute.xlu1 %3955 }
 0x53e   : > { %v3517_v41 = vpop.f32.mrb[232].mxu0 }
 0x53f   : > { %v4020_v25 = vmul.f32 %v3926_v16, %v3733_v12  ;;  %v3693_v27 = vmax.f32 %v3652_v59, 0.0  ;;  %v3605_v28 = vadd.f32 %v3517_v41, %v14575_v15  ;;  %v10027_v56 = vpop.f32.mrb[233].mxu0  ;;  %v3961_v41 = vpop.permute.xlu0 %3960 }
 0x541   : > { %4061 = vst [vmem:[#allocation2 + $0xea] sm:$0xff] %v4020_v25  ;;  %v3734_v0 = vmin.f32 %v3693_v27, 6.0  ;;  %v3653_v22 = vadd.f32 %v14627_v63, %v3605_v28  ;;  %10133 = vmatmul.mubr.f32.gmra.mrb[252].mxu1 %v4020_v25 }
 0x542   : > { %v3522_v38 = vpop.f32.mrb[234].mxu0 }
 0x543   : > { %v4021_v13 = vmul.f32 %v3931_v49, %v3734_v0  ;;  %v3694_v10 = vmax.f32 %v3653_v22, 0.0  ;;  %v3606_v47 = vadd.f32 %v3522_v38, %v14579_v46  ;;  %v10030_v53 = vpop.f32.mrb[235].mxu0  ;;  %v3966_v49 = vpop.permute.xlu1 %3965 }
 0x544   : > { %v4709_v53 = vld [vmem:[#allocation8 + $0x110] sm:$0xff] }
 0x545   : > { %4062 = vst [vmem:[#allocation2 + $0xf2] sm:$0xff] %v4021_v13  ;;  %v3735_v30 = vmin.f32 %v3694_v10, 6.0  ;;  %v3654_v24 = vadd.f32 %v14627_v63, %v3606_v47  ;;  %10135 = vmatprep.mubr.f32.mxu1 %v4021_v13 }
 0x546   : > { %v3527_v15 = vpop.f32.mrb[236].mxu0 }
 0x547   : > { %v4022_v3 = vmul.f32 %v3936_v1, %v3735_v30  ;;  %v3695_v48 = vmax.f32 %v3654_v24, 0.0  ;;  %v3607_v50 = vadd.f32 %v3527_v15, %v14583_v57  ;;  %v10033_v32 = vpop.f32.mrb[237].mxu0  ;;  %v4710_v30 = vld [vmem:[#allocation8 + $0x118] sm:$0xff]  ;;  %v3971_v15 = vpop.permute.xlu0 %3970 }
 0x549   : > { %4063 = vst [vmem:[#allocation2 + $0xfa] sm:$0xff] %v4022_v3  ;;  %v3736_v2 = vmin.f32 %v3695_v48, 6.0  ;;  %v3655_v4 = vadd.f32 %v14627_v63, %v3607_v50  ;;  %10136 = vmatmul.mubr.f32.gmra.mrb[254].mxu1 %v4022_v3 }
 0x54a   : > { %v3532_v46 = vpop.f32.mrb[238].mxu0 }
 0x54b   : > { %v4023_v33 = vmul.f32 %v3941_v42, %v3736_v2  ;;  %v3696_v18 = vmax.f32 %v3655_v4, 0.0  ;;  %v3608_v58 = vadd.f32 %v3532_v46, %v14587_v45  ;;  %v10036_v9 = vpop.f32.mrb[239].mxu0  ;;  %v11205_v4 = vpack.c.bf16 %v4710_v30, %v4709_v53  ;;  %v4076_v42 = vld [vmem:[#allocation2 + $0x19] sm:$0xff]  ;;  %v4087_v53 = vld [vmem:[#allocation2 + $0x71] sm:$0xff] }
 0x54c   : > { %v4712_v46 = vld [vmem:[#allocation8 + $0x128] sm:$0xff]  ;;  %v3976_v9 = vpop.permute.xlu1 %3975 }
 0x54d   : > { %4064 = vst [vmem:[#allocation2 + $0x102] sm:$0xff] %v4023_v33  ;;  %v3737_v34 = vmin.f32 %v3696_v18, 6.0  ;;  %v3656_v51 = vadd.f32 %v14627_v63, %v3608_v58  ;;  %10138 = vmatprep.mubr.f32.mxu1 %v4023_v33  ;;  %v4077_v58 = vld [vmem:[#allocation2 + $0x21] sm:$0xff] }
 0x54e   : > { %v3537_v57 = vpop.f32.mrb[240].mxu0 }
 0x54f   : > { %v4024_v44 = vmul.f32 %v3946_v43, %v3737_v34  ;;  %v3697_v52 = vmax.f32 %v3656_v51, 0.0  ;;  %v3609_v60 = vadd.f32 %v3537_v57, %v14591_v23  ;;  %v10039_v40 = vpop.f32.mrb[241].mxu0 }
 0x550   : > { %v4714_v40 = vld [vmem:[#allocation8 + $0x138] sm:$0xff] }
 0x551   : > { %4065 = vst [vmem:[#allocation2 + $0x10a] sm:$0xff] %v4024_v44  ;;  %v3738_v39 = vmin.f32 %v3697_v52, 6.0  ;;  %v3657_v29 = vadd.f32 %v14627_v63, %v3609_v60  ;;  %10139 = vmatmul.mubr.f32.gmra.mrb[0].mxu1 %v4024_v44  ;;  %v4078_v52 = vld [vmem:[#allocation2 + $0x29] sm:$0xff] }
 0x552   : > { %v3542_v45 = vpop.f32.mrb[242].mxu0  ;;  %v4713_v60 = vld [vmem:[#allocation8 + $0x130] sm:$0xff] }
 0x553   : > { %v4025_v6 = vmul.f32 %v3951_v31, %v3738_v39  ;;  %v3698_v19 = vmax.f32 %v3657_v29, 0.0  ;;  %v3610_v17 = vadd.f32 %v3542_v45, %v14598_v5  ;;  %v10042_v62 = vpop.f32.mrb[243].mxu0  ;;  %v4079_v31 = vld [vmem:[#allocation2 + $0x31] sm:$0xff]  ;;  %v3981_v45 = vpop.permute.xlu0 %3980 }
 0x555   : > { %4066 = vst [vmem:[#allocation2 + $0x112] sm:$0xff] %v4025_v6  ;;  %v3739_v21 = vmin.f32 %v3698_v19, 6.0  ;;  %v3658_v14 = vadd.f32 %v14627_v63, %v3610_v17  ;;  %10141 = vmatprep.mubr.f32.mxu1 %v4025_v6  ;;  %v11213_v17 = vpack.c.bf16 %v4714_v40, %v4713_v60 }
 0x556   : > { %v3547_v23 = vpop.f32.mrb[244].mxu0 }
 0x557   : > { %v4026_v11 = vmul.f32 %v3956_v54, %v3739_v21  ;;  %v3699_v8 = vmax.f32 %v3658_v14, 0.0  ;;  %v3611_v36 = vadd.f32 %v3547_v23, %v14602_v55  ;;  %v10045_v12 = vpop.f32.mrb[245].mxu0  ;;  %v4080_v21 = vld [vmem:[#allocation2 + $0x39] sm:$0xff] }
 0x558   : > { %v4715_v14 = vld [vmem:[#allocation8 + $0x140] sm:$0xff]  ;;  %v4716_v54 = vld [vmem:[#allocation8 + $0x148] sm:$0xff] }
 0x559   : > { %4067 = vst [vmem:[#allocation2 + $0x11a] sm:$0xff] %v4026_v11  ;;  %v3740_v59 = vmin.f32 %v3699_v8, 6.0  ;;  %v3659_v16 = vadd.f32 %v14627_v63, %v3611_v36  ;;  %10142 = vmatmul.mubr.f32.gmra.mrb[2].mxu1 %v4026_v11  ;;  %v4081_v8 = vld [vmem:[#allocation2 + $0x41] sm:$0xff]  ;;  %v3986_v36 = vpop.permute.xlu1 %3985 }
 0x55a   : > { %v3552_v5 = vpop.f32.mrb[246].mxu0 }
 0x55b   : > { %v4027_v25 = vmul.f32 %v3961_v41, %v3740_v59  ;;  %v3700_v27 = vmax.f32 %v3659_v16, 0.0  ;;  %v3612_v28 = vadd.f32 %v3552_v5, %v14606_v20  ;;  %v10048_v56 = vpop.f32.mrb[247].mxu0  ;;  %v4075_v20 = vld [vmem:[#allocation2 + $0x11] sm:$0xff]  ;;  %v11217_v16 = vpack.c.bf16 %v4716_v54, %v4715_v14  ;;  %v4717_v41 = vld [vmem:[#allocation8 + $0x150] sm:$0xff] }
 0x55c   : > { %v4718_v5 = vld [vmem:[#allocation8 + $0x158] sm:$0xff] }
 0x55d   : > { %4068 = vst [vmem:[#allocation2 + $0x122] sm:$0xff] %v4027_v25  ;;  %v3741_v0 = vmin.f32 %v3700_v27, 6.0  ;;  %v3660_v22 = vadd.f32 %v14627_v63, %v3612_v28  ;;  %10144 = vmatprep.mubr.f32.mxu1 %v4027_v25  ;;  %v4083_v27 = vld [vmem:[#allocation2 + $0x51] sm:$0xff]  ;;  %v3991_v28 = vpop.permute.xlu0 %3990  ;;  %v11221_v56 = vpack.c.bf16 %v4718_v5, %v4717_v41 }
 0x55e   : > { %v3557_v55 = vpop.f32.mrb[248].mxu0  ;;  %v5048_v14 = vld [vmem:[#allocation8 + $0x1b8] sm:$0xff] }
 0x55f   : > { %v4028_v38 = vmul.f32 %v3966_v49, %v3741_v0  ;;  %v3701_v13 = vmax.f32 %v3660_v22, 0.0  ;;  %v3613_v10 = vadd.f32 %v3557_v55, %v14610_v26  ;;  %v10051_v47 = vpop.f32.mrb[249].mxu0  ;;  %v4711_v26 = vld [vmem:[#allocation8 + $0x120] sm:$0xff]  ;;  %v4720_v49 = vld [vmem:[#allocation8 + $0x168] sm:$0xff]  ;;  %v5052_v41 = vld [vmem:[#allocation8 + $0x1d8] sm:$0xff] }
 0x560   : > { %v11209_v44 = vpack.c.bf16 %v4712_v46, %v4711_v26  ;;  %v4084_v0 = vld [vmem:[#allocation2 + $0x59] sm:$0xff]  ;;  %v4085_v55 = vld [vmem:[#allocation2 + $0x61] sm:$0xff]  ;;  %v4722_v47 = vld [vmem:[#allocation8 + $0x178] sm:$0xff] }
 0x561   : > { %4069 = vst [vmem:[#allocation2 + $0x12a] sm:$0xff] %v4028_v38  ;;  %v3742_v24 = vmin.f32 %v3701_v13, 6.0  ;;  %v3661_v1 = vadd.f32 %v14627_v63, %v3613_v10  ;;  %10145 = vmatmul.mubr.f32.gmra.mrb[4].mxu1 %v4028_v38  ;;  %v4719_v22 = vld [vmem:[#allocation8 + $0x160] sm:$0xff]  ;;  %v4086_v13 = vld [vmem:[#allocation2 + $0x69] sm:$0xff]  ;;  %v4097_v46 = vld [vmem:[#allocation2 + $0xc1] sm:$0xff] }
 0x562   : > { %v3562_v3 = vpop.f32.mrb[250].mxu0  ;;  %10179 = vmatprep.mubr.f32.mxu1 %v4075_v20  ;;  %v11225_v38 = vpack.c.bf16 %v4720_v49, %v4719_v22  ;;  %v4721_v10 = vld [vmem:[#allocation8 + $0x170] sm:$0xff]  ;;  %v5042_v20 = vld [vmem:[#allocation8 + $0x188] sm:$0xff]  ;;  %v14722_v54 = vld [vmem:[#allocation2 + $0x33] sm:$0xff] }
 0x563   : > { %v4029_v48 = vmul.f32 %v3971_v15, %v3742_v24  ;;  %v3702_v50 = vmax.f32 %v3661_v1, 0.0  ;;  %v3614_v32 = vadd.f32 %v3562_v3, %v14614_v37  ;;  %v10054_v2 = vpop.f32.mrb[251].mxu0  ;;  %v11229_v30 = vpack.c.bf16 %v4722_v47, %v4721_v10  ;;  %v4088_v24 = vld [vmem:[#allocation2 + $0x79] sm:$0xff]  ;;  %v4089_v15 = vld [vmem:[#allocation2 + $0x81] sm:$0xff]  ;;  %v14743_v22 = vld [vmem:[#allocation2 + $0x6b] sm:$0xff] }
 0x564   : > { %v5041_v1 = vld [vmem:[#allocation8 + $0x180] sm:$0xff]  ;;  %v4093_v2 = vld [vmem:[#allocation2 + $0xa1] sm:$0xff] }
 0x565   : > { %4070 = vst [vmem:[#allocation2 + $0x132] sm:$0xff] %v4029_v48  ;;  %v3743_v33 = vmin.f32 %v3702_v50, 6.0  ;;  %v3662_v18 = vadd.f32 %v14627_v63, %v3614_v32  ;;  %10180 = vmatmul.mubr.f32.vlgmr.msra.gmra.mrb[226].mxu1 %v4076_v42  ;;  %v11233_v3 = vpack.c.bf16 %v5042_v20, %v5041_v1  ;;  %v4090_v48 = vld [vmem:[#allocation2 + $0x89] sm:$0xff]  ;;  %v4091_v50 = vld [vmem:[#allocation2 + $0x91] sm:$0xff]  ;;  %v4092_v32 = vld [vmem:[#allocation2 + $0x99] sm:$0xff] }
 0x566   : > { %v3567_v34 = vpop.f32.mrb[252].mxu0  ;;  %10182 = vmatprep.mubr.f32.mxu1 %v4077_v58  ;;  %11204 = vmatpush3.bf16.msra.mxu1 %v14652_v35  ;;  %v4095_v42 = vld [vmem:[#allocation2 + $0xb1] sm:$0xff]  ;;  %v4096_v26 = vld [vmem:[#allocation2 + $0xb9] sm:$0xff]  ;;  %v4109_v60 = vld [vmem:[#allocation2 + $0x121] sm:$0xff] }
 0x567   : > { %v4030_v51 = vmul.f32 %v3976_v9, %v3743_v33  ;;  %v3703_v43 = vmax.f32 %v3662_v18, 0.0  ;;  %v3615_v37 = vadd.f32 %v3567_v34, %v14618_v7  ;;  %v10057_v57 = vpop.f32.mrb[253].mxu0  ;;  %11206 = vmatprep.subr.bf16.mxu1 %v11205_v4  ;;  %v4098_v33 = vld [vmem:[#allocation2 + $0xc9] sm:$0xff]  ;;  %v4099_v18 = vld [vmem:[#allocation2 + $0xd1] sm:$0xff]  ;;  %v4100_v58 = vld [vmem:[#allocation2 + $0xd9] sm:$0xff] }
 0x568   : > { %v4101_v9 = vld [vmem:[#allocation2 + $0xe1] sm:$0xff]  ;;  %v4102_v34 = vld [vmem:[#allocation2 + $0xe9] sm:$0xff]  ;;  %v14734_v5 = vld [vmem:[#allocation2 + $0x53] sm:$0xff] }
 0x569   : > { %4071 = vst [vmem:[#allocation2 + $0x13a] sm:$0xff] %v4030_v51  ;;  %v3744_v39 = vmin.f32 %v3703_v43, 6.0  ;;  %v3663_v29 = vadd.f32 %v14627_v63, %v3615_v37  ;;  %10183 = vmatmul.mubr.f32.gmra.mrb[228].mxu1 %v4078_v52  ;;  %v4103_v51 = vld [vmem:[#allocation2 + $0xf1] sm:$0xff]  ;;  %v4104_v43 = vld [vmem:[#allocation2 + $0xf9] sm:$0xff]  ;;  %v4105_v37 = vld [vmem:[#allocation2 + $0x101] sm:$0xff] }
 0x56a   : > { %v3572_v6 = vpop.f32.mrb[254].mxu0  ;;  %10185 = vmatprep.mubr.f32.mxu1 %v4079_v31  ;;  %11208 = vmatpush3.bf16.msra.mxu1 %v11205_v4  ;;  %v4094_v4 = vld [vmem:[#allocation2 + $0xa9] sm:$0xff]  ;;  %v4108_v52 = vld [vmem:[#allocation2 + $0x119] sm:$0xff] }
 0x56b   : > { %v4031_v35 = vmul.f32 %v3981_v45, %v3744_v39  ;;  %v3704_v19 = vmax.f32 %v3663_v29, 0.0  ;;  %v3616_v7 = vadd.f32 %v3572_v6, %v14622_v61  ;;  %11210 = vmatprep.subr.bf16.mxu1 %v11209_v44  ;;  %v10060_v62 = vpop.f32.mrb[255].mxu0  ;;  %v4082_v61 = vld [vmem:[#allocation2 + $0x49] sm:$0xff]  ;;  %v4670_v31 = vld [vmem:[#allocation2 + $0x13] sm:$0xff]  ;;  %v4671_v6 = vld [vmem:[#allocation2 + $0x1b] sm:$0xff] }
 0x56c   : > { %v4106_v57 = vld [vmem:[#allocation2 + $0x109] sm:$0xff]  ;;  %v14749_v10 = vld [vmem:[#allocation2 + $0x7b] sm:$0xff]  ;;  %v14758_v20 = vld [vmem:[#allocation2 + $0x93] sm:$0xff] }
 0x56d   : > { %4072 = vst [vmem:[#allocation2 + $0x142] sm:$0xff] %v4031_v35  ;;  %v3745_v23 = vmin.f32 %v3704_v19, 6.0  ;;  %v3664_v11 = vadd.f32 %v14627_v63, %v3616_v7  ;;  %10186 = vmatmul.mubr.f32.gmra.mrb[230].mxu1 %v4080_v21  ;;  %v4110_v40 = vld [vmem:[#allocation2 + $0x129] sm:$0xff]  ;;  %v5045_v35 = vld [vmem:[#allocation8 + $0x1a0] sm:$0xff]  ;;  %v5046_v19 = vld [vmem:[#allocation8 + $0x1a8] sm:$0xff] }
 0x56e   : > { %10188 = vmatprep.mubr.f32.mxu1 %v4081_v8  ;;  %11212 = vmatpush3.bf16.msra.mxu1 %v11209_v44  ;;  %v4107_v44 = vld [vmem:[#allocation2 + $0x111] sm:$0xff]  ;;  %v5043_v39 = vld [vmem:[#allocation8 + $0x190] sm:$0xff] }
 0x56f   : > { %v4032_v12 = vmul.f32 %v3986_v36, %v3745_v23  ;;  %v3705_v59 = vmax.f32 %v3664_v11, 0.0  ;;  %11214 = vmatprep.subr.bf16.mxu1 %v11213_v17  ;;  %v5044_v29 = vld [vmem:[#allocation8 + $0x198] sm:$0xff]  ;;  %v14716_v7 = vld [vmem:[#allocation2 + $0x23] sm:$0xff]  ;;  %v14725_v11 = vld [vmem:[#allocation2 + $0x3b] sm:$0xff] }
 0x570   : > { %v11237_v45 = vpack.c.bf16 %v5044_v29, %v5043_v39  ;;  %v14719_v62 = vld [vmem:[#allocation2 + $0x2b] sm:$0xff]  ;;  %v5049_v8 = vld [vmem:[#allocation8 + $0x1c0] sm:$0xff]  ;;  %v5050_v36 = vld [vmem:[#allocation8 + $0x1c8] sm:$0xff] }
 0x571   : > { %4073 = vst [vmem:[#allocation2 + $0x14a] sm:$0xff] %v4032_v12  ;;  %v3746_v25 = vmin.f32 %v3705_v59, 6.0  ;;  %10189 = vmatmul.mubr.f32.gmra.mrb[232].mxu1 %v4082_v61  ;;  %v5047_v21 = vld [vmem:[#allocation8 + $0x1b0] sm:$0xff]  ;;  %v11249_v59 = vpack.c.bf16 %v5050_v36, %v5049_v8  ;;  %v5375_v47 = vld [vmem:[#allocation8 + $0x200] sm:$0xff]  ;;  %v5380_v39 = vld [vmem:[#allocation8 + $0x228] sm:$0xff] }
 0x572   : > { %10191 = vmatprep.mubr.f32.mxu1 %v4083_v27  ;;  %11216 = vmatpush3.bf16.msra.mxu1 %v11213_v17  ;;  %v11241_v17 = vpack.c.bf16 %v5046_v19, %v5045_v35  ;;  %v11245_v23 = vpack.c.bf16 %v5048_v14, %v5047_v21  ;;  %v14728_v12 = vld [vmem:[#allocation2 + $0x43] sm:$0xff]  ;;  %v14737_v27 = vld [vmem:[#allocation2 + $0x5b] sm:$0xff]  ;;  %v14755_v1 = vld [vmem:[#allocation2 + $0x8b] sm:$0xff] }
 0x573   : > { %v4033_v63 = vmul.f32 %v3991_v28, %v3746_v25  ;;  %11218 = vmatprep.subr.bf16.mxu1 %v11217_v16  ;;  %v5051_v61 = vld [vmem:[#allocation8 + $0x1d0] sm:$0xff]  ;;  %v5053_v28 = vld [vmem:[#allocation8 + $0x1e0] sm:$0xff]  ;;  %v5384_v19 = vld [vmem:[#allocation8 + $0x248] sm:$0xff] }
 0x574   : > { %v11253_v25 = vpack.c.bf16 %v5052_v41, %v5051_v61  ;;  %v5055_v49 = vld [vmem:[#allocation8 + $0x1f0] sm:$0xff]  ;;  %v5383_v35 = vld [vmem:[#allocation8 + $0x240] sm:$0xff]  ;;  %v5390_v8 = vld [vmem:[#allocation8 + $0x278] sm:$0xff] }
 0x575   : > { %4074 = vst [vmem:[#allocation2 + $0x152] sm:$0xf] %v4033_v63  ;;  %10192 = vmatmul.mubr.f32.gmra.mrb[234].mxu1 %v4084_v0  ;;  %v5054_v63 = vld [vmem:[#allocation8 + $0x1e8] sm:$0xff]  ;;  %v5387_v14 = vld [vmem:[#allocation8 + $0x260] sm:$0xff] }
 0x576   : > { %10194 = vmatprep.mubr.f32.mxu1 %v4085_v55  ;;  %11220 = vmatpush3.bf16.msra.mxu1 %v11217_v16  ;;  %v14731_v16 = vld [vmem:[#allocation2 + $0x4b] sm:$0xff]  ;;  %v11257_v0 = vpack.c.bf16 %v5054_v63, %v5053_v28  ;;  %v5038_v61 = vld [vmem:[#allocation2 + $0x133] sm:$0xff]  ;;  %v5039_v41 = vld [vmem:[#allocation2 + $0x13b] sm:$0xff] }
 0x577   : > { %11222 = vmatprep.subr.bf16.mxu1 %v11221_v56  ;;  %v5056_v55 = vld [vmem:[#allocation8 + $0x1f8] sm:$0xff] }
 0x578   : > { %v5339_v63 = vld [vmem:[#allocation2 + $0x2c] sm:$0xff] }
 0x579   : > { %10195 = vmatmul.mubr.f32.gmra.mrb[236].mxu1 %v4086_v13  ;;  %v11261_v13 = vpack.c.bf16 %v5056_v55, %v5055_v49  ;;  %v5341_v55 = vld [vmem:[#allocation2 + $0x3c] sm:$0xff] }
 0x57a   : > { %10197 = vmatprep.mubr.f32.mxu1 %v4087_v53  ;;  %11224 = vmatpush3.bf16.msra.mxu1 %v11221_v56  ;;  %v14740_v56 = vld [vmem:[#allocation2 + $0x63] sm:$0xff] }
 0x57b   : > { %11226 = vmatprep.subr.bf16.mxu1 %v11225_v38  ;;  %v5376_v53 = vld [vmem:[#allocation8 + $0x208] sm:$0xff] }
 0x57d   : > { %10198 = vmatmul.mubr.f32.gmra.mrb[238].mxu1 %v4088_v24  ;;  %v11265_v24 = vpack.c.bf16 %v5376_v53, %v5375_v47  ;;  %v5343_v53 = vld [vmem:[#allocation2 + $0x4c] sm:$0xff] }
 0x57e   : > { %10200 = vmatprep.mubr.f32.mxu1 %v4089_v15  ;;  %11228 = vmatpush3.bf16.msra.mxu1 %v11225_v38  ;;  %v14746_v38 = vld [vmem:[#allocation2 + $0x73] sm:$0xff]  ;;  %v14761_v15 = vld [vmem:[#allocation2 + $0x9b] sm:$0xff] }
 0x57f   : > { %11230 = vmatprep.subr.bf16.mxu1 %v11229_v30 }
 0x581   : > { %10201 = vmatmul.mubr.f32.gmra.mrb[240].mxu1 %v4090_v48  ;;  %v14767_v48 = vld [vmem:[#allocation2 + $0xab] sm:$0xff] }
 0x582   : > { %10203 = vmatprep.mubr.f32.mxu1 %v4091_v50  ;;  %11232 = vmatpush3.bf16.msra.mxu1 %v11229_v30  ;;  %v14752_v30 = vld [vmem:[#allocation2 + $0x83] sm:$0xff]  ;;  %v14770_v50 = vld [vmem:[#allocation2 + $0xb3] sm:$0xff] }
 0x583   : > { %11234 = vmatprep.subr.bf16.mxu1 %v11233_v3 }
 0x585   : > { %10204 = vmatmul.mubr.f32.gmra.mrb[242].mxu1 %v4092_v32  ;;  %v14773_v32 = vld [vmem:[#allocation2 + $0xbb] sm:$0xff] }
 0x586   : > { %10206 = vmatprep.mubr.f32.mxu1 %v4093_v2  ;;  %v14776_v2 = vld [vmem:[#allocation2 + $0xc3] sm:$0xff] }
 0x589   : > { %10207 = vmatmul.mubr.f32.gmra.mrb[244].mxu1 %v4094_v4  ;;  %v14779_v4 = vld [vmem:[#allocation2 + $0xcb] sm:$0xff] }
 0x58a   : > { %10209 = vmatprep.mubr.f32.mxu1 %v4095_v42  ;;  %v14782_v42 = vld [vmem:[#allocation2 + $0xd3] sm:$0xff] }
 0x58d   : > { %10210 = vmatmul.mubr.f32.gmra.mrb[246].mxu1 %v4096_v26  ;;  %v14785_v26 = vld [vmem:[#allocation2 + $0xdb] sm:$0xff] }
 0x58e   : > { %10212 = vmatprep.mubr.f32.mxu1 %v4097_v46  ;;  %v14788_v46 = vld [vmem:[#allocation2 + $0xe3] sm:$0xff] }
 0x591   : > { %10213 = vmatmul.mubr.f32.gmra.mrb[248].mxu1 %v4098_v33  ;;  %v14791_v33 = vld [vmem:[#allocation2 + $0xeb] sm:$0xff] }
 0x592   : > { %10215 = vmatprep.mubr.f32.mxu1 %v4099_v18  ;;  %v14794_v18 = vld [vmem:[#allocation2 + $0xf3] sm:$0xff] }
 0x595   : > { %10216 = vmatmul.mubr.f32.gmra.mrb[250].mxu1 %v4100_v58  ;;  %v14797_v58 = vld [vmem:[#allocation2 + $0xfb] sm:$0xff] }
 0x596   : > { %10218 = vmatprep.mubr.f32.mxu1 %v4101_v9  ;;  %v14800_v9 = vld [vmem:[#allocation2 + $0x103] sm:$0xff] }
 0x599   : > { %10219 = vmatmul.mubr.f32.gmra.mrb[252].mxu1 %v4102_v34  ;;  %v14803_v34 = vld [vmem:[#allocation2 + $0x10b] sm:$0xff] }
 0x59a   : > { %10221 = vmatprep.mubr.f32.mxu1 %v4103_v51  ;;  %v14806_v51 = vld [vmem:[#allocation2 + $0x113] sm:$0xff] }
 0x59d   : > { %10222 = vmatmul.mubr.f32.gmra.mrb[254].mxu1 %v4104_v43  ;;  %v14809_v43 = vld [vmem:[#allocation2 + $0x11b] sm:$0xff] }
 0x59e   : > { %10224 = vmatprep.mubr.f32.mxu1 %v4105_v37  ;;  %v14812_v37 = vld [vmem:[#allocation2 + $0x123] sm:$0xff] }
 0x5a1   : > { %10225 = vmatmul.mubr.f32.gmra.mrb[0].mxu1 %v4106_v57  ;;  %v14815_v57 = vld [vmem:[#allocation2 + $0x12b] sm:$0xff] }
 0x5a2   : > { %10227 = vmatprep.mubr.f32.mxu1 %v4107_v44  ;;  %v5377_v44 = vld [vmem:[#allocation8 + $0x210] sm:$0xff] }
 0x5a5   : > { %10228 = vmatmul.mubr.f32.gmra.mrb[2].mxu1 %v4108_v52  ;;  %v5378_v52 = vld [vmem:[#allocation8 + $0x218] sm:$0xff] }
 0x5a6   : > { %10230 = vmatprep.mubr.f32.mxu1 %v4109_v60  ;;  %v11269_v60 = vpack.c.bf16 %v5378_v52, %v5377_v44  ;;  %v5353_v52 = vld [vmem:[#allocation2 + $0x9c] sm:$0xff] }
 0x5a9   : > { %10231 = vmatmul.mubr.f32.gmra.mrb[4].mxu1 %v4110_v40  ;;  %v5379_v40 = vld [vmem:[#allocation8 + $0x220] sm:$0xff] }
 0x5aa   : > { %10265 = vmatprep.mubr.f32.mxu1 %v4670_v31  ;;  %v11273_v29 = vpack.c.bf16 %v5380_v39, %v5379_v40  ;;  %v5381_v31 = vld [vmem:[#allocation8 + $0x230] sm:$0xff]  ;;  %v5356_v39 = vld [vmem:[#allocation2 + $0xb4] sm:$0xff] }
 0x5ab   : > { %v5355_v40 = vld [vmem:[#allocation2 + $0xac] sm:$0xff] }
 0x5ad   : > { %10266 = vmatmul.mubr.f32.vlgmr.msra.gmra.mrb[226].mxu1 %v4671_v6 }
 0x5ae   : > { %10268 = vmatprep.mubr.f32.mxu1 %v14716_v7  ;;  %11236 = vmatpush3.bf16.msra.mxu1 %v11233_v3  ;;  %v14764_v3 = vld [vmem:[#allocation2 + $0xa3] sm:$0xff] }
 0x5af   : > { %11238 = vmatprep.subr.bf16.mxu1 %v11237_v45 }
 0x5b1   : > { %10269 = vmatmul.mubr.f32.gmra.mrb[228].mxu1 %v14719_v62 }
 0x5b2   : > { %10271 = vmatprep.mubr.f32.mxu1 %v14722_v54  ;;  %11240 = vmatpush3.bf16.msra.mxu1 %v11237_v45  ;;  %v5382_v45 = vld [vmem:[#allocation8 + $0x238] sm:$0xff] }
 0x5b3   : > { %11242 = vmatprep.subr.bf16.mxu1 %v11241_v17  ;;  %v11277_v6 = vpack.c.bf16 %v5382_v45, %v5381_v31  ;;  %v5358_v31 = vld [vmem:[#allocation2 + $0xc4] sm:$0xff]  ;;  %v5359_v45 = vld [vmem:[#allocation2 + $0xcc] sm:$0xff] }
 0x5b5   : > { %10272 = vmatmul.mubr.f32.gmra.mrb[230].mxu1 %v14725_v11 }
 0x5b6   : > { %10274 = vmatprep.mubr.f32.mxu1 %v14728_v12  ;;  %11244 = vmatpush3.bf16.msra.mxu1 %v11241_v17  ;;  %v5385_v17 = vld [vmem:[#allocation8 + $0x250] sm:$0xff] }
 0x5b7   : > { %11246 = vmatprep.subr.bf16.mxu1 %v11245_v23 }
 0x5b9   : > { %10275 = vmatmul.mubr.f32.gmra.mrb[232].mxu1 %v14731_v16 }
 0x5ba   : > { %10277 = vmatprep.mubr.f32.mxu1 %v14734_v5  ;;  %11248 = vmatpush3.bf16.msra.mxu1 %v11245_v23 }
 0x5bb   : > { %11250 = vmatprep.subr.bf16.mxu1 %v11249_v59 }
 0x5bd   : > { %10278 = vmatmul.mubr.f32.gmra.mrb[234].mxu1 %v14737_v27 }
 0x5be   : > { %10280 = vmatprep.mubr.f32.mxu1 %v14740_v56  ;;  %11252 = vmatpush3.bf16.msra.mxu1 %v11249_v59  ;;  %v5710_v59 = vld [vmem:[#allocation8 + $0x288] sm:$0xff] }
 0x5bf   : > { %11254 = vmatprep.subr.bf16.mxu1 %v11253_v25 }
 0x5c1   : > { %10281 = vmatmul.mubr.f32.gmra.mrb[236].mxu1 %v14743_v22 }
 0x5c2   : > { %10283 = vmatprep.mubr.f32.mxu1 %v14746_v38  ;;  %11256 = vmatpush3.bf16.msra.mxu1 %v11253_v25  ;;  %v5712_v25 = vld [vmem:[#allocation8 + $0x298] sm:$0xff] }
 0x5c3   : > { %11258 = vmatprep.subr.bf16.mxu1 %v11257_v0 }
 0x5c5   : > { %10284 = vmatmul.mubr.f32.gmra.mrb[238].mxu1 %v14749_v10 }
 0x5c6   : > { %10286 = vmatprep.mubr.f32.mxu1 %v14752_v30  ;;  %11260 = vmatpush3.bf16.msra.mxu1 %v11257_v0  ;;  %v5714_v0 = vld [vmem:[#allocation8 + $0x2a8] sm:$0xff] }
 0x5c7   : > { %11262 = vmatprep.subr.bf16.mxu1 %v11261_v13 }
 0x5c9   : > { %10287 = vmatmul.mubr.f32.gmra.mrb[240].mxu1 %v14755_v1 }
 0x5ca   : > { %10289 = vmatprep.mubr.f32.mxu1 %v14758_v20  ;;  %11264 = vmatpush3.bf16.msra.mxu1 %v11261_v13  ;;  %v5716_v13 = vld [vmem:[#allocation8 + $0x2b8] sm:$0xff] }
 0x5cb   : > { %11266 = vmatprep.subr.bf16.mxu1 %v11265_v24 }
 0x5cd   : > { %10290 = vmatmul.mubr.f32.gmra.mrb[242].mxu1 %v14761_v15 }
 0x5ce   : > { %10292 = vmatprep.mubr.f32.mxu1 %v14764_v3 }
 0x5d1   : > { %10293 = vmatmul.mubr.f32.gmra.mrb[244].mxu1 %v14767_v48 }
 0x5d2   : > { %10295 = vmatprep.mubr.f32.mxu1 %v14770_v50 }
 0x5d5   : > { %10296 = vmatmul.mubr.f32.gmra.mrb[246].mxu1 %v14773_v32 }
 0x5d6   : > { %10298 = vmatprep.mubr.f32.mxu1 %v14776_v2 }
 0x5d9   : > { %10299 = vmatmul.mubr.f32.gmra.mrb[248].mxu1 %v14779_v4 }
 0x5da   : > { %10301 = vmatprep.mubr.f32.mxu1 %v14782_v42 }
 0x5dd   : > { %10302 = vmatmul.mubr.f32.gmra.mrb[250].mxu1 %v14785_v26 }
 0x5de   : > { %10304 = vmatprep.mubr.f32.mxu1 %v14788_v46 }
 0x5e1   : > { %10305 = vmatmul.mubr.f32.gmra.mrb[252].mxu1 %v14791_v33 }
 0x5e2   : > { %10307 = vmatprep.mubr.f32.mxu1 %v14794_v18 }
 0x5e5   : > { %10308 = vmatmul.mubr.f32.gmra.mrb[254].mxu1 %v14797_v58 }
 0x5e6   : > { %10310 = vmatprep.mubr.f32.mxu1 %v14800_v9 }
 0x5e9   : > { %10311 = vmatmul.mubr.f32.gmra.mrb[0].mxu1 %v14803_v34 }
 0x5ea   : > { %10313 = vmatprep.mubr.f32.mxu1 %v14806_v51 }
 0x5ed   : > { %10314 = vmatmul.mubr.f32.gmra.mrb[2].mxu1 %v14809_v43 }
 0x5ee   : > { %10316 = vmatprep.mubr.f32.mxu1 %v14812_v37 }
 0x5f1   : > { %10317 = vmatmul.mubr.f32.gmra.mrb[4].mxu1 %v14815_v57 }
 0x5f2   : > { %10351 = vmatprep.mubr.f32.mxu1 %v14716_v7  ;;  %v11281_v7 = vpack.c.bf16 %v5384_v19, %v5383_v35  ;;  %v5361_v35 = vld [vmem:[#allocation2 + $0xdc] sm:$0xff]  ;;  %v5362_v19 = vld [vmem:[#allocation2 + $0xe4] sm:$0xff] }
 0x5f5   : > { %10352 = vmatmul.mubr.f32.vlgmr.msra.gmra.mrb[226].mxu1 %v14719_v62  ;;  %v5386_v62 = vld [vmem:[#allocation8 + $0x258] sm:$0xff] }
 0x5f6   : > { %10354 = vmatprep.mubr.f32.mxu1 %v14722_v54  ;;  %11268 = vmatpush3.bf16.msra.mxu1 %v11265_v24  ;;  %v11285_v21 = vpack.c.bf16 %v5386_v62, %v5385_v17  ;;  %v5388_v54 = vld [vmem:[#allocation8 + $0x268] sm:$0xff]  ;;  %v5364_v17 = vld [vmem:[#allocation2 + $0xf4] sm:$0xff] }
 0x5f7   : > { %11270 = vmatprep.subr.bf16.mxu1 %v11269_v60  ;;  %v11289_v23 = vpack.c.bf16 %v5388_v54, %v5387_v14  ;;  %v5718_v24 = vld [vmem:[#allocation8 + $0x2c8] sm:$0xff]  ;;  %v5367_v14 = vld [vmem:[#allocation2 + $0x10c] sm:$0xff]  ;;  %v5368_v54 = vld [vmem:[#allocation2 + $0x114] sm:$0xff] }
 0x5f8   : > { %v5365_v62 = vld [vmem:[#allocation2 + $0xfc] sm:$0xff] }
 0x5f9   : > { %10355 = vmatmul.mubr.f32.gmra.mrb[228].mxu1 %v14725_v11  ;;  %v5389_v11 = vld [vmem:[#allocation8 + $0x270] sm:$0xff] }
 0x5fa   : > { %10357 = vmatprep.mubr.f32.mxu1 %v14728_v12  ;;  %11272 = vmatpush3.bf16.msra.mxu1 %v11269_v60  ;;  %v11293_v36 = vpack.c.bf16 %v5390_v8, %v5389_v11  ;;  %v5709_v12 = vld [vmem:[#allocation8 + $0x280] sm:$0xff]  ;;  %v5354_v60 = vld [vmem:[#allocation2 + $0xa4] sm:$0xff]  ;;  %v5371_v8 = vld [vmem:[#allocation2 + $0x12c] sm:$0xff] }
 0x5fb   : > { %11274 = vmatprep.subr.bf16.mxu1 %v11273_v29  ;;  %v5370_v11 = vld [vmem:[#allocation2 + $0x124] sm:$0xff] }
 0x5fd   : > { %10358 = vmatmul.mubr.f32.gmra.mrb[230].mxu1 %v14731_v16  ;;  %v11297_v16 = vpack.c.bf16 %v5710_v59, %v5709_v12  ;;  %v5373_v12 = vld [vmem:[#allocation2 + $0x13c] sm:$0xff]  ;;  %v6045_v59 = vld [vmem:[#allocation8 + $0x310] sm:$0xff] }
 0x5fe   : > { %10360 = vmatprep.mubr.f32.mxu1 %v14734_v5  ;;  %11276 = vmatpush3.bf16.msra.mxu1 %v11273_v29  ;;  %v5711_v5 = vld [vmem:[#allocation8 + $0x290] sm:$0xff]  ;;  %v5357_v29 = vld [vmem:[#allocation2 + $0xbc] sm:$0xff] }
 0x5ff   : > { %11278 = vmatprep.subr.bf16.mxu1 %v11277_v6  ;;  %v11301_v28 = vpack.c.bf16 %v5712_v25, %v5711_v5  ;;  %v5673_v5 = vld [vmem:[#allocation2 + $0x2d] sm:$0xff]  ;;  %v6047_v25 = vld [vmem:[#allocation8 + $0x320] sm:$0xff] }
 0x601   : > { %10361 = vmatmul.mubr.f32.gmra.mrb[232].mxu1 %v14737_v27  ;;  %v5338_v27 = vld [vmem:[#allocation2 + $0x24] sm:$0xff] }
 0x602   : > { %10363 = vmatprep.mubr.f32.mxu1 %v14740_v56  ;;  %11280 = vmatpush3.bf16.msra.mxu1 %v11277_v6  ;;  %v5713_v56 = vld [vmem:[#allocation8 + $0x2a0] sm:$0xff] }
 0x603   : > { %11282 = vmatprep.subr.bf16.mxu1 %v11281_v7  ;;  %v11305_v49 = vpack.c.bf16 %v5714_v0, %v5713_v56  ;;  %v5360_v6 = vld [vmem:[#allocation2 + $0xd4] sm:$0xff]  ;;  %v14855_v56 = vld [vmem:[#allocation2 + $0x3d] sm:$0xff]  ;;  %v6049_v0 = vld [vmem:[#allocation8 + $0x330] sm:$0xff] }
 0x605   : > { %10364 = vmatmul.mubr.f32.gmra.mrb[234].mxu1 %v14743_v22  ;;  %v5340_v22 = vld [vmem:[#allocation2 + $0x34] sm:$0xff] }
 0x606   : > { %10366 = vmatprep.mubr.f32.mxu1 %v14746_v38  ;;  %11284 = vmatpush3.bf16.msra.mxu1 %v11281_v7  ;;  %v5715_v38 = vld [vmem:[#allocation8 + $0x2b0] sm:$0xff] }
 0x607   : > { %11286 = vmatprep.subr.bf16.mxu1 %v11285_v21  ;;  %v11309_v47 = vpack.c.bf16 %v5716_v13, %v5715_v38  ;;  %v5363_v7 = vld [vmem:[#allocation2 + $0xec] sm:$0xff]  ;;  %v6051_v13 = vld [vmem:[#allocation8 + $0x340] sm:$0xff] }
 0x608   : > { %v14861_v38 = vld [vmem:[#allocation2 + $0x4d] sm:$0xff] }
 0x609   : > { %10367 = vmatmul.mubr.f32.gmra.mrb[236].mxu1 %v14749_v10  ;;  %v5342_v10 = vld [vmem:[#allocation2 + $0x44] sm:$0xff] }
 0x60a   : > { %10369 = vmatprep.mubr.f32.mxu1 %v14752_v30  ;;  %11288 = vmatpush3.bf16.msra.mxu1 %v11285_v21  ;;  %v5717_v30 = vld [vmem:[#allocation8 + $0x2c0] sm:$0xff]  ;;  %v5366_v21 = vld [vmem:[#allocation2 + $0x104] sm:$0xff] }
 0x60b   : > { %11290 = vmatprep.subr.bf16.mxu1 %v11289_v23 }
 0x60d   : > { %10370 = vmatmul.mubr.f32.gmra.mrb[238].mxu1 %v14755_v1  ;;  %v5344_v1 = vld [vmem:[#allocation2 + $0x54] sm:$0xff] }
 0x60e   : > { %10372 = vmatprep.mubr.f32.mxu1 %v14758_v20  ;;  %11292 = vmatpush3.bf16.msra.mxu1 %v11289_v23  ;;  %v11313_v20 = vpack.c.bf16 %v5718_v24, %v5717_v30  ;;  %v5369_v23 = vld [vmem:[#allocation2 + $0x11c] sm:$0xff]  ;;  %v6053_v24 = vld [vmem:[#allocation8 + $0x350] sm:$0xff] }
 0x60f   : > { %11294 = vmatprep.subr.bf16.mxu1 %v11293_v36  ;;  %v14867_v30 = vld [vmem:[#allocation2 + $0x5d] sm:$0xff] }
 0x611   : > { %10373 = vmatmul.mubr.f32.gmra.mrb[240].mxu1 %v14761_v15  ;;  %v5345_v15 = vld [vmem:[#allocation2 + $0x5c] sm:$0xff] }
 0x612   : > { %10375 = vmatprep.mubr.f32.mxu1 %v14764_v3  ;;  %11296 = vmatpush3.bf16.msra.mxu1 %v11293_v36  ;;  %v5719_v3 = vld [vmem:[#allocation8 + $0x2d0] sm:$0xff]  ;;  %v5372_v36 = vld [vmem:[#allocation2 + $0x134] sm:$0xff] }
 0x613   : > { %11298 = vmatprep.subr.bf16.mxu1 %v11297_v16 }
 0x615   : > { %10376 = vmatmul.mubr.f32.gmra.mrb[242].mxu1 %v14767_v48  ;;  %v5720_v48 = vld [vmem:[#allocation8 + $0x2d8] sm:$0xff] }
 0x616   : > { %10378 = vmatprep.mubr.f32.mxu1 %v14770_v50  ;;  %v5346_v50 = vld [vmem:[#allocation2 + $0x64] sm:$0xff] }
 0x619   : > { %10379 = vmatmul.mubr.f32.gmra.mrb[244].mxu1 %v14773_v32  ;;  %v11317_v32 = vpack.c.bf16 %v5720_v48, %v5719_v3  ;;  %v14873_v3 = vld [vmem:[#allocation2 + $0x6d] sm:$0xff]  ;;  %v6055_v48 = vld [vmem:[#allocation8 + $0x360] sm:$0xff] }
 0x61a   : > { %10381 = vmatprep.mubr.f32.mxu1 %v14776_v2  ;;  %v5347_v2 = vld [vmem:[#allocation2 + $0x6c] sm:$0xff] }
 0x61d   : > { %10382 = vmatmul.mubr.f32.gmra.mrb[246].mxu1 %v14779_v4  ;;  %v5721_v4 = vld [vmem:[#allocation8 + $0x2e0] sm:$0xff] }
 0x61e   : > { %10384 = vmatprep.mubr.f32.mxu1 %v14782_v42  ;;  %v5722_v42 = vld [vmem:[#allocation8 + $0x2e8] sm:$0xff] }
 0x621   : > { %10385 = vmatmul.mubr.f32.gmra.mrb[248].mxu1 %v14785_v26  ;;  %v5348_v26 = vld [vmem:[#allocation2 + $0x74] sm:$0xff] }
 0x622   : > { %10387 = vmatprep.mubr.f32.mxu1 %v14788_v46  ;;  %v11321_v46 = vpack.c.bf16 %v5722_v42, %v5721_v4  ;;  %v14879_v4 = vld [vmem:[#allocation2 + $0x7d] sm:$0xff]  ;;  %v6057_v42 = vld [vmem:[#allocation8 + $0x370] sm:$0xff] }
 0x625   : > { %10388 = vmatmul.mubr.f32.gmra.mrb[250].mxu1 %v14791_v33  ;;  %v5349_v33 = vld [vmem:[#allocation2 + $0x7c] sm:$0xff] }
 0x626   : > { %10390 = vmatprep.mubr.f32.mxu1 %v14794_v18  ;;  %v5723_v18 = vld [vmem:[#allocation8 + $0x2f0] sm:$0xff] }
 0x629   : > { %10391 = vmatmul.mubr.f32.gmra.mrb[252].mxu1 %v14797_v58  ;;  %v5724_v58 = vld [vmem:[#allocation8 + $0x2f8] sm:$0xff] }
 0x62a   : > { %10393 = vmatprep.mubr.f32.mxu1 %v14800_v9  ;;  %v5350_v9 = vld [vmem:[#allocation2 + $0x84] sm:$0xff] }
 0x62d   : > { %10394 = vmatmul.mubr.f32.gmra.mrb[254].mxu1 %v14803_v34  ;;  %v11325_v34 = vpack.c.bf16 %v5724_v58, %v5723_v18  ;;  %v14885_v18 = vld [vmem:[#allocation2 + $0x8d] sm:$0xff]  ;;  %v6377_v58 = vld [vmem:[#allocation8 + $0x380] sm:$0xff] }
 0x62e   : > { %10396 = vmatprep.mubr.f32.mxu1 %v14806_v51  ;;  %v5351_v51 = vld [vmem:[#allocation2 + $0x8c] sm:$0xff] }
 0x631   : > { %10397 = vmatmul.mubr.f32.gmra.mrb[0].mxu1 %v14809_v43  ;;  %v6043_v43 = vld [vmem:[#allocation8 + $0x300] sm:$0xff] }
 0x632   : > { %10399 = vmatprep.mubr.f32.mxu1 %v14812_v37  ;;  %v6044_v37 = vld [vmem:[#allocation8 + $0x308] sm:$0xff] }
 0x633   : > { %v11329_v44 = vpack.c.bf16 %v6044_v37, %v6043_v43  ;;  %v14891_v43 = vld [vmem:[#allocation2 + $0x9d] sm:$0xff]  ;;  %v14894_v37 = vld [vmem:[#allocation2 + $0xa5] sm:$0xff] }
 0x635   : > { %10400 = vmatmul.mubr.f32.gmra.mrb[2].mxu1 %v14815_v57  ;;  %v5352_v57 = vld [vmem:[#allocation2 + $0x94] sm:$0xff] }
 0x636   : > { %10402 = vmatprep.mubr.f32.mxu1 %v5038_v61  ;;  %v5672_v61 = vld [vmem:[#allocation2 + $0x25] sm:$0xff] }
 0x639   : > { %10403 = vmatmul.mubr.f32.gmra.mrb[4].mxu1 %v5039_v41 }
 0x63a   : > { %10437 = vmatprep.mubr.f32.mxu1 %v5338_v27  ;;  %v6048_v27 = vld [vmem:[#allocation8 + $0x328] sm:$0xff] }
 0x63d   : > { %10438 = vmatmul.mubr.f32.vlgmr.msra.gmra.mrb[226].mxu1 %v5339_v63  ;;  %v11337_v63 = vpack.c.bf16 %v6048_v27, %v6047_v25  ;;  %v6385_v25 = vld [vmem:[#allocation8 + $0x3c0] sm:$0xff]  ;;  %v6386_v27 = vld [vmem:[#allocation8 + $0x3c8] sm:$0xff] }
 0x63e   : > { %10440 = vmatprep.mubr.f32.mxu1 %v5340_v22  ;;  %11300 = vmatpush3.bf16.msra.mxu1 %v11297_v16  ;;  %v6046_v16 = vld [vmem:[#allocation8 + $0x318] sm:$0xff] }
 0x63f   : > { %11302 = vmatprep.subr.bf16.mxu1 %v11301_v28  ;;  %v11333_v41 = vpack.c.bf16 %v6046_v16, %v6045_v59  ;;  %v6050_v22 = vld [vmem:[#allocation8 + $0x338] sm:$0xff]  ;;  %v6382_v59 = vld [vmem:[#allocation8 + $0x3a8] sm:$0xff] }
 0x641   : > { %10441 = vmatmul.mubr.f32.gmra.mrb[228].mxu1 %v5341_v55  ;;  %v11341_v55 = vpack.c.bf16 %v6050_v22, %v6049_v0  ;;  %v6389_v22 = vld [vmem:[#allocation8 + $0x3e0] sm:$0xff] }
 0x642   : > { %10443 = vmatprep.mubr.f32.mxu1 %v5342_v10  ;;  %11304 = vmatpush3.bf16.msra.mxu1 %v11301_v28  ;;  %v14852_v28 = vld [vmem:[#allocation2 + $0x35] sm:$0xff]  ;;  %v6052_v10 = vld [vmem:[#allocation8 + $0x348] sm:$0xff] }
 0x643   : > { %11306 = vmatprep.subr.bf16.mxu1 %v11305_v49 }
 0x645   : > { %10444 = vmatmul.mubr.f32.gmra.mrb[230].mxu1 %v5343_v53  ;;  %v11345_v53 = vpack.c.bf16 %v6052_v10, %v6051_v13  ;;  %v6392_v13 = vld [vmem:[#allocation8 + $0x3f8] sm:$0xff] }
 0x646   : > { %10446 = vmatprep.mubr.f32.mxu1 %v5344_v1  ;;  %11308 = vmatpush3.bf16.msra.mxu1 %v11305_v49  ;;  %v14858_v49 = vld [vmem:[#allocation2 + $0x45] sm:$0xff]  ;;  %v6054_v1 = vld [vmem:[#allocation8 + $0x358] sm:$0xff] }
 0x647   : > { %11310 = vmatprep.subr.bf16.mxu1 %v11309_v47 }
 0x649   : > { %10447 = vmatmul.mubr.f32.gmra.mrb[232].mxu1 %v5345_v15  ;;  %v11349_v15 = vpack.c.bf16 %v6054_v1, %v6053_v24  ;;  %v6040_v24 = vld [vmem:[#allocation2 + $0x145] sm:$0xff]  ;;  %v6041_v1 = vld [vmem:[#allocation2 + $0x14d] sm:$0xff] }
 0x64a   : > { %10449 = vmatprep.mubr.f32.mxu1 %v5346_v50  ;;  %11312 = vmatpush3.bf16.msra.mxu1 %v11309_v47  ;;  %v14864_v47 = vld [vmem:[#allocation2 + $0x55] sm:$0xff]  ;;  %v6056_v50 = vld [vmem:[#allocation8 + $0x368] sm:$0xff] }
 0x64b   : > { %11314 = vmatprep.subr.bf16.mxu1 %v11313_v20 }
 0x64d   : > { %10450 = vmatmul.mubr.f32.gmra.mrb[234].mxu1 %v5347_v2  ;;  %v11353_v2 = vpack.c.bf16 %v6056_v50, %v6055_v48  ;;  %v6341_v50 = vld [vmem:[#allocation2 + $0x3e] sm:$0xff] }
 0x64e   : > { %10452 = vmatprep.mubr.f32.mxu1 %v5348_v26  ;;  %11316 = vmatpush3.bf16.msra.mxu1 %v11313_v20  ;;  %v14870_v20 = vld [vmem:[#allocation2 + $0x65] sm:$0xff]  ;;  %v6058_v26 = vld [vmem:[#allocation8 + $0x378] sm:$0xff] }
 0x64f   : > { %11318 = vmatprep.subr.bf16.mxu1 %v11317_v32 }
 0x651   : > { %10453 = vmatmul.mubr.f32.gmra.mrb[236].mxu1 %v5349_v33  ;;  %v11357_v33 = vpack.c.bf16 %v6058_v26, %v6057_v42  ;;  %v7123_v42 = vld [vmem:[%s15250_s6] sm:$0xff]  ;;  %v7124_v26 = vld [vmem:[%s15250_s6 + $0x8] sm:$0xff] }
 0x652   : > { %10455 = vmatprep.mubr.f32.mxu1 %v5350_v9  ;;  %11320 = vmatpush3.bf16.msra.mxu1 %v11317_v32  ;;  %v14876_v32 = vld [vmem:[#allocation2 + $0x75] sm:$0xff]  ;;  %v6378_v9 = vld [vmem:[#allocation8 + $0x388] sm:$0xff] }
 0x653   : > { %11322 = vmatprep.subr.bf16.mxu1 %v11321_v46 }
 0x655   : > { %10456 = vmatmul.mubr.f32.gmra.mrb[238].mxu1 %v5351_v51  ;;  %v11361_v51 = vpack.c.bf16 %v6378_v9, %v6377_v58  ;;  %v6717_v58 = vld [vmem:[#allocation8 + $0x430] sm:$0xff]  ;;  %v6718_v9 = vld [vmem:[#allocation8 + $0x438] sm:$0xff] }
 0x656   : > { %10458 = vmatprep.mubr.f32.mxu1 %v5352_v57  ;;  %11324 = vmatpush3.bf16.msra.mxu1 %v11321_v46  ;;  %v14882_v46 = vld [vmem:[#allocation2 + $0x85] sm:$0xff]  ;;  %v14897_v57 = vld [vmem:[#allocation2 + $0xad] sm:$0xff] }
 0x657   : > { %11326 = vmatprep.subr.bf16.mxu1 %v11325_v34 }
 0x659   : > { %10459 = vmatmul.mubr.f32.gmra.mrb[240].mxu1 %v5353_v52  ;;  %v14903_v52 = vld [vmem:[#allocation2 + $0xbd] sm:$0xff] }
 0x65a   : > { %10461 = vmatprep.mubr.f32.mxu1 %v5354_v60  ;;  %11328 = vmatpush3.bf16.msra.mxu1 %v11325_v34  ;;  %v14888_v34 = vld [vmem:[#allocation2 + $0x95] sm:$0xff]  ;;  %v14906_v60 = vld [vmem:[#allocation2 + $0xc5] sm:$0xff] }
 0x65b   : > { %11330 = vmatprep.subr.bf16.mxu1 %v11329_v44 }
 0x65d   : > { %10462 = vmatmul.mubr.f32.gmra.mrb[242].mxu1 %v5355_v40  ;;  %v14909_v40 = vld [vmem:[#allocation2 + $0xcd] sm:$0xff] }
 0x65e   : > { %10464 = vmatprep.mubr.f32.mxu1 %v5356_v39  ;;  %v14912_v39 = vld [vmem:[#allocation2 + $0xd5] sm:$0xff] }
 0x661   : > { %10465 = vmatmul.mubr.f32.gmra.mrb[244].mxu1 %v5357_v29  ;;  %v14915_v29 = vld [vmem:[#allocation2 + $0xdd] sm:$0xff] }
 0x662   : > { %10467 = vmatprep.mubr.f32.mxu1 %v5358_v31  ;;  %v14918_v31 = vld [vmem:[#allocation2 + $0xe5] sm:$0xff] }
 0x665   : > { %10468 = vmatmul.mubr.f32.gmra.mrb[246].mxu1 %v5359_v45  ;;  %v14921_v45 = vld [vmem:[#allocation2 + $0xed] sm:$0xff] }
 0x666   : > { %10470 = vmatprep.mubr.f32.mxu1 %v5360_v6  ;;  %v14924_v6 = vld [vmem:[#allocation2 + $0xf5] sm:$0xff] }
 0x669   : > { %10471 = vmatmul.mubr.f32.gmra.mrb[248].mxu1 %v5361_v35  ;;  %v14927_v35 = vld [vmem:[#allocation2 + $0xfd] sm:$0xff] }
 0x66a   : > { %10473 = vmatprep.mubr.f32.mxu1 %v5362_v19  ;;  %v14930_v19 = vld [vmem:[#allocation2 + $0x105] sm:$0xff] }
 0x66d   : > { %10474 = vmatmul.mubr.f32.gmra.mrb[250].mxu1 %v5363_v7  ;;  %v14933_v7 = vld [vmem:[#allocation2 + $0x10d] sm:$0xff] }
 0x66e   : > { %10476 = vmatprep.mubr.f32.mxu1 %v5364_v17  ;;  %v14936_v17 = vld [vmem:[#allocation2 + $0x115] sm:$0xff] }
 0x671   : > { %10477 = vmatmul.mubr.f32.gmra.mrb[252].mxu1 %v5365_v62  ;;  %v14939_v62 = vld [vmem:[#allocation2 + $0x11d] sm:$0xff] }
 0x672   : > { %10479 = vmatprep.mubr.f32.mxu1 %v5366_v21  ;;  %v14942_v21 = vld [vmem:[#allocation2 + $0x125] sm:$0xff] }
 0x675   : > { %10480 = vmatmul.mubr.f32.gmra.mrb[254].mxu1 %v5367_v14  ;;  %v14945_v14 = vld [vmem:[#allocation2 + $0x12d] sm:$0xff] }
 0x676   : > { %10482 = vmatprep.mubr.f32.mxu1 %v5368_v54  ;;  %v14948_v54 = vld [vmem:[#allocation2 + $0x135] sm:$0xff] }
 0x679   : > { %10483 = vmatmul.mubr.f32.gmra.mrb[0].mxu1 %v5369_v23  ;;  %v14951_v23 = vld [vmem:[#allocation2 + $0x13d] sm:$0xff] }
 0x67a   : > { %10485 = vmatprep.mubr.f32.mxu1 %v5370_v11  ;;  %v6379_v11 = vld [vmem:[#allocation8 + $0x390] sm:$0xff] }
 0x67d   : > { %10486 = vmatmul.mubr.f32.gmra.mrb[2].mxu1 %v5371_v8  ;;  %v6380_v8 = vld [vmem:[#allocation8 + $0x398] sm:$0xff] }
 0x67e   : > { %10488 = vmatprep.mubr.f32.mxu1 %v5372_v36  ;;  %v11365_v36 = vpack.c.bf16 %v6380_v8, %v6379_v11  ;;  %v6350_v11 = vld [vmem:[#allocation2 + $0x86] sm:$0xff]  ;;  %v6351_v8 = vld [vmem:[#allocation2 + $0x8e] sm:$0xff] }
 0x681   : > { %10489 = vmatmul.mubr.f32.gmra.mrb[4].mxu1 %v5373_v12  ;;  %v6381_v12 = vld [vmem:[#allocation8 + $0x3a0] sm:$0xff] }
 0x682   : > { %10523 = vmatprep.mubr.f32.mxu1 %v5672_v61  ;;  %v11369_v16 = vpack.c.bf16 %v6382_v59, %v6381_v12  ;;  %v6383_v61 = vld [vmem:[#allocation8 + $0x3b0] sm:$0xff] }
 0x683   : > { %v6725_v12 = vld [vmem:[#allocation8 + $0x470] sm:$0xff] }
 0x685   : > { %10524 = vmatmul.mubr.f32.vlgmr.msra.gmra.mrb[226].mxu1 %v5673_v5 }
 0x686   : > { %10526 = vmatprep.mubr.f32.mxu1 %v14852_v28  ;;  %11332 = vmatpush3.bf16.msra.mxu1 %v11329_v44  ;;  %v14900_v44 = vld [vmem:[#allocation2 + $0xb5] sm:$0xff] }
 0x687   : > { %11334 = vmatprep.subr.bf16.mxu1 %v11333_v41 }
 0x689   : > { %10527 = vmatmul.mubr.f32.gmra.mrb[228].mxu1 %v14855_v56 }
 0x68a   : > { %10529 = vmatprep.mubr.f32.mxu1 %v14858_v49  ;;  %11336 = vmatpush3.bf16.msra.mxu1 %v11333_v41  ;;  %v6384_v41 = vld [vmem:[#allocation8 + $0x3b8] sm:$0xff] }
 0x68b   : > { %11338 = vmatprep.subr.bf16.mxu1 %v11337_v63  ;;  %v11373_v5 = vpack.c.bf16 %v6384_v41, %v6383_v61  ;;  %v7131_v61 = vld [vmem:[%s15250_s6 + $0x40] sm:$0xff]  ;;  %v7132_v41 = vld [vmem:[%s15250_s6 + $0x48] sm:$0xff] }
 0x68d   : > { %10530 = vmatmul.mubr.f32.gmra.mrb[230].mxu1 %v14861_v38 }
 0x68e   : > { %10532 = vmatprep.mubr.f32.mxu1 %v14864_v47  ;;  %11340 = vmatpush3.bf16.msra.mxu1 %v11337_v63  ;;  %v6387_v63 = vld [vmem:[#allocation8 + $0x3d0] sm:$0xff] }
 0x68f   : > { %11342 = vmatprep.subr.bf16.mxu1 %v11341_v55 }
 0x691   : > { %10533 = vmatmul.mubr.f32.gmra.mrb[232].mxu1 %v14867_v30 }
 0x692   : > { %10535 = vmatprep.mubr.f32.mxu1 %v14870_v20  ;;  %11344 = vmatpush3.bf16.msra.mxu1 %v11341_v55 }
 0x693   : > { %11346 = vmatprep.subr.bf16.mxu1 %v11345_v53 }
 0x695   : > { %10536 = vmatmul.mubr.f32.gmra.mrb[234].mxu1 %v14873_v3 }
 0x696   : > { %10538 = vmatprep.mubr.f32.mxu1 %v14876_v32  ;;  %11348 = vmatpush3.bf16.msra.mxu1 %v11345_v53  ;;  %v6712_v53 = vld [vmem:[#allocation8 + $0x408] sm:$0xff] }
 0x697   : > { %11350 = vmatprep.subr.bf16.mxu1 %v11349_v15 }
 0x699   : > { %10539 = vmatmul.mubr.f32.gmra.mrb[236].mxu1 %v14879_v4 }
 0x69a   : > { %10541 = vmatprep.mubr.f32.mxu1 %v14882_v46  ;;  %11352 = vmatpush3.bf16.msra.mxu1 %v11349_v15  ;;  %v6714_v15 = vld [vmem:[#allocation8 + $0x418] sm:$0xff] }
 0x69b   : > { %11354 = vmatprep.subr.bf16.mxu1 %v11353_v2 }
 0x69d   : > { %10542 = vmatmul.mubr.f32.gmra.mrb[238].mxu1 %v14885_v18 }
 0x69e   : > { %10544 = vmatprep.mubr.f32.mxu1 %v14888_v34  ;;  %11356 = vmatpush3.bf16.msra.mxu1 %v11353_v2  ;;  %v6716_v2 = vld [vmem:[#allocation8 + $0x428] sm:$0xff] }
 0x69f   : > { %11358 = vmatprep.subr.bf16.mxu1 %v11357_v33 }
 0x6a1   : > { %10545 = vmatmul.mubr.f32.gmra.mrb[240].mxu1 %v14891_v43 }
 0x6a2   : > { %10547 = vmatprep.mubr.f32.mxu1 %v14894_v37  ;;  %11360 = vmatpush3.bf16.msra.mxu1 %v11357_v33 }
 0x6a3   : > { %11362 = vmatprep.subr.bf16.mxu1 %v11361_v51 }
 0x6a5   : > { %10548 = vmatmul.mubr.f32.gmra.mrb[242].mxu1 %v14897_v57 }
 0x6a6   : > { %10550 = vmatprep.mubr.f32.mxu1 %v14900_v44 }
 0x6a9   : > { %10551 = vmatmul.mubr.f32.gmra.mrb[244].mxu1 %v14903_v52 }
 0x6aa   : > { %10553 = vmatprep.mubr.f32.mxu1 %v14906_v60 }
 0x6ad   : > { %10554 = vmatmul.mubr.f32.gmra.mrb[246].mxu1 %v14909_v40 }
 0x6ae   : > { %10556 = vmatprep.mubr.f32.mxu1 %v14912_v39 }
 0x6b1   : > { %10557 = vmatmul.mubr.f32.gmra.mrb[248].mxu1 %v14915_v29 }
 0x6b2   : > { %10559 = vmatprep.mubr.f32.mxu1 %v14918_v31 }
 0x6b5   : > { %10560 = vmatmul.mubr.f32.gmra.mrb[250].mxu1 %v14921_v45 }
 0x6b6   : > { %10562 = vmatprep.mubr.f32.mxu1 %v14924_v6 }
 0x6b9   : > { %10563 = vmatmul.mubr.f32.gmra.mrb[252].mxu1 %v14927_v35 }
 0x6ba   : > { %10565 = vmatprep.mubr.f32.mxu1 %v14930_v19 }
 0x6bd   : > { %10566 = vmatmul.mubr.f32.gmra.mrb[254].mxu1 %v14933_v7 }
 0x6be   : > { %10568 = vmatprep.mubr.f32.mxu1 %v14936_v17 }
 0x6c1   : > { %10569 = vmatmul.mubr.f32.gmra.mrb[0].mxu1 %v14939_v62 }
 0x6c2   : > { %10571 = vmatprep.mubr.f32.mxu1 %v14942_v21 }
 0x6c5   : > { %10572 = vmatmul.mubr.f32.gmra.mrb[2].mxu1 %v14945_v14 }
 0x6c6   : > { %10574 = vmatprep.mubr.f32.mxu1 %v14948_v54 }
 0x6c9   : > { %10575 = vmatmul.mubr.f32.gmra.mrb[4].mxu1 %v14951_v23 }
 0x6ca   : > { %10609 = vmatprep.mubr.f32.mxu1 %v14852_v28  ;;  %v11377_v28 = vpack.c.bf16 %v6386_v27, %v6385_v25  ;;  %v11441_v27 = vpack.c.bf16 %v7132_v41, %v7131_v61  ;;  %v6701_v61 = vld [vmem:[#allocation2 + $0x10f] sm:$0xff]  ;;  %v6702_v41 = vld [vmem:[#allocation2 + $0x117] sm:$0xff] }
 0x6cd   : > { %10610 = vmatmul.mubr.f32.vlgmr.msra.gmra.mrb[226].mxu1 %v14855_v56  ;;  %v6388_v56 = vld [vmem:[#allocation8 + $0x3d8] sm:$0xff] }
 0x6ce   : > { %10612 = vmatprep.mubr.f32.mxu1 %v14858_v49  ;;  %11364 = vmatpush3.bf16.msra.mxu1 %v11361_v51  ;;  %v11381_v0 = vpack.c.bf16 %v6388_v56, %v6387_v63  ;;  %v6390_v49 = vld [vmem:[#allocation8 + $0x3e8] sm:$0xff]  ;;  %v11405_v51 = vpack.c.bf16 %v6718_v9, %v6717_v58  ;;  %v7133_v63 = vld [vmem:[%s15250_s6 + $0x50] sm:$0xff]  ;;  %v7134_v56 = vld [vmem:[%s15250_s6 + $0x58] sm:$0xff] }
 0x6cf   : > { %11366 = vmatprep.subr.bf16.mxu1 %v11365_v36  ;;  %v11385_v55 = vpack.c.bf16 %v6390_v49, %v6389_v22  ;;  %v11445_v22 = vpack.c.bf16 %v7134_v56, %v7133_v63  ;;  %v7135_v49 = vld [vmem:[%s15250_s6 + $0x60] sm:$0xff]  ;;  %v6372_v58 = vld [vmem:[#allocation2 + $0x136] sm:$0xff] }
 0x6d0   : > { %v6373_v9 = vld [vmem:[#allocation2 + $0x13e] sm:$0xff]  ;;  %v6708_v56 = vld [vmem:[#allocation2 + $0x147] sm:$0xff] }
 0x6d1   : > { %10613 = vmatmul.mubr.f32.gmra.mrb[228].mxu1 %v14861_v38  ;;  %v6391_v38 = vld [vmem:[#allocation8 + $0x3f0] sm:$0xff]  ;;  %v6707_v63 = vld [vmem:[#allocation2 + $0x13f] sm:$0xff] }
 0x6d2   : > { %10615 = vmatprep.mubr.f32.mxu1 %v14864_v47  ;;  %11368 = vmatpush3.bf16.msra.mxu1 %v11365_v36  ;;  %v11389_v10 = vpack.c.bf16 %v6392_v13, %v6391_v38  ;;  %v6711_v47 = vld [vmem:[#allocation8 + $0x400] sm:$0xff]  ;;  %v6355_v38 = vld [vmem:[#allocation2 + $0xae] sm:$0xff] }
 0x6d3   : > { %11370 = vmatprep.subr.bf16.mxu1 %v11369_v16  ;;  %v6356_v13 = vld [vmem:[#allocation2 + $0xb6] sm:$0xff] }
 0x6d5   : > { %10616 = vmatmul.mubr.f32.gmra.mrb[230].mxu1 %v14867_v30  ;;  %v11393_v30 = vpack.c.bf16 %v6712_v53, %v6711_v47  ;;  %v7137_v47 = vld [vmem:[%s15250_s6 + $0x70] sm:$0xff]  ;;  %v7138_v53 = vld [vmem:[%s15250_s6 + $0x78] sm:$0xff] }
 0x6d6   : > { %10618 = vmatprep.mubr.f32.mxu1 %v14870_v20  ;;  %11372 = vmatpush3.bf16.msra.mxu1 %v11369_v16  ;;  %v6713_v20 = vld [vmem:[#allocation8 + $0x410] sm:$0xff]  ;;  %v6726_v16 = vld [vmem:[#allocation8 + $0x478] sm:$0xff] }
 0x6d7   : > { %11374 = vmatprep.subr.bf16.mxu1 %v11373_v5  ;;  %v11397_v48 = vpack.c.bf16 %v6714_v15, %v6713_v20  ;;  %v11421_v25 = vpack.c.bf16 %v6726_v16, %v6725_v12  ;;  %v6359_v20 = vld [vmem:[#allocation2 + $0xce] sm:$0xff]  ;;  %v6360_v15 = vld [vmem:[#allocation2 + $0xd6] sm:$0xff] }
 0x6d8   : > { %v6698_v12 = vld [vmem:[#allocation2 + $0xf7] sm:$0xff]  ;;  %v6700_v16 = vld [vmem:[#allocation2 + $0x107] sm:$0xff] }
 0x6d9   : > { %10619 = vmatmul.mubr.f32.gmra.mrb[232].mxu1 %v14873_v3  ;;  %v6340_v3 = vld [vmem:[#allocation2 + $0x36] sm:$0xff] }
 0x6da   : > { %10621 = vmatprep.mubr.f32.mxu1 %v14876_v32  ;;  %11376 = vmatpush3.bf16.msra.mxu1 %v11373_v5  ;;  %v6715_v32 = vld [vmem:[#allocation8 + $0x420] sm:$0xff] }
 0x6db   : > { %11378 = vmatprep.subr.bf16.mxu1 %v11377_v28  ;;  %v11401_v33 = vpack.c.bf16 %v6716_v2, %v6715_v32  ;;  %v6352_v5 = vld [vmem:[#allocation2 + $0x96] sm:$0xff]  ;;  %v6365_v2 = vld [vmem:[#allocation2 + $0xfe] sm:$0xff] }
 0x6dc   : > { %v6364_v32 = vld [vmem:[#allocation2 + $0xf6] sm:$0xff] }
 0x6dd   : > { %10622 = vmatmul.mubr.f32.gmra.mrb[234].mxu1 %v14879_v4  ;;  %v6342_v4 = vld [vmem:[#allocation2 + $0x46] sm:$0xff] }
 0x6de   : > { %10624 = vmatprep.mubr.f32.mxu1 %v14882_v46  ;;  %11380 = vmatpush3.bf16.msra.mxu1 %v11377_v28  ;;  %v11425_v46 = vpack.c.bf16 %v7124_v26, %v7123_v42  ;;  %v6353_v28 = vld [vmem:[#allocation2 + $0x9e] sm:$0xff]  ;;  %v6367_v42 = vld [vmem:[#allocation2 + $0x10e] sm:$0xff]  ;;  %v6368_v26 = vld [vmem:[#allocation2 + $0x116] sm:$0xff] }
 0x6df   : > { %11382 = vmatprep.subr.bf16.mxu1 %v11381_v0 }
 0x6e0   : > { %11426 = vmatprep.subr.bf16.mxu0 %v11425_v46 }
 0x6e1   : > { %10625 = vmatmul.mubr.f32.gmra.mrb[236].mxu1 %v14885_v18  ;;  %v6343_v18 = vld [vmem:[#allocation2 + $0x4e] sm:$0xff]  ;;  %11428 = vmatpush3.bf16.msra.mxu0 %v11425_v46  ;;  %v6369_v46 = vld [vmem:[#allocation2 + $0x11e] sm:$0xff] }
 0x6e2   : > { %10627 = vmatprep.mubr.f32.mxu1 %v14888_v34  ;;  %11384 = vmatpush3.bf16.msra.mxu1 %v11381_v0  ;;  %v6344_v34 = vld [vmem:[#allocation2 + $0x56] sm:$0xff]  ;;  %v6354_v0 = vld [vmem:[#allocation2 + $0xa6] sm:$0xff] }
 0x6e3   : > { %11386 = vmatprep.subr.bf16.mxu1 %v11385_v55 }
 0x6e5   : > { %10628 = vmatmul.mubr.f32.gmra.mrb[238].mxu1 %v14891_v43  ;;  %v6345_v43 = vld [vmem:[#allocation2 + $0x5e] sm:$0xff] }
 0x6e6   : > { %10630 = vmatprep.mubr.f32.mxu1 %v14894_v37  ;;  %11388 = vmatpush3.bf16.msra.mxu1 %v11385_v55  ;;  %v6719_v37 = vld [vmem:[#allocation8 + $0x440] sm:$0xff]  ;;  %v7136_v55 = vld [vmem:[%s15250_s6 + $0x68] sm:$0xff] }
 0x6e7   : > { %11390 = vmatprep.subr.bf16.mxu1 %v11389_v10 }
 0x6e9   : > { %10631 = vmatmul.mubr.f32.gmra.mrb[240].mxu1 %v14897_v57  ;;  %v6720_v57 = vld [vmem:[#allocation8 + $0x448] sm:$0xff] }
 0x6ea   : > { %10633 = vmatprep.mubr.f32.mxu1 %v14900_v44  ;;  %11392 = vmatpush3.bf16.msra.mxu1 %v11389_v10  ;;  %v6346_v44 = vld [vmem:[#allocation2 + $0x66] sm:$0xff]  ;;  %v11449_v10 = vpack.c.bf16 %v7136_v55, %v7135_v49 }
 0x6eb   : > { %11394 = vmatprep.subr.bf16.mxu1 %v11393_v30 }
 0x6ed   : > { %10634 = vmatmul.mubr.f32.gmra.mrb[242].mxu1 %v14903_v52  ;;  %v6347_v52 = vld [vmem:[#allocation2 + $0x6e] sm:$0xff] }
 0x6ee   : > { %10636 = vmatprep.mubr.f32.mxu1 %v14906_v60  ;;  %v11409_v60 = vpack.c.bf16 %v6720_v57, %v6719_v37  ;;  %v6675_v37 = vld [vmem:[#allocation2 + $0x3f] sm:$0xff]  ;;  %v6676_v57 = vld [vmem:[#allocation2 + $0x47] sm:$0xff] }
 0x6f1   : > { %10637 = vmatmul.mubr.f32.gmra.mrb[244].mxu1 %v14909_v40  ;;  %v6348_v40 = vld [vmem:[#allocation2 + $0x76] sm:$0xff] }
 0x6f2   : > { %10639 = vmatprep.mubr.f32.mxu1 %v14912_v39  ;;  %v6721_v39 = vld [vmem:[#allocation8 + $0x450] sm:$0xff] }
 0x6f5   : > { %10640 = vmatmul.mubr.f32.gmra.mrb[246].mxu1 %v14915_v29  ;;  %v6722_v29 = vld [vmem:[#allocation8 + $0x458] sm:$0xff] }
 0x6f6   : > { %10642 = vmatprep.mubr.f32.mxu1 %v14918_v31  ;;  %v7125_v31 = vld [vmem:[%s15250_s6 + $0x10] sm:$0xff] }
 0x6f9   : > { %10643 = vmatmul.mubr.f32.gmra.mrb[248].mxu1 %v14921_v45  ;;  %v7126_v45 = vld [vmem:[%s15250_s6 + $0x18] sm:$0xff] }
 0x6fa   : > { %10645 = vmatprep.mubr.f32.mxu1 %v14924_v6  ;;  %v7127_v6 = vld [vmem:[%s15250_s6 + $0x20] sm:$0xff] }
 0x6fd   : > { %10646 = vmatmul.mubr.f32.gmra.mrb[250].mxu1 %v14927_v35  ;;  %v11429_v35 = vpack.c.bf16 %v7126_v45, %v7125_v31  ;;  %v6683_v31 = vld [vmem:[#allocation2 + $0x7f] sm:$0xff]  ;;  %v6684_v45 = vld [vmem:[#allocation2 + $0x87] sm:$0xff] }
 0x6fe   : > { %10648 = vmatprep.mubr.f32.mxu1 %v14930_v19  ;;  %v7128_v19 = vld [vmem:[%s15250_s6 + $0x28] sm:$0xff] }
 0x6ff   : > { %11430 = vmatprep.subr.bf16.mxu0 %v11429_v35 }
 0x700   : > { %11432 = vmatpush3.bf16.msra.mxu0 %v11429_v35  ;;  %v6686_v35 = vld [vmem:[#allocation2 + $0x97] sm:$0xff] }
 0x701   : > { %10649 = vmatmul.mubr.f32.gmra.mrb[252].mxu1 %v14933_v7  ;;  %v6349_v7 = vld [vmem:[#allocation2 + $0x7e] sm:$0xff] }
 0x702   : > { %10651 = vmatprep.mubr.f32.mxu1 %v14936_v17  ;;  %v11413_v17 = vpack.c.bf16 %v6722_v29, %v6721_v39  ;;  %v6681_v39 = vld [vmem:[#allocation2 + $0x6f] sm:$0xff]  ;;  %v6682_v29 = vld [vmem:[#allocation2 + $0x77] sm:$0xff] }
 0x705   : > { %10652 = vmatmul.mubr.f32.gmra.mrb[254].mxu1 %v14939_v62  ;;  %v6723_v62 = vld [vmem:[#allocation8 + $0x460] sm:$0xff] }
 0x706   : > { %10654 = vmatprep.mubr.f32.mxu1 %v14942_v21  ;;  %v11433_v21 = vpack.c.bf16 %v7128_v19, %v7127_v6  ;;  %v6685_v6 = vld [vmem:[#allocation2 + $0x8f] sm:$0xff]  ;;  %v6687_v19 = vld [vmem:[#allocation2 + $0x9f] sm:$0xff] }
 0x708   : > { %11434 = vmatprep.subr.bf16.mxu0 %v11433_v21 }
 0x709   : > { %10655 = vmatmul.mubr.f32.gmra.mrb[0].mxu1 %v14945_v14  ;;  %v6724_v14 = vld [vmem:[#allocation8 + $0x468] sm:$0xff]  ;;  %11436 = vmatpush3.bf16.msra.mxu0 %v11433_v21 }
 0x70a   : > { %10657 = vmatprep.mubr.f32.mxu1 %v14948_v54  ;;  %v7129_v54 = vld [vmem:[%s15250_s6 + $0x30] sm:$0xff]  ;;  %v11417_v36 = vpack.c.bf16 %v6724_v14, %v6723_v62  ;;  %v6691_v21 = vld [vmem:[#allocation2 + $0xbf] sm:$0xff]  ;;  %v6692_v14 = vld [vmem:[#allocation2 + $0xc7] sm:$0xff] }
 0x70b   : > { %v6690_v62 = vld [vmem:[#allocation2 + $0xb7] sm:$0xff] }
 0x70d   : > { %10658 = vmatmul.mubr.f32.gmra.mrb[2].mxu1 %v14951_v23  ;;  %v7130_v23 = vld [vmem:[%s15250_s6 + $0x38] sm:$0xff] }
 0x70e   : > { %10660 = vmatprep.mubr.f32.mxu1 %v6040_v24  ;;  %v11437_v59 = vpack.c.bf16 %v7130_v23, %v7129_v54  ;;  %v6358_v24 = vld [vmem:[#allocation2 + $0xc6] sm:$0xff]  ;;  %v6693_v54 = vld [vmem:[#allocation2 + $0xcf] sm:$0xff]  ;;  %v6694_v23 = vld [vmem:[#allocation2 + $0xd7] sm:$0xff] }
 0x710   : > { %11438 = vmatprep.subr.bf16.mxu0 %v11437_v59 }
 0x711   : > { %10661 = vmatmul.mubr.f32.gmra.mrb[4].mxu1 %v6041_v1  ;;  %11440 = vmatpush3.bf16.msra.mxu0 %v11437_v59  ;;  %v11453_v1 = vpack.c.bf16 %v7138_v53, %v7137_v47  ;;  %v6699_v59 = vld [vmem:[#allocation2 + $0xff] sm:$0xff] }
 0x712   : > { %10695 = vmatprep.mubr.f32.mxu1 %v6340_v3  ;;  %11442 = vmatprep.subr.bf16.mxu0 %v11441_v27  ;;  %v6361_v3 = vld [vmem:[#allocation2 + $0xde] sm:$0xff] }
 0x715   : > { %10696 = vmatmul.mubr.f32.vlgmr.msra.gmra.mrb[226].mxu1 %v6341_v50  ;;  %11444 = vmatpush3.bf16.msra.mxu0 %v11441_v27  ;;  %v6363_v50 = vld [vmem:[#allocation2 + $0xee] sm:$0xff] }
 0x716   : > { %10698 = vmatprep.mubr.f32.mxu1 %v6342_v4  ;;  %11396 = vmatpush3.bf16.msra.mxu1 %v11393_v30  ;;  %v6357_v30 = vld [vmem:[#allocation2 + $0xbe] sm:$0xff]  ;;  %v6366_v4 = vld [vmem:[#allocation2 + $0x106] sm:$0xff]  ;;  %v6705_v27 = vld [vmem:[#allocation2 + $0x12f] sm:$0xff] }
 0x717   : > { %11398 = vmatprep.subr.bf16.mxu1 %v11397_v48  ;;  %11446 = vmatprep.subr.bf16.mxu0 %v11445_v22 }
 0x719   : > { %10699 = vmatmul.mubr.f32.gmra.mrb[228].mxu1 %v6343_v18  ;;  %11448 = vmatpush3.bf16.msra.mxu0 %v11445_v22  ;;  %v6371_v18 = vld [vmem:[#allocation2 + $0x12e] sm:$0xff]  ;;  %v15039_v22 = vld [vmem:[%s15249_s5] ss:$0 sm:$0xff] }
 0x71a   : > { %10701 = vmatprep.mubr.f32.mxu1 %v6344_v34  ;;  %11400 = vmatpush3.bf16.msra.mxu1 %v11397_v48  ;;  %v6362_v48 = vld [vmem:[#allocation2 + $0xe6] sm:$0xff] }
 0x71b   : > { %11402 = vmatprep.subr.bf16.mxu1 %v11401_v33  ;;  %11450 = vmatprep.subr.bf16.mxu0 %v11449_v10  ;;  %v6374_v34 = vld [vmem:[#allocation2 + $0x146] sm:$0xff] }
 0x71d   : > { %10702 = vmatmul.mubr.f32.gmra.mrb[230].mxu1 %v6345_v43  ;;  %11452 = vmatpush3.bf16.msra.mxu0 %v11449_v10  ;;  %v6674_v43 = vld [vmem:[#allocation2 + $0x37] sm:$0xff] }
 0x71e   : > { %10704 = vmatprep.mubr.f32.mxu1 %v6346_v44  ;;  %11404 = vmatpush3.bf16.msra.mxu1 %v11401_v33  ;;  %v6370_v33 = vld [vmem:[#allocation2 + $0x126] sm:$0xff]  ;;  %v6677_v44 = vld [vmem:[#allocation2 + $0x4f] sm:$0xff] }
 0x71f   : > { %11406 = vmatprep.subr.bf16.mxu1 %v11405_v51  ;;  %11454 = vmatprep.subr.bf16.mxu0 %v11453_v1 }
 0x721   : > { %10705 = vmatmul.mubr.f32.gmra.mrb[232].mxu1 %v6347_v52  ;;  %11456 = vmatpush3.bf16.msra.mxu0 %v11453_v1  ;;  %v6678_v52 = vld [vmem:[#allocation2 + $0x57] sm:$0xff] }
 0x722   : > { %10707 = vmatprep.mubr.f32.mxu1 %v6348_v40  ;;  %11408 = vmatpush3.bf16.msra.mxu1 %v11405_v51  ;;  %v6375_v51 = vld [vmem:[#allocation2 + $0x14e] sm:$0xff] }
 0x723   : > { %11410 = vmatprep.subr.bf16.mxu1 %v11409_v60  ;;  %v6680_v40 = vld [vmem:[#allocation2 + $0x67] sm:$0xff] }
 0x725   : > { %10708 = vmatmul.mubr.f32.gmra.mrb[234].mxu1 %v6349_v7  ;;  %v6688_v7 = vld [vmem:[#allocation2 + $0xa7] sm:$0xff] }
 0x726   : > { %10710 = vmatprep.mubr.f32.mxu1 %v6350_v11  ;;  %11412 = vmatpush3.bf16.msra.mxu1 %v11409_v60  ;;  %v6679_v60 = vld [vmem:[#allocation2 + $0x5f] sm:$0xff] }
 0x727   : > { %11414 = vmatprep.subr.bf16.mxu1 %v11413_v17  ;;  %v6695_v11 = vld [vmem:[#allocation2 + $0xdf] sm:$0xff] }
 0x729   : > { %10711 = vmatmul.mubr.f32.gmra.mrb[236].mxu1 %v6351_v8  ;;  %v6696_v8 = vld [vmem:[#allocation2 + $0xe7] sm:$0xff] }
 0x72a   : > { %10713 = vmatprep.mubr.f32.mxu1 %v6352_v5  ;;  %11416 = vmatpush3.bf16.msra.mxu1 %v11413_v17  ;;  %v6689_v17 = vld [vmem:[#allocation2 + $0xaf] sm:$0xff]  ;;  %v6703_v5 = vld [vmem:[#allocation2 + $0x11f] sm:$0xff] }
 0x72b   : > { %11418 = vmatprep.subr.bf16.mxu1 %v11417_v36 }
 0x72d   : > { %10714 = vmatmul.mubr.f32.gmra.mrb[238].mxu1 %v6353_v28  ;;  %v6706_v28 = vld [vmem:[#allocation2 + $0x137] sm:$0xff] }
 0x72e   : > { %10716 = vmatprep.mubr.f32.mxu1 %v6354_v0  ;;  %11420 = vmatpush3.bf16.msra.mxu1 %v11417_v36  ;;  %v6697_v36 = vld [vmem:[#allocation2 + $0xef] sm:$0xff] }
 0x72f   : > { %11422 = vmatprep.subr.bf16.mxu1 %v11421_v25  ;;  %v6709_v0 = vld [vmem:[#allocation2 + $0x14f] sm:$0xff] }
 0x731   : > { %10717 = vmatmul.mubr.f32.gmra.mrb[240].mxu1 %v6355_v38 }
 0x732   : > { %10719 = vmatprep.mubr.f32.mxu1 %v6356_v13  ;;  %11424 = vmatpush3.bf16.msra.mxu1 %v11421_v25  ;;  %v6704_v25 = vld [vmem:[#allocation2 + $0x127] sm:$0xff] }
 0x735   : > { %10720 = vmatmul.mubr.f32.gmra.mrb[242].mxu1 %v6357_v30 }
 0x736   : > { %10722 = vmatprep.mubr.f32.mxu1 %v6358_v24 }
 0x739   : > { %10723 = vmatmul.mubr.f32.gmra.mrb[244].mxu1 %v6359_v20 }
 0x73a   : > { %10725 = vmatprep.mubr.f32.mxu1 %v6360_v15 }
 0x73d   : > { %10726 = vmatmul.mubr.f32.gmra.mrb[246].mxu1 %v6361_v3 }
 0x73e   : > { %10728 = vmatprep.mubr.f32.mxu1 %v6362_v48 }
 0x741   : > { %10729 = vmatmul.mubr.f32.gmra.mrb[248].mxu1 %v6363_v50 }
 0x742   : > { %10731 = vmatprep.mubr.f32.mxu1 %v6364_v32 }
 0x745   : > { %10732 = vmatmul.mubr.f32.gmra.mrb[250].mxu1 %v6365_v2 }
 0x746   : > { %10734 = vmatprep.mubr.f32.mxu1 %v6366_v4 }
 0x749   : > { %10735 = vmatmul.mubr.f32.gmra.mrb[252].mxu1 %v6367_v42 }
 0x74a   : > { %10737 = vmatprep.mubr.f32.mxu1 %v6368_v26 }
 0x74d   : > { %10738 = vmatmul.mubr.f32.gmra.mrb[254].mxu1 %v6369_v46 }
 0x74e   : > { %10740 = vmatprep.mubr.f32.mxu1 %v6370_v33 }
 0x751   : > { %10741 = vmatmul.mubr.f32.gmra.mrb[0].mxu1 %v6371_v18 }
 0x752   : > { %10743 = vmatprep.mubr.f32.mxu1 %v6372_v58 }
 0x755   : > { %10744 = vmatmul.mubr.f32.gmra.mrb[2].mxu1 %v6373_v9 }
 0x756   : > { %10746 = vmatprep.mubr.f32.mxu1 %v6374_v34 }
 0x759   : > { %10747 = vmatmul.mubr.f32.gmra.mrb[4].mxu1 %v6375_v51 }
 0x75a   : > { %10781 = vmatprep.mubr.f32.mxu1 %v6674_v43 }
 0x75d   : > { %10782 = vmatmul.mubr.f32.vlgmr.msra.gmra.mrb[226].mxu1 %v6675_v37 }
 0x75e   : > { %10784 = vmatprep.mubr.f32.mxu1 %v6676_v57 }
 0x761   : > { %10785 = vmatmul.mubr.f32.gmra.mrb[228].mxu1 %v6677_v44 }
 0x762   : > { %10787 = vmatprep.mubr.f32.mxu1 %v6678_v52 }
 0x765   : > { %10788 = vmatmul.mubr.f32.gmra.mrb[230].mxu1 %v6679_v60 }
 0x766   : > { %10790 = vmatprep.mubr.f32.mxu1 %v6680_v40 }
 0x769   : > { %10791 = vmatmul.mubr.f32.gmra.mrb[232].mxu1 %v6681_v39 }
 0x76a   : > { %10793 = vmatprep.mubr.f32.mxu1 %v6682_v29 }
 0x76d   : > { %10794 = vmatmul.mubr.f32.gmra.mrb[234].mxu1 %v6683_v31 }
 0x76e   : > { %10796 = vmatprep.mubr.f32.mxu1 %v6684_v45 }
 0x771   : > { %10797 = vmatmul.mubr.f32.gmra.mrb[236].mxu1 %v6685_v6 }
 0x772   : > { %10799 = vmatprep.mubr.f32.mxu1 %v6686_v35 }
 0x775   : > { %10800 = vmatmul.mubr.f32.gmra.mrb[238].mxu1 %v6687_v19 }
 0x776   : > { %10802 = vmatprep.mubr.f32.mxu1 %v6688_v7 }
 0x779   : > { %10803 = vmatmul.mubr.f32.gmra.mrb[240].mxu1 %v6689_v17 }
 0x77a   : > { %10805 = vmatprep.mubr.f32.mxu1 %v6690_v62 }
 0x77d   : > { %10806 = vmatmul.mubr.f32.gmra.mrb[242].mxu1 %v6691_v21 }
 0x77e   : > { %10808 = vmatprep.mubr.f32.mxu1 %v6692_v14 }
 0x781   : > { %10809 = vmatmul.mubr.f32.gmra.mrb[244].mxu1 %v6693_v54 }
 0x782   : > { %10811 = vmatprep.mubr.f32.mxu1 %v6694_v23 }
 0x785   : > { %10812 = vmatmul.mubr.f32.gmra.mrb[246].mxu1 %v6695_v11 }
 0x786   : > { %10814 = vmatprep.mubr.f32.mxu1 %v6696_v8 }
 0x789   : > { %10815 = vmatmul.mubr.f32.gmra.mrb[248].mxu1 %v6697_v36 }
 0x78a   : > { %10817 = vmatprep.mubr.f32.mxu1 %v6698_v12 }
 0x78d   : > { %10818 = vmatmul.mubr.f32.gmra.mrb[250].mxu1 %v6699_v59 }
 0x78e   : > { %10820 = vmatprep.mubr.f32.mxu1 %v6700_v16 }
 0x791   : > { %10821 = vmatmul.mubr.f32.gmra.mrb[252].mxu1 %v6701_v61 }
 0x792   : > { %10823 = vmatprep.mubr.f32.mxu1 %v6702_v41 }
 0x795   : > { %10824 = vmatmul.mubr.f32.gmra.mrb[254].mxu1 %v6703_v5 }
 0x796   : > { %10826 = vmatprep.mubr.f32.mxu1 %v6704_v25 }
 0x799   : > { %10827 = vmatmul.mubr.f32.gmra.mrb[0].mxu1 %v6705_v27 }
 0x79a   : > { %10829 = vmatprep.mubr.f32.mxu1 %v6706_v28 }
 0x79d   : > { %10830 = vmatmul.mubr.f32.gmra.mrb[2].mxu1 %v6707_v63 }
 0x79e   : > { %10832 = vmatprep.mubr.f32.mxu1 %v6708_v56 }
 0x7a1   : > { %10833 = vmatmul.mubr.f32.gmra.mrb[4].mxu1 %v6709_v0 }
 0x830   : > { %v10783_v49 = vpop.f32.mrb[226].mxu1 }
 0x831   : > { %v7016_v55 = vadd.f32 %v10783_v49, %v15039_v22  ;;  %v6793_v38 = vpop.f32.mrb[227].mxu1 }
 0x832   : > { %v7015_v13 = vadd.f32 %v15039_v22, %v6793_v38 }
 0x833   : > { %v7052_v10 = vmax.f32 %v7016_v55, 0.0 }
 0x834   : > { %v7051_v47 = vmax.f32 %v7015_v13, 0.0  ;;  %v10786_v53 = vpop.f32.mrb[228].mxu1 }
 0x835   : > { %v7018_v30 = vadd.f32 %v10786_v53, %v15039_v22  ;;  %v6803_v24 = vpop.f32.mrb[229].mxu1  ;;  %v7088_v15 = vmin.f32 %v7052_v10, 6.0 }
 0x836   : > { %v7087_v1 = vmin.f32 %v7051_v47, 6.0  ;;  %v7017_v20 = vadd.f32 %v15039_v22, %v6803_v24 }
 0x837   : > { %v7054_v3 = vmax.f32 %v7018_v30, 0.0 }
 0x838   : > { %v7053_v48 = vmax.f32 %v7017_v20, 0.0  ;;  %v10789_v50 = vpop.f32.mrb[230].mxu1  ;;  %10867 = vmatprep.mubr.f32.mxu0 %v7087_v1 }
 0x839   : > { %v7020_v32 = vadd.f32 %v10789_v50, %v15039_v22  ;;  %v6813_v2 = vpop.f32.mrb[231].mxu1  ;;  %10868 = vmatmul.mubr.f32.vlgmr.msra.gmra.mrb[0].mxu0 %v7088_v15  ;;  %v7090_v26 = vmin.f32 %v7054_v3, 6.0 }
 0x83a   : > { %v7089_v4 = vmin.f32 %v7053_v48, 6.0  ;;  %v7019_v42 = vadd.f32 %v15039_v22, %v6813_v2 }
 0x83b   : > { %v7056_v46 = vmax.f32 %v7020_v32, 0.0 }
 0x83c   : > { %v7055_v33 = vmax.f32 %v7019_v42, 0.0  ;;  %v10792_v18 = vpop.f32.mrb[232].mxu1  ;;  %10870 = vmatprep.mubr.f32.mxu0 %v7089_v4 }
 0x83d   : > { %v7022_v58 = vadd.f32 %v10792_v18, %v15039_v22  ;;  %v6823_v9 = vpop.f32.mrb[233].mxu1  ;;  %10871 = vmatmul.mubr.f32.gmra.mrb[2].mxu0 %v7090_v26  ;;  %v7092_v43 = vmin.f32 %v7056_v46, 6.0 }
 0x83e   : > { %v7091_v34 = vmin.f32 %v7055_v33, 6.0  ;;  %v7021_v51 = vadd.f32 %v15039_v22, %v6823_v9 }
 0x83f   : > { %v7058_v37 = vmax.f32 %v7022_v58, 0.0 }
 0x840   : > { %v7057_v57 = vmax.f32 %v7021_v51, 0.0  ;;  %v10795_v44 = vpop.f32.mrb[234].mxu1  ;;  %10873 = vmatprep.mubr.f32.mxu0 %v7091_v34 }
 0x841   : > { %v7024_v52 = vadd.f32 %v10795_v44, %v15039_v22  ;;  %v6833_v60 = vpop.f32.mrb[235].mxu1  ;;  %10874 = vmatmul.mubr.f32.gmra.mrb[4].mxu0 %v7092_v43  ;;  %v7094_v29 = vmin.f32 %v7058_v37, 6.0 }
 0x842   : > { %v7093_v40 = vmin.f32 %v7057_v57, 6.0  ;;  %v7023_v39 = vadd.f32 %v15039_v22, %v6833_v60 }
 0x843   : > { %v7060_v31 = vmax.f32 %v7024_v52, 0.0 }
 0x844   : > { %v7059_v45 = vmax.f32 %v7023_v39, 0.0  ;;  %v10798_v6 = vpop.f32.mrb[236].mxu1  ;;  %10876 = vmatprep.mubr.f32.mxu0 %v7093_v40 }
 0x845   : > { %v7026_v35 = vadd.f32 %v10798_v6, %v15039_v22  ;;  %v6843_v19 = vpop.f32.mrb[237].mxu1  ;;  %10877 = vmatmul.mubr.f32.gmra.mrb[6].mxu0 %v7094_v29  ;;  %v7096_v62 = vmin.f32 %v7060_v31, 6.0 }
 0x846   : > { %v7095_v7 = vmin.f32 %v7059_v45, 6.0  ;;  %v7025_v17 = vadd.f32 %v15039_v22, %v6843_v19 }
 0x847   : > { %v7062_v21 = vmax.f32 %v7026_v35, 0.0 }
 0x848   : > { %v7061_v14 = vmax.f32 %v7025_v17, 0.0  ;;  %v10801_v54 = vpop.f32.mrb[238].mxu1  ;;  %10879 = vmatprep.mubr.f32.mxu0 %v7095_v7 }
 0x849   : > { %v7028_v23 = vadd.f32 %v10801_v54, %v15039_v22  ;;  %v6853_v11 = vpop.f32.mrb[239].mxu1  ;;  %10880 = vmatmul.mubr.f32.gmra.mrb[8].mxu0 %v7096_v62  ;;  %v7098_v12 = vmin.f32 %v7062_v21, 6.0 }
 0x84a   : > { %v7097_v8 = vmin.f32 %v7061_v14, 6.0  ;;  %v7027_v36 = vadd.f32 %v15039_v22, %v6853_v11 }
 0x84b   : > { %v7064_v59 = vmax.f32 %v7028_v23, 0.0 }
 0x84c   : > { %v7063_v16 = vmax.f32 %v7027_v36, 0.0  ;;  %v10804_v61 = vpop.f32.mrb[240].mxu1  ;;  %10882 = vmatprep.mubr.f32.mxu0 %v7097_v8 }
 0x84d   : > { %v7030_v41 = vadd.f32 %v10804_v61, %v15039_v22  ;;  %v6863_v5 = vpop.f32.mrb[241].mxu1  ;;  %10883 = vmatmul.mubr.f32.gmra.mrb[10].mxu0 %v7098_v12  ;;  %v7100_v28 = vmin.f32 %v7064_v59, 6.0 }
 0x84e   : > { %v7099_v25 = vmin.f32 %v7063_v16, 6.0  ;;  %v7029_v27 = vadd.f32 %v15039_v22, %v6863_v5 }
 0x84f   : > { %v7066_v63 = vmax.f32 %v7030_v41, 0.0 }
 0x850   : > { %v7065_v56 = vmax.f32 %v7029_v27, 0.0  ;;  %v10807_v0 = vpop.f32.mrb[242].mxu1  ;;  %10885 = vmatprep.mubr.f32.mxu0 %v7099_v25 }
 0x851   : > { %v7032_v49 = vadd.f32 %v10807_v0, %v15039_v22  ;;  %v6873_v55 = vpop.f32.mrb[243].mxu1  ;;  %10886 = vmatmul.mubr.f32.gmra.mrb[12].mxu0 %v7100_v28  ;;  %v7102_v10 = vmin.f32 %v7066_v63, 6.0 }
 0x852   : > { %v7101_v38 = vmin.f32 %v7065_v56, 6.0  ;;  %v7031_v13 = vadd.f32 %v15039_v22, %v6873_v55 }
 0x853   : > { %v7068_v47 = vmax.f32 %v7032_v49, 0.0 }
 0x854   : > { %v7067_v53 = vmax.f32 %v7031_v13, 0.0  ;;  %v10810_v30 = vpop.f32.mrb[244].mxu1  ;;  %10888 = vmatprep.mubr.f32.mxu0 %v7101_v38 }
 0x855   : > { %v7034_v24 = vadd.f32 %v10810_v30, %v15039_v22  ;;  %v6883_v1 = vpop.f32.mrb[245].mxu1  ;;  %10889 = vmatmul.mubr.f32.gmra.mrb[14].mxu0 %v7102_v10  ;;  %v7104_v3 = vmin.f32 %v7068_v47, 6.0 }
 0x856   : > { %v7103_v20 = vmin.f32 %v7067_v53, 6.0  ;;  %v7033_v15 = vadd.f32 %v15039_v22, %v6883_v1 }
 0x857   : > { %v7070_v48 = vmax.f32 %v7034_v24, 0.0 }
 0x858   : > { %v7069_v50 = vmax.f32 %v7033_v15, 0.0  ;;  %v10813_v32 = vpop.f32.mrb[246].mxu1  ;;  %10891 = vmatprep.mubr.f32.mxu0 %v7103_v20 }
 0x859   : > { %v7036_v2 = vadd.f32 %v10813_v32, %v15039_v22  ;;  %v6893_v4 = vpop.f32.mrb[247].mxu1  ;;  %10892 = vmatmul.mubr.f32.gmra.mrb[16].mxu0 %v7104_v3  ;;  %v7106_v46 = vmin.f32 %v7070_v48, 6.0 }
 0x85a   : > { %v7105_v42 = vmin.f32 %v7069_v50, 6.0  ;;  %v7035_v26 = vadd.f32 %v15039_v22, %v6893_v4 }
 0x85b   : > { %v7072_v33 = vmax.f32 %v7036_v2, 0.0 }
 0x85c   : > { %v7071_v18 = vmax.f32 %v7035_v26, 0.0  ;;  %v10816_v58 = vpop.f32.mrb[248].mxu1  ;;  %10894 = vmatprep.mubr.f32.mxu0 %v7105_v42  ;;  %v15081_v42 = vld [vmem:[%s15251_s7] ss:$0 sm:$0xff] }
 0x85d   : > { %v7038_v9 = vadd.f32 %v10816_v58, %v15039_v22  ;;  %v6903_v34 = vpop.f32.mrb[249].mxu1  ;;  %10895 = vmatmul.mubr.f32.gmra.mrb[18].mxu0 %v7106_v46  ;;  %v7108_v37 = vmin.f32 %v7072_v33, 6.0 }
 0x85e   : > { %v7107_v51 = vmin.f32 %v7071_v18, 6.0  ;;  %v7037_v43 = vadd.f32 %v15039_v22, %v6903_v34  ;;  %v7391_v18 = vld [vmem:[%s12276_s24 + $0x2c] sm:$0xff] }
 0x85f   : > { %v7074_v57 = vmax.f32 %v7038_v9, 0.0 }
 0x860   : > { %v7073_v44 = vmax.f32 %v7037_v43, 0.0  ;;  %v10819_v52 = vpop.f32.mrb[250].mxu1  ;;  %10897 = vmatprep.mubr.f32.mxu0 %v7107_v51  ;;  %v7394_v43 = vld [vmem:[%s12276_s24 + $0x44] sm:$0xff] }
 0x861   : > { %v7040_v60 = vadd.f32 %v10819_v52, %v15039_v22  ;;  %v6913_v40 = vpop.f32.mrb[251].mxu1  ;;  %10898 = vmatmul.mubr.f32.gmra.mrb[20].mxu0 %v7108_v37  ;;  %v7110_v31 = vmin.f32 %v7074_v57, 6.0 }
 0x862   : > { %v7109_v39 = vmin.f32 %v7073_v44, 6.0  ;;  %v7039_v29 = vadd.f32 %v15039_v22, %v6913_v40  ;;  %v7393_v44 = vld [vmem:[%s12276_s24 + $0x3c] sm:$0xff] }
 0x863   : > { %v7076_v45 = vmax.f32 %v7040_v60, 0.0 }
 0x864   : > { %v7075_v6 = vmax.f32 %v7039_v29, 0.0  ;;  %v10822_v35 = vpop.f32.mrb[252].mxu1  ;;  %10900 = vmatprep.mubr.f32.mxu0 %v7109_v39  ;;  %v7396_v29 = vld [vmem:[%s12276_s24 + $0x54] sm:$0xff] }
 0x865   : > { %v7042_v19 = vadd.f32 %v10822_v35, %v15039_v22  ;;  %v6923_v7 = vpop.f32.mrb[253].mxu1  ;;  %10901 = vmatmul.mubr.f32.gmra.mrb[22].mxu0 %v7110_v31  ;;  %v7112_v21 = vmin.f32 %v7076_v45, 6.0 }
 0x866   : > { %v7111_v17 = vmin.f32 %v7075_v6, 6.0  ;;  %v7041_v62 = vadd.f32 %v15039_v22, %v6923_v7  ;;  %v7395_v6 = vld [vmem:[%s12276_s24 + $0x4c] sm:$0xff] }
 0x867   : > { %v7078_v14 = vmax.f32 %v7042_v19, 0.0 }
 0x868   : > { %v7077_v54 = vmax.f32 %v7041_v62, 0.0  ;;  %v10825_v23 = vpop.f32.mrb[254].mxu1  ;;  %10903 = vmatprep.mubr.f32.mxu0 %v7111_v17  ;;  %v7398_v62 = vld [vmem:[%s12276_s24 + $0x64] sm:$0xff] }
 0x869   : > { %v7044_v11 = vadd.f32 %v10825_v23, %v15039_v22  ;;  %v6933_v8 = vpop.f32.mrb[255].mxu1  ;;  %10904 = vmatmul.mubr.f32.gmra.mrb[24].mxu0 %v7112_v21  ;;  %v7114_v59 = vmin.f32 %v7078_v14, 6.0 }
 0x86a   : > { %v7113_v36 = vmin.f32 %v7077_v54, 6.0  ;;  %v7043_v12 = vadd.f32 %v15039_v22, %v6933_v8  ;;  %v7397_v54 = vld [vmem:[%s12276_s24 + $0x5c] sm:$0xff] }
 0x86b   : > { %v7080_v16 = vmax.f32 %v7044_v11, 0.0 }
 0x86c   : > { %v7079_v61 = vmax.f32 %v7043_v12, 0.0  ;;  %v10828_v41 = vpop.f32.mrb[0].mxu1  ;;  %10906 = vmatprep.mubr.f32.mxu0 %v7113_v36  ;;  %v7400_v12 = vld [vmem:[%s12276_s24 + $0x74] sm:$0xff] }
 0x86d   : > { %v7046_v5 = vadd.f32 %v10828_v41, %v15039_v22  ;;  %v6943_v25 = vpop.f32.mrb[1].mxu1  ;;  %10907 = vmatmul.mubr.f32.gmra.mrb[26].mxu0 %v7114_v59  ;;  %v7116_v63 = vmin.f32 %v7080_v16, 6.0 }
 0x86e   : > { %v7115_v27 = vmin.f32 %v7079_v61, 6.0  ;;  %v7045_v28 = vadd.f32 %v15039_v22, %v6943_v25  ;;  %v7399_v61 = vld [vmem:[%s12276_s24 + $0x6c] sm:$0xff] }
 0x86f   : > { %v7082_v56 = vmax.f32 %v7046_v5, 0.0 }
 0x870   : > { %v7081_v0 = vmax.f32 %v7045_v28, 0.0  ;;  %v10831_v49 = vpop.f32.mrb[2].mxu1  ;;  %10909 = vmatprep.mubr.f32.mxu0 %v7115_v27  ;;  %v7402_v28 = vld [vmem:[%s12276_s24 + $0x84] sm:$0xff] }
 0x871   : > { %v7048_v55 = vadd.f32 %v10831_v49, %v15039_v22  ;;  %v6953_v38 = vpop.f32.mrb[3].mxu1  ;;  %10910 = vmatmul.mubr.f32.gmra.mrb[28].mxu0 %v7116_v63  ;;  %v7118_v47 = vmin.f32 %v7082_v56, 6.0 }
 0x872   : > { %v7117_v13 = vmin.f32 %v7081_v0, 6.0  ;;  %v7047_v10 = vadd.f32 %v15039_v22, %v6953_v38  ;;  %v7401_v0 = vld [vmem:[%s12276_s24 + $0x7c] sm:$0xff] }
 0x873   : > { %v7084_v53 = vmax.f32 %v7048_v55, 0.0 }
 0x874   : > { %v7083_v30 = vmax.f32 %v7047_v10, 0.0  ;;  %v10834_v24 = vpop.f32.mrb[4].mxu1  ;;  %10912 = vmatprep.mubr.f32.mxu0 %v7117_v13  ;;  %v7404_v10 = vld [vmem:[%s12276_s24 + $0x94] sm:$0xff] }
 0x875   : > { %v7050_v1 = vadd.f32 %v10834_v24, %v15039_v22  ;;  %v6963_v20 = vpop.f32.mrb[5].mxu1  ;;  %10913 = vmatmul.mubr.f32.gmra.mrb[30].mxu0 %v7118_v47  ;;  %v7120_v48 = vmin.f32 %v7084_v53, 6.0 }
 0x876   : > { %v7119_v15 = vmin.f32 %v7083_v30, 6.0  ;;  %v7049_v3 = vadd.f32 %v15039_v22, %v6963_v20  ;;  %v7392_v22 = vld [vmem:[%s12276_s24 + $0x34] sm:$0xff]  ;;  %v7403_v30 = vld [vmem:[%s12276_s24 + $0x8c] sm:$0xff] }
 0x877   : > { %v7086_v50 = vmax.f32 %v7050_v1, 0.0 }
 0x878   : > { %v7085_v32 = vmax.f32 %v7049_v3, 0.0  ;;  %10915 = vmatprep.mubr.f32.mxu0 %v7119_v15  ;;  %v7406_v3 = vld [vmem:[%s12276_s24 + $0xa4] sm:$0xff] }
 0x879   : > { %10916 = vmatmul.mubr.f32.gmra.mrb[32].mxu0 %v7120_v48  ;;  %v7122_v4 = vmin.f32 %v7086_v50, 6.0 }
 0x87a   : > { %v7121_v2 = vmin.f32 %v7085_v32, 6.0  ;;  %v7405_v32 = vld [vmem:[%s12276_s24 + $0x9c] sm:$0xff] }
 0x87c   : > { %10918 = vmatprep.mubr.f32.mxu0 %v7121_v2 }
 0x87d   : > { %10919 = vmatmul.mubr.f32.gmra.mrb[34].mxu0 %v7122_v4 }
 0x90c   : > { %v10869_v26 = vpop.f32.mrb[0].mxu0 }
 0x90d   : > { %v7218_v46 = vadd.f32 %v10869_v26, %v15081_v42  ;;  %v7212_v33 = vpop.f32.mrb[1].mxu0 }
 0x90e   : > { %v7213_v58 = vadd.f32 %v15081_v42, %v7212_v33 }
 0x90f   : > { %v7428_v9 = vadd.f32 %v7392_v22, %v7218_v46  ;;  %v7408_v46 = vld [vmem:[%s12276_s24 + $0xb4] sm:$0xff] }
 0x910   : > { %v7427_v34 = vadd.f32 %v7391_v18, %v7213_v58  ;;  %v10872_v51 = vpop.f32.mrb[2].mxu0  ;;  %v7407_v58 = vld [vmem:[%s12276_s24 + $0xac] sm:$0xff] }
 0x911   : > { %7464 = vst [vmem:[%s15088_s21 + $0x8] sm:$0xff] %v7428_v9  ;;  %v7228_v37 = vadd.f32 %v10872_v51, %v15081_v42  ;;  %v7222_v57 = vpop.f32.mrb[3].mxu0 }
 0x912   : > { %7463 = vst [vmem:[%s15088_s21] sm:$0xff] %v7427_v34  ;;  %v7223_v52 = vadd.f32 %v15081_v42, %v7222_v57 }
 0x913   : > { %v7430_v60 = vadd.f32 %v7394_v43, %v7228_v37  ;;  %v7410_v37 = vld [vmem:[%s12276_s24 + $0xc4] sm:$0xff] }
 0x914   : > { %v7429_v40 = vadd.f32 %v7393_v44, %v7223_v52  ;;  %v10875_v39 = vpop.f32.mrb[4].mxu0  ;;  %v7409_v52 = vld [vmem:[%s12276_s24 + $0xbc] sm:$0xff] }
 0x915   : > { %7466 = vst [vmem:[%s15088_s21 + $0x18] sm:$0xff] %v7430_v60  ;;  %v7238_v31 = vadd.f32 %v10875_v39, %v15081_v42  ;;  %v7232_v45 = vpop.f32.mrb[5].mxu0 }
 0x916   : > { %7465 = vst [vmem:[%s15088_s21 + $0x10] sm:$0xff] %v7429_v40  ;;  %v7233_v35 = vadd.f32 %v15081_v42, %v7232_v45 }
 0x917   : > { %v7432_v19 = vadd.f32 %v7396_v29, %v7238_v31  ;;  %v7412_v31 = vld [vmem:[%s12276_s24 + $0xd4] sm:$0xff] }
 0x918   : > { %v7431_v7 = vadd.f32 %v7395_v6, %v7233_v35  ;;  %v10878_v17 = vpop.f32.mrb[6].mxu0  ;;  %v7411_v35 = vld [vmem:[%s12276_s24 + $0xcc] sm:$0xff] }
 0x919   : > { %7468 = vst [vmem:[%s15088_s21 + $0x28] sm:$0xff] %v7432_v19  ;;  %v7248_v21 = vadd.f32 %v10878_v17, %v15081_v42  ;;  %v7242_v14 = vpop.f32.mrb[7].mxu0 }
 0x91a   : > { %7467 = vst [vmem:[%s15088_s21 + $0x20] sm:$0xff] %v7431_v7  ;;  %v7243_v23 = vadd.f32 %v15081_v42, %v7242_v14 }
 0x91b   : > { %v7434_v11 = vadd.f32 %v7398_v62, %v7248_v21  ;;  %v7414_v21 = vld [vmem:[%s12276_s24 + $0xe4] sm:$0xff] }
 0x91c   : > { %v7433_v8 = vadd.f32 %v7397_v54, %v7243_v23  ;;  %v10881_v36 = vpop.f32.mrb[8].mxu0  ;;  %v7413_v23 = vld [vmem:[%s12276_s24 + $0xdc] sm:$0xff] }
 0x91d   : > { %7470 = vst [vmem:[%s15088_s21 + $0x38] sm:$0xff] %v7434_v11  ;;  %v7258_v59 = vadd.f32 %v10881_v36, %v15081_v42  ;;  %v7252_v16 = vpop.f32.mrb[9].mxu0 }
 0x91e   : > { %7469 = vst [vmem:[%s15088_s21 + $0x30] sm:$0xff] %v7433_v8  ;;  %v7253_v41 = vadd.f32 %v15081_v42, %v7252_v16 }
 0x91f   : > { %v7436_v5 = vadd.f32 %v7400_v12, %v7258_v59  ;;  %v7416_v59 = vld [vmem:[%s12276_s24 + $0xf4] sm:$0xff] }
 0x920   : > { %v7435_v25 = vadd.f32 %v7399_v61, %v7253_v41  ;;  %v10884_v27 = vpop.f32.mrb[10].mxu0  ;;  %v7415_v41 = vld [vmem:[%s12276_s24 + $0xec] sm:$0xff] }
 0x921   : > { %7472 = vst [vmem:[%s15088_s21 + $0x48] sm:$0xff] %v7436_v5  ;;  %v7268_v63 = vadd.f32 %v10884_v27, %v15081_v42  ;;  %v7262_v56 = vpop.f32.mrb[11].mxu0 }
 0x922   : > { %7471 = vst [vmem:[%s15088_s21 + $0x40] sm:$0xff] %v7435_v25  ;;  %v7263_v49 = vadd.f32 %v15081_v42, %v7262_v56 }
 0x923   : > { %v7438_v55 = vadd.f32 %v7402_v28, %v7268_v63  ;;  %v7418_v63 = vld [vmem:[%s12276_s24 + $0x104] sm:$0xff] }
 0x924   : > { %v7437_v38 = vadd.f32 %v7401_v0, %v7263_v49  ;;  %v10887_v13 = vpop.f32.mrb[12].mxu0  ;;  %v7417_v49 = vld [vmem:[%s12276_s24 + $0xfc] sm:$0xff] }
 0x925   : > { %7474 = vst [vmem:[%s15088_s21 + $0x58] sm:$0xff] %v7438_v55  ;;  %v7278_v47 = vadd.f32 %v10887_v13, %v15081_v42  ;;  %v7272_v53 = vpop.f32.mrb[13].mxu0 }
 0x926   : > { %7473 = vst [vmem:[%s15088_s21 + $0x50] sm:$0xff] %v7437_v38  ;;  %v7273_v24 = vadd.f32 %v15081_v42, %v7272_v53 }
 0x927   : > { %v7440_v1 = vadd.f32 %v7404_v10, %v7278_v47  ;;  %v7420_v47 = vld [vmem:[%s12276_s24 + $0x114] sm:$0xff] }
 0x928   : > { %v7439_v20 = vadd.f32 %v7403_v30, %v7273_v24  ;;  %v10890_v15 = vpop.f32.mrb[14].mxu0  ;;  %v7419_v24 = vld [vmem:[%s12276_s24 + $0x10c] sm:$0xff] }
 0x929   : > { %7476 = vst [vmem:[%s15088_s21 + $0x68] sm:$0xff] %v7440_v1  ;;  %v7288_v48 = vadd.f32 %v10890_v15, %v15081_v42  ;;  %v7282_v50 = vpop.f32.mrb[15].mxu0 }
 0x92a   : > { %7475 = vst [vmem:[%s15088_s21 + $0x60] sm:$0xff] %v7439_v20  ;;  %v7283_v2 = vadd.f32 %v15081_v42, %v7282_v50 }
 0x92b   : > { %v7442_v4 = vadd.f32 %v7406_v3, %v7288_v48  ;;  %v7422_v48 = vld [vmem:[%s12276_s24 + $0x124] sm:$0xff] }
 0x92c   : > { %v7441_v26 = vadd.f32 %v7405_v32, %v7283_v2  ;;  %v10893_v22 = vpop.f32.mrb[16].mxu0  ;;  %v7421_v2 = vld [vmem:[%s12276_s24 + $0x11c] sm:$0xff] }
 0x92d   : > { %7478 = vst [vmem:[%s15088_s21 + $0x78] sm:$0xff] %v7442_v4  ;;  %v7298_v33 = vadd.f32 %v10893_v22, %v15081_v42  ;;  %v7292_v18 = vpop.f32.mrb[17].mxu0 }
 0x92e   : > { %7477 = vst [vmem:[%s15088_s21 + $0x70] sm:$0xff] %v7441_v26  ;;  %v7293_v9 = vadd.f32 %v15081_v42, %v7292_v18 }
 0x92f   : > { %v7444_v34 = vadd.f32 %v7408_v46, %v7298_v33  ;;  %v7424_v33 = vld [vmem:[%s12276_s24 + $0x134] sm:$0xff] }
 0x930   : > { %v7443_v51 = vadd.f32 %v7407_v58, %v7293_v9  ;;  %v10896_v43 = vpop.f32.mrb[18].mxu0  ;;  %v7423_v9 = vld [vmem:[%s12276_s24 + $0x12c] sm:$0xff] }
 0x931   : > { %7480 = vst [vmem:[%s15088_s21 + $0x88] sm:$0xff] %v7444_v34  ;;  %v7308_v57 = vadd.f32 %v10896_v43, %v15081_v42  ;;  %v7302_v44 = vpop.f32.mrb[19].mxu0 }
 0x932   : > { %7479 = vst [vmem:[%s15088_s21 + $0x80] sm:$0xff] %v7443_v51  ;;  %v7303_v60 = vadd.f32 %v15081_v42, %v7302_v44 }
 0x933   : > { %v7446_v40 = vadd.f32 %v7410_v37, %v7308_v57  ;;  %v7426_v57 = vld [vmem:[%s12276_s24 + $0x144] sm:$0xff] }
 0x934   : > { %v7445_v39 = vadd.f32 %v7409_v52, %v7303_v60  ;;  %v10899_v29 = vpop.f32.mrb[20].mxu0  ;;  %v7425_v60 = vld [vmem:[%s12276_s24 + $0x13c] sm:$0xff]  ;;  %s11962_s24 = scalar_lea.vmem %s15198_s20, 4608 }
 0x935   : > { %7482 = vst [vmem:[%s15088_s21 + $0x98] sm:$0xff] %v7446_v40  ;;  %v7318_v45 = vadd.f32 %v10899_v29, %v15081_v42  ;;  %v7312_v6 = vpop.f32.mrb[21].mxu0  ;;  %p11963_p0 = scmp.ne.s32.totalorder %s15198_s20, %s11962_s24  ;;  %p11970_p12 = scmp.lt.s32.totalorder %s11968_s11, %s11962_s24 }
 0x936   : > { %7481 = vst [vmem:[%s15088_s21 + $0x90] sm:$0xff] %v7445_v39  ;;  %v7313_v19 = vadd.f32 %v15081_v42, %v7312_v6 }
 0x937   : > { %v7448_v7 = vadd.f32 %v7412_v31, %v7318_v45  ;;  %p11964_p3 = pnand %p11963_p0, %p15476_p2  ;;  %p11971_p1 = por %p11970_p12, %p11969_p9 }
 0x938   : > { %v7447_v17 = vadd.f32 %v7411_v35, %v7313_v19  ;;  %v10902_v62 = vpop.f32.mrb[22].mxu0 }
 0x939   : > { %7484 = vst [vmem:[%s15088_s21 + $0xa8] sm:$0xff] %v7448_v7  ;;  %v7328_v14 = vadd.f32 %v10902_v62, %v15081_v42  ;;  %v7322_v54 = vpop.f32.mrb[23].mxu0  ;;  %p11965_p7 = pneg %p11964_p3 }
 0x93a   : > { %7483 = vst [vmem:[%s15088_s21 + $0xa0] sm:$0xff] %v7447_v17  ;;  %v7323_v11 = vadd.f32 %v15081_v42, %v7322_v54 }
 0x93b   : > { %v7450_v8 = vadd.f32 %v7414_v21, %v7328_v14  ;;  %p11972_p13 = pnand %p11971_p1, %p11965_p7 }
 0x93c   : > { %v7449_v36 = vadd.f32 %v7413_v23, %v7323_v11  ;;  %v10905_v12 = vpop.f32.mrb[24].mxu0 }
 0x93d   : > { %7486 = vst [vmem:[%s15088_s21 + $0xb8] sm:$0xff] %v7450_v8  ;;  %v7338_v16 = vadd.f32 %v10905_v12, %v15081_v42  ;;  %v7332_v61 = vpop.f32.mrb[25].mxu0 }
 0x93e   : > { %7485 = vst [vmem:[%s15088_s21 + $0xb0] sm:$0xff] %v7449_v36  ;;  %v7333_v5 = vadd.f32 %v15081_v42, %v7332_v61 }
 0x93f   : > { %v7452_v25 = vadd.f32 %v7416_v59, %v7338_v16 }
 0x940   : > { %v7451_v27 = vadd.f32 %v7415_v41, %v7333_v5  ;;  %v10908_v28 = vpop.f32.mrb[26].mxu0 }
 0x941   : > { %7488 = vst [vmem:[%s15088_s21 + $0xc8] sm:$0xff] %v7452_v25  ;;  %v7348_v56 = vadd.f32 %v10908_v28, %v15081_v42  ;;  %v7342_v0 = vpop.f32.mrb[27].mxu0 }
 0x942   : > { %7487 = vst [vmem:[%s15088_s21 + $0xc0] sm:$0xff] %v7451_v27  ;;  %v7343_v55 = vadd.f32 %v15081_v42, %v7342_v0 }
 0x943   : > { %v7454_v38 = vadd.f32 %v7418_v63, %v7348_v56 }
 0x944   : > { %v7453_v13 = vadd.f32 %v7417_v49, %v7343_v55  ;;  %v10911_v10 = vpop.f32.mrb[28].mxu0 }
 0x945   : > { %7490 = vst [vmem:[%s15088_s21 + $0xd8] sm:$0xff] %v7454_v38  ;;  %v7358_v53 = vadd.f32 %v10911_v10, %v15081_v42  ;;  %v7352_v30 = vpop.f32.mrb[29].mxu0 }
 0x946   : > { %7489 = vst [vmem:[%s15088_s21 + $0xd0] sm:$0xff] %v7453_v13  ;;  %v7353_v1 = vadd.f32 %v15081_v42, %v7352_v30 }
 0x947   : > { %v7456_v20 = vadd.f32 %v7420_v47, %v7358_v53 }
 0x948   : > { %v7455_v15 = vadd.f32 %v7419_v24, %v7353_v1  ;;  %v10914_v3 = vpop.f32.mrb[30].mxu0 }
 0x949   : > { %7492 = vst [vmem:[%s15088_s21 + $0xe8] sm:$0xff] %v7456_v20  ;;  %v7368_v50 = vadd.f32 %v10914_v3, %v15081_v42  ;;  %v7362_v32 = vpop.f32.mrb[31].mxu0 }
 0x94a   : > { %7491 = vst [vmem:[%s15088_s21 + $0xe0] sm:$0xff] %v7455_v15  ;;  %v7363_v4 = vadd.f32 %v15081_v42, %v7362_v32 }
 0x94b   : > { %v7458_v26 = vadd.f32 %v7422_v48, %v7368_v50 }
 0x94c   : > { %v7457_v22 = vadd.f32 %v7421_v2, %v7363_v4  ;;  %v10917_v46 = vpop.f32.mrb[32].mxu0 }
 0x94d   : > { %7494 = vst [vmem:[%s15088_s21 + $0xf8] sm:$0xff] %v7458_v26  ;;  %v7378_v18 = vadd.f32 %v10917_v46, %v15081_v42  ;;  %v7372_v58 = vpop.f32.mrb[33].mxu0 }
 0x94e   : > { %7493 = vst [vmem:[%s15088_s21 + $0xf0] sm:$0xff] %v7457_v22  ;;  %v7373_v34 = vadd.f32 %v15081_v42, %v7372_v58 }
 0x94f   : > { %v7460_v51 = vadd.f32 %v7424_v33, %v7378_v18 }
 0x950   : > { %v7459_v43 = vadd.f32 %v7423_v9, %v7373_v34  ;;  %v10920_v37 = vpop.f32.mrb[34].mxu0 }
 0x951   : > { %7496 = vst [vmem:[%s15088_s21 + $0x108] sm:$0xff] %v7460_v51  ;;  %v7388_v44 = vadd.f32 %v10920_v37, %v15081_v42  ;;  %v7382_v52 = vpop.f32.mrb[35].mxu0 }
 0x952   : > { %7495 = vst [vmem:[%s15088_s21 + $0x100] sm:$0xff] %v7459_v43  ;;  %v7383_v40 = vadd.f32 %v15081_v42, %v7382_v52 }
 0x953   : > { %v7462_v39 = vadd.f32 %v7426_v57, %v7388_v44 }
 0x954   : > { %v7461_v29 = vadd.f32 %v7425_v60, %v7383_v40 }
 0x955   : > { %7498 = vst [vmem:[%s15088_s21 + $0x118] sm:$0xff] %v7462_v39 }
 0x956   : > { %7497 = vst [vmem:[%s15088_s21 + $0x110] sm:$0xff] %v7461_v29 }
 0x957   : > { %11975 = shalt.err (!%p11972_p13)
}
 0x958   : > { %s11976_s13 = scalar_lea.hbm %s15196_s9, 4608  ;;  %s11980_s19 = scalar_lea.hbm %s15252_s8, 9216 }
 0x959   : > { %p11977_p6 = scmp.ne.s32.totalorder %s15196_s9, %s11976_s13  ;;  %p11981_p5 = scmp.lt.u32.totalorder %s15196_s9, %s15252_s8 }
 0x95a   : > { %p11982_p8 = scmp.lt.u32.totalorder %s11980_s19, %s11976_s13  ;;  %p11984_p0 = scmp.lt.u32.totalorder %s11976_s13, %s15196_s9 }
 0x95b   : > { %p11978_p10 = pnand %p11977_p6, %p15476_p2 }
 0x95c   : > { %p11983_p11 = por %p11982_p8, %p11981_p5 }
 0x95d   : > { %p11979_p4 = pneg %p11978_p10 }
 0x95e   : > { %p11985_p3 = por %p11984_p0, %p11983_p11 }
 0x960   : > { %p11986_p7 = pnand %p11985_p3, %p11979_p4 }
 0x962   : > { %11989 = shalt.err (!%p11986_p7)
}
 0x963   : > { %s12044_s2 = smov 128   ;;  %s12045_s4 = smov 8  }
 0x964   : > { %11777 = dma.vmem_to_hbm [thread:$0]  (%p15476_p2), %s15198_s20, 4608, %s15196_s9, %s7500_s14, %s12044_s2, %s12044_s2, %s12045_s4  }
 0x965 PF: > { %s7528_s24 = sand.u32 1, %s12020_s27   ;;  %p15477_p9 = scmp.ne.s32.totalorder %s15276_s12, 0 }
 0x966   : > { %p15478_p12 = scmp.ge.s32.totalorder %s12032_s30, 2  ;;  %s7529_s15 = scalar_lea.sflag [#allocation5], %s7528_s24 }
 0x968   : > { %p11791_p1 = pnand %p15478_p12, %p15477_p9 }
 0x96a   : > { %12015 = dma.done.wait (!%p11791_p1), %s7529_s15, 4608  }
 0x96b   : > { %12017 = vsyncadd (!%p11791_p1), %s7529_s15, 4294962688  ;;  %p22_p13 = scmp.ge.s32.totalorder %s12207_s16, 4   ;;  %s15479_s27 = smov %s12024_s28 }
 0x96c   : > { %s15480_s28 = smov %s12028_s29  ;;  %s15481_s29 = smov %s12223_s23 }
 0x96d   : > { %s15482_s30 = smov %s12207_s16  ;;  %24 = sbr.rel (!%p22_p13) target bundleno = 9 (0x9), region = 124 }
 0x974   :  { %7534 = vsyncpa [#allocation4], 1 }
 0x975   :  { %7536 = vsyncpa [#allocation4 + $0x1], 1 }
 0x976   :  { %7537 = vsyncpa [#allocation7], 1 }
 0x977   :  { %7538 = vsyncpa [#allocation5], 1 }
 0x978   :  { %7540 = vsyncpa [#allocation5 + $0x1], 1 }

</bundles_post_ra>
